<compile_context>
chip_gen: v7x
topology: tpu7x:2x2x1
jax: 0.10.0
libtpu: 0.0.40
codegen_flags: <defaults>
</compile_context>

<pallas_src>
import numpy as np

import jax
import jax.numpy as jnp
from jax.experimental import pallas as pl
from jax.experimental.pallas import tpu as pltpu


def _round_up(x, m):
    return ((x + m - 1) // m) * m


# ----------------------------------------------------------------------------
# Host-side constant builders
# ----------------------------------------------------------------------------
def _tap_masks(sh, sw, batch):
    """(9, batch*sh*sw) f32.  mask[t, b*M+m] = 1 iff 3x3 tap t read at flat
    position m stays inside the (sh, sw) image (implements zero padding and
    kills the row-wrap / batch-wrap positions of the lane rotation)."""
    m = sh * sw
    row = np.arange(m) // sw
    col = np.arange(m) % sw
    masks = np.empty((9, m), np.float32)
    t = 0
    for dy in (-1, 0, 1):
        for dx in (-1, 0, 1):
            ok = ((row + dy >= 0) & (row + dy < sh) &
                  (col + dx >= 0) & (col + dx < sw))
            masks[t] = ok.astype(np.float32)
            t += 1
    return np.tile(masks, (1, batch))


def _pool_mats(sh, sw, batch):
    """(B*M_in, 4*B*M_out) f32: the four MaxPool2x2 selection matrices (one per
    2x2 tap), block-diagonal over the folded batch, stacked along columns.
    Elementwise max of the 4 matmul results == MaxPool2d(2, 2)."""
    oh, ow = sh // 2, sw // 2
    m_in, m_out = sh * sw, oh * ow
    mats = np.zeros((4, m_in, m_out), np.float32)
    for k, (dy, dx) in enumerate(((0, 0), (0, 1), (1, 0), (1, 1))):
        for i in range(oh):
            for j in range(ow):
                mats[k, (2 * i + dy) * sw + (2 * j + dx), i * ow + j] = 1.0
    out = np.zeros((batch * m_in, 4 * batch * m_out), np.float32)
    for k in range(4):
        for b in range(batch):
            out[b * m_in:(b + 1) * m_in,
                k * batch * m_out + b * m_out:
                k * batch * m_out + (b + 1) * m_out] = mats[k]
    return out


def _up_mat(sh, sw, batch):
    """(B*M_in, B*M_out) 0/1 duplication matrix (block-diag over folded batch)
    == nn.Upsample(scale_factor=2, mode='nearest')."""
    oh, ow = 2 * sh, 2 * sw
    m_in, m_out = sh * sw, oh * ow
    u = np.zeros((m_in, m_out), np.float32)
    for i in range(oh):
        for j in range(ow):
            u[(i // 2) * sw + (j // 2), i * ow + j] = 1.0
    out = np.zeros((batch * m_in, batch * m_out), np.float32)
    for b in range(batch):
        out[b * m_in:(b + 1) * m_in, b * m_out:(b + 1) * m_out] = u
    return out


class _Slab:
    """Packs 2-D arrays into one fixed-width slab so the kernel gets a single
    bulk input and slices it with static row/col offsets."""

    def __init__(self, dtype, row_align):
        self.dtype, self.align = dtype, row_align
        self.items, self.rows = [], 0

    def add(self, arr):
        arr = jnp.asarray(arr, jnp.float32)
        assert arr.ndim == 2
        off = self.rows
        self.items.append(arr)
        self.rows += _round_up(arr.shape[0], self.align)
        return off

    def build(self):
        width = _round_up(max(a.shape[1] for a in self.items), 128)
        parts = [jnp.pad(a, ((0, _round_up(a.shape[0], self.align) - a.shape[0]),
                             (0, width - a.shape[1])))
                 for a in self.items]
        return jnp.concatenate(parts, axis=0).astype(self.dtype)


# ----------------------------------------------------------------------------
# In-kernel helper: lane rotation with unambiguous direction
# ----------------------------------------------------------------------------
def _lane_roll(a, d):
    """result[:, m] = a[:, (m + d) % n]; wrapped lanes are zeroed by the caller's
    edge mask.  Written as a lane-slice concat (same XLU rotate as pltpu.roll,
    but with the shift direction spelled out)."""
    n = a.shape[1]
    s = d % n
    if s == 0:
        return a
    return jnp.concatenate([a[:, s:], a[:, :s]], axis=1)


# ----------------------------------------------------------------------------
# Whole-network fused forward pass (one pallas_call, no grid)
# ----------------------------------------------------------------------------
def tasknet_forward(params, x, out_dict):
    B, Cx, H, W = x.shape
    classes = int(params["head"][2][0].shape[-1])

    # Pad the 3 input channels up to 8 (zeros) so every sublane concat inside
    # the kernel is 8-aligned; mathematically a no-op.
    w0, b0 = params["start"]
    cx_pad = _round_up(Cx, 8)
    if cx_pad != Cx:
        x = jnp.pad(x, ((0, 0), (0, cx_pad - Cx), (0, 0), (0, 0)))
        w0 = jnp.pad(w0, ((0, 0), (0, 0), (0, cx_pad - Cx), (0, 0)))

    def flat_cm(a):                           # NCHW -> channel-major (C, B*H*W)
        b, c, h, w = a.shape
        return jnp.transpose(a, (1, 0, 2, 3)).reshape(c, b * h * w)

    acts = ([flat_cm(x)]
            + [flat_cm(a) for a in out_dict["enc"]]
            + [flat_cm(a) for a in out_dict["dec"]])
    n_enc = len(params["enc"])
    n_dec = len(params["dec"])
    enc_idx = [1 + i for i in range(n_enc)]
    dec_idx = [1 + n_enc + i for i in range(n_dec)]

    wslab = _Slab(jnp.bfloat16, 16)           # conv weights + pool/up matrices
    fslab = _Slab(jnp.float32, 8)             # edge masks + biases

    ops = []
    stats = dict(flops=0, trans=0)
    cache = {}
    sh, sw = H, W
    cur_c = cx_pad

    def mask_off():
        key = ("mask", sh, sw)
        if key not in cache:
            cache[key] = fslab.add(_tap_masks(sh, sw, B))
        return cache[key]

    def conv_op(w_hwio, bias, srcs, src_c):
        nonlocal cur_c
        cin, cout = int(w_hwio.shape[2]), int(w_hwio.shape[3])
        assert sum(src_c) == cin, (src_c, w_hwio.shape)
        # (ky,kx,I,O) -> (O,ky,kx,I) -> (O, 9*I): tap-major, channel-minor,
        # matching the patch row order (tap t = (dy+1)*3 + (dx+1)).
        w2 = jnp.transpose(w_hwio, (3, 0, 1, 2)).reshape(cout, 9 * cin)
        ops.append(dict(kind="conv", sw=sw, bm=B * sh * sw, srcs=tuple(srcs),
                        cin=cin, cout=cout,
                        woff=wslab.add(w2),
                        boff=fslab.add(jnp.reshape(bias, (cout, 1))),
                        moff=mask_off()))
        stats["flops"] += 2 * (B * sh * sw) * 9 * cin * cout
        cur_c = cout

    def pool_op():
        nonlocal sh, sw
        key = ("pool", sh, sw)
        if key not in cache:
            cache[key] = wslab.add(_pool_mats(sh, sw, B))
        bmi, bmo = B * sh * sw, B * sh * sw // 4
        ops.append(dict(kind="pool", woff=cache[key], bm_in=bmi, bm_out=bmo))
        stats["flops"] += 4 * 2 * cur_c * bmi * bmo
        sh, sw = sh // 2, sw // 2

    def up_op():
        nonlocal sh, sw
        key = ("up", sh, sw)
        if key not in cache:
            cache[key] = wslab.add(_up_mat(sh, sw, B))
        bmi, bmo = B * sh * sw, 4 * B * sh * sw
        ops.append(dict(kind="up", woff=cache[key], bm_in=bmi, bm_out=bmo))
        stats["flops"] += 2 * cur_c * bmi * bmo
        sh, sw = 2 * sh, 2 * sw

    # ---- start_conv: ConvLayer(3, f0) -> MaxPool2d(2, 2) --------------------
    conv_op(w0, b0, [0], [cx_pad])
    pool_op()

    # ---- dense encoder blocks ----------------------------------------------
    for i, ((w1, b1), (w2, b2)) in enumerate(params["enc"]):
        skip = out_dict["enc"][i]
        assert skip.shape[2:] == (sh, sw)
        conv_op(w1, b1, [-1, enc_idx[i]], [cur_c, int(skip.shape[1])])
        conv_op(w2, b2, [-1], [cur_c])
        if i == n_enc - 1:
            up_op()
        else:
            pool_op()

    # ---- dense decoder blocks ----------------------------------------------
    for i, ((w1, b1), (w2, b2)) in enumerate(params["dec"]):
        skip = out_dict["dec"][i]
        assert skip.shape[2:] == (sh, sw)
        conv_op(w1, b1, [-1, dec_idx[i]], [cur_c, int(skip.shape[1])])
        conv_op(w2, b2, [-1], [cur_c])
        if i != n_dec - 1:
            up_op()

    # ---- head: ConvLayer, ConvLayer, Conv2d(1x1), Sigmoid -------------------
    (wh1, bh1), (wh2, bh2), (wc, bc) = params["head"]
    conv_op(wh1, bh1, [-1], [cur_c])
    conv_op(wh2, bh2, [-1], [cur_c])
    cin_h = int(wc.shape[2])
    assert cin_h == cur_c and (sh, sw) == (H, W)
    ops.append(dict(kind="dense", cin=cin_h, cout=classes, bm=B * sh * sw,
                    woff=wslab.add(jnp.transpose(wc, (3, 0, 1, 2))
                                   .reshape(classes, cin_h)),
                    boff=fslab.add(jnp.reshape(bc, (classes, 1)))))
    stats["flops"] += 2 * (B * sh * sw) * cin_h * classes
    stats["trans"] += B * sh * sw * classes

    inputs = acts + [wslab.build(), fslab.build()]
    n_acts = len(acts)

    # ---- the single fused kernel --------------------------------------------
    def kernel(*refs):
        act_refs = refs[:n_acts]
        wref, fref, out_ref = refs[n_acts], refs[n_acts + 1], refs[n_acts + 2]

        y = None
        for op in ops:
            kind = op["kind"]
            if kind == "conv":
                parts = [y if s < 0 else act_refs[s][...] for s in op["srcs"]]
                yin = parts[0] if len(parts) == 1 else jnp.concatenate(parts,
                                                                       axis=0)
                bm, sw_ = op["bm"], op["sw"]
                masks = fref[op["moff"]:op["moff"] + 9, 0:bm]       # (9, B*M)
                taps, t = [], 0
                for dy in (-1, 0, 1):
                    for dx in (-1, 0, 1):
                        d = dy * sw_ + dx
                        a = yin if d == 0 else _lane_roll(yin, d)
                        if (dy, dx) != (0, 0):
                            a = a * masks[t:t + 1, :]               # f32 mask
                        taps.append(a.astype(jnp.bfloat16))
                        t += 1
                patch = jnp.concatenate(taps, axis=0)       # (9*Cin, B*M) bf16
                w = wref[op["woff"]:op["woff"] + op["cout"], 0:9 * op["cin"]]
                b = fref[op["boff"]:op["boff"] + op["cout"], 0:1]
                z = jnp.dot(w, patch, preferred_element_type=jnp.float32) + b
                y = jnp.maximum(z, 0.0)                             # ReLU
            elif kind == "pool":
                bmi, bmo = op["bm_in"], op["bm_out"]
                sel = wref[op["woff"]:op["woff"] + bmi, 0:4 * bmo]
                ybf = y.astype(jnp.bfloat16)
                p = None
                for q in range(4):
                    d = jnp.dot(ybf, sel[:, q * bmo:(q + 1) * bmo],
                                preferred_element_type=jnp.float32)
                    p = d if p is None else jnp.maximum(p, d)
                y = p
            elif kind == "up":
                bmi, bmo = op["bm_in"], op["bm_out"]
                dup = wref[op["woff"]:op["woff"] + bmi, 0:bmo]
                y = jnp.dot(y.astype(jnp.bfloat16), dup,
                            preferred_element_type=jnp.float32)
            else:                                    # 1x1 head conv + sigmoid
                w = wref[op["woff"]:op["woff"] + op["cout"], 0:op["cin"]]
                b = fref[op["boff"]:op["boff"] + op["cout"], 0:1]
                z = jnp.dot(w, y.astype(jnp.bfloat16),
                            preferred_element_type=jnp.float32) + b
                y = jax.nn.sigmoid(z)
        out_ref[...] = y                              # (classes, B*H*W), dense

    bytes_accessed = int(sum(int(np.prod(a.shape)) * a.dtype.itemsize
                             for a in inputs)) + classes * B * H * W * 4
    cost = pl.CostEstimate(flops=int(stats["flops"]),
                           transcendentals=int(stats["trans"]),
                           bytes_accessed=int(bytes_accessed))

    out = pl.pallas_call(
        kernel,
        out_shape=jax.ShapeDtypeStruct((classes, B * H * W), jnp.float32),
        in_specs=[pl.BlockSpec(memory_space=pltpu.MemorySpace.VMEM)] * len(inputs),
        out_specs=pl.BlockSpec(memory_space=pltpu.MemorySpace.VMEM),
        cost_estimate=cost,
        # NOTE: total VMEM residency here is ~2 MiB.  If spatial size is scaled
        # up, set pltpu.CompilerParams(vmem_limit_bytes=...) and replace the
        # O((B*H*W)^2) pool/upsample matrices (v7x has only 64 MiB VMEM).
    )(*inputs)

    # lane-dense (classes, B*H*W) -> PyTorch NCHW (B, classes, H, W)
    return jnp.transpose(out.reshape(classes, B, H, W), (1, 0, 2, 3))


# ----------------------------------------------------------------------------
# Pure-JAX f32 reference (validation of the PyTorch forward-pass semantics)
# ----------------------------------------------------------------------------
def _conv_ref(y, w_hwio, b):
    w_oihw = jnp.transpose(w_hwio, (3, 2, 0, 1))
    y = jax.lax.conv_general_dilated(
        y, w_oihw, window_strides=(1, 1), padding=((1, 1), (1, 1)),
        dimension_numbers=("NCHW", "OIHW", "NCHW"))
    return jax.nn.relu(y + b.reshape(1, -1, 1, 1))


def _pool_ref(y):
    return jax.lax.reduce_window(y, -jnp.inf, jax.lax.max,
                                 (1, 1, 2, 2), (1, 1, 2, 2), "VALID")


def _up_ref(y):
    return jnp.repeat(jnp.repeat(y, 2, axis=2), 2, axis=3)


def tasknet_reference(params, x, out_dict):
    y = _pool_ref(_conv_ref(x, *params["start"]))
    n_enc = len(params["enc"])
    for i, ((w1, b1), (w2, b2)) in enumerate(params["enc"]):
        y = jnp.concatenate([y, out_dict["enc"][i]], axis=1)
        y = _conv_ref(_conv_ref(y, w1, b1), w2, b2)
        y = _up_ref(y) if i == n_enc - 1 else _pool_ref(y)
    n_dec = len(params["dec"])
    for i, ((w1, b1), (w2, b2)) in enumerate(params["dec"]):
        y = jnp.concatenate([y, out_dict["dec"][i]], axis=1)
        y = _conv_ref(_conv_ref(y, w1, b1), w2, b2)
        if i != n_dec - 1:
            y = _up_ref(y)
    (wh1, bh1), (wh2, bh2), (wc, bc) = params["head"]
    y = _conv_ref(_conv_ref(y, wh1, bh1), wh2, bh2)
    w1x1 = jnp.transpose(wc, (3, 2, 0, 1))
    y = jax.lax.conv_general_dilated(
        y, w1x1, window_strides=(1, 1), padding="VALID",
        dimension_numbers=("NCHW", "OIHW", "NCHW"))
    return jax.nn.sigmoid(y + bc.reshape(1, -1, 1, 1))


# ----------------------------------------------------------------------------
# Parameters (deterministic synthetic init, HWIO conv weights)
# ----------------------------------------------------------------------------
def init_conv(key, cin, cout, k=3):
    kw, kb = jax.random.split(key)
    fan_in = cin * k * k
    w = jax.random.normal(kw, (k, k, cin, cout), jnp.float32) / jnp.sqrt(float(fan_in))
    b = 0.01 * jax.random.normal(kb, (cout,), jnp.float32)
    return w, b


def build_params(key, filt, classes):
    keys = iter(jax.random.split(key, 64))
    params = {"start": init_conv(next(keys), 3, filt[0])}

    enc = []
    for i in range(len(filt) - 1):
        enc.append((init_conv(next(keys), 2 * filt[i], filt[i + 1]),
                    init_conv(next(keys), filt[i + 1], filt[i + 1])))
    enc.append((init_conv(next(keys), 2 * filt[-1], filt[-1]),
                init_conv(next(keys), filt[-1], filt[-1])))
    params["enc"] = enc

    dec = []
    for i in range(len(filt) - 1):
        dec.append((init_conv(next(keys), filt[-i - 1] + filt[-i - 2], filt[-i - 2]),
                    init_conv(next(keys), filt[-i - 2], filt[-i - 2])))
    dec.append((init_conv(next(keys), 2 * filt[0], filt[0]),
                init_conv(next(keys), filt[0], filt[0])))
    params["dec"] = dec

    params["head"] = (init_conv(next(keys), filt[0], filt[0]),
                      init_conv(next(keys), filt[0], filt[0]),
                      init_conv(next(keys), filt[0], classes, k=1))
    return params


# ----------------------------------------------------------------------------
if __name__ == "__main__":
    filt = [8, 16]
    classes = 3
    B, H, W = 2, 16, 16

    key = jax.random.PRNGKey(0)
    k_par, k_x, k_e0, k_e1, k_d0, k_d1 = jax.random.split(key, 6)

    params = build_params(k_par, filt, classes)

    # PyTorch-style NCHW inputs.
    x = jax.random.normal(k_x, (B, 3, H, W), jnp.float32)
    out_dict = {
        "enc": [
            jax.random.normal(k_e0, (B, filt[0], H // 2, W // 2), jnp.float32),
            jax.random.normal(k_e1, (B, filt[1], H // 4, W // 4), jnp.float32),
        ],
        "dec": [
            jax.random.normal(k_d0, (B, filt[0], H // 2, W // 2), jnp.float32),
            jax.random.normal(k_d1, (B, filt[0], H, W), jnp.float32),
        ],
    }

    fwd = jax.jit(tasknet_forward)
    out = jax.block_until_ready(fwd(params, x, out_dict))

    assert out.shape == (B, classes, H, W), out.shape
    assert bool(jnp.all(jnp.isfinite(out)))

    # Validate against the pure-JAX f32 reference (kernel runs matmuls in bf16,
    # so allow a loose tolerance on the post-sigmoid outputs).
    ref = jax.block_until_ready(jax.jit(tasknet_reference)(params, x, out_dict))
    max_err = float(jnp.max(jnp.abs(out - ref)))
    assert max_err < 8e-2, f"mismatch vs reference: max abs err = {max_err}"

    print("KERNEL_OK")
</pallas_src>

<mosaic_0001>
module attributes {stable_mosaic.version = 11 : i64} {
  func.func @kernel(%arg0: memref<8x512xf32, #tpu.memory_space<vmem>>, %arg1: memref<8x128xf32, #tpu.memory_space<vmem>>, %arg2: memref<16x32xf32, #tpu.memory_space<vmem>>, %arg3: memref<8x128xf32, #tpu.memory_space<vmem>>, %arg4: memref<8x512xf32, #tpu.memory_space<vmem>>, %arg5: memref<992x512xbf16, #tpu.memory_space<vmem>>, %arg6: memref<176x512xf32, #tpu.memory_space<vmem>>, %arg7: memref<3x512xf32, #tpu.memory_space<vmem>>) attributes {dimension_semantics = [], scalar_prefetch = 0 : i64, scratch_operands = 0 : i64, tpu.core_type = #tpu.core_type<tc>} {
    %c0 = arith.constant 0 : index
    %c0_0 = arith.constant 0 : index
    %0 = vector.load %arg0[%c0, %c0_0] : memref<8x512xf32, #tpu.memory_space<vmem>>, vector<8x512xf32>
    %c8 = arith.constant 8 : index
    %c0_1 = arith.constant 0 : index
    %1 = vector.load %arg6[%c8, %c0_1] : memref<176x512xf32, #tpu.memory_space<vmem>>, vector<9x512xf32>
    %2 = vector.extract_strided_slice %0 {offsets = [0, 495], sizes = [8, 17], strides = [1, 1]} : vector<8x512xf32> to vector<8x17xf32>
    %3 = vector.extract_strided_slice %0 {offsets = [0, 0], sizes = [8, 495], strides = [1, 1]} : vector<8x512xf32> to vector<8x495xf32>
    %4 = tpu.concatenate %2, %3 in 1 : vector<8x17xf32>, vector<8x495xf32> -> vector<8x512xf32>
    %5 = vector.extract_strided_slice %1 {offsets = [0, 0], sizes = [1, 512], strides = [1, 1]} : vector<9x512xf32> to vector<1x512xf32>
    %6 = vector.broadcast %5 : vector<1x512xf32> to vector<8x512xf32>
    %7 = arith.mulf %4, %6 : vector<8x512xf32>
    %8 = arith.truncf %7 : vector<8x512xf32> to vector<8x512xbf16>
    %9 = vector.extract_strided_slice %0 {offsets = [0, 496], sizes = [8, 16], strides = [1, 1]} : vector<8x512xf32> to vector<8x16xf32>
    %10 = vector.extract_strided_slice %0 {offsets = [0, 0], sizes = [8, 496], strides = [1, 1]} : vector<8x512xf32> to vector<8x496xf32>
    %11 = tpu.concatenate %9, %10 in 1 : vector<8x16xf32>, vector<8x496xf32> -> vector<8x512xf32>
    %12 = vector.extract_strided_slice %1 {offsets = [1, 0], sizes = [1, 512], strides = [1, 1]} : vector<9x512xf32> to vector<1x512xf32>
    %13 = vector.broadcast %12 : vector<1x512xf32> to vector<8x512xf32>
    %14 = arith.mulf %11, %13 : vector<8x512xf32>
    %15 = arith.truncf %14 : vector<8x512xf32> to vector<8x512xbf16>
    %16 = vector.extract_strided_slice %0 {offsets = [0, 497], sizes = [8, 15], strides = [1, 1]} : vector<8x512xf32> to vector<8x15xf32>
    %17 = vector.extract_strided_slice %0 {offsets = [0, 0], sizes = [8, 497], strides = [1, 1]} : vector<8x512xf32> to vector<8x497xf32>
    %18 = tpu.concatenate %16, %17 in 1 : vector<8x15xf32>, vector<8x497xf32> -> vector<8x512xf32>
    %19 = vector.extract_strided_slice %1 {offsets = [2, 0], sizes = [1, 512], strides = [1, 1]} : vector<9x512xf32> to vector<1x512xf32>
    %20 = vector.broadcast %19 : vector<1x512xf32> to vector<8x512xf32>
    %21 = arith.mulf %18, %20 : vector<8x512xf32>
    %22 = arith.truncf %21 : vector<8x512xf32> to vector<8x512xbf16>
    %23 = vector.extract_strided_slice %0 {offsets = [0, 511], sizes = [8, 1], strides = [1, 1]} : vector<8x512xf32> to vector<8x1xf32>
    %24 = vector.extract_strided_slice %0 {offsets = [0, 0], sizes = [8, 511], strides = [1, 1]} : vector<8x512xf32> to vector<8x511xf32>
    %25 = tpu.concatenate %23, %24 in 1 : vector<8x1xf32>, vector<8x511xf32> -> vector<8x512xf32>
    %26 = vector.extract_strided_slice %1 {offsets = [3, 0], sizes = [1, 512], strides = [1, 1]} : vector<9x512xf32> to vector<1x512xf32>
    %27 = vector.broadcast %26 : vector<1x512xf32> to vector<8x512xf32>
    %28 = arith.mulf %25, %27 : vector<8x512xf32>
    %29 = arith.truncf %28 : vector<8x512xf32> to vector<8x512xbf16>
    %30 = arith.truncf %0 : vector<8x512xf32> to vector<8x512xbf16>
    %31 = vector.extract_strided_slice %0 {offsets = [0, 1], sizes = [8, 511], strides = [1, 1]} : vector<8x512xf32> to vector<8x511xf32>
    %32 = vector.extract_strided_slice %0 {offsets = [0, 0], sizes = [8, 1], strides = [1, 1]} : vector<8x512xf32> to vector<8x1xf32>
    %33 = tpu.concatenate %31, %32 in 1 : vector<8x511xf32>, vector<8x1xf32> -> vector<8x512xf32>
    %34 = vector.extract_strided_slice %1 {offsets = [5, 0], sizes = [1, 512], strides = [1, 1]} : vector<9x512xf32> to vector<1x512xf32>
    %35 = vector.broadcast %34 : vector<1x512xf32> to vector<8x512xf32>
    %36 = arith.mulf %33, %35 : vector<8x512xf32>
    %37 = arith.truncf %36 : vector<8x512xf32> to vector<8x512xbf16>
    %38 = vector.extract_strided_slice %0 {offsets = [0, 15], sizes = [8, 497], strides = [1, 1]} : vector<8x512xf32> to vector<8x497xf32>
    %39 = vector.extract_strided_slice %0 {offsets = [0, 0], sizes = [8, 15], strides = [1, 1]} : vector<8x512xf32> to vector<8x15xf32>
    %40 = tpu.concatenate %38, %39 in 1 : vector<8x497xf32>, vector<8x15xf32> -> vector<8x512xf32>
    %41 = vector.extract_strided_slice %1 {offsets = [6, 0], sizes = [1, 512], strides = [1, 1]} : vector<9x512xf32> to vector<1x512xf32>
    %42 = vector.broadcast %41 : vector<1x512xf32> to vector<8x512xf32>
    %43 = arith.mulf %40, %42 : vector<8x512xf32>
    %44 = arith.truncf %43 : vector<8x512xf32> to vector<8x512xbf16>
    %45 = vector.extract_strided_slice %0 {offsets = [0, 16], sizes = [8, 496], strides = [1, 1]} : vector<8x512xf32> to vector<8x496xf32>
    %46 = vector.extract_strided_slice %0 {offsets = [0, 0], sizes = [8, 16], strides = [1, 1]} : vector<8x512xf32> to vector<8x16xf32>
    %47 = tpu.concatenate %45, %46 in 1 : vector<8x496xf32>, vector<8x16xf32> -> vector<8x512xf32>
    %48 = vector.extract_strided_slice %1 {offsets = [7, 0], sizes = [1, 512], strides = [1, 1]} : vector<9x512xf32> to vector<1x512xf32>
    %49 = vector.broadcast %48 : vector<1x512xf32> to vector<8x512xf32>
    %50 = arith.mulf %47, %49 : vector<8x512xf32>
    %51 = arith.truncf %50 : vector<8x512xf32> to vector<8x512xbf16>
    %52 = vector.extract_strided_slice %0 {offsets = [0, 17], sizes = [8, 495], strides = [1, 1]} : vector<8x512xf32> to vector<8x495xf32>
    %53 = vector.extract_strided_slice %0 {offsets = [0, 0], sizes = [8, 17], strides = [1, 1]} : vector<8x512xf32> to vector<8x17xf32>
    %54 = tpu.concatenate %52, %53 in 1 : vector<8x495xf32>, vector<8x17xf32> -> vector<8x512xf32>
    %55 = vector.extract_strided_slice %1 {offsets = [8, 0], sizes = [1, 512], strides = [1, 1]} : vector<9x512xf32> to vector<1x512xf32>
    %56 = vector.broadcast %55 : vector<1x512xf32> to vector<8x512xf32>
    %57 = arith.mulf %54, %56 : vector<8x512xf32>
    %58 = arith.truncf %57 : vector<8x512xf32> to vector<8x512xbf16>
    %59 = tpu.concatenate %8, %15, %22, %29, %30, %37, %44, %51, %58 in 0 : vector<8x512xbf16>, vector<8x512xbf16>, vector<8x512xbf16>, vector<8x512xbf16>, vector<8x512xbf16>, vector<8x512xbf16>, vector<8x512xbf16>, vector<8x512xbf16>, vector<8x512xbf16> -> vector<72x512xbf16>
    %c0_2 = arith.constant 0 : index
    %c0_3 = arith.constant 0 : index
    %60 = vector.load %arg5[%c0_2, %c0_3] : memref<992x512xbf16, #tpu.memory_space<vmem>>, vector<8x72xbf16>
    %c0_4 = arith.constant 0 : index
    %c0_5 = arith.constant 0 : index
    %61 = vector.load %arg6[%c0_4, %c0_5] : memref<176x512xf32, #tpu.memory_space<vmem>>, vector<8x1xf32>
    %cst = arith.constant dense<0.000000e+00> : vector<8x512xf32>
    %62 = tpu.matmul %60, %59, %cst {dimension_numbers = #tpu.dot_dimension_numbers<[1], [0], [0], [1], [0, 0, 1, 1], [], []>} : vector<8x72xbf16>, vector<72x512xbf16>, vector<8x512xf32> -> vector<8x512xf32>
    %63 = vector.broadcast %61 : vector<8x1xf32> to vector<8x512xf32>
    %64 = arith.addf %62, %63 : vector<8x512xf32>
    %cst_6 = arith.constant 0.000000e+00 : f32
    %65 = vector.broadcast %cst_6 : f32 to vector<8x512xf32>
    %66 = arith.maximumf %64, %65 : vector<8x512xf32>
    %c16 = arith.constant 16 : index
    %c0_7 = arith.constant 0 : index
    %67 = vector.load %arg5[%c16, %c0_7] : memref<992x512xbf16, #tpu.memory_space<vmem>>, vector<512x512xbf16>
    %68 = arith.truncf %66 : vector<8x512xf32> to vector<8x512xbf16>
    %69 = vector.extract_strided_slice %67 {offsets = [0, 0], sizes = [512, 128], strides = [1, 1]} : vector<512x512xbf16> to vector<512x128xbf16>
    %cst_8 = arith.constant dense<0.000000e+00> : vector<8x128xf32>
    %70 = tpu.matmul %68, %69, %cst_8 {dimension_numbers = #tpu.dot_dimension_numbers<[1], [0], [0], [1], [0, 0, 1, 1], [], []>} : vector<8x512xbf16>, vector<512x128xbf16>, vector<8x128xf32> -> vector<8x128xf32>
    %71 = vector.extract_strided_slice %67 {offsets = [0, 128], sizes = [512, 128], strides = [1, 1]} : vector<512x512xbf16> to vector<512x128xbf16>
    %cst_9 = arith.constant dense<0.000000e+00> : vector<8x128xf32>
    %72 = tpu.matmul %68, %71, %cst_9 {dimension_numbers = #tpu.dot_dimension_numbers<[1], [0], [0], [1], [0, 0, 1, 1], [], []>} : vector<8x512xbf16>, vector<512x128xbf16>, vector<8x128xf32> -> vector<8x128xf32>
    %73 = arith.maximumf %70, %72 : vector<8x128xf32>
    %74 = vector.extract_strided_slice %67 {offsets = [0, 256], sizes = [512, 128], strides = [1, 1]} : vector<512x512xbf16> to vector<512x128xbf16>
    %cst_10 = arith.constant dense<0.000000e+00> : vector<8x128xf32>
    %75 = tpu.matmul %68, %74, %cst_10 {dimension_numbers = #tpu.dot_dimension_numbers<[1], [0], [0], [1], [0, 0, 1, 1], [], []>} : vector<8x512xbf16>, vector<512x128xbf16>, vector<8x128xf32> -> vector<8x128xf32>
    %76 = arith.maximumf %73, %75 : vector<8x128xf32>
    %77 = vector.extract_strided_slice %67 {offsets = [0, 384], sizes = [512, 128], strides = [1, 1]} : vector<512x512xbf16> to vector<512x128xbf16>
    %cst_11 = arith.constant dense<0.000000e+00> : vector<8x128xf32>
    %78 = tpu.matmul %68, %77, %cst_11 {dimension_numbers = #tpu.dot_dimension_numbers<[1], [0], [0], [1], [0, 0, 1, 1], [], []>} : vector<8x512xbf16>, vector<512x128xbf16>, vector<8x128xf32> -> vector<8x128xf32>
    %79 = arith.maximumf %76, %78 : vector<8x128xf32>
    %c0_12 = arith.constant 0 : index
    %c0_13 = arith.constant 0 : index
    %80 = vector.load %arg1[%c0_12, %c0_13] : memref<8x128xf32, #tpu.memory_space<vmem>>, vector<8x128xf32>
    %81 = tpu.concatenate %79, %80 in 0 : vector<8x128xf32>, vector<8x128xf32> -> vector<16x128xf32>
    %c40 = arith.constant 40 : index
    %c0_14 = arith.constant 0 : index
    %82 = vector.load %arg6[%c40, %c0_14] : memref<176x512xf32, #tpu.memory_space<vmem>>, vector<9x128xf32>
    %83 = vector.extract_strided_slice %81 {offsets = [0, 119], sizes = [16, 9], strides = [1, 1]} : vector<16x128xf32> to vector<16x9xf32>
    %84 = vector.extract_strided_slice %81 {offsets = [0, 0], sizes = [16, 119], strides = [1, 1]} : vector<16x128xf32> to vector<16x119xf32>
    %85 = tpu.concatenate %83, %84 in 1 : vector<16x9xf32>, vector<16x119xf32> -> vector<16x128xf32>
    %86 = vector.extract_strided_slice %82 {offsets = [0, 0], sizes = [1, 128], strides = [1, 1]} : vector<9x128xf32> to vector<1x128xf32>
    %87 = vector.broadcast %86 : vector<1x128xf32> to vector<16x128xf32>
    %88 = arith.mulf %85, %87 : vector<16x128xf32>
    %89 = arith.truncf %88 : vector<16x128xf32> to vector<16x128xbf16>
    %90 = vector.extract_strided_slice %81 {offsets = [0, 120], sizes = [16, 8], strides = [1, 1]} : vector<16x128xf32> to vector<16x8xf32>
    %91 = vector.extract_strided_slice %81 {offsets = [0, 0], sizes = [16, 120], strides = [1, 1]} : vector<16x128xf32> to vector<16x120xf32>
    %92 = tpu.concatenate %90, %91 in 1 : vector<16x8xf32>, vector<16x120xf32> -> vector<16x128xf32>
    %93 = vector.extract_strided_slice %82 {offsets = [1, 0], sizes = [1, 128], strides = [1, 1]} : vector<9x128xf32> to vector<1x128xf32>
    %94 = vector.broadcast %93 : vector<1x128xf32> to vector<16x128xf32>
    %95 = arith.mulf %92, %94 : vector<16x128xf32>
    %96 = arith.truncf %95 : vector<16x128xf32> to vector<16x128xbf16>
    %97 = vector.extract_strided_slice %81 {offsets = [0, 121], sizes = [16, 7], strides = [1, 1]} : vector<16x128xf32> to vector<16x7xf32>
    %98 = vector.extract_strided_slice %81 {offsets = [0, 0], sizes = [16, 121], strides = [1, 1]} : vector<16x128xf32> to vector<16x121xf32>
    %99 = tpu.concatenate %97, %98 in 1 : vector<16x7xf32>, vector<16x121xf32> -> vector<16x128xf32>
    %100 = vector.extract_strided_slice %82 {offsets = [2, 0], sizes = [1, 128], strides = [1, 1]} : vector<9x128xf32> to vector<1x128xf32>
    %101 = vector.broadcast %100 : vector<1x128xf32> to vector<16x128xf32>
    %102 = arith.mulf %99, %101 : vector<16x128xf32>
    %103 = arith.truncf %102 : vector<16x128xf32> to vector<16x128xbf16>
    %104 = vector.extract_strided_slice %81 {offsets = [0, 127], sizes = [16, 1], strides = [1, 1]} : vector<16x128xf32> to vector<16x1xf32>
    %105 = vector.extract_strided_slice %81 {offsets = [0, 0], sizes = [16, 127], strides = [1, 1]} : vector<16x128xf32> to vector<16x127xf32>
    %106 = tpu.concatenate %104, %105 in 1 : vector<16x1xf32>, vector<16x127xf32> -> vector<16x128xf32>
    %107 = vector.extract_strided_slice %82 {offsets = [3, 0], sizes = [1, 128], strides = [1, 1]} : vector<9x128xf32> to vector<1x128xf32>
    %108 = vector.broadcast %107 : vector<1x128xf32> to vector<16x128xf32>
    %109 = arith.mulf %106, %108 : vector<16x128xf32>
    %110 = arith.truncf %109 : vector<16x128xf32> to vector<16x128xbf16>
    %111 = arith.truncf %81 : vector<16x128xf32> to vector<16x128xbf16>
    %112 = vector.extract_strided_slice %81 {offsets = [0, 1], sizes = [16, 127], strides = [1, 1]} : vector<16x128xf32> to vector<16x127xf32>
    %113 = vector.extract_strided_slice %81 {offsets = [0, 0], sizes = [16, 1], strides = [1, 1]} : vector<16x128xf32> to vector<16x1xf32>
    %114 = tpu.concatenate %112, %113 in 1 : vector<16x127xf32>, vector<16x1xf32> -> vector<16x128xf32>
    %115 = vector.extract_strided_slice %82 {offsets = [5, 0], sizes = [1, 128], strides = [1, 1]} : vector<9x128xf32> to vector<1x128xf32>
    %116 = vector.broadcast %115 : vector<1x128xf32> to vector<16x128xf32>
    %117 = arith.mulf %114, %116 : vector<16x128xf32>
    %118 = arith.truncf %117 : vector<16x128xf32> to vector<16x128xbf16>
    %119 = vector.extract_strided_slice %81 {offsets = [0, 7], sizes = [16, 121], strides = [1, 1]} : vector<16x128xf32> to vector<16x121xf32>
    %120 = vector.extract_strided_slice %81 {offsets = [0, 0], sizes = [16, 7], strides = [1, 1]} : vector<16x128xf32> to vector<16x7xf32>
    %121 = tpu.concatenate %119, %120 in 1 : vector<16x121xf32>, vector<16x7xf32> -> vector<16x128xf32>
    %122 = vector.extract_strided_slice %82 {offsets = [6, 0], sizes = [1, 128], strides = [1, 1]} : vector<9x128xf32> to vector<1x128xf32>
    %123 = vector.broadcast %122 : vector<1x128xf32> to vector<16x128xf32>
    %124 = arith.mulf %121, %123 : vector<16x128xf32>
    %125 = arith.truncf %124 : vector<16x128xf32> to vector<16x128xbf16>
    %126 = vector.extract_strided_slice %81 {offsets = [0, 8], sizes = [16, 120], strides = [1, 1]} : vector<16x128xf32> to vector<16x120xf32>
    %127 = vector.extract_strided_slice %81 {offsets = [0, 0], sizes = [16, 8], strides = [1, 1]} : vector<16x128xf32> to vector<16x8xf32>
    %128 = tpu.concatenate %126, %127 in 1 : vector<16x120xf32>, vector<16x8xf32> -> vector<16x128xf32>
    %129 = vector.extract_strided_slice %82 {offsets = [7, 0], sizes = [1, 128], strides = [1, 1]} : vector<9x128xf32> to vector<1x128xf32>
    %130 = vector.broadcast %129 : vector<1x128xf32> to vector<16x128xf32>
    %131 = arith.mulf %128, %130 : vector<16x128xf32>
    %132 = arith.truncf %131 : vector<16x128xf32> to vector<16x128xbf16>
    %133 = vector.extract_strided_slice %81 {offsets = [0, 9], sizes = [16, 119], strides = [1, 1]} : vector<16x128xf32> to vector<16x119xf32>
    %134 = vector.extract_strided_slice %81 {offsets = [0, 0], sizes = [16, 9], strides = [1, 1]} : vector<16x128xf32> to vector<16x9xf32>
    %135 = tpu.concatenate %133, %134 in 1 : vector<16x119xf32>, vector<16x9xf32> -> vector<16x128xf32>
    %136 = vector.extract_strided_slice %82 {offsets = [8, 0], sizes = [1, 128], strides = [1, 1]} : vector<9x128xf32> to vector<1x128xf32>
    %137 = vector.broadcast %136 : vector<1x128xf32> to vector<16x128xf32>
    %138 = arith.mulf %135, %137 : vector<16x128xf32>
    %139 = arith.truncf %138 : vector<16x128xf32> to vector<16x128xbf16>
    %140 = tpu.concatenate %89, %96, %103, %110, %111, %118, %125, %132, %139 in 0 : vector<16x128xbf16>, vector<16x128xbf16>, vector<16x128xbf16>, vector<16x128xbf16>, vector<16x128xbf16>, vector<16x128xbf16>, vector<16x128xbf16>, vector<16x128xbf16>, vector<16x128xbf16> -> vector<144x128xbf16>
    %c528 = arith.constant 528 : index
    %c0_15 = arith.constant 0 : index
    %141 = vector.load %arg5[%c528, %c0_15] : memref<992x512xbf16, #tpu.memory_space<vmem>>, vector<16x144xbf16>
    %c24 = arith.constant 24 : index
    %c0_16 = arith.constant 0 : index
    %142 = vector.load %arg6[%c24, %c0_16] : memref<176x512xf32, #tpu.memory_space<vmem>>, vector<16x1xf32>
    %cst_17 = arith.constant dense<0.000000e+00> : vector<16x128xf32>
    %143 = tpu.matmul %141, %140, %cst_17 {dimension_numbers = #tpu.dot_dimension_numbers<[1], [0], [0], [1], [0, 0, 1, 1], [], []>} : vector<16x144xbf16>, vector<144x128xbf16>, vector<16x128xf32> -> vector<16x128xf32>
    %144 = vector.broadcast %142 : vector<16x1xf32> to vector<16x128xf32>
    %145 = arith.addf %143, %144 : vector<16x128xf32>
    %cst_18 = arith.constant 0.000000e+00 : f32
    %146 = vector.broadcast %cst_18 : f32 to vector<16x128xf32>
    %147 = arith.maximumf %145, %146 : vector<16x128xf32>
    %c40_19 = arith.constant 40 : index
    %c0_20 = arith.constant 0 : index
    %148 = vector.load %arg6[%c40_19, %c0_20] : memref<176x512xf32, #tpu.memory_space<vmem>>, vector<9x128xf32>
    %149 = vector.extract_strided_slice %147 {offsets = [0, 119], sizes = [16, 9], strides = [1, 1]} : vector<16x128xf32> to vector<16x9xf32>
    %150 = vector.extract_strided_slice %147 {offsets = [0, 0], sizes = [16, 119], strides = [1, 1]} : vector<16x128xf32> to vector<16x119xf32>
    %151 = tpu.concatenate %149, %150 in 1 : vector<16x9xf32>, vector<16x119xf32> -> vector<16x128xf32>
    %152 = vector.extract_strided_slice %148 {offsets = [0, 0], sizes = [1, 128], strides = [1, 1]} : vector<9x128xf32> to vector<1x128xf32>
    %153 = vector.broadcast %152 : vector<1x128xf32> to vector<16x128xf32>
    %154 = arith.mulf %151, %153 : vector<16x128xf32>
    %155 = arith.truncf %154 : vector<16x128xf32> to vector<16x128xbf16>
    %156 = vector.extract_strided_slice %147 {offsets = [0, 120], sizes = [16, 8], strides = [1, 1]} : vector<16x128xf32> to vector<16x8xf32>
    %157 = vector.extract_strided_slice %147 {offsets = [0, 0], sizes = [16, 120], strides = [1, 1]} : vector<16x128xf32> to vector<16x120xf32>
    %158 = tpu.concatenate %156, %157 in 1 : vector<16x8xf32>, vector<16x120xf32> -> vector<16x128xf32>
    %159 = vector.extract_strided_slice %148 {offsets = [1, 0], sizes = [1, 128], strides = [1, 1]} : vector<9x128xf32> to vector<1x128xf32>
    %160 = vector.broadcast %159 : vector<1x128xf32> to vector<16x128xf32>
    %161 = arith.mulf %158, %160 : vector<16x128xf32>
    %162 = arith.truncf %161 : vector<16x128xf32> to vector<16x128xbf16>
    %163 = vector.extract_strided_slice %147 {offsets = [0, 121], sizes = [16, 7], strides = [1, 1]} : vector<16x128xf32> to vector<16x7xf32>
    %164 = vector.extract_strided_slice %147 {offsets = [0, 0], sizes = [16, 121], strides = [1, 1]} : vector<16x128xf32> to vector<16x121xf32>
    %165 = tpu.concatenate %163, %164 in 1 : vector<16x7xf32>, vector<16x121xf32> -> vector<16x128xf32>
    %166 = vector.extract_strided_slice %148 {offsets = [2, 0], sizes = [1, 128], strides = [1, 1]} : vector<9x128xf32> to vector<1x128xf32>
    %167 = vector.broadcast %166 : vector<1x128xf32> to vector<16x128xf32>
    %168 = arith.mulf %165, %167 : vector<16x128xf32>
    %169 = arith.truncf %168 : vector<16x128xf32> to vector<16x128xbf16>
    %170 = vector.extract_strided_slice %147 {offsets = [0, 127], sizes = [16, 1], strides = [1, 1]} : vector<16x128xf32> to vector<16x1xf32>
    %171 = vector.extract_strided_slice %147 {offsets = [0, 0], sizes = [16, 127], strides = [1, 1]} : vector<16x128xf32> to vector<16x127xf32>
    %172 = tpu.concatenate %170, %171 in 1 : vector<16x1xf32>, vector<16x127xf32> -> vector<16x128xf32>
    %173 = vector.extract_strided_slice %148 {offsets = [3, 0], sizes = [1, 128], strides = [1, 1]} : vector<9x128xf32> to vector<1x128xf32>
    %174 = vector.broadcast %173 : vector<1x128xf32> to vector<16x128xf32>
    %175 = arith.mulf %172, %174 : vector<16x128xf32>
    %176 = arith.truncf %175 : vector<16x128xf32> to vector<16x128xbf16>
    %177 = arith.truncf %147 : vector<16x128xf32> to vector<16x128xbf16>
    %178 = vector.extract_strided_slice %147 {offsets = [0, 1], sizes = [16, 127], strides = [1, 1]} : vector<16x128xf32> to vector<16x127xf32>
    %179 = vector.extract_strided_slice %147 {offsets = [0, 0], sizes = [16, 1], strides = [1, 1]} : vector<16x128xf32> to vector<16x1xf32>
    %180 = tpu.concatenate %178, %179 in 1 : vector<16x127xf32>, vector<16x1xf32> -> vector<16x128xf32>
    %181 = vector.extract_strided_slice %148 {offsets = [5, 0], sizes = [1, 128], strides = [1, 1]} : vector<9x128xf32> to vector<1x128xf32>
    %182 = vector.broadcast %181 : vector<1x128xf32> to vector<16x128xf32>
    %183 = arith.mulf %180, %182 : vector<16x128xf32>
    %184 = arith.truncf %183 : vector<16x128xf32> to vector<16x128xbf16>
    %185 = vector.extract_strided_slice %147 {offsets = [0, 7], sizes = [16, 121], strides = [1, 1]} : vector<16x128xf32> to vector<16x121xf32>
    %186 = vector.extract_strided_slice %147 {offsets = [0, 0], sizes = [16, 7], strides = [1, 1]} : vector<16x128xf32> to vector<16x7xf32>
    %187 = tpu.concatenate %185, %186 in 1 : vector<16x121xf32>, vector<16x7xf32> -> vector<16x128xf32>
    %188 = vector.extract_strided_slice %148 {offsets = [6, 0], sizes = [1, 128], strides = [1, 1]} : vector<9x128xf32> to vector<1x128xf32>
    %189 = vector.broadcast %188 : vector<1x128xf32> to vector<16x128xf32>
    %190 = arith.mulf %187, %189 : vector<16x128xf32>
    %191 = arith.truncf %190 : vector<16x128xf32> to vector<16x128xbf16>
    %192 = vector.extract_strided_slice %147 {offsets = [0, 8], sizes = [16, 120], strides = [1, 1]} : vector<16x128xf32> to vector<16x120xf32>
    %193 = vector.extract_strided_slice %147 {offsets = [0, 0], sizes = [16, 8], strides = [1, 1]} : vector<16x128xf32> to vector<16x8xf32>
    %194 = tpu.concatenate %192, %193 in 1 : vector<16x120xf32>, vector<16x8xf32> -> vector<16x128xf32>
    %195 = vector.extract_strided_slice %148 {offsets = [7, 0], sizes = [1, 128], strides = [1, 1]} : vector<9x128xf32> to vector<1x128xf32>
    %196 = vector.broadcast %195 : vector<1x128xf32> to vector<16x128xf32>
    %197 = arith.mulf %194, %196 : vector<16x128xf32>
    %198 = arith.truncf %197 : vector<16x128xf32> to vector<16x128xbf16>
    %199 = vector.extract_strided_slice %147 {offsets = [0, 9], sizes = [16, 119], strides = [1, 1]} : vector<16x128xf32> to vector<16x119xf32>
    %200 = vector.extract_strided_slice %147 {offsets = [0, 0], sizes = [16, 9], strides = [1, 1]} : vector<16x128xf32> to vector<16x9xf32>
    %201 = tpu.concatenate %199, %200 in 1 : vector<16x119xf32>, vector<16x9xf32> -> vector<16x128xf32>
    %202 = vector.extract_strided_slice %148 {offsets = [8, 0], sizes = [1, 128], strides = [1, 1]} : vector<9x128xf32> to vector<1x128xf32>
    %203 = vector.broadcast %202 : vector<1x128xf32> to vector<16x128xf32>
    %204 = arith.mulf %201, %203 : vector<16x128xf32>
    %205 = arith.truncf %204 : vector<16x128xf32> to vector<16x128xbf16>
    %206 = tpu.concatenate %155, %162, %169, %176, %177, %184, %191, %198, %205 in 0 : vector<16x128xbf16>, vector<16x128xbf16>, vector<16x128xbf16>, vector<16x128xbf16>, vector<16x128xbf16>, vector<16x128xbf16>, vector<16x128xbf16>, vector<16x128xbf16>, vector<16x128xbf16> -> vector<144x128xbf16>
    %c544 = arith.constant 544 : index
    %c0_21 = arith.constant 0 : index
    %207 = vector.load %arg5[%c544, %c0_21] : memref<992x512xbf16, #tpu.memory_space<vmem>>, vector<16x144xbf16>
    %c56 = arith.constant 56 : index
    %c0_22 = arith.constant 0 : index
    %208 = vector.load %arg6[%c56, %c0_22] : memref<176x512xf32, #tpu.memory_space<vmem>>, vector<16x1xf32>
    %cst_23 = arith.constant dense<0.000000e+00> : vector<16x128xf32>
    %209 = tpu.matmul %207, %206, %cst_23 {dimension_numbers = #tpu.dot_dimension_numbers<[1], [0], [0], [1], [0, 0, 1, 1], [], []>} : vector<16x144xbf16>, vector<144x128xbf16>, vector<16x128xf32> -> vector<16x128xf32>
    %210 = vector.broadcast %208 : vector<16x1xf32> to vector<16x128xf32>
    %211 = arith.addf %209, %210 : vector<16x128xf32>
    %cst_24 = arith.constant 0.000000e+00 : f32
    %212 = vector.broadcast %cst_24 : f32 to vector<16x128xf32>
    %213 = arith.maximumf %211, %212 : vector<16x128xf32>
    %c560 = arith.constant 560 : index
    %c0_25 = arith.constant 0 : index
    %214 = vector.load %arg5[%c560, %c0_25] : memref<992x512xbf16, #tpu.memory_space<vmem>>, vector<128x128xbf16>
    %215 = arith.truncf %213 : vector<16x128xf32> to vector<16x128xbf16>
    %216 = vector.extract_strided_slice %214 {offsets = [0, 0], sizes = [128, 32], strides = [1, 1]} : vector<128x128xbf16> to vector<128x32xbf16>
    %cst_26 = arith.constant dense<0.000000e+00> : vector<16x32xf32>
    %217 = tpu.matmul %215, %216, %cst_26 {dimension_numbers = #tpu.dot_dimension_numbers<[1], [0], [0], [1], [0, 0, 1, 1], [], []>} : vector<16x128xbf16>, vector<128x32xbf16>, vector<16x32xf32> -> vector<16x32xf32>
    %218 = vector.extract_strided_slice %214 {offsets = [0, 32], sizes = [128, 32], strides = [1, 1]} : vector<128x128xbf16> to vector<128x32xbf16>
    %cst_27 = arith.constant dense<0.000000e+00> : vector<16x32xf32>
    %219 = tpu.matmul %215, %218, %cst_27 {dimension_numbers = #tpu.dot_dimension_numbers<[1], [0], [0], [1], [0, 0, 1, 1], [], []>} : vector<16x128xbf16>, vector<128x32xbf16>, vector<16x32xf32> -> vector<16x32xf32>
    %220 = arith.maximumf %217, %219 : vector<16x32xf32>
    %221 = vector.extract_strided_slice %214 {offsets = [0, 64], sizes = [128, 32], strides = [1, 1]} : vector<128x128xbf16> to vector<128x32xbf16>
    %cst_28 = arith.constant dense<0.000000e+00> : vector<16x32xf32>
    %222 = tpu.matmul %215, %221, %cst_28 {dimension_numbers = #tpu.dot_dimension_numbers<[1], [0], [0], [1], [0, 0, 1, 1], [], []>} : vector<16x128xbf16>, vector<128x32xbf16>, vector<16x32xf32> -> vector<16x32xf32>
    %223 = arith.maximumf %220, %222 : vector<16x32xf32>
    %224 = vector.extract_strided_slice %214 {offsets = [0, 96], sizes = [128, 32], strides = [1, 1]} : vector<128x128xbf16> to vector<128x32xbf16>
    %cst_29 = arith.constant dense<0.000000e+00> : vector<16x32xf32>
    %225 = tpu.matmul %215, %224, %cst_29 {dimension_numbers = #tpu.dot_dimension_numbers<[1], [0], [0], [1], [0, 0, 1, 1], [], []>} : vector<16x128xbf16>, vector<128x32xbf16>, vector<16x32xf32> -> vector<16x32xf32>
    %226 = arith.maximumf %223, %225 : vector<16x32xf32>
    %c0_30 = arith.constant 0 : index
    %c0_31 = arith.constant 0 : index
    %227 = vector.load %arg2[%c0_30, %c0_31] : memref<16x32xf32, #tpu.memory_space<vmem>>, vector<16x32xf32>
    %228 = tpu.concatenate %226, %227 in 0 : vector<16x32xf32>, vector<16x32xf32> -> vector<32x32xf32>
    %c88 = arith.constant 88 : index
    %c0_32 = arith.constant 0 : index
    %229 = vector.load %arg6[%c88, %c0_32] : memref<176x512xf32, #tpu.memory_space<vmem>>, vector<9x32xf32>
    %230 = vector.extract_strided_slice %228 {offsets = [0, 27], sizes = [32, 5], strides = [1, 1]} : vector<32x32xf32> to vector<32x5xf32>
    %231 = vector.extract_strided_slice %228 {offsets = [0, 0], sizes = [32, 27], strides = [1, 1]} : vector<32x32xf32> to vector<32x27xf32>
    %232 = tpu.concatenate %230, %231 in 1 : vector<32x5xf32>, vector<32x27xf32> -> vector<32x32xf32>
    %233 = vector.extract_strided_slice %229 {offsets = [0, 0], sizes = [1, 32], strides = [1, 1]} : vector<9x32xf32> to vector<1x32xf32>
    %234 = vector.broadcast %233 : vector<1x32xf32> to vector<32x32xf32>
    %235 = arith.mulf %232, %234 : vector<32x32xf32>
    %236 = arith.truncf %235 : vector<32x32xf32> to vector<32x32xbf16>
    %237 = vector.extract_strided_slice %228 {offsets = [0, 28], sizes = [32, 4], strides = [1, 1]} : vector<32x32xf32> to vector<32x4xf32>
    %238 = vector.extract_strided_slice %228 {offsets = [0, 0], sizes = [32, 28], strides = [1, 1]} : vector<32x32xf32> to vector<32x28xf32>
    %239 = tpu.concatenate %237, %238 in 1 : vector<32x4xf32>, vector<32x28xf32> -> vector<32x32xf32>
    %240 = vector.extract_strided_slice %229 {offsets = [1, 0], sizes = [1, 32], strides = [1, 1]} : vector<9x32xf32> to vector<1x32xf32>
    %241 = vector.broadcast %240 : vector<1x32xf32> to vector<32x32xf32>
    %242 = arith.mulf %239, %241 : vector<32x32xf32>
    %243 = arith.truncf %242 : vector<32x32xf32> to vector<32x32xbf16>
    %244 = vector.extract_strided_slice %228 {offsets = [0, 29], sizes = [32, 3], strides = [1, 1]} : vector<32x32xf32> to vector<32x3xf32>
    %245 = vector.extract_strided_slice %228 {offsets = [0, 0], sizes = [32, 29], strides = [1, 1]} : vector<32x32xf32> to vector<32x29xf32>
    %246 = tpu.concatenate %244, %245 in 1 : vector<32x3xf32>, vector<32x29xf32> -> vector<32x32xf32>
    %247 = vector.extract_strided_slice %229 {offsets = [2, 0], sizes = [1, 32], strides = [1, 1]} : vector<9x32xf32> to vector<1x32xf32>
    %248 = vector.broadcast %247 : vector<1x32xf32> to vector<32x32xf32>
    %249 = arith.mulf %246, %248 : vector<32x32xf32>
    %250 = arith.truncf %249 : vector<32x32xf32> to vector<32x32xbf16>
    %251 = vector.extract_strided_slice %228 {offsets = [0, 31], sizes = [32, 1], strides = [1, 1]} : vector<32x32xf32> to vector<32x1xf32>
    %252 = vector.extract_strided_slice %228 {offsets = [0, 0], sizes = [32, 31], strides = [1, 1]} : vector<32x32xf32> to vector<32x31xf32>
    %253 = tpu.concatenate %251, %252 in 1 : vector<32x1xf32>, vector<32x31xf32> -> vector<32x32xf32>
    %254 = vector.extract_strided_slice %229 {offsets = [3, 0], sizes = [1, 32], strides = [1, 1]} : vector<9x32xf32> to vector<1x32xf32>
    %255 = vector.broadcast %254 : vector<1x32xf32> to vector<32x32xf32>
    %256 = arith.mulf %253, %255 : vector<32x32xf32>
    %257 = arith.truncf %256 : vector<32x32xf32> to vector<32x32xbf16>
    %258 = arith.truncf %228 : vector<32x32xf32> to vector<32x32xbf16>
    %259 = vector.extract_strided_slice %228 {offsets = [0, 1], sizes = [32, 31], strides = [1, 1]} : vector<32x32xf32> to vector<32x31xf32>
    %260 = vector.extract_strided_slice %228 {offsets = [0, 0], sizes = [32, 1], strides = [1, 1]} : vector<32x32xf32> to vector<32x1xf32>
    %261 = tpu.concatenate %259, %260 in 1 : vector<32x31xf32>, vector<32x1xf32> -> vector<32x32xf32>
    %262 = vector.extract_strided_slice %229 {offsets = [5, 0], sizes = [1, 32], strides = [1, 1]} : vector<9x32xf32> to vector<1x32xf32>
    %263 = vector.broadcast %262 : vector<1x32xf32> to vector<32x32xf32>
    %264 = arith.mulf %261, %263 : vector<32x32xf32>
    %265 = arith.truncf %264 : vector<32x32xf32> to vector<32x32xbf16>
    %266 = vector.extract_strided_slice %228 {offsets = [0, 3], sizes = [32, 29], strides = [1, 1]} : vector<32x32xf32> to vector<32x29xf32>
    %267 = vector.extract_strided_slice %228 {offsets = [0, 0], sizes = [32, 3], strides = [1, 1]} : vector<32x32xf32> to vector<32x3xf32>
    %268 = tpu.concatenate %266, %267 in 1 : vector<32x29xf32>, vector<32x3xf32> -> vector<32x32xf32>
    %269 = vector.extract_strided_slice %229 {offsets = [6, 0], sizes = [1, 32], strides = [1, 1]} : vector<9x32xf32> to vector<1x32xf32>
    %270 = vector.broadcast %269 : vector<1x32xf32> to vector<32x32xf32>
    %271 = arith.mulf %268, %270 : vector<32x32xf32>
    %272 = arith.truncf %271 : vector<32x32xf32> to vector<32x32xbf16>
    %273 = vector.extract_strided_slice %228 {offsets = [0, 4], sizes = [32, 28], strides = [1, 1]} : vector<32x32xf32> to vector<32x28xf32>
    %274 = vector.extract_strided_slice %228 {offsets = [0, 0], sizes = [32, 4], strides = [1, 1]} : vector<32x32xf32> to vector<32x4xf32>
    %275 = tpu.concatenate %273, %274 in 1 : vector<32x28xf32>, vector<32x4xf32> -> vector<32x32xf32>
    %276 = vector.extract_strided_slice %229 {offsets = [7, 0], sizes = [1, 32], strides = [1, 1]} : vector<9x32xf32> to vector<1x32xf32>
    %277 = vector.broadcast %276 : vector<1x32xf32> to vector<32x32xf32>
    %278 = arith.mulf %275, %277 : vector<32x32xf32>
    %279 = arith.truncf %278 : vector<32x32xf32> to vector<32x32xbf16>
    %280 = vector.extract_strided_slice %228 {offsets = [0, 5], sizes = [32, 27], strides = [1, 1]} : vector<32x32xf32> to vector<32x27xf32>
    %281 = vector.extract_strided_slice %228 {offsets = [0, 0], sizes = [32, 5], strides = [1, 1]} : vector<32x32xf32> to vector<32x5xf32>
    %282 = tpu.concatenate %280, %281 in 1 : vector<32x27xf32>, vector<32x5xf32> -> vector<32x32xf32>
    %283 = vector.extract_strided_slice %229 {offsets = [8, 0], sizes = [1, 32], strides = [1, 1]} : vector<9x32xf32> to vector<1x32xf32>
    %284 = vector.broadcast %283 : vector<1x32xf32> to vector<32x32xf32>
    %285 = arith.mulf %282, %284 : vector<32x32xf32>
    %286 = arith.truncf %285 : vector<32x32xf32> to vector<32x32xbf16>
    %287 = tpu.concatenate %236, %243, %250, %257, %258, %265, %272, %279, %286 in 0 : vector<32x32xbf16>, vector<32x32xbf16>, vector<32x32xbf16>, vector<32x32xbf16>, vector<32x32xbf16>, vector<32x32xbf16>, vector<32x32xbf16>, vector<32x32xbf16>, vector<32x32xbf16> -> vector<288x32xbf16>
    %c688 = arith.constant 688 : index
    %c0_33 = arith.constant 0 : index
    %288 = vector.load %arg5[%c688, %c0_33] : memref<992x512xbf16, #tpu.memory_space<vmem>>, vector<16x288xbf16>
    %c72 = arith.constant 72 : index
    %c0_34 = arith.constant 0 : index
    %289 = vector.load %arg6[%c72, %c0_34] : memref<176x512xf32, #tpu.memory_space<vmem>>, vector<16x1xf32>
    %cst_35 = arith.constant dense<0.000000e+00> : vector<16x32xf32>
    %290 = tpu.matmul %288, %287, %cst_35 {dimension_numbers = #tpu.dot_dimension_numbers<[1], [0], [0], [1], [0, 0, 1, 1], [], []>} : vector<16x288xbf16>, vector<288x32xbf16>, vector<16x32xf32> -> vector<16x32xf32>
    %291 = vector.broadcast %289 : vector<16x1xf32> to vector<16x32xf32>
    %292 = arith.addf %290, %291 : vector<16x32xf32>
    %cst_36 = arith.constant 0.000000e+00 : f32
    %293 = vector.broadcast %cst_36 : f32 to vector<16x32xf32>
    %294 = arith.maximumf %292, %293 : vector<16x32xf32>
    %c88_37 = arith.constant 88 : index
    %c0_38 = arith.constant 0 : index
    %295 = vector.load %arg6[%c88_37, %c0_38] : memref<176x512xf32, #tpu.memory_space<vmem>>, vector<9x32xf32>
    %296 = vector.extract_strided_slice %294 {offsets = [0, 27], sizes = [16, 5], strides = [1, 1]} : vector<16x32xf32> to vector<16x5xf32>
    %297 = vector.extract_strided_slice %294 {offsets = [0, 0], sizes = [16, 27], strides = [1, 1]} : vector<16x32xf32> to vector<16x27xf32>
    %298 = tpu.concatenate %296, %297 in 1 : vector<16x5xf32>, vector<16x27xf32> -> vector<16x32xf32>
    %299 = vector.extract_strided_slice %295 {offsets = [0, 0], sizes = [1, 32], strides = [1, 1]} : vector<9x32xf32> to vector<1x32xf32>
    %300 = vector.broadcast %299 : vector<1x32xf32> to vector<16x32xf32>
    %301 = arith.mulf %298, %300 : vector<16x32xf32>
    %302 = arith.truncf %301 : vector<16x32xf32> to vector<16x32xbf16>
    %303 = vector.extract_strided_slice %294 {offsets = [0, 28], sizes = [16, 4], strides = [1, 1]} : vector<16x32xf32> to vector<16x4xf32>
    %304 = vector.extract_strided_slice %294 {offsets = [0, 0], sizes = [16, 28], strides = [1, 1]} : vector<16x32xf32> to vector<16x28xf32>
    %305 = tpu.concatenate %303, %304 in 1 : vector<16x4xf32>, vector<16x28xf32> -> vector<16x32xf32>
    %306 = vector.extract_strided_slice %295 {offsets = [1, 0], sizes = [1, 32], strides = [1, 1]} : vector<9x32xf32> to vector<1x32xf32>
    %307 = vector.broadcast %306 : vector<1x32xf32> to vector<16x32xf32>
    %308 = arith.mulf %305, %307 : vector<16x32xf32>
    %309 = arith.truncf %308 : vector<16x32xf32> to vector<16x32xbf16>
    %310 = vector.extract_strided_slice %294 {offsets = [0, 29], sizes = [16, 3], strides = [1, 1]} : vector<16x32xf32> to vector<16x3xf32>
    %311 = vector.extract_strided_slice %294 {offsets = [0, 0], sizes = [16, 29], strides = [1, 1]} : vector<16x32xf32> to vector<16x29xf32>
    %312 = tpu.concatenate %310, %311 in 1 : vector<16x3xf32>, vector<16x29xf32> -> vector<16x32xf32>
    %313 = vector.extract_strided_slice %295 {offsets = [2, 0], sizes = [1, 32], strides = [1, 1]} : vector<9x32xf32> to vector<1x32xf32>
    %314 = vector.broadcast %313 : vector<1x32xf32> to vector<16x32xf32>
    %315 = arith.mulf %312, %314 : vector<16x32xf32>
    %316 = arith.truncf %315 : vector<16x32xf32> to vector<16x32xbf16>
    %317 = vector.extract_strided_slice %294 {offsets = [0, 31], sizes = [16, 1], strides = [1, 1]} : vector<16x32xf32> to vector<16x1xf32>
    %318 = vector.extract_strided_slice %294 {offsets = [0, 0], sizes = [16, 31], strides = [1, 1]} : vector<16x32xf32> to vector<16x31xf32>
    %319 = tpu.concatenate %317, %318 in 1 : vector<16x1xf32>, vector<16x31xf32> -> vector<16x32xf32>
    %320 = vector.extract_strided_slice %295 {offsets = [3, 0], sizes = [1, 32], strides = [1, 1]} : vector<9x32xf32> to vector<1x32xf32>
    %321 = vector.broadcast %320 : vector<1x32xf32> to vector<16x32xf32>
    %322 = arith.mulf %319, %321 : vector<16x32xf32>
    %323 = arith.truncf %322 : vector<16x32xf32> to vector<16x32xbf16>
    %324 = arith.truncf %294 : vector<16x32xf32> to vector<16x32xbf16>
    %325 = vector.extract_strided_slice %294 {offsets = [0, 1], sizes = [16, 31], strides = [1, 1]} : vector<16x32xf32> to vector<16x31xf32>
    %326 = vector.extract_strided_slice %294 {offsets = [0, 0], sizes = [16, 1], strides = [1, 1]} : vector<16x32xf32> to vector<16x1xf32>
    %327 = tpu.concatenate %325, %326 in 1 : vector<16x31xf32>, vector<16x1xf32> -> vector<16x32xf32>
    %328 = vector.extract_strided_slice %295 {offsets = [5, 0], sizes = [1, 32], strides = [1, 1]} : vector<9x32xf32> to vector<1x32xf32>
    %329 = vector.broadcast %328 : vector<1x32xf32> to vector<16x32xf32>
    %330 = arith.mulf %327, %329 : vector<16x32xf32>
    %331 = arith.truncf %330 : vector<16x32xf32> to vector<16x32xbf16>
    %332 = vector.extract_strided_slice %294 {offsets = [0, 3], sizes = [16, 29], strides = [1, 1]} : vector<16x32xf32> to vector<16x29xf32>
    %333 = vector.extract_strided_slice %294 {offsets = [0, 0], sizes = [16, 3], strides = [1, 1]} : vector<16x32xf32> to vector<16x3xf32>
    %334 = tpu.concatenate %332, %333 in 1 : vector<16x29xf32>, vector<16x3xf32> -> vector<16x32xf32>
    %335 = vector.extract_strided_slice %295 {offsets = [6, 0], sizes = [1, 32], strides = [1, 1]} : vector<9x32xf32> to vector<1x32xf32>
    %336 = vector.broadcast %335 : vector<1x32xf32> to vector<16x32xf32>
    %337 = arith.mulf %334, %336 : vector<16x32xf32>
    %338 = arith.truncf %337 : vector<16x32xf32> to vector<16x32xbf16>
    %339 = vector.extract_strided_slice %294 {offsets = [0, 4], sizes = [16, 28], strides = [1, 1]} : vector<16x32xf32> to vector<16x28xf32>
    %340 = vector.extract_strided_slice %294 {offsets = [0, 0], sizes = [16, 4], strides = [1, 1]} : vector<16x32xf32> to vector<16x4xf32>
    %341 = tpu.concatenate %339, %340 in 1 : vector<16x28xf32>, vector<16x4xf32> -> vector<16x32xf32>
    %342 = vector.extract_strided_slice %295 {offsets = [7, 0], sizes = [1, 32], strides = [1, 1]} : vector<9x32xf32> to vector<1x32xf32>
    %343 = vector.broadcast %342 : vector<1x32xf32> to vector<16x32xf32>
    %344 = arith.mulf %341, %343 : vector<16x32xf32>
    %345 = arith.truncf %344 : vector<16x32xf32> to vector<16x32xbf16>
    %346 = vector.extract_strided_slice %294 {offsets = [0, 5], sizes = [16, 27], strides = [1, 1]} : vector<16x32xf32> to vector<16x27xf32>
    %347 = vector.extract_strided_slice %294 {offsets = [0, 0], sizes = [16, 5], strides = [1, 1]} : vector<16x32xf32> to vector<16x5xf32>
    %348 = tpu.concatenate %346, %347 in 1 : vector<16x27xf32>, vector<16x5xf32> -> vector<16x32xf32>
    %349 = vector.extract_strided_slice %295 {offsets = [8, 0], sizes = [1, 32], strides = [1, 1]} : vector<9x32xf32> to vector<1x32xf32>
    %350 = vector.broadcast %349 : vector<1x32xf32> to vector<16x32xf32>
    %351 = arith.mulf %348, %350 : vector<16x32xf32>
    %352 = arith.truncf %351 : vector<16x32xf32> to vector<16x32xbf16>
    %353 = tpu.concatenate %302, %309, %316, %323, %324, %331, %338, %345, %352 in 0 : vector<16x32xbf16>, vector<16x32xbf16>, vector<16x32xbf16>, vector<16x32xbf16>, vector<16x32xbf16>, vector<16x32xbf16>, vector<16x32xbf16>, vector<16x32xbf16>, vector<16x32xbf16> -> vector<144x32xbf16>
    %c704 = arith.constant 704 : index
    %c0_39 = arith.constant 0 : index
    %354 = vector.load %arg5[%c704, %c0_39] : memref<992x512xbf16, #tpu.memory_space<vmem>>, vector<16x144xbf16>
    %c104 = arith.constant 104 : index
    %c0_40 = arith.constant 0 : index
    %355 = vector.load %arg6[%c104, %c0_40] : memref<176x512xf32, #tpu.memory_space<vmem>>, vector<16x1xf32>
    %cst_41 = arith.constant dense<0.000000e+00> : vector<16x32xf32>
    %356 = tpu.matmul %354, %353, %cst_41 {dimension_numbers = #tpu.dot_dimension_numbers<[1], [0], [0], [1], [0, 0, 1, 1], [], []>} : vector<16x144xbf16>, vector<144x32xbf16>, vector<16x32xf32> -> vector<16x32xf32>
    %357 = vector.broadcast %355 : vector<16x1xf32> to vector<16x32xf32>
    %358 = arith.addf %356, %357 : vector<16x32xf32>
    %cst_42 = arith.constant 0.000000e+00 : f32
    %359 = vector.broadcast %cst_42 : f32 to vector<16x32xf32>
    %360 = arith.maximumf %358, %359 : vector<16x32xf32>
    %c720 = arith.constant 720 : index
    %c0_43 = arith.constant 0 : index
    %361 = vector.load %arg5[%c720, %c0_43] : memref<992x512xbf16, #tpu.memory_space<vmem>>, vector<32x128xbf16>
    %362 = arith.truncf %360 : vector<16x32xf32> to vector<16x32xbf16>
    %cst_44 = arith.constant dense<0.000000e+00> : vector<16x128xf32>
    %363 = tpu.matmul %362, %361, %cst_44 {dimension_numbers = #tpu.dot_dimension_numbers<[1], [0], [0], [1], [0, 0, 1, 1], [], []>} : vector<16x32xbf16>, vector<32x128xbf16>, vector<16x128xf32> -> vector<16x128xf32>
    %c0_45 = arith.constant 0 : index
    %c0_46 = arith.constant 0 : index
    %364 = vector.load %arg3[%c0_45, %c0_46] : memref<8x128xf32, #tpu.memory_space<vmem>>, vector<8x128xf32>
    %365 = tpu.concatenate %363, %364 in 0 : vector<16x128xf32>, vector<8x128xf32> -> vector<24x128xf32>
    %c40_47 = arith.constant 40 : index
    %c0_48 = arith.constant 0 : index
    %366 = vector.load %arg6[%c40_47, %c0_48] : memref<176x512xf32, #tpu.memory_space<vmem>>, vector<9x128xf32>
    %367 = vector.extract_strided_slice %365 {offsets = [0, 119], sizes = [24, 9], strides = [1, 1]} : vector<24x128xf32> to vector<24x9xf32>
    %368 = vector.extract_strided_slice %365 {offsets = [0, 0], sizes = [24, 119], strides = [1, 1]} : vector<24x128xf32> to vector<24x119xf32>
    %369 = tpu.concatenate %367, %368 in 1 : vector<24x9xf32>, vector<24x119xf32> -> vector<24x128xf32>
    %370 = vector.extract_strided_slice %366 {offsets = [0, 0], sizes = [1, 128], strides = [1, 1]} : vector<9x128xf32> to vector<1x128xf32>
    %371 = vector.broadcast %370 : vector<1x128xf32> to vector<24x128xf32>
    %372 = arith.mulf %369, %371 : vector<24x128xf32>
    %373 = arith.truncf %372 : vector<24x128xf32> to vector<24x128xbf16>
    %374 = vector.extract_strided_slice %365 {offsets = [0, 120], sizes = [24, 8], strides = [1, 1]} : vector<24x128xf32> to vector<24x8xf32>
    %375 = vector.extract_strided_slice %365 {offsets = [0, 0], sizes = [24, 120], strides = [1, 1]} : vector<24x128xf32> to vector<24x120xf32>
    %376 = tpu.concatenate %374, %375 in 1 : vector<24x8xf32>, vector<24x120xf32> -> vector<24x128xf32>
    %377 = vector.extract_strided_slice %366 {offsets = [1, 0], sizes = [1, 128], strides = [1, 1]} : vector<9x128xf32> to vector<1x128xf32>
    %378 = vector.broadcast %377 : vector<1x128xf32> to vector<24x128xf32>
    %379 = arith.mulf %376, %378 : vector<24x128xf32>
    %380 = arith.truncf %379 : vector<24x128xf32> to vector<24x128xbf16>
    %381 = vector.extract_strided_slice %365 {offsets = [0, 121], sizes = [24, 7], strides = [1, 1]} : vector<24x128xf32> to vector<24x7xf32>
    %382 = vector.extract_strided_slice %365 {offsets = [0, 0], sizes = [24, 121], strides = [1, 1]} : vector<24x128xf32> to vector<24x121xf32>
    %383 = tpu.concatenate %381, %382 in 1 : vector<24x7xf32>, vector<24x121xf32> -> vector<24x128xf32>
    %384 = vector.extract_strided_slice %366 {offsets = [2, 0], sizes = [1, 128], strides = [1, 1]} : vector<9x128xf32> to vector<1x128xf32>
    %385 = vector.broadcast %384 : vector<1x128xf32> to vector<24x128xf32>
    %386 = arith.mulf %383, %385 : vector<24x128xf32>
    %387 = arith.truncf %386 : vector<24x128xf32> to vector<24x128xbf16>
    %388 = vector.extract_strided_slice %365 {offsets = [0, 127], sizes = [24, 1], strides = [1, 1]} : vector<24x128xf32> to vector<24x1xf32>
    %389 = vector.extract_strided_slice %365 {offsets = [0, 0], sizes = [24, 127], strides = [1, 1]} : vector<24x128xf32> to vector<24x127xf32>
    %390 = tpu.concatenate %388, %389 in 1 : vector<24x1xf32>, vector<24x127xf32> -> vector<24x128xf32>
    %391 = vector.extract_strided_slice %366 {offsets = [3, 0], sizes = [1, 128], strides = [1, 1]} : vector<9x128xf32> to vector<1x128xf32>
    %392 = vector.broadcast %391 : vector<1x128xf32> to vector<24x128xf32>
    %393 = arith.mulf %390, %392 : vector<24x128xf32>
    %394 = arith.truncf %393 : vector<24x128xf32> to vector<24x128xbf16>
    %395 = arith.truncf %365 : vector<24x128xf32> to vector<24x128xbf16>
    %396 = vector.extract_strided_slice %365 {offsets = [0, 1], sizes = [24, 127], strides = [1, 1]} : vector<24x128xf32> to vector<24x127xf32>
    %397 = vector.extract_strided_slice %365 {offsets = [0, 0], sizes = [24, 1], strides = [1, 1]} : vector<24x128xf32> to vector<24x1xf32>
    %398 = tpu.concatenate %396, %397 in 1 : vector<24x127xf32>, vector<24x1xf32> -> vector<24x128xf32>
    %399 = vector.extract_strided_slice %366 {offsets = [5, 0], sizes = [1, 128], strides = [1, 1]} : vector<9x128xf32> to vector<1x128xf32>
    %400 = vector.broadcast %399 : vector<1x128xf32> to vector<24x128xf32>
    %401 = arith.mulf %398, %400 : vector<24x128xf32>
    %402 = arith.truncf %401 : vector<24x128xf32> to vector<24x128xbf16>
    %403 = vector.extract_strided_slice %365 {offsets = [0, 7], sizes = [24, 121], strides = [1, 1]} : vector<24x128xf32> to vector<24x121xf32>
    %404 = vector.extract_strided_slice %365 {offsets = [0, 0], sizes = [24, 7], strides = [1, 1]} : vector<24x128xf32> to vector<24x7xf32>
    %405 = tpu.concatenate %403, %404 in 1 : vector<24x121xf32>, vector<24x7xf32> -> vector<24x128xf32>
    %406 = vector.extract_strided_slice %366 {offsets = [6, 0], sizes = [1, 128], strides = [1, 1]} : vector<9x128xf32> to vector<1x128xf32>
    %407 = vector.broadcast %406 : vector<1x128xf32> to vector<24x128xf32>
    %408 = arith.mulf %405, %407 : vector<24x128xf32>
    %409 = arith.truncf %408 : vector<24x128xf32> to vector<24x128xbf16>
    %410 = vector.extract_strided_slice %365 {offsets = [0, 8], sizes = [24, 120], strides = [1, 1]} : vector<24x128xf32> to vector<24x120xf32>
    %411 = vector.extract_strided_slice %365 {offsets = [0, 0], sizes = [24, 8], strides = [1, 1]} : vector<24x128xf32> to vector<24x8xf32>
    %412 = tpu.concatenate %410, %411 in 1 : vector<24x120xf32>, vector<24x8xf32> -> vector<24x128xf32>
    %413 = vector.extract_strided_slice %366 {offsets = [7, 0], sizes = [1, 128], strides = [1, 1]} : vector<9x128xf32> to vector<1x128xf32>
    %414 = vector.broadcast %413 : vector<1x128xf32> to vector<24x128xf32>
    %415 = arith.mulf %412, %414 : vector<24x128xf32>
    %416 = arith.truncf %415 : vector<24x128xf32> to vector<24x128xbf16>
    %417 = vector.extract_strided_slice %365 {offsets = [0, 9], sizes = [24, 119], strides = [1, 1]} : vector<24x128xf32> to vector<24x119xf32>
    %418 = vector.extract_strided_slice %365 {offsets = [0, 0], sizes = [24, 9], strides = [1, 1]} : vector<24x128xf32> to vector<24x9xf32>
    %419 = tpu.concatenate %417, %418 in 1 : vector<24x119xf32>, vector<24x9xf32> -> vector<24x128xf32>
    %420 = vector.extract_strided_slice %366 {offsets = [8, 0], sizes = [1, 128], strides = [1, 1]} : vector<9x128xf32> to vector<1x128xf32>
    %421 = vector.broadcast %420 : vector<1x128xf32> to vector<24x128xf32>
    %422 = arith.mulf %419, %421 : vector<24x128xf32>
    %423 = arith.truncf %422 : vector<24x128xf32> to vector<24x128xbf16>
    %424 = tpu.concatenate %373, %380, %387, %394, %395, %402, %409, %416, %423 in 0 : vector<24x128xbf16>, vector<24x128xbf16>, vector<24x128xbf16>, vector<24x128xbf16>, vector<24x128xbf16>, vector<24x128xbf16>, vector<24x128xbf16>, vector<24x128xbf16>, vector<24x128xbf16> -> vector<216x128xbf16>
    %c752 = arith.constant 752 : index
    %c0_49 = arith.constant 0 : index
    %425 = vector.load %arg5[%c752, %c0_49] : memref<992x512xbf16, #tpu.memory_space<vmem>>, vector<8x216xbf16>
    %c120 = arith.constant 120 : index
    %c0_50 = arith.constant 0 : index
    %426 = vector.load %arg6[%c120, %c0_50] : memref<176x512xf32, #tpu.memory_space<vmem>>, vector<8x1xf32>
    %cst_51 = arith.constant dense<0.000000e+00> : vector<8x128xf32>
    %427 = tpu.matmul %425, %424, %cst_51 {dimension_numbers = #tpu.dot_dimension_numbers<[1], [0], [0], [1], [0, 0, 1, 1], [], []>} : vector<8x216xbf16>, vector<216x128xbf16>, vector<8x128xf32> -> vector<8x128xf32>
    %428 = vector.broadcast %426 : vector<8x1xf32> to vector<8x128xf32>
    %429 = arith.addf %427, %428 : vector<8x128xf32>
    %cst_52 = arith.constant 0.000000e+00 : f32
    %430 = vector.broadcast %cst_52 : f32 to vector<8x128xf32>
    %431 = arith.maximumf %429, %430 : vector<8x128xf32>
    %c40_53 = arith.constant 40 : index
    %c0_54 = arith.constant 0 : index
    %432 = vector.load %arg6[%c40_53, %c0_54] : memref<176x512xf32, #tpu.memory_space<vmem>>, vector<9x128xf32>
    %433 = vector.extract_strided_slice %431 {offsets = [0, 119], sizes = [8, 9], strides = [1, 1]} : vector<8x128xf32> to vector<8x9xf32>
    %434 = vector.extract_strided_slice %431 {offsets = [0, 0], sizes = [8, 119], strides = [1, 1]} : vector<8x128xf32> to vector<8x119xf32>
    %435 = tpu.concatenate %433, %434 in 1 : vector<8x9xf32>, vector<8x119xf32> -> vector<8x128xf32>
    %436 = vector.extract_strided_slice %432 {offsets = [0, 0], sizes = [1, 128], strides = [1, 1]} : vector<9x128xf32> to vector<1x128xf32>
    %437 = vector.broadcast %436 : vector<1x128xf32> to vector<8x128xf32>
    %438 = arith.mulf %435, %437 : vector<8x128xf32>
    %439 = arith.truncf %438 : vector<8x128xf32> to vector<8x128xbf16>
    %440 = vector.extract_strided_slice %431 {offsets = [0, 120], sizes = [8, 8], strides = [1, 1]} : vector<8x128xf32> to vector<8x8xf32>
    %441 = vector.extract_strided_slice %431 {offsets = [0, 0], sizes = [8, 120], strides = [1, 1]} : vector<8x128xf32> to vector<8x120xf32>
    %442 = tpu.concatenate %440, %441 in 1 : vector<8x8xf32>, vector<8x120xf32> -> vector<8x128xf32>
    %443 = vector.extract_strided_slice %432 {offsets = [1, 0], sizes = [1, 128], strides = [1, 1]} : vector<9x128xf32> to vector<1x128xf32>
    %444 = vector.broadcast %443 : vector<1x128xf32> to vector<8x128xf32>
    %445 = arith.mulf %442, %444 : vector<8x128xf32>
    %446 = arith.truncf %445 : vector<8x128xf32> to vector<8x128xbf16>
    %447 = vector.extract_strided_slice %431 {offsets = [0, 121], sizes = [8, 7], strides = [1, 1]} : vector<8x128xf32> to vector<8x7xf32>
    %448 = vector.extract_strided_slice %431 {offsets = [0, 0], sizes = [8, 121], strides = [1, 1]} : vector<8x128xf32> to vector<8x121xf32>
    %449 = tpu.concatenate %447, %448 in 1 : vector<8x7xf32>, vector<8x121xf32> -> vector<8x128xf32>
    %450 = vector.extract_strided_slice %432 {offsets = [2, 0], sizes = [1, 128], strides = [1, 1]} : vector<9x128xf32> to vector<1x128xf32>
    %451 = vector.broadcast %450 : vector<1x128xf32> to vector<8x128xf32>
    %452 = arith.mulf %449, %451 : vector<8x128xf32>
    %453 = arith.truncf %452 : vector<8x128xf32> to vector<8x128xbf16>
    %454 = vector.extract_strided_slice %431 {offsets = [0, 127], sizes = [8, 1], strides = [1, 1]} : vector<8x128xf32> to vector<8x1xf32>
    %455 = vector.extract_strided_slice %431 {offsets = [0, 0], sizes = [8, 127], strides = [1, 1]} : vector<8x128xf32> to vector<8x127xf32>
    %456 = tpu.concatenate %454, %455 in 1 : vector<8x1xf32>, vector<8x127xf32> -> vector<8x128xf32>
    %457 = vector.extract_strided_slice %432 {offsets = [3, 0], sizes = [1, 128], strides = [1, 1]} : vector<9x128xf32> to vector<1x128xf32>
    %458 = vector.broadcast %457 : vector<1x128xf32> to vector<8x128xf32>
    %459 = arith.mulf %456, %458 : vector<8x128xf32>
    %460 = arith.truncf %459 : vector<8x128xf32> to vector<8x128xbf16>
    %461 = arith.truncf %431 : vector<8x128xf32> to vector<8x128xbf16>
    %462 = vector.extract_strided_slice %431 {offsets = [0, 1], sizes = [8, 127], strides = [1, 1]} : vector<8x128xf32> to vector<8x127xf32>
    %463 = vector.extract_strided_slice %431 {offsets = [0, 0], sizes = [8, 1], strides = [1, 1]} : vector<8x128xf32> to vector<8x1xf32>
    %464 = tpu.concatenate %462, %463 in 1 : vector<8x127xf32>, vector<8x1xf32> -> vector<8x128xf32>
    %465 = vector.extract_strided_slice %432 {offsets = [5, 0], sizes = [1, 128], strides = [1, 1]} : vector<9x128xf32> to vector<1x128xf32>
    %466 = vector.broadcast %465 : vector<1x128xf32> to vector<8x128xf32>
    %467 = arith.mulf %464, %466 : vector<8x128xf32>
    %468 = arith.truncf %467 : vector<8x128xf32> to vector<8x128xbf16>
    %469 = vector.extract_strided_slice %431 {offsets = [0, 7], sizes = [8, 121], strides = [1, 1]} : vector<8x128xf32> to vector<8x121xf32>
    %470 = vector.extract_strided_slice %431 {offsets = [0, 0], sizes = [8, 7], strides = [1, 1]} : vector<8x128xf32> to vector<8x7xf32>
    %471 = tpu.concatenate %469, %470 in 1 : vector<8x121xf32>, vector<8x7xf32> -> vector<8x128xf32>
    %472 = vector.extract_strided_slice %432 {offsets = [6, 0], sizes = [1, 128], strides = [1, 1]} : vector<9x128xf32> to vector<1x128xf32>
    %473 = vector.broadcast %472 : vector<1x128xf32> to vector<8x128xf32>
    %474 = arith.mulf %471, %473 : vector<8x128xf32>
    %475 = arith.truncf %474 : vector<8x128xf32> to vector<8x128xbf16>
    %476 = vector.extract_strided_slice %431 {offsets = [0, 8], sizes = [8, 120], strides = [1, 1]} : vector<8x128xf32> to vector<8x120xf32>
    %477 = vector.extract_strided_slice %431 {offsets = [0, 0], sizes = [8, 8], strides = [1, 1]} : vector<8x128xf32> to vector<8x8xf32>
    %478 = tpu.concatenate %476, %477 in 1 : vector<8x120xf32>, vector<8x8xf32> -> vector<8x128xf32>
    %479 = vector.extract_strided_slice %432 {offsets = [7, 0], sizes = [1, 128], strides = [1, 1]} : vector<9x128xf32> to vector<1x128xf32>
    %480 = vector.broadcast %479 : vector<1x128xf32> to vector<8x128xf32>
    %481 = arith.mulf %478, %480 : vector<8x128xf32>
    %482 = arith.truncf %481 : vector<8x128xf32> to vector<8x128xbf16>
    %483 = vector.extract_strided_slice %431 {offsets = [0, 9], sizes = [8, 119], strides = [1, 1]} : vector<8x128xf32> to vector<8x119xf32>
    %484 = vector.extract_strided_slice %431 {offsets = [0, 0], sizes = [8, 9], strides = [1, 1]} : vector<8x128xf32> to vector<8x9xf32>
    %485 = tpu.concatenate %483, %484 in 1 : vector<8x119xf32>, vector<8x9xf32> -> vector<8x128xf32>
    %486 = vector.extract_strided_slice %432 {offsets = [8, 0], sizes = [1, 128], strides = [1, 1]} : vector<9x128xf32> to vector<1x128xf32>
    %487 = vector.broadcast %486 : vector<1x128xf32> to vector<8x128xf32>
    %488 = arith.mulf %485, %487 : vector<8x128xf32>
    %489 = arith.truncf %488 : vector<8x128xf32> to vector<8x128xbf16>
    %490 = tpu.concatenate %439, %446, %453, %460, %461, %468, %475, %482, %489 in 0 : vector<8x128xbf16>, vector<8x128xbf16>, vector<8x128xbf16>, vector<8x128xbf16>, vector<8x128xbf16>, vector<8x128xbf16>, vector<8x128xbf16>, vector<8x128xbf16>, vector<8x128xbf16> -> vector<72x128xbf16>
    %c768 = arith.constant 768 : index
    %c0_55 = arith.constant 0 : index
    %491 = vector.load %arg5[%c768, %c0_55] : memref<992x512xbf16, #tpu.memory_space<vmem>>, vector<8x72xbf16>
    %c128 = arith.constant 128 : index
    %c0_56 = arith.constant 0 : index
    %492 = vector.load %arg6[%c128, %c0_56] : memref<176x512xf32, #tpu.memory_space<vmem>>, vector<8x1xf32>
    %cst_57 = arith.constant dense<0.000000e+00> : vector<8x128xf32>
    %493 = tpu.matmul %491, %490, %cst_57 {dimension_numbers = #tpu.dot_dimension_numbers<[1], [0], [0], [1], [0, 0, 1, 1], [], []>} : vector<8x72xbf16>, vector<72x128xbf16>, vector<8x128xf32> -> vector<8x128xf32>
    %494 = vector.broadcast %492 : vector<8x1xf32> to vector<8x128xf32>
    %495 = arith.addf %493, %494 : vector<8x128xf32>
    %cst_58 = arith.constant 0.000000e+00 : f32
    %496 = vector.broadcast %cst_58 : f32 to vector<8x128xf32>
    %497 = arith.maximumf %495, %496 : vector<8x128xf32>
    %c784 = arith.constant 784 : index
    %c0_59 = arith.constant 0 : index
    %498 = vector.load %arg5[%c784, %c0_59] : memref<992x512xbf16, #tpu.memory_space<vmem>>, vector<128x512xbf16>
    %499 = arith.truncf %497 : vector<8x128xf32> to vector<8x128xbf16>
    %cst_60 = arith.constant dense<0.000000e+00> : vector<8x512xf32>
    %500 = tpu.matmul %499, %498, %cst_60 {dimension_numbers = #tpu.dot_dimension_numbers<[1], [0], [0], [1], [0, 0, 1, 1], [], []>} : vector<8x128xbf16>, vector<128x512xbf16>, vector<8x512xf32> -> vector<8x512xf32>
    %c0_61 = arith.constant 0 : index
    %c0_62 = arith.constant 0 : index
    %501 = vector.load %arg4[%c0_61, %c0_62] : memref<8x512xf32, #tpu.memory_space<vmem>>, vector<8x512xf32>
    %502 = tpu.concatenate %500, %501 in 0 : vector<8x512xf32>, vector<8x512xf32> -> vector<16x512xf32>
    %c8_63 = arith.constant 8 : index
    %c0_64 = arith.constant 0 : index
    %503 = vector.load %arg6[%c8_63, %c0_64] : memref<176x512xf32, #tpu.memory_space<vmem>>, vector<9x512xf32>
    %504 = vector.extract_strided_slice %502 {offsets = [0, 495], sizes = [16, 17], strides = [1, 1]} : vector<16x512xf32> to vector<16x17xf32>
    %505 = vector.extract_strided_slice %502 {offsets = [0, 0], sizes = [16, 495], strides = [1, 1]} : vector<16x512xf32> to vector<16x495xf32>
    %506 = tpu.concatenate %504, %505 in 1 : vector<16x17xf32>, vector<16x495xf32> -> vector<16x512xf32>
    %507 = vector.extract_strided_slice %503 {offsets = [0, 0], sizes = [1, 512], strides = [1, 1]} : vector<9x512xf32> to vector<1x512xf32>
    %508 = vector.broadcast %507 : vector<1x512xf32> to vector<16x512xf32>
    %509 = arith.mulf %506, %508 : vector<16x512xf32>
    %510 = arith.truncf %509 : vector<16x512xf32> to vector<16x512xbf16>
    %511 = vector.extract_strided_slice %502 {offsets = [0, 496], sizes = [16, 16], strides = [1, 1]} : vector<16x512xf32> to vector<16x16xf32>
    %512 = vector.extract_strided_slice %502 {offsets = [0, 0], sizes = [16, 496], strides = [1, 1]} : vector<16x512xf32> to vector<16x496xf32>
    %513 = tpu.concatenate %511, %512 in 1 : vector<16x16xf32>, vector<16x496xf32> -> vector<16x512xf32>
    %514 = vector.extract_strided_slice %503 {offsets = [1, 0], sizes = [1, 512], strides = [1, 1]} : vector<9x512xf32> to vector<1x512xf32>
    %515 = vector.broadcast %514 : vector<1x512xf32> to vector<16x512xf32>
    %516 = arith.mulf %513, %515 : vector<16x512xf32>
    %517 = arith.truncf %516 : vector<16x512xf32> to vector<16x512xbf16>
    %518 = vector.extract_strided_slice %502 {offsets = [0, 497], sizes = [16, 15], strides = [1, 1]} : vector<16x512xf32> to vector<16x15xf32>
    %519 = vector.extract_strided_slice %502 {offsets = [0, 0], sizes = [16, 497], strides = [1, 1]} : vector<16x512xf32> to vector<16x497xf32>
    %520 = tpu.concatenate %518, %519 in 1 : vector<16x15xf32>, vector<16x497xf32> -> vector<16x512xf32>
    %521 = vector.extract_strided_slice %503 {offsets = [2, 0], sizes = [1, 512], strides = [1, 1]} : vector<9x512xf32> to vector<1x512xf32>
    %522 = vector.broadcast %521 : vector<1x512xf32> to vector<16x512xf32>
    %523 = arith.mulf %520, %522 : vector<16x512xf32>
    %524 = arith.truncf %523 : vector<16x512xf32> to vector<16x512xbf16>
    %525 = vector.extract_strided_slice %502 {offsets = [0, 511], sizes = [16, 1], strides = [1, 1]} : vector<16x512xf32> to vector<16x1xf32>
    %526 = vector.extract_strided_slice %502 {offsets = [0, 0], sizes = [16, 511], strides = [1, 1]} : vector<16x512xf32> to vector<16x511xf32>
    %527 = tpu.concatenate %525, %526 in 1 : vector<16x1xf32>, vector<16x511xf32> -> vector<16x512xf32>
    %528 = vector.extract_strided_slice %503 {offsets = [3, 0], sizes = [1, 512], strides = [1, 1]} : vector<9x512xf32> to vector<1x512xf32>
    %529 = vector.broadcast %528 : vector<1x512xf32> to vector<16x512xf32>
    %530 = arith.mulf %527, %529 : vector<16x512xf32>
    %531 = arith.truncf %530 : vector<16x512xf32> to vector<16x512xbf16>
    %532 = arith.truncf %502 : vector<16x512xf32> to vector<16x512xbf16>
    %533 = vector.extract_strided_slice %502 {offsets = [0, 1], sizes = [16, 511], strides = [1, 1]} : vector<16x512xf32> to vector<16x511xf32>
    %534 = vector.extract_strided_slice %502 {offsets = [0, 0], sizes = [16, 1], strides = [1, 1]} : vector<16x512xf32> to vector<16x1xf32>
    %535 = tpu.concatenate %533, %534 in 1 : vector<16x511xf32>, vector<16x1xf32> -> vector<16x512xf32>
    %536 = vector.extract_strided_slice %503 {offsets = [5, 0], sizes = [1, 512], strides = [1, 1]} : vector<9x512xf32> to vector<1x512xf32>
    %537 = vector.broadcast %536 : vector<1x512xf32> to vector<16x512xf32>
    %538 = arith.mulf %535, %537 : vector<16x512xf32>
    %539 = arith.truncf %538 : vector<16x512xf32> to vector<16x512xbf16>
    %540 = vector.extract_strided_slice %502 {offsets = [0, 15], sizes = [16, 497], strides = [1, 1]} : vector<16x512xf32> to vector<16x497xf32>
    %541 = vector.extract_strided_slice %502 {offsets = [0, 0], sizes = [16, 15], strides = [1, 1]} : vector<16x512xf32> to vector<16x15xf32>
    %542 = tpu.concatenate %540, %541 in 1 : vector<16x497xf32>, vector<16x15xf32> -> vector<16x512xf32>
    %543 = vector.extract_strided_slice %503 {offsets = [6, 0], sizes = [1, 512], strides = [1, 1]} : vector<9x512xf32> to vector<1x512xf32>
    %544 = vector.broadcast %543 : vector<1x512xf32> to vector<16x512xf32>
    %545 = arith.mulf %542, %544 : vector<16x512xf32>
    %546 = arith.truncf %545 : vector<16x512xf32> to vector<16x512xbf16>
    %547 = vector.extract_strided_slice %502 {offsets = [0, 16], sizes = [16, 496], strides = [1, 1]} : vector<16x512xf32> to vector<16x496xf32>
    %548 = vector.extract_strided_slice %502 {offsets = [0, 0], sizes = [16, 16], strides = [1, 1]} : vector<16x512xf32> to vector<16x16xf32>
    %549 = tpu.concatenate %547, %548 in 1 : vector<16x496xf32>, vector<16x16xf32> -> vector<16x512xf32>
    %550 = vector.extract_strided_slice %503 {offsets = [7, 0], sizes = [1, 512], strides = [1, 1]} : vector<9x512xf32> to vector<1x512xf32>
    %551 = vector.broadcast %550 : vector<1x512xf32> to vector<16x512xf32>
    %552 = arith.mulf %549, %551 : vector<16x512xf32>
    %553 = arith.truncf %552 : vector<16x512xf32> to vector<16x512xbf16>
    %554 = vector.extract_strided_slice %502 {offsets = [0, 17], sizes = [16, 495], strides = [1, 1]} : vector<16x512xf32> to vector<16x495xf32>
    %555 = vector.extract_strided_slice %502 {offsets = [0, 0], sizes = [16, 17], strides = [1, 1]} : vector<16x512xf32> to vector<16x17xf32>
    %556 = tpu.concatenate %554, %555 in 1 : vector<16x495xf32>, vector<16x17xf32> -> vector<16x512xf32>
    %557 = vector.extract_strided_slice %503 {offsets = [8, 0], sizes = [1, 512], strides = [1, 1]} : vector<9x512xf32> to vector<1x512xf32>
    %558 = vector.broadcast %557 : vector<1x512xf32> to vector<16x512xf32>
    %559 = arith.mulf %556, %558 : vector<16x512xf32>
    %560 = arith.truncf %559 : vector<16x512xf32> to vector<16x512xbf16>
    %561 = tpu.concatenate %510, %517, %524, %531, %532, %539, %546, %553, %560 in 0 : vector<16x512xbf16>, vector<16x512xbf16>, vector<16x512xbf16>, vector<16x512xbf16>, vector<16x512xbf16>, vector<16x512xbf16>, vector<16x512xbf16>, vector<16x512xbf16>, vector<16x512xbf16> -> vector<144x512xbf16>
    %c912 = arith.constant 912 : index
    %c0_65 = arith.constant 0 : index
    %562 = vector.load %arg5[%c912, %c0_65] : memref<992x512xbf16, #tpu.memory_space<vmem>>, vector<8x144xbf16>
    %c136 = arith.constant 136 : index
    %c0_66 = arith.constant 0 : index
    %563 = vector.load %arg6[%c136, %c0_66] : memref<176x512xf32, #tpu.memory_space<vmem>>, vector<8x1xf32>
    %cst_67 = arith.constant dense<0.000000e+00> : vector<8x512xf32>
    %564 = tpu.matmul %562, %561, %cst_67 {dimension_numbers = #tpu.dot_dimension_numbers<[1], [0], [0], [1], [0, 0, 1, 1], [], []>} : vector<8x144xbf16>, vector<144x512xbf16>, vector<8x512xf32> -> vector<8x512xf32>
    %565 = vector.broadcast %563 : vector<8x1xf32> to vector<8x512xf32>
    %566 = arith.addf %564, %565 : vector<8x512xf32>
    %cst_68 = arith.constant 0.000000e+00 : f32
    %567 = vector.broadcast %cst_68 : f32 to vector<8x512xf32>
    %568 = arith.maximumf %566, %567 : vector<8x512xf32>
    %c8_69 = arith.constant 8 : index
    %c0_70 = arith.constant 0 : index
    %569 = vector.load %arg6[%c8_69, %c0_70] : memref<176x512xf32, #tpu.memory_space<vmem>>, vector<9x512xf32>
    %570 = vector.extract_strided_slice %568 {offsets = [0, 495], sizes = [8, 17], strides = [1, 1]} : vector<8x512xf32> to vector<8x17xf32>
    %571 = vector.extract_strided_slice %568 {offsets = [0, 0], sizes = [8, 495], strides = [1, 1]} : vector<8x512xf32> to vector<8x495xf32>
    %572 = tpu.concatenate %570, %571 in 1 : vector<8x17xf32>, vector<8x495xf32> -> vector<8x512xf32>
    %573 = vector.extract_strided_slice %569 {offsets = [0, 0], sizes = [1, 512], strides = [1, 1]} : vector<9x512xf32> to vector<1x512xf32>
    %574 = vector.broadcast %573 : vector<1x512xf32> to vector<8x512xf32>
    %575 = arith.mulf %572, %574 : vector<8x512xf32>
    %576 = arith.truncf %575 : vector<8x512xf32> to vector<8x512xbf16>
    %577 = vector.extract_strided_slice %568 {offsets = [0, 496], sizes = [8, 16], strides = [1, 1]} : vector<8x512xf32> to vector<8x16xf32>
    %578 = vector.extract_strided_slice %568 {offsets = [0, 0], sizes = [8, 496], strides = [1, 1]} : vector<8x512xf32> to vector<8x496xf32>
    %579 = tpu.concatenate %577, %578 in 1 : vector<8x16xf32>, vector<8x496xf32> -> vector<8x512xf32>
    %580 = vector.extract_strided_slice %569 {offsets = [1, 0], sizes = [1, 512], strides = [1, 1]} : vector<9x512xf32> to vector<1x512xf32>
    %581 = vector.broadcast %580 : vector<1x512xf32> to vector<8x512xf32>
    %582 = arith.mulf %579, %581 : vector<8x512xf32>
    %583 = arith.truncf %582 : vector<8x512xf32> to vector<8x512xbf16>
    %584 = vector.extract_strided_slice %568 {offsets = [0, 497], sizes = [8, 15], strides = [1, 1]} : vector<8x512xf32> to vector<8x15xf32>
    %585 = vector.extract_strided_slice %568 {offsets = [0, 0], sizes = [8, 497], strides = [1, 1]} : vector<8x512xf32> to vector<8x497xf32>
    %586 = tpu.concatenate %584, %585 in 1 : vector<8x15xf32>, vector<8x497xf32> -> vector<8x512xf32>
    %587 = vector.extract_strided_slice %569 {offsets = [2, 0], sizes = [1, 512], strides = [1, 1]} : vector<9x512xf32> to vector<1x512xf32>
    %588 = vector.broadcast %587 : vector<1x512xf32> to vector<8x512xf32>
    %589 = arith.mulf %586, %588 : vector<8x512xf32>
    %590 = arith.truncf %589 : vector<8x512xf32> to vector<8x512xbf16>
    %591 = vector.extract_strided_slice %568 {offsets = [0, 511], sizes = [8, 1], strides = [1, 1]} : vector<8x512xf32> to vector<8x1xf32>
    %592 = vector.extract_strided_slice %568 {offsets = [0, 0], sizes = [8, 511], strides = [1, 1]} : vector<8x512xf32> to vector<8x511xf32>
    %593 = tpu.concatenate %591, %592 in 1 : vector<8x1xf32>, vector<8x511xf32> -> vector<8x512xf32>
    %594 = vector.extract_strided_slice %569 {offsets = [3, 0], sizes = [1, 512], strides = [1, 1]} : vector<9x512xf32> to vector<1x512xf32>
    %595 = vector.broadcast %594 : vector<1x512xf32> to vector<8x512xf32>
    %596 = arith.mulf %593, %595 : vector<8x512xf32>
    %597 = arith.truncf %596 : vector<8x512xf32> to vector<8x512xbf16>
    %598 = arith.truncf %568 : vector<8x512xf32> to vector<8x512xbf16>
    %599 = vector.extract_strided_slice %568 {offsets = [0, 1], sizes = [8, 511], strides = [1, 1]} : vector<8x512xf32> to vector<8x511xf32>
    %600 = vector.extract_strided_slice %568 {offsets = [0, 0], sizes = [8, 1], strides = [1, 1]} : vector<8x512xf32> to vector<8x1xf32>
    %601 = tpu.concatenate %599, %600 in 1 : vector<8x511xf32>, vector<8x1xf32> -> vector<8x512xf32>
    %602 = vector.extract_strided_slice %569 {offsets = [5, 0], sizes = [1, 512], strides = [1, 1]} : vector<9x512xf32> to vector<1x512xf32>
    %603 = vector.broadcast %602 : vector<1x512xf32> to vector<8x512xf32>
    %604 = arith.mulf %601, %603 : vector<8x512xf32>
    %605 = arith.truncf %604 : vector<8x512xf32> to vector<8x512xbf16>
    %606 = vector.extract_strided_slice %568 {offsets = [0, 15], sizes = [8, 497], strides = [1, 1]} : vector<8x512xf32> to vector<8x497xf32>
    %607 = vector.extract_strided_slice %568 {offsets = [0, 0], sizes = [8, 15], strides = [1, 1]} : vector<8x512xf32> to vector<8x15xf32>
    %608 = tpu.concatenate %606, %607 in 1 : vector<8x497xf32>, vector<8x15xf32> -> vector<8x512xf32>
    %609 = vector.extract_strided_slice %569 {offsets = [6, 0], sizes = [1, 512], strides = [1, 1]} : vector<9x512xf32> to vector<1x512xf32>
    %610 = vector.broadcast %609 : vector<1x512xf32> to vector<8x512xf32>
    %611 = arith.mulf %608, %610 : vector<8x512xf32>
    %612 = arith.truncf %611 : vector<8x512xf32> to vector<8x512xbf16>
    %613 = vector.extract_strided_slice %568 {offsets = [0, 16], sizes = [8, 496], strides = [1, 1]} : vector<8x512xf32> to vector<8x496xf32>
    %614 = vector.extract_strided_slice %568 {offsets = [0, 0], sizes = [8, 16], strides = [1, 1]} : vector<8x512xf32> to vector<8x16xf32>
    %615 = tpu.concatenate %613, %614 in 1 : vector<8x496xf32>, vector<8x16xf32> -> vector<8x512xf32>
    %616 = vector.extract_strided_slice %569 {offsets = [7, 0], sizes = [1, 512], strides = [1, 1]} : vector<9x512xf32> to vector<1x512xf32>
    %617 = vector.broadcast %616 : vector<1x512xf32> to vector<8x512xf32>
    %618 = arith.mulf %615, %617 : vector<8x512xf32>
    %619 = arith.truncf %618 : vector<8x512xf32> to vector<8x512xbf16>
    %620 = vector.extract_strided_slice %568 {offsets = [0, 17], sizes = [8, 495], strides = [1, 1]} : vector<8x512xf32> to vector<8x495xf32>
    %621 = vector.extract_strided_slice %568 {offsets = [0, 0], sizes = [8, 17], strides = [1, 1]} : vector<8x512xf32> to vector<8x17xf32>
    %622 = tpu.concatenate %620, %621 in 1 : vector<8x495xf32>, vector<8x17xf32> -> vector<8x512xf32>
    %623 = vector.extract_strided_slice %569 {offsets = [8, 0], sizes = [1, 512], strides = [1, 1]} : vector<9x512xf32> to vector<1x512xf32>
    %624 = vector.broadcast %623 : vector<1x512xf32> to vector<8x512xf32>
    %625 = arith.mulf %622, %624 : vector<8x512xf32>
    %626 = arith.truncf %625 : vector<8x512xf32> to vector<8x512xbf16>
    %627 = tpu.concatenate %576, %583, %590, %597, %598, %605, %612, %619, %626 in 0 : vector<8x512xbf16>, vector<8x512xbf16>, vector<8x512xbf16>, vector<8x512xbf16>, vector<8x512xbf16>, vector<8x512xbf16>, vector<8x512xbf16>, vector<8x512xbf16>, vector<8x512xbf16> -> vector<72x512xbf16>
    %c928 = arith.constant 928 : index
    %c0_71 = arith.constant 0 : index
    %628 = vector.load %arg5[%c928, %c0_71] : memref<992x512xbf16, #tpu.memory_space<vmem>>, vector<8x72xbf16>
    %c144 = arith.constant 144 : index
    %c0_72 = arith.constant 0 : index
    %629 = vector.load %arg6[%c144, %c0_72] : memref<176x512xf32, #tpu.memory_space<vmem>>, vector<8x1xf32>
    %cst_73 = arith.constant dense<0.000000e+00> : vector<8x512xf32>
    %630 = tpu.matmul %628, %627, %cst_73 {dimension_numbers = #tpu.dot_dimension_numbers<[1], [0], [0], [1], [0, 0, 1, 1], [], []>} : vector<8x72xbf16>, vector<72x512xbf16>, vector<8x512xf32> -> vector<8x512xf32>
    %631 = vector.broadcast %629 : vector<8x1xf32> to vector<8x512xf32>
    %632 = arith.addf %630, %631 : vector<8x512xf32>
    %cst_74 = arith.constant 0.000000e+00 : f32
    %633 = vector.broadcast %cst_74 : f32 to vector<8x512xf32>
    %634 = arith.maximumf %632, %633 : vector<8x512xf32>
    %c8_75 = arith.constant 8 : index
    %c0_76 = arith.constant 0 : index
    %635 = vector.load %arg6[%c8_75, %c0_76] : memref<176x512xf32, #tpu.memory_space<vmem>>, vector<9x512xf32>
    %636 = vector.extract_strided_slice %634 {offsets = [0, 495], sizes = [8, 17], strides = [1, 1]} : vector<8x512xf32> to vector<8x17xf32>
    %637 = vector.extract_strided_slice %634 {offsets = [0, 0], sizes = [8, 495], strides = [1, 1]} : vector<8x512xf32> to vector<8x495xf32>
    %638 = tpu.concatenate %636, %637 in 1 : vector<8x17xf32>, vector<8x495xf32> -> vector<8x512xf32>
    %639 = vector.extract_strided_slice %635 {offsets = [0, 0], sizes = [1, 512], strides = [1, 1]} : vector<9x512xf32> to vector<1x512xf32>
    %640 = vector.broadcast %639 : vector<1x512xf32> to vector<8x512xf32>
    %641 = arith.mulf %638, %640 : vector<8x512xf32>
    %642 = arith.truncf %641 : vector<8x512xf32> to vector<8x512xbf16>
    %643 = vector.extract_strided_slice %634 {offsets = [0, 496], sizes = [8, 16], strides = [1, 1]} : vector<8x512xf32> to vector<8x16xf32>
    %644 = vector.extract_strided_slice %634 {offsets = [0, 0], sizes = [8, 496], strides = [1, 1]} : vector<8x512xf32> to vector<8x496xf32>
    %645 = tpu.concatenate %643, %644 in 1 : vector<8x16xf32>, vector<8x496xf32> -> vector<8x512xf32>
    %646 = vector.extract_strided_slice %635 {offsets = [1, 0], sizes = [1, 512], strides = [1, 1]} : vector<9x512xf32> to vector<1x512xf32>
    %647 = vector.broadcast %646 : vector<1x512xf32> to vector<8x512xf32>
    %648 = arith.mulf %645, %647 : vector<8x512xf32>
    %649 = arith.truncf %648 : vector<8x512xf32> to vector<8x512xbf16>
    %650 = vector.extract_strided_slice %634 {offsets = [0, 497], sizes = [8, 15], strides = [1, 1]} : vector<8x512xf32> to vector<8x15xf32>
    %651 = vector.extract_strided_slice %634 {offsets = [0, 0], sizes = [8, 497], strides = [1, 1]} : vector<8x512xf32> to vector<8x497xf32>
    %652 = tpu.concatenate %650, %651 in 1 : vector<8x15xf32>, vector<8x497xf32> -> vector<8x512xf32>
    %653 = vector.extract_strided_slice %635 {offsets = [2, 0], sizes = [1, 512], strides = [1, 1]} : vector<9x512xf32> to vector<1x512xf32>
    %654 = vector.broadcast %653 : vector<1x512xf32> to vector<8x512xf32>
    %655 = arith.mulf %652, %654 : vector<8x512xf32>
    %656 = arith.truncf %655 : vector<8x512xf32> to vector<8x512xbf16>
    %657 = vector.extract_strided_slice %634 {offsets = [0, 511], sizes = [8, 1], strides = [1, 1]} : vector<8x512xf32> to vector<8x1xf32>
    %658 = vector.extract_strided_slice %634 {offsets = [0, 0], sizes = [8, 511], strides = [1, 1]} : vector<8x512xf32> to vector<8x511xf32>
    %659 = tpu.concatenate %657, %658 in 1 : vector<8x1xf32>, vector<8x511xf32> -> vector<8x512xf32>
    %660 = vector.extract_strided_slice %635 {offsets = [3, 0], sizes = [1, 512], strides = [1, 1]} : vector<9x512xf32> to vector<1x512xf32>
    %661 = vector.broadcast %660 : vector<1x512xf32> to vector<8x512xf32>
    %662 = arith.mulf %659, %661 : vector<8x512xf32>
    %663 = arith.truncf %662 : vector<8x512xf32> to vector<8x512xbf16>
    %664 = arith.truncf %634 : vector<8x512xf32> to vector<8x512xbf16>
    %665 = vector.extract_strided_slice %634 {offsets = [0, 1], sizes = [8, 511], strides = [1, 1]} : vector<8x512xf32> to vector<8x511xf32>
    %666 = vector.extract_strided_slice %634 {offsets = [0, 0], sizes = [8, 1], strides = [1, 1]} : vector<8x512xf32> to vector<8x1xf32>
    %667 = tpu.concatenate %665, %666 in 1 : vector<8x511xf32>, vector<8x1xf32> -> vector<8x512xf32>
    %668 = vector.extract_strided_slice %635 {offsets = [5, 0], sizes = [1, 512], strides = [1, 1]} : vector<9x512xf32> to vector<1x512xf32>
    %669 = vector.broadcast %668 : vector<1x512xf32> to vector<8x512xf32>
    %670 = arith.mulf %667, %669 : vector<8x512xf32>
    %671 = arith.truncf %670 : vector<8x512xf32> to vector<8x512xbf16>
    %672 = vector.extract_strided_slice %634 {offsets = [0, 15], sizes = [8, 497], strides = [1, 1]} : vector<8x512xf32> to vector<8x497xf32>
    %673 = vector.extract_strided_slice %634 {offsets = [0, 0], sizes = [8, 15], strides = [1, 1]} : vector<8x512xf32> to vector<8x15xf32>
    %674 = tpu.concatenate %672, %673 in 1 : vector<8x497xf32>, vector<8x15xf32> -> vector<8x512xf32>
    %675 = vector.extract_strided_slice %635 {offsets = [6, 0], sizes = [1, 512], strides = [1, 1]} : vector<9x512xf32> to vector<1x512xf32>
    %676 = vector.broadcast %675 : vector<1x512xf32> to vector<8x512xf32>
    %677 = arith.mulf %674, %676 : vector<8x512xf32>
    %678 = arith.truncf %677 : vector<8x512xf32> to vector<8x512xbf16>
    %679 = vector.extract_strided_slice %634 {offsets = [0, 16], sizes = [8, 496], strides = [1, 1]} : vector<8x512xf32> to vector<8x496xf32>
    %680 = vector.extract_strided_slice %634 {offsets = [0, 0], sizes = [8, 16], strides = [1, 1]} : vector<8x512xf32> to vector<8x16xf32>
    %681 = tpu.concatenate %679, %680 in 1 : vector<8x496xf32>, vector<8x16xf32> -> vector<8x512xf32>
    %682 = vector.extract_strided_slice %635 {offsets = [7, 0], sizes = [1, 512], strides = [1, 1]} : vector<9x512xf32> to vector<1x512xf32>
    %683 = vector.broadcast %682 : vector<1x512xf32> to vector<8x512xf32>
    %684 = arith.mulf %681, %683 : vector<8x512xf32>
    %685 = arith.truncf %684 : vector<8x512xf32> to vector<8x512xbf16>
    %686 = vector.extract_strided_slice %634 {offsets = [0, 17], sizes = [8, 495], strides = [1, 1]} : vector<8x512xf32> to vector<8x495xf32>
    %687 = vector.extract_strided_slice %634 {offsets = [0, 0], sizes = [8, 17], strides = [1, 1]} : vector<8x512xf32> to vector<8x17xf32>
    %688 = tpu.concatenate %686, %687 in 1 : vector<8x495xf32>, vector<8x17xf32> -> vector<8x512xf32>
    %689 = vector.extract_strided_slice %635 {offsets = [8, 0], sizes = [1, 512], strides = [1, 1]} : vector<9x512xf32> to vector<1x512xf32>
    %690 = vector.broadcast %689 : vector<1x512xf32> to vector<8x512xf32>
    %691 = arith.mulf %688, %690 : vector<8x512xf32>
    %692 = arith.truncf %691 : vector<8x512xf32> to vector<8x512xbf16>
    %693 = tpu.concatenate %642, %649, %656, %663, %664, %671, %678, %685, %692 in 0 : vector<8x512xbf16>, vector<8x512xbf16>, vector<8x512xbf16>, vector<8x512xbf16>, vector<8x512xbf16>, vector<8x512xbf16>, vector<8x512xbf16>, vector<8x512xbf16>, vector<8x512xbf16> -> vector<72x512xbf16>
    %c944 = arith.constant 944 : index
    %c0_77 = arith.constant 0 : index
    %694 = vector.load %arg5[%c944, %c0_77] : memref<992x512xbf16, #tpu.memory_space<vmem>>, vector<8x72xbf16>
    %c152 = arith.constant 152 : index
    %c0_78 = arith.constant 0 : index
    %695 = vector.load %arg6[%c152, %c0_78] : memref<176x512xf32, #tpu.memory_space<vmem>>, vector<8x1xf32>
    %cst_79 = arith.constant dense<0.000000e+00> : vector<8x512xf32>
    %696 = tpu.matmul %694, %693, %cst_79 {dimension_numbers = #tpu.dot_dimension_numbers<[1], [0], [0], [1], [0, 0, 1, 1], [], []>} : vector<8x72xbf16>, vector<72x512xbf16>, vector<8x512xf32> -> vector<8x512xf32>
    %697 = vector.broadcast %695 : vector<8x1xf32> to vector<8x512xf32>
    %698 = arith.addf %696, %697 : vector<8x512xf32>
    %cst_80 = arith.constant 0.000000e+00 : f32
    %699 = vector.broadcast %cst_80 : f32 to vector<8x512xf32>
    %700 = arith.maximumf %698, %699 : vector<8x512xf32>
    %c8_81 = arith.constant 8 : index
    %c0_82 = arith.constant 0 : index
    %701 = vector.load %arg6[%c8_81, %c0_82] : memref<176x512xf32, #tpu.memory_space<vmem>>, vector<9x512xf32>
    %702 = vector.extract_strided_slice %700 {offsets = [0, 495], sizes = [8, 17], strides = [1, 1]} : vector<8x512xf32> to vector<8x17xf32>
    %703 = vector.extract_strided_slice %700 {offsets = [0, 0], sizes = [8, 495], strides = [1, 1]} : vector<8x512xf32> to vector<8x495xf32>
    %704 = tpu.concatenate %702, %703 in 1 : vector<8x17xf32>, vector<8x495xf32> -> vector<8x512xf32>
    %705 = vector.extract_strided_slice %701 {offsets = [0, 0], sizes = [1, 512], strides = [1, 1]} : vector<9x512xf32> to vector<1x512xf32>
    %706 = vector.broadcast %705 : vector<1x512xf32> to vector<8x512xf32>
    %707 = arith.mulf %704, %706 : vector<8x512xf32>
    %708 = arith.truncf %707 : vector<8x512xf32> to vector<8x512xbf16>
    %709 = vector.extract_strided_slice %700 {offsets = [0, 496], sizes = [8, 16], strides = [1, 1]} : vector<8x512xf32> to vector<8x16xf32>
    %710 = vector.extract_strided_slice %700 {offsets = [0, 0], sizes = [8, 496], strides = [1, 1]} : vector<8x512xf32> to vector<8x496xf32>
    %711 = tpu.concatenate %709, %710 in 1 : vector<8x16xf32>, vector<8x496xf32> -> vector<8x512xf32>
    %712 = vector.extract_strided_slice %701 {offsets = [1, 0], sizes = [1, 512], strides = [1, 1]} : vector<9x512xf32> to vector<1x512xf32>
    %713 = vector.broadcast %712 : vector<1x512xf32> to vector<8x512xf32>
    %714 = arith.mulf %711, %713 : vector<8x512xf32>
    %715 = arith.truncf %714 : vector<8x512xf32> to vector<8x512xbf16>
    %716 = vector.extract_strided_slice %700 {offsets = [0, 497], sizes = [8, 15], strides = [1, 1]} : vector<8x512xf32> to vector<8x15xf32>
    %717 = vector.extract_strided_slice %700 {offsets = [0, 0], sizes = [8, 497], strides = [1, 1]} : vector<8x512xf32> to vector<8x497xf32>
    %718 = tpu.concatenate %716, %717 in 1 : vector<8x15xf32>, vector<8x497xf32> -> vector<8x512xf32>
    %719 = vector.extract_strided_slice %701 {offsets = [2, 0], sizes = [1, 512], strides = [1, 1]} : vector<9x512xf32> to vector<1x512xf32>
    %720 = vector.broadcast %719 : vector<1x512xf32> to vector<8x512xf32>
    %721 = arith.mulf %718, %720 : vector<8x512xf32>
    %722 = arith.truncf %721 : vector<8x512xf32> to vector<8x512xbf16>
    %723 = vector.extract_strided_slice %700 {offsets = [0, 511], sizes = [8, 1], strides = [1, 1]} : vector<8x512xf32> to vector<8x1xf32>
    %724 = vector.extract_strided_slice %700 {offsets = [0, 0], sizes = [8, 511], strides = [1, 1]} : vector<8x512xf32> to vector<8x511xf32>
    %725 = tpu.concatenate %723, %724 in 1 : vector<8x1xf32>, vector<8x511xf32> -> vector<8x512xf32>
    %726 = vector.extract_strided_slice %701 {offsets = [3, 0], sizes = [1, 512], strides = [1, 1]} : vector<9x512xf32> to vector<1x512xf32>
    %727 = vector.broadcast %726 : vector<1x512xf32> to vector<8x512xf32>
    %728 = arith.mulf %725, %727 : vector<8x512xf32>
    %729 = arith.truncf %728 : vector<8x512xf32> to vector<8x512xbf16>
    %730 = arith.truncf %700 : vector<8x512xf32> to vector<8x512xbf16>
    %731 = vector.extract_strided_slice %700 {offsets = [0, 1], sizes = [8, 511], strides = [1, 1]} : vector<8x512xf32> to vector<8x511xf32>
    %732 = vector.extract_strided_slice %700 {offsets = [0, 0], sizes = [8, 1], strides = [1, 1]} : vector<8x512xf32> to vector<8x1xf32>
    %733 = tpu.concatenate %731, %732 in 1 : vector<8x511xf32>, vector<8x1xf32> -> vector<8x512xf32>
    %734 = vector.extract_strided_slice %701 {offsets = [5, 0], sizes = [1, 512], strides = [1, 1]} : vector<9x512xf32> to vector<1x512xf32>
    %735 = vector.broadcast %734 : vector<1x512xf32> to vector<8x512xf32>
    %736 = arith.mulf %733, %735 : vector<8x512xf32>
    %737 = arith.truncf %736 : vector<8x512xf32> to vector<8x512xbf16>
    %738 = vector.extract_strided_slice %700 {offsets = [0, 15], sizes = [8, 497], strides = [1, 1]} : vector<8x512xf32> to vector<8x497xf32>
    %739 = vector.extract_strided_slice %700 {offsets = [0, 0], sizes = [8, 15], strides = [1, 1]} : vector<8x512xf32> to vector<8x15xf32>
    %740 = tpu.concatenate %738, %739 in 1 : vector<8x497xf32>, vector<8x15xf32> -> vector<8x512xf32>
    %741 = vector.extract_strided_slice %701 {offsets = [6, 0], sizes = [1, 512], strides = [1, 1]} : vector<9x512xf32> to vector<1x512xf32>
    %742 = vector.broadcast %741 : vector<1x512xf32> to vector<8x512xf32>
    %743 = arith.mulf %740, %742 : vector<8x512xf32>
    %744 = arith.truncf %743 : vector<8x512xf32> to vector<8x512xbf16>
    %745 = vector.extract_strided_slice %700 {offsets = [0, 16], sizes = [8, 496], strides = [1, 1]} : vector<8x512xf32> to vector<8x496xf32>
    %746 = vector.extract_strided_slice %700 {offsets = [0, 0], sizes = [8, 16], strides = [1, 1]} : vector<8x512xf32> to vector<8x16xf32>
    %747 = tpu.concatenate %745, %746 in 1 : vector<8x496xf32>, vector<8x16xf32> -> vector<8x512xf32>
    %748 = vector.extract_strided_slice %701 {offsets = [7, 0], sizes = [1, 512], strides = [1, 1]} : vector<9x512xf32> to vector<1x512xf32>
    %749 = vector.broadcast %748 : vector<1x512xf32> to vector<8x512xf32>
    %750 = arith.mulf %747, %749 : vector<8x512xf32>
    %751 = arith.truncf %750 : vector<8x512xf32> to vector<8x512xbf16>
    %752 = vector.extract_strided_slice %700 {offsets = [0, 17], sizes = [8, 495], strides = [1, 1]} : vector<8x512xf32> to vector<8x495xf32>
    %753 = vector.extract_strided_slice %700 {offsets = [0, 0], sizes = [8, 17], strides = [1, 1]} : vector<8x512xf32> to vector<8x17xf32>
    %754 = tpu.concatenate %752, %753 in 1 : vector<8x495xf32>, vector<8x17xf32> -> vector<8x512xf32>
    %755 = vector.extract_strided_slice %701 {offsets = [8, 0], sizes = [1, 512], strides = [1, 1]} : vector<9x512xf32> to vector<1x512xf32>
    %756 = vector.broadcast %755 : vector<1x512xf32> to vector<8x512xf32>
    %757 = arith.mulf %754, %756 : vector<8x512xf32>
    %758 = arith.truncf %757 : vector<8x512xf32> to vector<8x512xbf16>
    %759 = tpu.concatenate %708, %715, %722, %729, %730, %737, %744, %751, %758 in 0 : vector<8x512xbf16>, vector<8x512xbf16>, vector<8x512xbf16>, vector<8x512xbf16>, vector<8x512xbf16>, vector<8x512xbf16>, vector<8x512xbf16>, vector<8x512xbf16>, vector<8x512xbf16> -> vector<72x512xbf16>
    %c960 = arith.constant 960 : index
    %c0_83 = arith.constant 0 : index
    %760 = vector.load %arg5[%c960, %c0_83] : memref<992x512xbf16, #tpu.memory_space<vmem>>, vector<8x72xbf16>
    %c160 = arith.constant 160 : index
    %c0_84 = arith.constant 0 : index
    %761 = vector.load %arg6[%c160, %c0_84] : memref<176x512xf32, #tpu.memory_space<vmem>>, vector<8x1xf32>
    %cst_85 = arith.constant dense<0.000000e+00> : vector<8x512xf32>
    %762 = tpu.matmul %760, %759, %cst_85 {dimension_numbers = #tpu.dot_dimension_numbers<[1], [0], [0], [1], [0, 0, 1, 1], [], []>} : vector<8x72xbf16>, vector<72x512xbf16>, vector<8x512xf32> -> vector<8x512xf32>
    %763 = vector.broadcast %761 : vector<8x1xf32> to vector<8x512xf32>
    %764 = arith.addf %762, %763 : vector<8x512xf32>
    %cst_86 = arith.constant 0.000000e+00 : f32
    %765 = vector.broadcast %cst_86 : f32 to vector<8x512xf32>
    %766 = arith.maximumf %764, %765 : vector<8x512xf32>
    %c976 = arith.constant 976 : index
    %c0_87 = arith.constant 0 : index
    %767 = vector.load %arg5[%c976, %c0_87] : memref<992x512xbf16, #tpu.memory_space<vmem>>, vector<3x8xbf16>
    %c168 = arith.constant 168 : index
    %c0_88 = arith.constant 0 : index
    %768 = vector.load %arg6[%c168, %c0_88] : memref<176x512xf32, #tpu.memory_space<vmem>>, vector<3x1xf32>
    %769 = arith.truncf %766 : vector<8x512xf32> to vector<8x512xbf16>
    %cst_89 = arith.constant dense<0.000000e+00> : vector<3x512xf32>
    %770 = tpu.matmul %767, %769, %cst_89 {dimension_numbers = #tpu.dot_dimension_numbers<[1], [0], [0], [1], [0, 0, 1, 1], [], []>} : vector<3x8xbf16>, vector<8x512xbf16>, vector<3x512xf32> -> vector<3x512xf32>
    %771 = vector.broadcast %768 : vector<3x1xf32> to vector<3x512xf32>
    %772 = arith.addf %770, %771 : vector<3x512xf32>
    %773 = arith.negf %772 : vector<3x512xf32>
    %774 = math.exp %773 : vector<3x512xf32>
    %cst_90 = arith.constant 1.000000e+00 : f32
    %775 = vector.broadcast %cst_90 : f32 to vector<3x512xf32>
    %776 = arith.addf %775, %774 : vector<3x512xf32>
    %777 = arith.divf %775, %776 : vector<3x512xf32>
    %c0_91 = arith.constant 0 : index
    %c0_92 = arith.constant 0 : index
    %778 = vector.load %arg7[%c0_91, %c0_92] : memref<3x512xf32, #tpu.memory_space<vmem>>, vector<3x512xf32>
    tpu.vector_store %arg7[%c0_91, %c0_92], %777 {strides = array<i32>} : memref<3x512xf32, #tpu.memory_space<vmem>>, vector<3x512xf32>,
    return
  }
}

</mosaic_0001>

<bundles_post_ra>
// kernel: tasknet_forward.1
= control target key start
LH: loop header
LB: loop body
LE: loop exit
PB: predicated region body
PF: predicated region fallthrough
CT: control target
= control target key end

     0   :  { %s9446_s28 = smov 16   ;;  %s9448_s10 = smov 17   ;;  %v9430_v4 = vmov 0   ;;  %v61_v6 = vlaneseq  ;;  %vm94_vm0 = vcmask 130048   ;;  %vm52_vm1 = vcmask 138240   ;;  %s9422_s0 = inlined_call_operand.vmem [shape: f32[8,512], index: 0, kind: input, shape index: {}]   ;;  %s9423_s5 = inlined_call_operand.vmem [shape: bf16[992,512], index: 5, kind: input, shape index: {}]   ;;  %s9424_s6 = inlined_call_operand.vmem [shape: f32[176,512], index: 6, kind: input, shape index: {}]   ;;  %s9425_s1 = inlined_call_operand.vmem [shape: f32[8,128], index: 1, kind: input, shape index: {}]   ;;  %s9426_s2 = inlined_call_operand.vmem [shape: f32[16,32], index: 2, kind: input, shape index: {}]   ;;  %s9427_s3 = inlined_call_operand.vmem [shape: f32[8,128], index: 3, kind: input, shape index: {}]   ;;  %s9428_s4 = inlined_call_operand.vmem [shape: f32[8,512], index: 4, kind: input, shape index: {}]   ;;  %s9429_s7 = inlined_call_operand.vmem [shape: f32[3,512], index: 7, kind: output, shape index: {}]  }
   0x1   :  { %v6490_v0 = vld [vmem:[%s9422_s0 + $0x18] sm:$0xff]  ;;  %v6495_v1 = vld [vmem:[%s9422_s0 + $0x8] sm:$0xff]  ;;  %v6504_v2 = vld [vmem:[%s9422_s0 + $0x10] sm:$0xff]  ;;  %s9444_s11 = smov 15   ;;  %s6417_s12 = smov 127   ;;  %535 = vmatprep.mubr.bf16.mxu0 %v9430_v4  ;;  %576 = vmatprep.mubr.bf16.mxu1 %v9430_v4  ;;  %vm415_vm2 = vcmask 1043456  }
   0x2   :  { %85 = vrot.lane.b32.xlu0 %v6490_v0, %s9446_s28  ;;  %90 = vrot.lane.b32.xlu1 %v6495_v1, %s9446_s28  ;;  %v6509_v3 = vld [vmem:[%s9422_s0] sm:$0xff]  ;;  %s6415_s0 = smov 1   ;;  %s9440_s13 = smov 112   ;;  %v6578_v7 = vshrl.u32 %v61_v6, 7  ;;  %v6583_v8 = vld [vmem:[%s9424_s6 + $0x38] sm:$0xff]  ;;  %vm178_vm3 = vcmask 7168  }
   0x3   :  { %s9442_s14 = smov 113   ;;  %6119 = vset.pattern.permute.xlu0 %v9430_v4  ;;  %6120 = vset.pattern.permute.xlu1 %v9430_v4  ;;  %s9432_s15 = smov 111   ;;  %v481_v5 = vld [vmem:[%s9424_s6] sm:$0xff]  ;;  %v6588_v9 = vld [vmem:[%s9424_s6 + $0x28] sm:$0xff]  ;;  %v6593_v10 = vld [vmem:[%s9424_s6 + $0x30] sm:$0xff]  ;;  %vm136_vm4 = vcmask 121856  }
   0x4   :  { %v6596_v11 = vsub.s32 1, %v6578_v7  ;;  %v6601_v14 = vld [vmem:[%s9424_s6 + $0x20] sm:$0xff]  ;;  %v6612_v17 = vsub.s32 0, %v6578_v7  ;;  %v6655_v59 = vsub.s32 3, %v6578_v7  ;;  %vm223_vm5 = vcmask 1039360   ;;  %s6422_s22 = smov 9  }
   0x5   :  { %vm9497_vm6 = vcmask 916480   ;;  %vm9498_vm7 = vcmask 924672   ;;  %vm9496_vm8 = vcmask 908288   ;;  %vm487_vm9 = vcmask 588800   ;;  %s6424_s23 = smov 7   ;;  %s6425_s24 = smov 121  }
   0x6   :  { %92 = vrot.lane.b32.xlu1 %v6504_v2, %s9446_s28  ;;  %88 = vrot.lane.b32.xlu0 %v6509_v3, %s9446_s28  ;;  %v6605_v15 = vrot.slane %v6583_v8, %v6596_v11  ;;  %v6609_v16 = vrot.slane %v6588_v9, %v6596_v11  ;;  %v6616_v18 = vrot.slane %v6593_v10, %v6596_v11  ;;  %s6426_s25 = smov 120   ;;  %s6427_s29 = smov 119   ;;  %vm6432_vm10 = vmmov 0  }
   0x7   :  { %v6622_v23 = vrot.slane %v6601_v14, %v6596_v11  ;;  %v6630_v28 = vrot.slane %v6601_v14, %v6612_v17  ;;  %v6637_v34 = vrot.slane %v6583_v8, %v6612_v17  ;;  %v6641_v35 = vrot.slane %v6588_v9, %v6612_v17  ;;  %s6428_s18 = smov 96   ;;  %s6430_s8 = smov 64  }
   0x8   :  { %9527 = vst [vmem:[#allocation2_spill] sm:$0xff] %v6605_v15  ;;  %9528 = vst [vmem:[#allocation3_spill] sm:$0xff] %v6609_v16  ;;  %v6645_v36 = vrot.slane %v6593_v10, %v6612_v17  ;;  %s6431_s9 = smov 32   ;;  %s6433_s26 = smov 101   ;;  %vm2347_vm11 = vcmask 39936   ;;  %vm2504_vm12 = vcmask 252928  }
   0x9   :  { %9529 = vst [vmem:[#allocation4_spill] sm:$0xff] %v6616_v18  ;;  %9530 = vst [vmem:[#allocation5_spill] sm:$0xff] %v6622_v23  ;;  %s6434_s27 = smov 5   ;;  %s6436_s30 = smov 100   ;;  %vm2386_vm13 = vcmask 31744   ;;  %vm2543_vm14 = vcmask 236544  }
   0xa   :  { %46 = vrot.lane.b32.xlu1 %v6509_v3, %s9448_s10  ;;  %40 = vrot.lane.b32.xlu0 %v6490_v0, %s9448_s10  ;;  %9531 = vst [vmem:[#allocation6_spill] sm:$0xff] %v6630_v28  ;;  %9532 = vst [vmem:[#allocation7_spill] sm:$0xff] %v6641_v35  ;;  %s6440_s16 = smov 99   ;;  %s6441_s17 = smov 3   ;;  %vm2425_vm15 = vcmask 23552  }
   0xb   :  { %9533 = vst [vmem:[#allocation8_spill] sm:$0xff] %v6645_v36  ;;  %s6442_s19 = smov 124   ;;  %s6443_s20 = smov 28  }
   0xc   :  { %s6444_s21 = smov 97   ;;  %s9556_s28 = smov 17  }
   0xe   :  { %50 = vrot.lane.b32.xlu1 %v6504_v2, %s9448_s10  ;;  %48 = vrot.lane.b32.xlu0 %v6495_v1, %s9448_s10 }
  0x12   :  { %172 = vrot.lane.b32.xlu1 %v6509_v3, %s6415_s0  ;;  %169 = vrot.lane.b32.xlu0 %v6490_v0, %s6415_s0 }
  0x16   :  { %176 = vrot.lane.b32.xlu1 %v6504_v2, %s6415_s0  ;;  %174 = vrot.lane.b32.xlu0 %v6495_v1, %s6415_s0 }
  0x1a   :  { %130 = vrot.lane.b32.xlu1 %v6509_v3, %s9444_s11  ;;  %127 = vrot.lane.b32.xlu0 %v6490_v0, %s9444_s11 }
  0x1e   :  { %134 = vrot.lane.b32.xlu1 %v6504_v2, %s9444_s11  ;;  %132 = vrot.lane.b32.xlu0 %v6495_v1, %s9444_s11  ;;  %s6446_s11 = smov 27  }
  0x22   :  { %217 = vrot.lane.b32.xlu1 %v6495_v1, %s6417_s12  ;;  %215 = vrot.lane.b32.xlu0 %v6509_v3, %s6417_s12 }
  0x26   :  { %221 = vrot.lane.b32.xlu1 %v6490_v0, %s6417_s12  ;;  %219 = vrot.lane.b32.xlu0 %v6504_v2, %s6417_s12 }
  0x2a   :  { %301 = vrot.lane.b32.xlu1 %v6495_v1, %s9440_s13  ;;  %299 = vrot.lane.b32.xlu0 %v6509_v3, %s9440_s13 }
  0x2e   :  { %305 = vrot.lane.b32.xlu1 %v6490_v0, %s9440_s13  ;;  %303 = vrot.lane.b32.xlu0 %v6504_v2, %s9440_s13 }
  0x32   :  { %259 = vrot.lane.b32.xlu1 %v6495_v1, %s9442_s14  ;;  %257 = vrot.lane.b32.xlu0 %v6509_v3, %s9442_s14 }
  0x36   :  { %263 = vrot.lane.b32.xlu1 %v6490_v0, %s9442_s14  ;;  %261 = vrot.lane.b32.xlu0 %v6504_v2, %s9442_s14 }
  0x3a   :  { %343 = vrot.lane.b32.xlu1 %v6495_v1, %s9432_s15  ;;  %341 = vrot.lane.b32.xlu0 %v6509_v3, %s9432_s15 }
  0x3e   :  { %347 = vrot.lane.b32.xlu1 %v6490_v0, %s9432_s15  ;;  %345 = vrot.lane.b32.xlu0 %v6504_v2, %s9432_s15  ;;  %s6445_s15 = smov 123  }
  0x42   :  { %484 = vperm.xlu0 %6119, %v481_v5   ;;  %v6662_v5 = vrot.slane %v6583_v8, %v6655_v59 }
  0x44   :  { %9534 = vst [vmem:[#allocation9_spill] sm:$0xff] %v6662_v5 }
  0x74   :  { %v86_v12 = vpop.permute.xlu0 %85  ;;  %v91_v13 = vpop.permute.xlu1 %90 }
  0x78   :  { %v93_v19 = vpop.permute.xlu1 %92  ;;  %v89_v20 = vpop.permute.xlu0 %88 }
  0x79   :  { %v96_v21 = vsel %vm94_vm0, %v91_v13, %v93_v19  ;;  %v97_v22 = vsel %vm94_vm0, %v93_v19, %v86_v12  ;;  %v95_v24 = vsel %vm94_vm0, %v89_v20, %v91_v13  ;;  %v102_v25 = vsel %vm94_vm0, %v86_v12, %v89_v20 }
  0x7a   :  { %v122_v26 = vmul.f32 %v6605_v15, %v97_v22  ;;  %v120_v27 = vmul.f32 %v6609_v16, %v95_v24  ;;  %v121_v29 = vmul.f32 %v6616_v18, %v96_v21  ;;  %v119_v32 = vmul.f32 %v6622_v23, %v102_v25 }
  0x7b   :  { %v6667_v12 = vrot.slane %v6588_v9, %v6655_v59  ;;  %v6670_v13 = vsub.s32 2, %v6578_v7  ;;  %v6674_v20 = vrot.slane %v6593_v10, %v6655_v59  ;;  %v6678_v22 = vrot.slane %v6601_v14, %v6655_v59 }
  0x7c   :  { %v47_v30 = vpop.permute.xlu1 %46  ;;  %v41_v31 = vpop.permute.xlu0 %40  ;;  %v124_v38 = vpack.c.bf16 %v120_v27, %v120_v27  ;;  %v126_v39 = vpack.c.bf16 %v122_v26, %v122_v26  ;;  %v125_v40 = vpack.c.bf16 %v121_v29, %v121_v29  ;;  %v123_v43 = vpack.c.bf16 %v119_v32, %v119_v32 }
  0x7d   :  { %v60_v33 = vsel %vm52_vm1, %v41_v31, %v47_v30  ;;  %9535 = vst [vmem:[#allocation10_spill] sm:$0xff] %v6667_v12  ;;  %9536 = vst [vmem:[#allocation11_spill] sm:$0xff] %v6674_v20 }
  0x7e   :  { %v77_v37 = vmul.f32 %v6630_v28, %v60_v33  ;;  %v388_v50 = vrot.slane %v124_v38, 4  ;;  %v390_v51 = vrot.slane %v126_v39, 4  ;;  %v389_v58 = vrot.slane %v125_v40, 4  ;;  %9537 = vst [vmem:[#allocation12_spill] sm:$0xff] %v6678_v22 }
  0x7f   :  { %v387_v60 = vrot.slane %v123_v43, 4  ;;  %v6695_v40 = vrot.slane %v6583_v8, %v6670_v13  ;;  %v6706_v43 = vsub.s32 5, %v6578_v7 }
  0x80   :  { %v51_v41 = vpop.permute.xlu1 %50  ;;  %v49_v42 = vpop.permute.xlu0 %48  ;;  %v81_v52 = vpack.c.bf16 %v77_v37, %v77_v37 }
  0x81   :  { %v55_v44 = vsel %vm52_vm1, %v51_v41, %v41_v31  ;;  %v53_v45 = vsel %vm52_vm1, %v47_v30, %v49_v42  ;;  %v54_v46 = vsel %vm52_vm1, %v49_v42, %v51_v41  ;;  %v6688_v31 = vrot.slane %v6601_v14, %v6670_v13  ;;  %9539 = vst [vmem:[#allocation14_spill] sm:$0xff] %v6695_v40 }
  0x82   :  { %v80_v47 = vmul.f32 %v6637_v34, %v55_v44  ;;  %v78_v48 = vmul.f32 %v6641_v35, %v53_v45  ;;  %v79_v49 = vmul.f32 %v6645_v36, %v54_v46  ;;  %v418_v6 = vsel %vm415_vm2, %v81_v52, %v387_v60 }
  0x83   :  { %9538 = vst [vmem:[#allocation13_spill] sm:$0xff] %v6688_v31  ;;  %v6699_v41 = vrot.slane %v6588_v9, %v6670_v13  ;;  %v6703_v42 = vrot.slane %v6593_v10, %v6670_v13 }
  0x84   :  { %v173_v53 = vpop.permute.xlu1 %172  ;;  %v170_v54 = vpop.permute.xlu0 %169  ;;  %v82_v55 = vpack.c.bf16 %v78_v48, %v78_v48  ;;  %v84_v56 = vpack.c.bf16 %v80_v47, %v80_v47  ;;  %v83_v57 = vpack.c.bf16 %v79_v49, %v79_v49 }
  0x85   :  { %v186_v27 = vsel %vm178_vm3, %v170_v54, %v173_v53  ;;  %9540 = vst [vmem:[#allocation15_spill] sm:$0xff] %v6699_v41  ;;  %9541 = vst [vmem:[#allocation16_spill] sm:$0xff] %v6703_v42 }
  0x86   :  { %v422_v61 = vsel %vm415_vm2, %v82_v55, %v388_v50  ;;  %v430_v62 = vsel %vm415_vm2, %v84_v56, %v390_v51  ;;  %v426_v63 = vsel %vm415_vm2, %v83_v57, %v389_v58  ;;  %v203_v38 = vmul.f32 %v6678_v22, %v186_v27 }
  0x87   :  { %503 = vmatprep.subr.bf16.mxu0 %v422_v61  ;;  %544 = vmatprep.subr.bf16.mxu1 %v430_v62  ;;  %v6717_v57 = vrot.slane %v6601_v14, %v6706_v43  ;;  %v6721_v62 = vrot.slane %v6583_v8, %v6706_v43 }
  0x88   :  { %v177_v19 = vpop.permute.xlu1 %176  ;;  %504 = vmatpush1.bf16.msra.mxu0 %v418_v6  ;;  %545 = vmatpush1.bf16.msra.mxu1 %v426_v63  ;;  %v175_v21 = vpop.permute.xlu0 %174  ;;  %v207_v50 = vpack.c.bf16 %v203_v38, %v203_v38 }
  0x89   :  { %v181_v24 = vsel %vm178_vm3, %v177_v19, %v170_v54  ;;  %v179_v25 = vsel %vm178_vm3, %v173_v53, %v175_v21  ;;  %v180_v26 = vsel %vm178_vm3, %v175_v21, %v177_v19  ;;  %9542 = vst [vmem:[#allocation17_spill] sm:$0xff] %v6717_v57  ;;  %9543 = vst [vmem:[#allocation18_spill] sm:$0xff] %v6721_v62 }
  0x8a   :  { %v206_v29 = vmul.f32 %v6662_v5, %v181_v24  ;;  %v204_v30 = vmul.f32 %v6667_v12, %v179_v25  ;;  %v205_v32 = vmul.f32 %v6674_v20, %v180_v26  ;;  %v395_v26 = vrot.slane %v207_v50, 4  ;;  %v7674_v5 = vld [vmem:[%s9424_s6 + $0x160] sm:$0xff] }
  0x8c   :  { %v131_v33 = vpop.permute.xlu1 %130  ;;  %v128_v37 = vpop.permute.xlu0 %127  ;;  %v210_v44 = vpack.c.bf16 %v206_v29, %v206_v29  ;;  %v208_v45 = vpack.c.bf16 %v204_v30, %v204_v30  ;;  %v209_v47 = vpack.c.bf16 %v205_v32, %v205_v32  ;;  %v6726_v29 = vrot.slane %v6588_v9, %v6706_v43 }
  0x8d   :  { %v144_v39 = vsel %vm136_vm4, %v128_v37, %v131_v33  ;;  %v6730_v30 = vrot.slane %v6593_v10, %v6706_v43 }
  0x8e   :  { %v161_v46 = vmul.f32 %v6688_v31, %v144_v39  ;;  %v398_v58 = vrot.slane %v210_v44, 4  ;;  %v396_v60 = vrot.slane %v208_v45, 4  ;;  %v397_v63 = vrot.slane %v209_v47, 4  ;;  %9544 = vst [vmem:[#allocation19_spill] sm:$0xff] %v6726_v29 }
  0x8f   :  { %9545 = vst [vmem:[#allocation20_spill] sm:$0xff] %v6730_v30  ;;  %v7679_v31 = vrot.slane %v7674_v5, %v6612_v17 }
  0x90   :  { %v135_v48 = vpop.permute.xlu1 %134  ;;  %v133_v49 = vpop.permute.xlu0 %132  ;;  %v165_v61 = vpack.c.bf16 %v161_v46, %v161_v46 }
  0x91   :  { %v139_v51 = vsel %vm136_vm4, %v135_v48, %v128_v37  ;;  %v137_v52 = vsel %vm136_vm4, %v131_v33, %v133_v49  ;;  %v138_v53 = vsel %vm136_vm4, %v133_v49, %v135_v48 }
  0x92   :  { %v164_v54 = vmul.f32 %v6695_v40, %v139_v51  ;;  %v162_v55 = vmul.f32 %v6699_v41, %v137_v52  ;;  %v163_v56 = vmul.f32 %v6703_v42, %v138_v53  ;;  %v434_v39 = vsel %vm415_vm2, %v165_v61, %v395_v26 }
  0x93   :  { %v6744_v53 = vsub.s32 7, %v6578_v7 }
  0x94   :  { %v168_v6 = vpack.c.bf16 %v164_v54, %v164_v54  ;;  %v166_v19 = vpack.c.bf16 %v162_v55, %v162_v55  ;;  %v167_v21 = vpack.c.bf16 %v163_v56, %v163_v56  ;;  %v218_v24 = vpop.permute.xlu1 %217  ;;  %v216_v25 = vpop.permute.xlu0 %215  ;;  %v212_v54 = vpack.c.bf16 %v6495_v1, %v6495_v1 }
  0x95   :  { %v224_v27 = vsel %vm223_vm5, %v216_v25, %v218_v24  ;;  %v214_v55 = vpack.c.bf16 %v6490_v0, %v6490_v0  ;;  %v211_v56 = vpack.c.bf16 %v6509_v3, %v6509_v3  ;;  %v6756_v1 = vrot.slane %v6601_v14, %v6744_v53 }
  0x96   :  { %v249_v32 = vmul.f32 %v6717_v57, %v224_v27  ;;  %v438_v33 = vsel %vm415_vm2, %v166_v19, %v396_v60  ;;  %v446_v37 = vsel %vm415_vm2, %v168_v6, %v398_v58  ;;  %v442_v38 = vsel %vm415_vm2, %v167_v21, %v397_v63 }
  0x97   :  { %505 = vmatprep.subr.bf16.mxu0 %v438_v33  ;;  %546 = vmatprep.subr.bf16.mxu1 %v446_v37  ;;  %v213_v58 = vpack.c.bf16 %v6504_v2, %v6504_v2  ;;  %9546 = vst [vmem:[#allocation21_spill] sm:$0xff] %v6756_v1  ;;  %v6760_v0 = vrot.slane %v6583_v8, %v6744_v53  ;;  %v6771_v27 = vsub.s32 6, %v6578_v7 }
  0x98   :  { %v253_v44 = vpack.c.bf16 %v249_v32, %v249_v32  ;;  %v222_v45 = vpop.permute.xlu1 %221  ;;  %506 = vmatpush1.bf16.msra.mxu0 %v434_v39  ;;  %547 = vmatpush1.bf16.msra.mxu1 %v442_v38  ;;  %v220_v46 = vpop.permute.xlu0 %219  ;;  %v6764_v2 = vrot.slane %v6588_v9, %v6744_v53  ;;  %v6768_v3 = vrot.slane %v6593_v10, %v6744_v53 }
  0x99   :  { %v232_v47 = vsel %vm223_vm5, %v222_v45, %v216_v25  ;;  %v225_v48 = vsel %vm223_vm5, %v218_v24, %v220_v46  ;;  %v226_v49 = vsel %vm223_vm5, %v220_v46, %v222_v45  ;;  %9547 = vst [vmem:[#allocation22_spill] sm:$0xff] %v6760_v0 }
  0x9a   :  { %v252_v50 = vmul.f32 %v6721_v62, %v232_v47  ;;  %v250_v51 = vmul.f32 %v6726_v29, %v225_v48  ;;  %v251_v52 = vmul.f32 %v6730_v30, %v226_v49  ;;  %v403_v60 = vrot.slane %v253_v44, 4  ;;  %9548 = vst [vmem:[#allocation23_spill] sm:$0xff] %v6764_v2  ;;  %9549 = vst [vmem:[#allocation24_spill] sm:$0xff] %v6768_v3 }
  0x9c   :  { %v256_v61 = vpack.c.bf16 %v252_v50, %v252_v50  ;;  %v254_v63 = vpack.c.bf16 %v250_v51, %v250_v51  ;;  %v255_v6 = vpack.c.bf16 %v251_v52, %v251_v52  ;;  %v302_v19 = vpop.permute.xlu1 %301  ;;  %v300_v21 = vpop.permute.xlu0 %299  ;;  %v450_v39 = vsel %vm415_vm2, %v211_v56, %v403_v60 }
  0x9d   :  { %v308_v7 = vsel %vm9497_vm6, %v300_v21, %v302_v19  ;;  %v6785_v50 = vrot.slane %v6601_v14, %v6771_v27  ;;  %v6796_v60 = vrot.slane %v6588_v9, %v6771_v27  ;;  %v6800_v14 = vrot.slane %v6593_v10, %v6771_v27 }
  0x9e   :  { %v406_v24 = vrot.slane %v256_v61, 4  ;;  %v404_v25 = vrot.slane %v254_v63, 4  ;;  %v405_v26 = vrot.slane %v255_v6, 4 }
  0x9f   :  { %9550 = vst [vmem:[#allocation25_spill] sm:$0xff] %v6785_v50  ;;  %9552 = vst [vmem:[#allocation27_spill] sm:$0xff] %v6796_v60 }
  0xa0   :  { %v306_v32 = vpop.permute.xlu1 %305  ;;  %v304_v33 = vpop.permute.xlu0 %303  ;;  %v454_v37 = vsel %vm415_vm2, %v212_v54, %v404_v25  ;;  %v462_v38 = vsel %vm415_vm2, %v214_v55, %v406_v24  ;;  %v458_v44 = vsel %vm415_vm2, %v213_v58, %v405_v26  ;;  %v333_v55 = vmul.f32 %v6756_v1, %v308_v7  ;;  %9553 = vst [vmem:[#allocation28_spill] sm:$0xff] %v6800_v14 }
  0xa1   :  { %v316_v45 = vsel %vm9497_vm6, %v306_v32, %v300_v21  ;;  %v309_v46 = vsel %vm9497_vm6, %v302_v19, %v304_v33  ;;  %v310_v47 = vsel %vm9497_vm6, %v304_v33, %v306_v32  ;;  %507 = vmatprep.subr.bf16.mxu0 %v454_v37  ;;  %548 = vmatprep.subr.bf16.mxu1 %v462_v38  ;;  %vm2621_vm6 = vcmask 220160  }
  0xa2   :  { %508 = vmatpush1.bf16.msra.mxu0 %v450_v39  ;;  %549 = vmatpush1.bf16.msra.mxu1 %v458_v44  ;;  %v336_v48 = vmul.f32 %v6760_v0, %v316_v45  ;;  %v334_v49 = vmul.f32 %v6764_v2, %v309_v46  ;;  %v335_v51 = vmul.f32 %v6768_v3, %v310_v47  ;;  %v5507_v44 = vld [vmem:[%s9424_s6 + $0x40] ss:$0 sm:$0xff] }
  0xa3   :  { %v6792_v58 = vrot.slane %v6583_v8, %v6771_v27  ;;  %v337_v25 = vpack.c.bf16 %v333_v55, %v333_v55 }
  0xa4   :  { %v260_v52 = vpop.permute.xlu1 %259  ;;  %v258_v54 = vpop.permute.xlu0 %257  ;;  %v340_v61 = vpack.c.bf16 %v336_v48, %v336_v48  ;;  %v338_v63 = vpack.c.bf16 %v334_v49, %v334_v49  ;;  %v339_v19 = vpack.c.bf16 %v335_v51, %v335_v51 }
  0xa5   :  { %v266_v56 = vsel %vm9498_vm7, %v258_v54, %v260_v52  ;;  %9551 = vst [vmem:[#allocation26_spill] sm:$0xff] %v6792_v58  ;;  %v411_v51 = vrot.slane %v337_v25, 4 }
  0xa6   :  { %v291_v6 = vmul.f32 %v6785_v50, %v266_v56  ;;  %v414_v37 = vrot.slane %v340_v61, 4  ;;  %v412_v38 = vrot.slane %v338_v63, 4  ;;  %v413_v45 = vrot.slane %v339_v19, 4  ;;  %v5510_v63 = vld [vmem:[%s9424_s6 + $0x58] ss:$0 sm:$0xff] }
  0xa8   :  { %v264_v21 = vpop.permute.xlu1 %263  ;;  %v262_v24 = vpop.permute.xlu0 %261  ;;  %v295_v39 = vpack.c.bf16 %v291_v6, %v291_v6  ;;  %v5508_v6 = vld [vmem:[%s9424_s6 + $0x48] ss:$0 sm:$0xff] }
  0xa9   :  { %v274_v26 = vsel %vm9498_vm7, %v264_v21, %v258_v54  ;;  %v267_v8 = vsel %vm9498_vm7, %v260_v52, %v262_v24  ;;  %v268_v32 = vsel %vm9498_vm7, %v262_v24, %v264_v21  ;;  %v5509_v21 = vld [vmem:[%s9424_s6 + $0x50] ss:$0 sm:$0xff]  ;;  %vm2667_vm7 = vcmask 261120  }
  0xaa   :  { %v294_v9 = vmul.f32 %v6792_v58, %v274_v26  ;;  %v292_v33 = vmul.f32 %v6796_v60, %v267_v8  ;;  %v293_v10 = vmul.f32 %v6800_v14, %v268_v32  ;;  %v466_v19 = vsel %vm415_vm2, %v295_v39, %v411_v51  ;;  %v6127_v51 = vld [vmem:[%s9423_s5 + $0x220] ss:$16 sps:$4 sm:$0xff]  }
  0xac   :  { %v298_v46 = vpack.c.bf16 %v294_v9, %v294_v9  ;;  %v296_v47 = vpack.c.bf16 %v292_v33, %v292_v33  ;;  %v297_v7 = vpack.c.bf16 %v293_v10, %v293_v10  ;;  %v344_v48 = vpop.permute.xlu1 %343  ;;  %v342_v49 = vpop.permute.xlu0 %341 }
  0xad   :  { %v350_v52 = vsel %vm9496_vm8, %v342_v49, %v344_v48 }
  0xae   :  { %v470_v54 = vsel %vm415_vm2, %v296_v47, %v412_v38  ;;  %v478_v55 = vsel %vm415_vm2, %v298_v46, %v414_v37  ;;  %v474_v56 = vsel %vm415_vm2, %v297_v7, %v413_v45  ;;  %v375_v61 = vmul.f32 %v5507_v44, %v350_v52  ;;  %v6121_v45 = vld [vmem:[%s9423_s5 + $0x120] ss:$16 sps:$4 sm:$0xff]  }
  0xaf   :  { %509 = vmatprep.subr.bf16.mxu0 %v470_v54  ;;  %550 = vmatprep.subr.bf16.mxu1 %v478_v55  ;;  %v6123_v46 = vld [vmem:[%s9423_s5 + $0x320] ss:$16 sps:$4 sm:$0xff]  }
  0xb0   :  { %v348_v24 = vpop.permute.xlu1 %347  ;;  %551 = vmatpush1.bf16.msra.mxu1 %v474_v56  ;;  %v346_v25 = vpop.permute.xlu0 %345  ;;  %510 = vmatpush1.bf16.msra.mxu0 %v466_v19  ;;  %v379_v10 = vpack.c.bf16 %v375_v61, %v375_v61  ;;  %v6129_v52 = vld [vmem:[%s9423_s5 + $0x140] ss:$16 sps:$4 sm:$0xff]  }
  0xb1   :  { %v358_v26 = vsel %vm9496_vm8, %v348_v24, %v342_v49  ;;  %v351_v8 = vsel %vm9496_vm8, %v344_v48, %v346_v25  ;;  %v352_v32 = vsel %vm9496_vm8, %v346_v25, %v348_v24  ;;  %v480_v48 = vld [vmem:[%s9423_s5] sm:$0xf]  ;;  %vm2582_vm8 = vcmask 228352  }
  0xb2   :  { %v378_v9 = vmul.f32 %v5510_v63, %v358_v26  ;;  %v376_v33 = vmul.f32 %v5508_v6, %v351_v8  ;;  %v377_v37 = vmul.f32 %v5509_v21, %v352_v32  ;;  %v492_v47 = vsel %vm415_vm2, %v379_v10, 0  ;;  %v6125_v49 = vld [vmem:[%s9423_s5 + $0x20] ss:$16 sps:$4 sm:$0xff]  }
  0xb3   :  { %v6131_v54 = vld [vmem:[%s9423_s5 + $0x340] ss:$16 sps:$4 sm:$0xff]  }
  0xb4   :  { %v382_v38 = vpack.c.bf16 %v378_v9, %v378_v9  ;;  %v380_v39 = vpack.c.bf16 %v376_v33, %v376_v33  ;;  %v381_v44 = vpack.c.bf16 %v377_v37, %v377_v37  ;;  %v6133_v55 = vld [vmem:[%s9423_s5 + $0x40] ss:$16 sps:$4 sm:$0xff]  }
  0xb5   :  { %v6135_v56 = vld [vmem:[%s9423_s5 + $0x240] ss:$16 sps:$4 sm:$0xff]  }
  0xb6   :  { %5511 = vmatprep.subr.msk.bf16.mxu0 %vm415_vm2, %v380_v39  ;;  %5513 = vmatprep.subr.msk.bf16.mxu1 %vm415_vm2, %v382_v38  ;;  %v498_v7 = vsel %vm415_vm2, %v381_v44, 0  ;;  %v6137_v61 = vld [vmem:[%s9423_s5 + $0x160] ss:$16 sps:$4 sm:$0xff]  }
  0xb7   :  { %512 = vmatpush1.bf16.msra.mxu0 %v492_v47  ;;  %553 = vmatpush1.bf16.msra.mxu1 %v498_v7  ;;  %v6139_v63 = vld [vmem:[%s9423_s5 + $0x360] ss:$16 sps:$4 sm:$0xff]  }
  0xb8   :  { %5729 = vmatprep.subr.bf16.mxu0 %v6121_v45  ;;  %5751 = vmatprep.subr.bf16.mxu1 %v6123_v46  ;;  %v6141_v6 = vld [vmem:[%s9423_s5 + $0x60] ss:$16 sps:$4 sm:$0xff]  }
  0xb9   :  { %v6143_v19 = vld [vmem:[%s9423_s5 + $0x260] ss:$16 sps:$4 sm:$0xff]  }
  0xba   :  { %5512 = vmatmul.mubr.msk.bf16.vlgmr.msra.gmra.mrb[0].mxu0 %vm487_vm9, %v480_v48  ;;  %5514 = vmatmul.mubr.msk.bf16.vlgmr.msra.gmra.mrb[0].mxu1 %vm487_vm9, %v480_v48  ;;  %v6145_v21 = vld [vmem:[%s9423_s5 + $0x180] ss:$16 sps:$4 sm:$0xff]  }
  0xbb   :  { %5730 = vmatpush3.bf16.msra.mxu0 %v6125_v49  ;;  %5752 = vmatpush3.bf16.msra.mxu1 %v6127_v51  ;;  %v6147_v24 = vld [vmem:[%s9423_s5 + $0x380] ss:$16 sps:$4 sm:$0xff]  }
  0xbc   :  { %5731 = vmatprep.subr.bf16.mxu0 %v6129_v52  ;;  %5753 = vmatprep.subr.bf16.mxu1 %v6131_v54  ;;  %v6149_v25 = vld [vmem:[%s9423_s5 + $0x80] ss:$16 sps:$4 sm:$0xff]   ;;  %v6185_v52 = vld [vmem:[%s9423_s5 + $0x124] ss:$16 sps:$4 sm:$0xff]  }
  0xbd   :  { %v6151_v26 = vld [vmem:[%s9423_s5 + $0x280] ss:$16 sps:$4 sm:$0xff]   ;;  %v6186_v54 = vld [vmem:[%s9423_s5 + $0x324] ss:$16 sps:$4 sm:$0xff]  }
  0xbe   :  { %v6153_v8 = vld [vmem:[%s9423_s5 + $0x1a0] ss:$16 sps:$4 sm:$0xff]  }
  0xbf   :  { %5732 = vmatpush3.bf16.msra.mxu0 %v6133_v55  ;;  %5754 = vmatpush3.bf16.msra.mxu1 %v6135_v56  ;;  %v6155_v32 = vld [vmem:[%s9423_s5 + $0x3a0] ss:$16 sps:$4 sm:$0xff]  }
  0xc0   :  { %5733 = vmatprep.subr.bf16.mxu0 %v6137_v61  ;;  %5755 = vmatprep.subr.bf16.mxu1 %v6139_v63  ;;  %v6157_v9 = vld [vmem:[%s9423_s5 + $0xa0] ss:$16 sps:$4 sm:$0xff]  }
  0xc1   :  { %v6159_v33 = vld [vmem:[%s9423_s5 + $0x2a0] ss:$16 sps:$4 sm:$0xff]   ;;  %v485_v55 = vpop.permute.xlu0 %484 }
  0xc2   :  { %v6161_v10 = vld [vmem:[%s9423_s5 + $0x1c0] ss:$16 sps:$4 sm:$0xff]  }
  0xc3   :  { %5734 = vmatpush3.bf16.msra.mxu0 %v6141_v6  ;;  %5756 = vmatpush3.bf16.msra.mxu1 %v6143_v19  ;;  %v6163_v37 = vld [vmem:[%s9423_s5 + $0x3c0] ss:$16 sps:$4 sm:$0xff]  }
  0xc4   :  { %5735 = vmatprep.subr.bf16.mxu0 %v6145_v21  ;;  %5757 = vmatprep.subr.bf16.mxu1 %v6147_v24  ;;  %v6165_v38 = vld [vmem:[%s9423_s5 + $0xc0] ss:$16 sps:$4 sm:$0xff]  }
  0xc5   :  { %v6167_v39 = vld [vmem:[%s9423_s5 + $0x2c0] ss:$16 sps:$4 sm:$0xff]  }
  0xc6   :  { %v6169_v44 = vld [vmem:[%s9423_s5 + $0x3e0] ss:$16 sps:$4 sm:$0xff]  }
  0xc7   :  { %5736 = vmatpush3.bf16.msra.mxu0 %v6149_v25  ;;  %5758 = vmatpush3.bf16.msra.mxu1 %v6151_v26  ;;  %v6171_v45 = vld [vmem:[%s9423_s5 + $0x1e0] ss:$16 sps:$4 sm:$0xff]  }
  0xc8   :  { %5737 = vmatprep.subr.bf16.mxu0 %v6153_v8  ;;  %5759 = vmatprep.subr.bf16.mxu1 %v6155_v32  ;;  %v6173_v46 = vld [vmem:[%s9423_s5 + $0xe0] ss:$16 sps:$4 sm:$0xff]  }
  0xc9   :  { %v6175_v47 = vld [vmem:[%s9423_s5 + $0x2e0] ss:$16 sps:$4 sm:$0xff]  }
  0xca   :  { %v6177_v7 = vld [vmem:[%s9423_s5 + $0x200] ss:$16 sps:$4 sm:$0xff]  }
  0xcb   :  { %5738 = vmatpush3.bf16.msra.mxu0 %v6157_v9  ;;  %5760 = vmatpush3.bf16.msra.mxu1 %v6159_v33  ;;  %v6179_v48 = vld [vmem:[%s9423_s5 + $0x400] ss:$16 sps:$4 sm:$0xff]  }
  0xcc   :  { %5739 = vmatprep.subr.bf16.mxu0 %v6161_v10  ;;  %5761 = vmatprep.subr.bf16.mxu1 %v6163_v37  ;;  %v6181_v49 = vld [vmem:[%s9423_s5 + $0x100] ss:$16 sps:$4 sm:$0xff]  }
  0xcd   :  { %v6183_v51 = vld [vmem:[%s9423_s5 + $0x300] ss:$16 sps:$4 sm:$0xff]  }
  0xcf   :  { %5740 = vmatpush3.bf16.msra.mxu0 %v6165_v38  ;;  %5762 = vmatpush3.bf16.msra.mxu1 %v6167_v39 }
  0xd0   :  { %5763 = vmatprep.subr.bf16.mxu1 %v6169_v44  ;;  %5741 = vmatprep.subr.bf16.mxu0 %v6171_v45  ;;  %v6187_v45 = vld [vmem:[%s9423_s5 + $0x24] ss:$16 sps:$4 sm:$0xff]  }
  0xd3   :  { %5742 = vmatpush3.bf16.msra.mxu0 %v6173_v46  ;;  %5764 = vmatpush3.bf16.msra.mxu1 %v6175_v47  ;;  %v6188_v46 = vld [vmem:[%s9423_s5 + $0x224] ss:$16 sps:$4 sm:$0xff]  }
  0xd4   :  { %5743 = vmatprep.subr.bf16.mxu0 %v6177_v7  ;;  %5765 = vmatprep.subr.bf16.mxu1 %v6179_v48  ;;  %v6189_v48 = vld [vmem:[%s9423_s5 + $0x144] ss:$16 sps:$4 sm:$0xff]  }
  0xd7   :  { %5744 = vmatpush3.bf16.msra.mxu0 %v6181_v49  ;;  %5766 = vmatpush3.bf16.msra.mxu1 %v6183_v51  ;;  %v6190_v49 = vld [vmem:[%s9423_s5 + $0x344] ss:$16 sps:$4 sm:$0xff]  }
  0xd8   :  { %5773 = vmatprep.subr.bf16.mxu0 %v6185_v52  ;;  %5795 = vmatprep.subr.bf16.mxu1 %v6186_v54  ;;  %v6191_v51 = vld [vmem:[%s9423_s5 + $0x44] ss:$16 sps:$4 sm:$0xff]  }
  0xd9   :  { %v6192_v52 = vld [vmem:[%s9423_s5 + $0x244] ss:$16 sps:$4 sm:$0xff]  }
  0xda   :  { %v6193_v54 = vld [vmem:[%s9423_s5 + $0x164] ss:$16 sps:$4 sm:$0xff]  }
 0x18d   :  { %v578_v56 = vpop.f32.mrb[0].mxu1  ;;  %v537_v61 = vpop.f32.mrb[0].mxu0 }
 0x18e   :  { %v538_v63 = vadd.f32 %v537_v61, %v485_v55  ;;  %v539_v6 = vpop.f32.mrb[1].mxu0  ;;  %v580_v19 = vpop.f32.mrb[1].mxu1  ;;  %v579_v21 = vadd.f32 %v578_v56, %v485_v55  ;;  %v6195_v56 = vld [vmem:[%s9423_s5 + $0x64] ss:$16 sps:$4 sm:$0xff]  }
 0x18f   :  { %v540_v24 = vadd.f32 %v539_v6, %v485_v55  ;;  %v581_v25 = vadd.f32 %v580_v19, %v485_v55  ;;  %v541_v26 = vpop.f32.mrb[2].mxu0  ;;  %v582_v8 = vpop.f32.mrb[2].mxu1  ;;  %v6194_v55 = vld [vmem:[%s9423_s5 + $0x364] ss:$16 sps:$4 sm:$0xff]  }
 0x190   :  { %v585_v32 = vmax.f32 %v538_v63, 0.0  ;;  %v542_v9 = vpop.f32.mrb[3].mxu0  ;;  %v583_v33 = vpop.f32.mrb[3].mxu1  ;;  %v587_v10 = vmax.f32 %v579_v21, 0.0  ;;  %v6196_v61 = vld [vmem:[%s9423_s5 + $0x264] ss:$16 sps:$4 sm:$0xff]  }
 0x191   :  { %v586_v37 = vmax.f32 %v540_v24, 0.0  ;;  %v588_v38 = vmax.f32 %v581_v25, 0.0  ;;  %v6197_v63 = vld [vmem:[%s9423_s5 + $0x184] ss:$16 sps:$4 sm:$0xff]  }
 0x192   :  { %v6950_v47 = vpack.c.bf16 %v585_v32, %v585_v32  ;;  %v6952_v7 = vpack.c.bf16 %v587_v10, %v587_v10  ;;  %v6198_v6 = vld [vmem:[%s9423_s5 + $0x384] ss:$16 sps:$4 sm:$0xff]  }
 0x193   :  { %v6940_v39 = vpack.c.bf16 %v586_v37, %v586_v37  ;;  %v6942_v44 = vpack.c.bf16 %v588_v38, %v588_v38  ;;  %v6199_v19 = vld [vmem:[%s9423_s5 + $0x84] ss:$16 sps:$4 sm:$0xff]  }
 0x194   :  { %v6200_v21 = vld [vmem:[%s9423_s5 + $0x284] ss:$16 sps:$4 sm:$0xff]  }
 0x195   :  { %945 = vmatprep.mubr.bf16.mxu0 %v6940_v39  ;;  %985 = vmatprep.mubr.bf16.mxu1 %v6942_v44  ;;  %v6201_v24 = vld [vmem:[%s9423_s5 + $0x1a4] ss:$16 sps:$4 sm:$0xff]  }
 0x196   :  { %946 = vmatmul.mubr.bf16.vlgmr.msra.gmra.mrb[4].mxu0 %v6950_v47  ;;  %986 = vmatmul.mubr.bf16.vlgmr.msra.gmra.mrb[4].mxu1 %v6952_v7  ;;  %v6202_v25 = vld [vmem:[%s9423_s5 + $0x3a4] ss:$16 sps:$4 sm:$0xff]  }
 0x197   :  { %5774 = vmatpush3.bf16.msra.mxu0 %v6187_v45  ;;  %5796 = vmatpush3.bf16.msra.mxu1 %v6188_v46  ;;  %v6203_v26 = vld [vmem:[%s9423_s5 + $0xa4] ss:$16 sps:$4 sm:$0xff]  }
 0x198   :  { %1153 = vmatprep.mubr.bf16.mxu0 %v6940_v39  ;;  %1193 = vmatprep.mubr.bf16.mxu1 %v6942_v44  ;;  %v6204_v8 = vld [vmem:[%s9423_s5 + $0x2a4] ss:$16 sps:$4 sm:$0xff]  }
 0x199   :  { %5775 = vmatprep.subr.bf16.mxu0 %v6189_v48  ;;  %5797 = vmatprep.subr.bf16.mxu1 %v6190_v49  ;;  %v6205_v32 = vld [vmem:[%s9423_s5 + $0x1c4] ss:$16 sps:$4 sm:$0xff]  }
 0x19a   :  { %v6206_v9 = vld [vmem:[%s9423_s5 + $0x3c4] ss:$16 sps:$4 sm:$0xff]  }
 0x19b   :  { %5776 = vmatpush3.bf16.msra.mxu0 %v6191_v51  ;;  %5798 = vmatpush3.bf16.msra.mxu1 %v6192_v52  ;;  %v6207_v33 = vld [vmem:[%s9423_s5 + $0xc4] ss:$16 sps:$4 sm:$0xff]  }
 0x19c   :  { %5777 = vmatprep.subr.bf16.mxu0 %v6193_v54  ;;  %5799 = vmatprep.subr.bf16.mxu1 %v6194_v55  ;;  %v6208_v10 = vld [vmem:[%s9423_s5 + $0x2c4] ss:$16 sps:$4 sm:$0xff]   ;;  %v6217_v54 = vld [vmem:[%s9423_s5 + $0x128] ss:$16 sps:$4 sm:$0xff]  }
 0x19d   :  { %v6209_v37 = vld [vmem:[%s9423_s5 + $0x1e4] ss:$16 sps:$4 sm:$0xff]   ;;  %v6219_v55 = vld [vmem:[%s9423_s5 + $0x328] ss:$16 sps:$4 sm:$0xff]  }
 0x19e   :  { %v6210_v38 = vld [vmem:[%s9423_s5 + $0x3e4] ss:$16 sps:$4 sm:$0xff]  }
 0x19f   :  { %5778 = vmatpush3.bf16.msra.mxu0 %v6195_v56  ;;  %5800 = vmatpush3.bf16.msra.mxu1 %v6196_v61  ;;  %v6211_v45 = vld [vmem:[%s9423_s5 + $0xe4] ss:$16 sps:$4 sm:$0xff]   ;;  %v6221_v56 = vld [vmem:[%s9423_s5 + $0x28] ss:$16 sps:$4 sm:$0xff]  }
 0x1a0   :  { %5779 = vmatprep.subr.bf16.mxu0 %v6197_v63  ;;  %5801 = vmatprep.subr.bf16.mxu1 %v6198_v6  ;;  %v6212_v46 = vld [vmem:[%s9423_s5 + $0x2e4] ss:$16 sps:$4 sm:$0xff]   ;;  %v6223_v61 = vld [vmem:[%s9423_s5 + $0x228] ss:$16 sps:$4 sm:$0xff]  }
 0x1a1   :  { %v6213_v48 = vld [vmem:[%s9423_s5 + $0x204] ss:$16 sps:$4 sm:$0xff]   ;;  %v6225_v63 = vld [vmem:[%s9423_s5 + $0x148] ss:$16 sps:$4 sm:$0xff]  }
 0x1a2   :  { %v6214_v49 = vld [vmem:[%s9423_s5 + $0x404] ss:$16 sps:$4 sm:$0xff]   ;;  %v6227_v6 = vld [vmem:[%s9423_s5 + $0x348] ss:$16 sps:$4 sm:$0xff]  }
 0x1a3   :  { %5780 = vmatpush3.bf16.msra.mxu0 %v6199_v19  ;;  %5802 = vmatpush3.bf16.msra.mxu1 %v6200_v21  ;;  %v6215_v51 = vld [vmem:[%s9423_s5 + $0x104] ss:$16 sps:$4 sm:$0xff]   ;;  %v6229_v19 = vld [vmem:[%s9423_s5 + $0x48] ss:$16 sps:$4 sm:$0xff]  }
 0x1a4   :  { %5781 = vmatprep.subr.bf16.mxu0 %v6201_v24  ;;  %5803 = vmatprep.subr.bf16.mxu1 %v6202_v25  ;;  %v6216_v52 = vld [vmem:[%s9423_s5 + $0x304] ss:$16 sps:$4 sm:$0xff]   ;;  %v6231_v21 = vld [vmem:[%s9423_s5 + $0x248] ss:$16 sps:$4 sm:$0xff]  }
 0x1a5   :  { %v6233_v24 = vld [vmem:[%s9423_s5 + $0x168] ss:$16 sps:$4 sm:$0xff]  }
 0x1a6   :  { %v6235_v25 = vld [vmem:[%s9423_s5 + $0x368] ss:$16 sps:$4 sm:$0xff]  }
 0x1a7   :  { %5782 = vmatpush3.bf16.msra.mxu0 %v6203_v26  ;;  %5804 = vmatpush3.bf16.msra.mxu1 %v6204_v8  ;;  %v6237_v26 = vld [vmem:[%s9423_s5 + $0x68] ss:$16 sps:$4 sm:$0xff]  }
 0x1a8   :  { %5783 = vmatprep.subr.bf16.mxu0 %v6205_v32  ;;  %5805 = vmatprep.subr.bf16.mxu1 %v6206_v9  ;;  %v6239_v8 = vld [vmem:[%s9423_s5 + $0x268] ss:$16 sps:$4 sm:$0xff]  }
 0x1a9   :  { %v6241_v32 = vld [vmem:[%s9423_s5 + $0x188] ss:$16 sps:$4 sm:$0xff]  }
 0x1aa   :  { %v6243_v9 = vld [vmem:[%s9423_s5 + $0x388] ss:$16 sps:$4 sm:$0xff]  }
 0x1ab   :  { %5784 = vmatpush3.bf16.msra.mxu0 %v6207_v33  ;;  %5806 = vmatpush3.bf16.msra.mxu1 %v6208_v10  ;;  %v6245_v33 = vld [vmem:[%s9423_s5 + $0x88] ss:$16 sps:$4 sm:$0xff]  }
 0x1ac   :  { %5785 = vmatprep.subr.bf16.mxu0 %v6209_v37  ;;  %5807 = vmatprep.subr.bf16.mxu1 %v6210_v38  ;;  %v6247_v10 = vld [vmem:[%s9423_s5 + $0x288] ss:$16 sps:$4 sm:$0xff]  }
 0x1ad   :  { %v6249_v37 = vld [vmem:[%s9423_s5 + $0x1a8] ss:$16 sps:$4 sm:$0xff]  }
 0x1ae   :  { %v6251_v38 = vld [vmem:[%s9423_s5 + $0x3a8] ss:$16 sps:$4 sm:$0xff]  }
 0x1af   :  { %5786 = vmatpush3.bf16.msra.mxu0 %v6211_v45  ;;  %5808 = vmatpush3.bf16.msra.mxu1 %v6212_v46  ;;  %v6253_v45 = vld [vmem:[%s9423_s5 + $0xa8] ss:$16 sps:$4 sm:$0xff]  }
 0x1b0   :  { %5787 = vmatprep.subr.bf16.mxu0 %v6213_v48  ;;  %5809 = vmatprep.subr.bf16.mxu1 %v6214_v49  ;;  %v6255_v46 = vld [vmem:[%s9423_s5 + $0x2a8] ss:$16 sps:$4 sm:$0xff]  }
 0x1b1   :  { %v6257_v48 = vld [vmem:[%s9423_s5 + $0x1c8] ss:$16 sps:$4 sm:$0xff]  }
 0x1b2   :  { %v6259_v49 = vld [vmem:[%s9423_s5 + $0x3c8] ss:$16 sps:$4 sm:$0xff]  }
 0x1b3   :  { %5788 = vmatpush3.bf16.msra.mxu0 %v6215_v51  ;;  %5810 = vmatpush3.bf16.msra.mxu1 %v6216_v52  ;;  %v6261_v51 = vld [vmem:[%s9423_s5 + $0xc8] ss:$16 sps:$4 sm:$0xff]  }
 0x1b4   :  { %5817 = vmatprep.subr.bf16.mxu0 %v6217_v54  ;;  %5839 = vmatprep.subr.bf16.mxu1 %v6219_v55  ;;  %v6263_v52 = vld [vmem:[%s9423_s5 + $0x2c8] ss:$16 sps:$4 sm:$0xff]  }
 0x1b5   :  { %v6265_v54 = vld [vmem:[%s9423_s5 + $0x1e8] ss:$16 sps:$4 sm:$0xff]  }
 0x1b6   :  { %1154 = vmatmul.mubr.bf16.vlgmr.msra.gmra.mrb[8].mxu0 %v6950_v47  ;;  %1194 = vmatmul.mubr.bf16.vlgmr.msra.gmra.mrb[8].mxu1 %v6952_v7  ;;  %v6267_v55 = vld [vmem:[%s9423_s5 + $0x3e8] ss:$16 sps:$4 sm:$0xff]  }
 0x1b7   :  { %5818 = vmatpush3.bf16.msra.mxu0 %v6221_v56  ;;  %1426 = vmatprep.mubr.bf16.mxu0 %v6940_v39  ;;  %v6269_v56 = vld [vmem:[%s9423_s5 + $0xe8] ss:$16 sps:$4 sm:$0xff]  }
 0x1b8   :  { %5840 = vmatpush3.bf16.msra.mxu1 %v6223_v61  ;;  %1466 = vmatprep.mubr.bf16.mxu1 %v6942_v44  ;;  %v6271_v61 = vld [vmem:[%s9423_s5 + $0x2e8] ss:$16 sps:$4 sm:$0xff]  }
 0x1b9   :  { %5819 = vmatprep.subr.bf16.mxu0 %v6225_v63  ;;  %5841 = vmatprep.subr.bf16.mxu1 %v6227_v6  ;;  %v6273_v63 = vld [vmem:[%s9423_s5 + $0x208] ss:$16 sps:$4 sm:$0xff]  }
 0x1ba   :  { %v6275_v6 = vld [vmem:[%s9423_s5 + $0x408] ss:$16 sps:$4 sm:$0xff]  }
 0x1bb   :  { %5820 = vmatpush3.bf16.msra.mxu0 %v6229_v19  ;;  %v6277_v19 = vld [vmem:[%s9423_s5 + $0x108] ss:$16 sps:$4 sm:$0xff]  }
 0x1bc   :  { %5842 = vmatpush3.bf16.msra.mxu1 %v6231_v21  ;;  %5821 = vmatprep.subr.bf16.mxu0 %v6233_v24  ;;  %v6279_v21 = vld [vmem:[%s9423_s5 + $0x308] ss:$16 sps:$4 sm:$0xff]   ;;  %v6281_v24 = vld [vmem:[%s9423_s5 + $0x12c] ss:$16 sps:$4 sm:$0xff]  }
 0x1bd   :  { %5843 = vmatprep.subr.bf16.mxu1 %v6235_v25  ;;  %v6282_v25 = vld [vmem:[%s9423_s5 + $0x32c] ss:$16 sps:$4 sm:$0xff]  }
 0x1bf   :  { %5822 = vmatpush3.bf16.msra.mxu0 %v6237_v26  ;;  %v6283_v26 = vld [vmem:[%s9423_s5 + $0x2c] ss:$16 sps:$4 sm:$0xff]  }
 0x1c0   :  { %5844 = vmatpush3.bf16.msra.mxu1 %v6239_v8  ;;  %5823 = vmatprep.subr.bf16.mxu0 %v6241_v32  ;;  %v6284_v8 = vld [vmem:[%s9423_s5 + $0x22c] ss:$16 sps:$4 sm:$0xff]  }
 0x1c1   :  { %5845 = vmatprep.subr.bf16.mxu1 %v6243_v9  ;;  %v6285_v32 = vld [vmem:[%s9423_s5 + $0x14c] ss:$16 sps:$4 sm:$0xff]  }
 0x1c2   :  { %v6286_v9 = vld [vmem:[%s9423_s5 + $0x34c] ss:$16 sps:$4 sm:$0xff]  }
 0x1c3   :  { %5824 = vmatpush3.bf16.msra.mxu0 %v6245_v33  ;;  %v6287_v33 = vld [vmem:[%s9423_s5 + $0x4c] ss:$16 sps:$4 sm:$0xff]  }
 0x1c4   :  { %5846 = vmatpush3.bf16.msra.mxu1 %v6247_v10  ;;  %5825 = vmatprep.subr.bf16.mxu0 %v6249_v37  ;;  %v6288_v10 = vld [vmem:[%s9423_s5 + $0x24c] ss:$16 sps:$4 sm:$0xff]  }
 0x1c5   :  { %5847 = vmatprep.subr.bf16.mxu1 %v6251_v38  ;;  %v6289_v37 = vld [vmem:[%s9423_s5 + $0x16c] ss:$16 sps:$4 sm:$0xff]  }
 0x1c6   :  { %v6290_v38 = vld [vmem:[%s9423_s5 + $0x36c] ss:$16 sps:$4 sm:$0xff]  }
 0x1c7   :  { %5826 = vmatpush3.bf16.msra.mxu0 %v6253_v45  ;;  %v6292_v45 = vld [vmem:[%s9423_s5 + $0x26c] ss:$16 sps:$4 sm:$0xff]  }
 0x1c8   :  { %5848 = vmatpush3.bf16.msra.mxu1 %v6255_v46  ;;  %5827 = vmatprep.subr.bf16.mxu0 %v6257_v48  ;;  %v6294_v46 = vld [vmem:[%s9423_s5 + $0x38c] ss:$16 sps:$4 sm:$0xff]  }
 0x1c9   :  { %5849 = vmatprep.subr.bf16.mxu1 %v6259_v49  ;;  %v6295_v48 = vld [vmem:[%s9423_s5 + $0x8c] ss:$16 sps:$4 sm:$0xff]  }
 0x1ca   :  { %v6296_v49 = vld [vmem:[%s9423_s5 + $0x28c] ss:$16 sps:$4 sm:$0xff]  }
 0x1cb   :  { %5828 = vmatpush3.bf16.msra.mxu0 %v6261_v51  ;;  %v6297_v51 = vld [vmem:[%s9423_s5 + $0x1ac] ss:$16 sps:$4 sm:$0xff]  }
 0x1cc   :  { %5850 = vmatpush3.bf16.msra.mxu1 %v6263_v52  ;;  %5829 = vmatprep.subr.bf16.mxu0 %v6265_v54  ;;  %v6298_v52 = vld [vmem:[%s9423_s5 + $0x3ac] ss:$16 sps:$4 sm:$0xff]  }
 0x1cd   :  { %5851 = vmatprep.subr.bf16.mxu1 %v6267_v55  ;;  %v6299_v54 = vld [vmem:[%s9423_s5 + $0xac] ss:$16 sps:$4 sm:$0xff]  }
 0x1ce   :  { %v6300_v55 = vld [vmem:[%s9423_s5 + $0x2ac] ss:$16 sps:$4 sm:$0xff]  }
 0x1cf   :  { %5830 = vmatpush3.bf16.msra.mxu0 %v6269_v56  ;;  %v6301_v56 = vld [vmem:[%s9423_s5 + $0x1cc] ss:$16 sps:$4 sm:$0xff]  }
 0x1d0   :  { %5852 = vmatpush3.bf16.msra.mxu1 %v6271_v61  ;;  %5831 = vmatprep.subr.bf16.mxu0 %v6273_v63  ;;  %v6302_v61 = vld [vmem:[%s9423_s5 + $0x3cc] ss:$16 sps:$4 sm:$0xff]  }
 0x1d1   :  { %5853 = vmatprep.subr.bf16.mxu1 %v6275_v6  ;;  %v6303_v63 = vld [vmem:[%s9423_s5 + $0xcc] ss:$16 sps:$4 sm:$0xff]  }
 0x1d2   :  { %v6304_v6 = vld [vmem:[%s9423_s5 + $0x2cc] ss:$16 sps:$4 sm:$0xff]  }
 0x1d3   :  { %5832 = vmatpush3.bf16.msra.mxu0 %v6277_v19  ;;  %v6305_v19 = vld [vmem:[%s9423_s5 + $0x1ec] ss:$16 sps:$4 sm:$0xff]  }
 0x1d4   :  { %5854 = vmatpush3.bf16.msra.mxu1 %v6279_v21  ;;  %5861 = vmatprep.subr.bf16.mxu0 %v6281_v24  ;;  %v6306_v21 = vld [vmem:[%s9423_s5 + $0x3ec] ss:$16 sps:$4 sm:$0xff]  }
 0x1d5   :  { %5883 = vmatprep.subr.bf16.mxu1 %v6282_v25  ;;  %v6307_v24 = vld [vmem:[%s9423_s5 + $0xec] ss:$16 sps:$4 sm:$0xff]  }
 0x1d6   :  { %1427 = vmatmul.mubr.bf16.vlgmr.msra.gmra.mrb[12].mxu0 %v6950_v47  ;;  %v6308_v25 = vld [vmem:[%s9423_s5 + $0x2ec] ss:$16 sps:$4 sm:$0xff]  }
 0x1d7   :  { %1467 = vmatmul.mubr.bf16.vlgmr.msra.gmra.mrb[12].mxu1 %v6952_v7  ;;  %5862 = vmatpush3.bf16.msra.mxu0 %v6283_v26  ;;  %v6309_v26 = vld [vmem:[%s9423_s5 + $0x20c] ss:$16 sps:$4 sm:$0xff]  }
 0x1d8   :  { %1635 = vmatprep.mubr.bf16.mxu0 %v6940_v39  ;;  %5884 = vmatpush3.bf16.msra.mxu1 %v6284_v8  ;;  %v6291_v39 = vld [vmem:[%s9423_s5 + $0x6c] ss:$16 sps:$4 sm:$0xff]  }
 0x1d9   :  { %1675 = vmatprep.mubr.bf16.mxu1 %v6942_v44  ;;  %5863 = vmatprep.subr.bf16.mxu0 %v6285_v32  ;;  %v6293_v44 = vld [vmem:[%s9423_s5 + $0x18c] ss:$16 sps:$4 sm:$0xff]  }
 0x1da   :  { %5885 = vmatprep.subr.bf16.mxu1 %v6286_v9  ;;  %v6310_v8 = vld [vmem:[%s9423_s5 + $0x40c] ss:$16 sps:$4 sm:$0xff]  }
 0x1db   :  { %5864 = vmatpush3.bf16.msra.mxu0 %v6287_v33  ;;  %v6311_v32 = vld [vmem:[%s9423_s5 + $0x10c] ss:$16 sps:$4 sm:$0xff]   ;;  %v7251_v33 = vld [vmem:[%s9425_s1] sm:$0xff]  ;;  %s6423_s1 = smov 8  }
 0x1dc   :  { %5886 = vmatpush3.bf16.msra.mxu1 %v6288_v10  ;;  %5865 = vmatprep.subr.bf16.mxu0 %v6289_v37  ;;  %v6312_v9 = vld [vmem:[%s9423_s5 + $0x30c] ss:$16 sps:$4 sm:$0xff]  }
 0x1dd   :  { %5887 = vmatprep.subr.bf16.mxu1 %v6290_v38  ;;  %1691 = vrot.lane.b32.xlu1 %v7251_v33, %s6422_s22 }
 0x1df   :  { %5866 = vmatpush3.bf16.msra.mxu0 %v6291_v39 }
 0x1e0   :  { %5888 = vmatpush3.bf16.msra.mxu1 %v6292_v45  ;;  %5867 = vmatprep.subr.bf16.mxu0 %v6293_v44 }
 0x1e1   :  { %5889 = vmatprep.subr.bf16.mxu1 %v6294_v46 }
 0x1e3   :  { %5868 = vmatpush3.bf16.msra.mxu0 %v6295_v48 }
 0x1e4   :  { %5890 = vmatpush3.bf16.msra.mxu1 %v6296_v49  ;;  %5869 = vmatprep.subr.bf16.mxu0 %v6297_v51 }
 0x1e5   :  { %5891 = vmatprep.subr.bf16.mxu1 %v6298_v52 }
 0x1e7   :  { %5870 = vmatpush3.bf16.msra.mxu0 %v6299_v54 }
 0x1e8   :  { %5892 = vmatpush3.bf16.msra.mxu1 %v6300_v55  ;;  %5871 = vmatprep.subr.bf16.mxu0 %v6301_v56 }
 0x1e9   :  { %5893 = vmatprep.subr.bf16.mxu1 %v6302_v61 }
 0x1eb   :  { %5872 = vmatpush3.bf16.msra.mxu0 %v6303_v63 }
 0x1ec   :  { %5894 = vmatpush3.bf16.msra.mxu1 %v6304_v6  ;;  %5873 = vmatprep.subr.bf16.mxu0 %v6305_v19 }
 0x1ed   :  { %5895 = vmatprep.subr.bf16.mxu1 %v6306_v21 }
 0x1ef   :  { %5874 = vmatpush3.bf16.msra.mxu0 %v6307_v24 }
 0x1f0   :  { %5896 = vmatpush3.bf16.msra.mxu1 %v6308_v25  ;;  %5875 = vmatprep.subr.bf16.mxu0 %v6309_v26 }
 0x1f1   :  { %5897 = vmatprep.subr.bf16.mxu1 %v6310_v8 }
 0x1f3   :  { %5876 = vmatpush3.bf16.msra.mxu0 %v6311_v32 }
 0x1f4   :  { %5898 = vmatpush3.bf16.msra.mxu1 %v6312_v9  ;;  %1821 = vmatprep.subr.bf16.mxu0 %v9430_v4 }
 0x1f5   :  { %1965 = vmatprep.subr.bf16.mxu1 %v9430_v4 }
 0x1f6   :  { %1636 = vmatmul.mubr.bf16.vlgmr.msra.gmra.mrb[16].mxu0 %v6950_v47 }
 0x1f7   :  { %1676 = vmatmul.mubr.bf16.vlgmr.msra.gmra.mrb[16].mxu1 %v6952_v7 }
 0x269   :  { %v5745_v10 = vpop.f32.mrb[4].mxu0  ;;  %v5767_v37 = vpop.f32.mrb[4].mxu1 }
 0x26a   :  { %v5746_v38 = vpop.f32.mrb[5].mxu0  ;;  %v5768_v39 = vpop.f32.mrb[5].mxu1 }
 0x26b   :  { %v5747_v45 = vadd.f32 %v5746_v38, %v5745_v10  ;;  %v5769_v44 = vadd.f32 %v5768_v39, %v5767_v37  ;;  %v5748_v46 = vpop.f32.mrb[6].mxu0  ;;  %v5770_v48 = vpop.f32.mrb[6].mxu1 }
 0x26c   :  { %v5749_v47 = vpop.f32.mrb[7].mxu0  ;;  %v5771_v49 = vpop.f32.mrb[7].mxu1 }
 0x26d   :  { %v988_v7 = vadd.f32 %v5769_v44, %v5747_v45 }
 0x289   :  { %v5789_v51 = vpop.f32.mrb[8].mxu0  ;;  %v5811_v52 = vpop.f32.mrb[8].mxu1 }
 0x28a   :  { %v5790_v54 = vpop.f32.mrb[9].mxu0  ;;  %v5812_v55 = vpop.f32.mrb[9].mxu1 }
 0x28b   :  { %v5791_v56 = vadd.f32 %v5790_v54, %v5789_v51  ;;  %v5813_v61 = vadd.f32 %v5812_v55, %v5811_v52  ;;  %v5792_v63 = vpop.f32.mrb[10].mxu0  ;;  %v5814_v6 = vpop.f32.mrb[10].mxu1 }
 0x28c   :  { %v5793_v19 = vpop.f32.mrb[11].mxu0  ;;  %v5815_v21 = vpop.f32.mrb[11].mxu1 }
 0x28d   :  { %v1196_v24 = vadd.f32 %v5813_v61, %v5791_v56  ;;  %v6313_v21 = vld [vmem:[%s9423_s5 + $0x424] ss:$16 sps:$4 sm:$0xff]  }
 0x28e   :  { %5646 = vmatprep.mubr.msk.bf16.mxu0 %vm94_vm0, %v6313_v21 }
 0x28f   :  { %v1201_v25 = vmax.f32 %v988_v7, %v1196_v24  ;;  %v1797_v24 = vld [vmem:[%s9424_s6 + $0x60] sm:$0xff] }
 0x2a9   :  { %v5833_v26 = vpop.f32.mrb[12].mxu0 }
 0x2aa   :  { %v5855_v8 = vpop.f32.mrb[12].mxu1  ;;  %v5834_v32 = vpop.f32.mrb[13].mxu0 }
 0x2ab   :  { %v5835_v9 = vadd.f32 %v5834_v32, %v5833_v26  ;;  %v5856_v10 = vpop.f32.mrb[13].mxu1  ;;  %v5836_v37 = vpop.f32.mrb[14].mxu0  ;;  %v1685_v26 = vld [vmem:[%s9424_s6 + $0xa0] sm:$0xff] }
 0x2ac   :  { %v5857_v38 = vadd.f32 %v5856_v10, %v5855_v8  ;;  %v5858_v39 = vpop.f32.mrb[14].mxu1  ;;  %v5837_v45 = vpop.f32.mrb[15].mxu0  ;;  %v7301_v32 = vrot.slane %v1685_v26, %v6612_v17 }
 0x2ad   :  { %v5859_v44 = vpop.f32.mrb[15].mxu1  ;;  %v1692_v8 = vpop.permute.xlu1 %1691 }
 0x2ae   :  { %v1469_v46 = vadd.f32 %v5857_v38, %v5835_v9  ;;  %v1700_v37 = vmul.f32 %v7301_v32, %v1692_v8  ;;  %v7305_v38 = vrot.slane %v1685_v26, %v6596_v11 }
 0x2b0   :  { %v1474_v48 = vmax.f32 %v1201_v25, %v1469_v46  ;;  %v1798_v25 = vld [vmem:[%s9424_s6 + $0x80] sm:$0xff] }
 0x2c9   :  { %v5877_v47 = vpop.f32.mrb[16].mxu0 }
 0x2ca   :  { %v5899_v49 = vpop.f32.mrb[16].mxu1  ;;  %v5878_v51 = vpop.f32.mrb[17].mxu0 }
 0x2cb   :  { %v5879_v52 = vadd.f32 %v5878_v51, %v5877_v47  ;;  %v5900_v54 = vpop.f32.mrb[17].mxu1  ;;  %v5880_v55 = vpop.f32.mrb[18].mxu0  ;;  %v7310_v47 = vrot.slane %v1685_v26, %v6670_v13 }
 0x2cc   :  { %v5901_v56 = vadd.f32 %v5900_v54, %v5899_v49  ;;  %v5902_v7 = vpop.f32.mrb[18].mxu1  ;;  %v5881_v61 = vpop.f32.mrb[19].mxu0 }
 0x2cd   :  { %v5903_v63 = vpop.f32.mrb[19].mxu1 }
 0x2ce   :  { %v1678_v6 = vadd.f32 %v5901_v56, %v5879_v52  ;;  %v7316_v56 = vrot.slane %v1685_v26, %v6655_v59 }
 0x2d0   :  { %v7255_v19 = vmax.f32 %v1474_v48, %v1678_v6 }
 0x2d2   :  { %1702 = vrot.lane.b32.xlu0 %v7255_v19, %s6423_s1  ;;  %1689 = vrot.lane.b32.xlu1 %v7255_v19, %s6422_s22 }
 0x2d6   :  { %1716 = vrot.lane.b32.xlu0 %v7255_v19, %s6424_s23  ;;  %1704 = vrot.lane.b32.xlu1 %v7251_v33, %s6423_s1 }
 0x2da   :  { %1729 = vrot.lane.b32.xlu0 %v7255_v19, %s6415_s0  ;;  %1718 = vrot.lane.b32.xlu1 %v7251_v33, %s6424_s23 }
 0x2de   :  { %1743 = vrot.lane.b32.xlu0 %v7255_v19, %s6417_s12  ;;  %1731 = vrot.lane.b32.xlu1 %v7251_v33, %s6415_s0 }
 0x2e2   :  { %1756 = vrot.lane.b32.xlu0 %v7255_v19, %s6425_s24  ;;  %1745 = vrot.lane.b32.xlu1 %v7251_v33, %s6417_s12 }
 0x2e6   :  { %1769 = vrot.lane.b32.xlu0 %v7255_v19, %s6426_s25  ;;  %1758 = vrot.lane.b32.xlu1 %v7251_v33, %s6425_s24 }
 0x2ea   :  { %1782 = vrot.lane.b32.xlu0 %v7255_v19, %s6427_s29  ;;  %1771 = vrot.lane.b32.xlu1 %v7251_v33, %s6426_s25 }
 0x2ee   :  { %1801 = vperm.xlu0 %6119, %v1797_v24   ;;  %1784 = vrot.lane.b32.xlu1 %v7251_v33, %s6427_s29 }
 0x2f2   :  { %1806 = vperm.xlu1 %6120, %v1798_v25  }
 0x344   :  { %v1703_v9 = vpop.permute.xlu0 %1702  ;;  %v1690_v10 = vpop.permute.xlu1 %1689 }
 0x345   :  { %v1699_v39 = vmul.f32 %v7301_v32, %v1690_v10  ;;  %v1713_v48 = vmul.f32 %v7305_v38, %v1703_v9  ;;  %v7324_v9 = vrot.slane %v1685_v26, %v6706_v43 }
 0x347   :  { %v1701_v45 = vpack.c.bf16 %v1700_v37, %v1699_v39  ;;  %v1742_v39 = vpack.c.bf16 %v7251_v33, %v7255_v19 }
 0x348   :  { %v1717_v44 = vpop.permute.xlu0 %1716  ;;  %v1705_v46 = vpop.permute.xlu1 %1704 }
 0x349   :  { %v1714_v49 = vmul.f32 %v7305_v38, %v1705_v46  ;;  %1822 = vmatpush1.bf16.msra.mxu0 %v1701_v45  ;;  %v1726_v55 = vmul.f32 %v7310_v47, %v1717_v44  ;;  %v7332_v46 = vrot.slane %v1685_v26, %v6771_v27 }
 0x34a   :  { %1823 = vmatprep.subr.bf16.mxu0 %v9430_v4 }
 0x34b   :  { %v1715_v51 = vpack.c.bf16 %v1714_v49, %v1713_v48 }
 0x34c   :  { %v1730_v52 = vpop.permute.xlu0 %1729  ;;  %v1719_v54 = vpop.permute.xlu1 %1718 }
 0x34d   :  { %v1727_v7 = vmul.f32 %v7310_v47, %v1719_v54  ;;  %1824 = vmatpush1.bf16.msra.mxu0 %v1715_v51  ;;  %v1739_v21 = vmul.f32 %v7316_v56, %v1730_v52 }
 0x34e   :  { %1825 = vmatprep.subr.bf16.mxu0 %v9430_v4 }
 0x34f   :  { %v1728_v61 = vpack.c.bf16 %v1727_v7, %v1726_v55  ;;  %v7338_v55 = vrot.slane %v1685_v26, %v6744_v53 }
 0x350   :  { %v1744_v63 = vpop.permute.xlu0 %1743  ;;  %v1732_v6 = vpop.permute.xlu1 %1731 }
 0x351   :  { %v1740_v24 = vmul.f32 %v7316_v56, %v1732_v6  ;;  %1826 = vmatpush1.bf16.msra.mxu0 %v1728_v61  ;;  %v1753_v44 = vmul.f32 %v7324_v9, %v1744_v63  ;;  %v7346_v63 = vld [vmem:[%s9424_s6 + $0xc0] ss:$0 sm:$0xff] }
 0x352   :  { %1827 = vmatprep.subr.bf16.mxu0 %v9430_v4 }
 0x353   :  { %v1741_v25 = vpack.c.bf16 %v1740_v24, %v1739_v21 }
 0x354   :  { %v1746_v8 = vpop.permute.xlu1 %1745  ;;  %v1757_v10 = vpop.permute.xlu0 %1756 }
 0x355   :  { %1828 = vmatpush1.bf16.msra.mxu0 %v1741_v25  ;;  %v1754_v37 = vmul.f32 %v7324_v9, %v1746_v8  ;;  %v1766_v54 = vmul.f32 %v7332_v46, %v1757_v10  ;;  %v6315_v8 = vld [vmem:[%s9423_s5 + $0x420] ss:$16 sps:$4 sm:$0xff]  }
 0x356   :  { %1829 = vmatprep.subr.bf16.mxu0 %v9430_v4 }
 0x357   :  { %v1755_v48 = vpack.c.bf16 %v1754_v37, %v1753_v44 }
 0x358   :  { %v1759_v45 = vpop.permute.xlu1 %1758  ;;  %v1770_v51 = vpop.permute.xlu0 %1769 }
 0x359   :  { %1830 = vmatpush1.bf16.msra.mxu0 %v1742_v39  ;;  %v1767_v49 = vmul.f32 %v7332_v46, %v1759_v45  ;;  %v1779_v61 = vmul.f32 %v7338_v55, %v1770_v51 }
 0x35a   :  { %1831 = vmatprep.subr.bf16.mxu0 %v9430_v4 }
 0x35b   :  { %v1768_v33 = vpack.c.bf16 %v1767_v49, %v1766_v54 }
 0x35c   :  { %v1772_v52 = vpop.permute.xlu1 %1771  ;;  %v1783_v6 = vpop.permute.xlu0 %1782 }
 0x35d   :  { %1832 = vmatpush1.bf16.msra.mxu0 %v1755_v48  ;;  %v1780_v19 = vmul.f32 %v7338_v55, %v1772_v52  ;;  %v1792_v24 = vmul.f32 %v7346_v63, %v1783_v6  ;;  %v6318_v6 = vld [vmem:[%s9423_s5 + $0x4a0] ss:$16 sps:$4 sm:$0xff]  }
 0x35e   :  { %1833 = vmatprep.subr.bf16.mxu0 %v9430_v4 }
 0x35f   :  { %v1781_v26 = vpack.c.bf16 %v1780_v19, %v1779_v61  ;;  %v6321_v19 = vld [vmem:[%s9423_s5 + $0x444] ss:$16 sps:$4 sm:$0xff]   ;;  %v6317_v61 = vld [vmem:[%s9423_s5 + $0x480] ss:$16 sps:$4 sm:$0xff]  }
 0x360   :  { %v1785_v7 = vpop.permute.xlu1 %1784  ;;  %5649 = vmatprep.mubr.msk.bf16.mxu1 %vm94_vm0, %v6321_v19 }
 0x361   :  { %1834 = vmatpush1.bf16.msra.mxu0 %v1768_v33  ;;  %v1793_v21 = vmul.f32 %v7346_v63, %v1785_v7  ;;  %v6316_v7 = vld [vmem:[%s9423_s5 + $0x460] ss:$16 sps:$4 sm:$0xff]  }
 0x362   :  { %1835 = vmatprep.subr.bf16.mxu0 %v9430_v4 }
 0x363   :  { %v1794_v25 = vpack.c.bf16 %v1793_v21, %v1792_v24  ;;  %v6320_v21 = vld [vmem:[%s9423_s5 + $0x4e0] ss:$16 sps:$4 sm:$0xff]  }
 0x364   :  { %v1941_v24 = vld [vmem:[%s9424_s6 + $0xe0] sm:$0xff] }
 0x365   :  { %1836 = vmatpush1.bf16.msra.mxu0 %v1781_v26  ;;  %v6319_v26 = vld [vmem:[%s9423_s5 + $0x4c0] ss:$16 sps:$4 sm:$0xff]  }
 0x366   :  { %1837 = vmatprep.subr.bf16.mxu0 %v9430_v4 }
 0x369   :  { %1838 = vmatpush1.bf16.msra.mxu0 %v1794_v25  ;;  %v1942_v25 = vld [vmem:[%s9424_s6 + $0x100] sm:$0xff] }
 0x36c   :  { %1854 = vmatmul.mubr.bf16.vlgmr.msra.gmra.mrb[20].mxu0 %v6315_v8  ;;  %v6324_v8 = vld [vmem:[%s9423_s5 + $0x500] ss:$16 sps:$4 sm:$0xff]  }
 0x36d   :  { %v1802_v10 = vpop.permute.xlu0 %1801 }
 0x371   :  { %v1807_v39 = vpop.permute.xlu1 %1806 }
 0x43f   :  { %v1855_v37 = vpop.f32.mrb[20].mxu0 }
 0x440   :  { %v1856_v45 = vadd.f32 %v1855_v37, %v1802_v10  ;;  %v1857_v44 = vpop.f32.mrb[21].mxu0  ;;  %v6325_v10 = vld [vmem:[%s9423_s5 + $0x520] ss:$16 sps:$4 sm:$0xff]   ;;  %v9434_v37 = vmov 0.0  }
 0x441   :  { %v1858_v48 = vpop.f32.mrb[22].mxu0  ;;  %5975 = vmatprep.subr.bf16.mxu0 %v9434_v37  ;;  %5991 = vmatprep.mubr.msk.bf16.mxu0 %vm6432_vm10, %v9434_v37 }
 0x442   :  { %v7355_v49 = vmax.f32 %v1856_v45, 0.0  ;;  %v1859_v51 = vadd.f32 %v1858_v48, %v1807_v39  ;;  %v1860_v52 = vpop.f32.mrb[23].mxu0  ;;  %v6326_v39 = vld [vmem:[%s9423_s5 + $0x540] ss:$16 sps:$4 sm:$0xff]   ;;  %5976 = vmatpush3.bf16.msra.mxu0 %v6316_v7 }
 0x443   :  { %5977 = vmatprep.subr.bf16.mxu0 %v9434_v37 }
 0x444   :  { %v7357_v54 = vmax.f32 %v1859_v51, 0.0  ;;  %1866 = vrot.lane.b32.xlu0 %v7355_v49, %s6422_s22 }
 0x446   :  { %1868 = vrot.lane.b32.xlu1 %v7357_v54, %s6422_s22  ;;  %v1902_v33 = vpack.c.bf16 %v7357_v54, %v7355_v49  ;;  %5978 = vmatpush3.bf16.msra.mxu0 %v6317_v61 }
 0x447   :  { %5979 = vmatprep.subr.bf16.mxu0 %v9434_v37 }
 0x448   :  { %1875 = vrot.lane.b32.xlu0 %v7355_v49, %s6423_s1 }
 0x44a   :  { %1877 = vrot.lane.b32.xlu1 %v7357_v54, %s6423_s1  ;;  %5980 = vmatpush3.bf16.msra.mxu0 %v6318_v6 }
 0x44b   :  { %5981 = vmatprep.subr.bf16.mxu0 %v9434_v37 }
 0x44c   :  { %1884 = vrot.lane.b32.xlu0 %v7355_v49, %s6424_s23 }
 0x44e   :  { %1886 = vrot.lane.b32.xlu1 %v7357_v54, %s6424_s23  ;;  %5982 = vmatpush3.bf16.msra.mxu0 %v6319_v26 }
 0x44f   :  { %5983 = vmatprep.subr.bf16.mxu0 %v9434_v37 }
 0x450   :  { %1893 = vrot.lane.b32.xlu0 %v7355_v49, %s6415_s0 }
 0x452   :  { %1895 = vrot.lane.b32.xlu1 %v7357_v54, %s6415_s0  ;;  %5984 = vmatpush3.bf16.msra.mxu0 %v6320_v21 }
 0x453   :  { %5985 = vmatprep.subr.bf16.mxu0 %v9434_v37 }
 0x454   :  { %1903 = vrot.lane.b32.xlu0 %v7355_v49, %s6417_s12 }
 0x456   :  { %1905 = vrot.lane.b32.xlu1 %v7357_v54, %s6417_s12  ;;  %5986 = vmatpush3.bf16.msra.mxu0 %v6324_v8 }
 0x457   :  { %5987 = vmatprep.subr.bf16.mxu0 %v9434_v37 }
 0x458   :  { %1912 = vrot.lane.b32.xlu0 %v7355_v49, %s6425_s24 }
 0x45a   :  { %1914 = vrot.lane.b32.xlu1 %v7357_v54, %s6425_s24  ;;  %5988 = vmatpush3.bf16.msra.mxu0 %v6325_v10 }
 0x45b   :  { %5989 = vmatprep.subr.bf16.mxu0 %v9434_v37 }
 0x45c   :  { %1921 = vrot.lane.b32.xlu0 %v7355_v49, %s6426_s25 }
 0x45e   :  { %1923 = vrot.lane.b32.xlu1 %v7357_v54, %s6426_s25  ;;  %5990 = vmatpush3.bf16.msra.mxu0 %v6326_v39 }
 0x45f   :  { %6015 = vmatprep.subr.bf16.mxu0 %v9434_v37 }
 0x460   :  { %1930 = vrot.lane.b32.xlu0 %v7355_v49, %s6427_s29 }
 0x462   :  { %1932 = vrot.lane.b32.xlu1 %v7357_v54, %s6427_s29 }
 0x464   :  { %2114 = vrot.lane.b32.xlu0 %v6316_v7, %s6428_s18 }
 0x466   :  { %2116 = vrot.lane.b32.xlu1 %v6317_v61, %s6428_s18 }
 0x468   :  { %2118 = vrot.lane.b32.xlu0 %v6318_v6, %s6428_s18 }
 0x46a   :  { %2120 = vrot.lane.b32.xlu1 %v6319_v26, %s6428_s18 }
 0x46c   :  { %2122 = vrot.lane.b32.xlu0 %v6320_v21, %s6428_s18 }
 0x46e   :  { %1945 = vperm.xlu1 %6120, %v1941_v24  }
 0x470   :  { %1950 = vperm.xlu0 %6119, %v1942_v25  }
 0x472   :  { %2124 = vrot.lane.b32.xlu1 %v6324_v8, %s6428_s18 }
 0x474   :  { %2126 = vrot.lane.b32.xlu0 %v6325_v10, %s6428_s18 }
 0x476   :  { %2128 = vrot.lane.b32.xlu1 %v6326_v39, %s6428_s18  ;;  %s6439_s18 = smov 29  }
 0x478   :  { %2181 = vrot.lane.b32.xlu0 %v6316_v7, %s6430_s8 }
 0x47a   :  { %2248 = vrot.lane.b32.xlu1 %v6316_v7, %s6431_s9 }
 0x47c   :  { %2183 = vrot.lane.b32.xlu0 %v6317_v61, %s6430_s8 }
 0x47e   :  { %2250 = vrot.lane.b32.xlu1 %v6317_v61, %s6431_s9 }
 0x480   :  { %2185 = vrot.lane.b32.xlu0 %v6318_v6, %s6430_s8 }
 0x482   :  { %2252 = vrot.lane.b32.xlu1 %v6318_v6, %s6431_s9 }
 0x484   :  { %2187 = vrot.lane.b32.xlu0 %v6319_v26, %s6430_s8 }
 0x486   :  { %2254 = vrot.lane.b32.xlu1 %v6319_v26, %s6431_s9 }
 0x488   :  { %2189 = vrot.lane.b32.xlu0 %v6320_v21, %s6430_s8 }
 0x48a   :  { %2256 = vrot.lane.b32.xlu1 %v6320_v21, %s6431_s9 }
 0x48c   :  { %2191 = vrot.lane.b32.xlu0 %v6324_v8, %s6430_s8 }
 0x48e   :  { %2258 = vrot.lane.b32.xlu1 %v6324_v8, %s6431_s9 }
 0x490   :  { %2193 = vrot.lane.b32.xlu0 %v6325_v10, %s6430_s8 }
 0x492   :  { %2260 = vrot.lane.b32.xlu1 %v6325_v10, %s6431_s9 }
 0x494   :  { %2195 = vrot.lane.b32.xlu0 %v6326_v39, %s6430_s8  ;;  %s6437_s8 = smov 4  }
 0x496   :  { %2262 = vrot.lane.b32.xlu1 %v6326_v39, %s6431_s9  ;;  %s6438_s9 = smov 125  }
 0x4b6   :  { %v1867_v45 = vpop.permute.xlu0 %1866 }
 0x4b7   :  { %v1872_v48 = vmul.f32 %v1867_v45, %v7301_v32 }
 0x4b8   :  { %v1869_v44 = vpop.permute.xlu1 %1868 }
 0x4b9   :  { %v1873_v51 = vmul.f32 %v1869_v44, %v7301_v32 }
 0x4ba   :  { %v1876_v52 = vpop.permute.xlu0 %1875 }
 0x4bb   :  { %v1874_v19 = vpack.c.bf16 %v1873_v51, %v1872_v48  ;;  %v1881_v61 = vmul.f32 %v1876_v52, %v7305_v38 }
 0x4bc   :  { %v1878_v7 = vpop.permute.xlu1 %1877 }
 0x4bd   :  { %v1882_v6 = vmul.f32 %v1878_v7, %v7305_v38  ;;  %1966 = vmatpush1.bf16.msra.mxu1 %v1874_v19 }
 0x4be   :  { %v1885_v26 = vpop.permute.xlu0 %1884  ;;  %1967 = vmatprep.subr.bf16.mxu1 %v9430_v4 }
 0x4bf   :  { %v1883_v21 = vpack.c.bf16 %v1882_v6, %v1881_v61  ;;  %v1890_v25 = vmul.f32 %v1885_v26, %v7310_v47 }
 0x4c0   :  { %v1887_v24 = vpop.permute.xlu1 %1886 }
 0x4c1   :  { %v1891_v8 = vmul.f32 %v1887_v24, %v7310_v47  ;;  %1968 = vmatpush1.bf16.msra.mxu1 %v1883_v21 }
 0x4c2   :  { %v1894_v10 = vpop.permute.xlu0 %1893  ;;  %1969 = vmatprep.subr.bf16.mxu1 %v9430_v4 }
 0x4c3   :  { %v1892_v39 = vpack.c.bf16 %v1891_v8, %v1890_v25  ;;  %v1899_v44 = vmul.f32 %v1894_v10, %v7316_v56 }
 0x4c4   :  { %v1896_v45 = vpop.permute.xlu1 %1895 }
 0x4c5   :  { %v1900_v48 = vmul.f32 %v1896_v45, %v7316_v56  ;;  %1970 = vmatpush1.bf16.msra.mxu1 %v1892_v39 }
 0x4c6   :  { %v1904_v51 = vpop.permute.xlu0 %1903  ;;  %1971 = vmatprep.subr.bf16.mxu1 %v9430_v4 }
 0x4c7   :  { %v1901_v52 = vpack.c.bf16 %v1900_v48, %v1899_v44  ;;  %v1909_v26 = vmul.f32 %v1904_v51, %v7324_v9 }
 0x4c8   :  { %v1906_v19 = vpop.permute.xlu1 %1905 }
 0x4c9   :  { %1972 = vmatpush1.bf16.msra.mxu1 %v1901_v52  ;;  %v1910_v61 = vmul.f32 %v1906_v19, %v7324_v9  ;;  %v6323_v19 = vld [vmem:[%s9423_s5 + $0x440] ss:$16 sps:$4 sm:$0xff]  }
 0x4ca   :  { %v1913_v7 = vpop.permute.xlu0 %1912  ;;  %1973 = vmatprep.subr.bf16.mxu1 %v9430_v4 }
 0x4cb   :  { %v1911_v21 = vpack.c.bf16 %v1910_v61, %v1909_v26  ;;  %v1918_v10 = vmul.f32 %v1913_v7, %v7332_v46 }
 0x4cc   :  { %v1915_v6 = vpop.permute.xlu1 %1914 }
 0x4cd   :  { %1974 = vmatpush1.bf16.msra.mxu1 %v1902_v33  ;;  %v1919_v24 = vmul.f32 %v1915_v6, %v7332_v46 }
 0x4ce   :  { %1975 = vmatprep.subr.bf16.mxu1 %v9430_v4  ;;  %v1922_v25 = vpop.permute.xlu0 %1921 }
 0x4cf   :  { %v1920_v39 = vpack.c.bf16 %v1919_v24, %v1918_v10  ;;  %v1927_v48 = vmul.f32 %v1922_v25, %v7338_v55 }
 0x4d0   :  { %v1924_v8 = vpop.permute.xlu1 %1923 }
 0x4d1   :  { %1976 = vmatpush1.bf16.msra.mxu1 %v1911_v21  ;;  %v1928_v45 = vmul.f32 %v1924_v8, %v7338_v55 }
 0x4d2   :  { %1977 = vmatprep.subr.bf16.mxu1 %v9430_v4  ;;  %v1931_v49 = vpop.permute.xlu0 %1930 }
 0x4d3   :  { %v1929_v54 = vpack.c.bf16 %v1928_v45, %v1927_v48  ;;  %v1936_v51 = vmul.f32 %v7346_v63, %v1931_v49  ;;  %v7487_v45 = vld [vmem:[%s9426_s2] sm:$0xff] }
 0x4d4   :  { %v1933_v44 = vpop.permute.xlu1 %1932  ;;  %2327 = vrot.lane.b32.xlu0 %v7487_v45, %s6433_s26 }
 0x4d5   :  { %1978 = vmatpush1.bf16.msra.mxu1 %v1920_v39  ;;  %v1937_v33 = vmul.f32 %v7346_v63, %v1933_v44  ;;  %v7482_v39 = vld [vmem:[%s9426_s2 + $0x8] sm:$0xff]  ;;  %s6435_s2 = smov 31  }
 0x4d6   :  { %1979 = vmatprep.subr.bf16.mxu1 %v9430_v4  ;;  %v2115_v7 = vpop.permute.xlu0 %2114  ;;  %2329 = vrot.lane.b32.xlu1 %v7482_v39, %s6433_s26 }
 0x4d7   :  { %v1938_v52 = vpack.c.bf16 %v1937_v33, %v1936_v51 }
 0x4d8   :  { %v2117_v61 = vpop.permute.xlu1 %2116  ;;  %2339 = vrot.lane.b32.xlu0 %v7487_v45, %s6434_s27 }
 0x4d9   :  { %1980 = vmatpush1.bf16.msra.mxu1 %v1929_v54 }
 0x4da   :  { %1981 = vmatprep.subr.bf16.mxu1 %v9430_v4  ;;  %v2119_v6 = vpop.permute.xlu0 %2118  ;;  %2341 = vrot.lane.b32.xlu1 %v7482_v39, %s6434_s27 }
 0x4dc   :  { %v2121_v63 = vpop.permute.xlu1 %2120  ;;  %2484 = vrot.lane.b32.xlu0 %v7487_v45, %s6417_s12 }
 0x4dd   :  { %1982 = vmatpush1.bf16.msra.mxu1 %v1938_v52 }
 0x4de   :  { %5995 = vmatprep.subr.bf16.mxu1 %v9434_v37  ;;  %v2123_v26 = vpop.permute.xlu0 %2122  ;;  %2486 = vrot.lane.b32.xlu1 %v7482_v39, %s6417_s12 }
 0x4e0   :  { %1998 = vmatmul.mubr.bf16.vlgmr.msra.gmra.mrb[20].mxu1 %v6323_v19  ;;  %2496 = vrot.lane.b32.xlu0 %v7487_v45, %s6435_s2 }
 0x4e1   :  { %5996 = vmatpush3.bf16.msra.mxu1 %v2115_v7  ;;  %6011 = vmatprep.mubr.msk.bf16.mxu1 %vm6432_vm10, %v9434_v37 }
 0x4e2   :  { %5997 = vmatprep.subr.bf16.mxu1 %v9434_v37  ;;  %2498 = vrot.lane.b32.xlu1 %v7482_v39, %s6435_s2 }
 0x4e4   :  { %2366 = vrot.lane.b32.xlu0 %v7487_v45, %s6436_s30 }
 0x4e5   :  { %5998 = vmatpush3.bf16.msra.mxu1 %v2117_v61 }
 0x4e6   :  { %5999 = vmatprep.subr.bf16.mxu1 %v9434_v37  ;;  %2368 = vrot.lane.b32.xlu1 %v7482_v39, %s6436_s30 }
 0x4e8   :  { %2378 = vrot.lane.b32.xlu0 %v7487_v45, %s6437_s8 }
 0x4e9   :  { %6000 = vmatpush3.bf16.msra.mxu1 %v2119_v6 }
 0x4ea   :  { %6001 = vmatprep.subr.bf16.mxu1 %v9434_v37  ;;  %2380 = vrot.lane.b32.xlu1 %v7482_v39, %s6437_s8 }
 0x4ec   :  { %2523 = vrot.lane.b32.xlu0 %v7487_v45, %s6438_s9 }
 0x4ed   :  { %6002 = vmatpush3.bf16.msra.mxu1 %v2121_v63  ;;  %v1946_v21 = vpop.permute.xlu1 %1945 }
 0x4ee   :  { %6003 = vmatprep.subr.bf16.mxu1 %v9434_v37  ;;  %2525 = vrot.lane.b32.xlu1 %v7482_v39, %s6438_s9 }
 0x4ef   :  { %v1951_v24 = vpop.permute.xlu0 %1950 }
 0x4f0   :  { %2535 = vrot.lane.b32.xlu0 %v7487_v45, %s6439_s18 }
 0x4f1   :  { %6004 = vmatpush3.bf16.msra.mxu1 %v2123_v26  ;;  %v2125_v25 = vpop.permute.xlu1 %2124 }
 0x4f2   :  { %6005 = vmatprep.subr.bf16.mxu1 %v9434_v37  ;;  %2537 = vrot.lane.b32.xlu1 %v7482_v39, %s6439_s18 }
 0x4f3   :  { %v2127_v8 = vpop.permute.xlu0 %2126 }
 0x4f4   :  { %2405 = vrot.lane.b32.xlu0 %v7487_v45, %s6440_s16 }
 0x4f5   :  { %6006 = vmatpush3.bf16.msra.mxu1 %v2125_v25  ;;  %v2129_v10 = vpop.permute.xlu1 %2128 }
 0x4f6   :  { %6007 = vmatprep.subr.bf16.mxu1 %v9434_v37  ;;  %2407 = vrot.lane.b32.xlu1 %v7482_v39, %s6440_s16 }
 0x4f7   :  { %v2182_v48 = vpop.permute.xlu0 %2181 }
 0x4f8   :  { %2417 = vrot.lane.b32.xlu0 %v7487_v45, %s6441_s17 }
 0x4f9   :  { %6008 = vmatpush3.bf16.msra.mxu1 %v2127_v8  ;;  %v2249_v44 = vpop.permute.xlu1 %2248 }
 0x4fa   :  { %6009 = vmatprep.subr.bf16.mxu1 %v9434_v37  ;;  %2419 = vrot.lane.b32.xlu1 %v7482_v39, %s6441_s17 }
 0x4fb   :  { %v2184_v54 = vpop.permute.xlu0 %2183 }
 0x4fc   :  { %2562 = vrot.lane.b32.xlu0 %v7487_v45, %s6442_s19 }
 0x4fd   :  { %6010 = vmatpush3.bf16.msra.mxu1 %v2129_v10  ;;  %v2251_v49 = vpop.permute.xlu1 %2250 }
 0x4fe   :  { %6035 = vmatprep.subr.bf16.mxu1 %v9434_v37  ;;  %2564 = vrot.lane.b32.xlu1 %v7482_v39, %s6442_s19 }
 0x4ff   :  { %v2186_v25 = vpop.permute.xlu0 %2185 }
 0x500   :  { %2574 = vrot.lane.b32.xlu0 %v7487_v45, %s6443_s20 }
 0x501   :  { %v2253_v26 = vpop.permute.xlu1 %2252 }
 0x502   :  { %2576 = vrot.lane.b32.xlu1 %v7482_v39, %s6443_s20 }
 0x503   :  { %v2188_v4 = vpop.permute.xlu0 %2187 }
 0x504   :  { %2444 = vrot.lane.b32.xlu0 %v7487_v45, %s6444_s21 }
 0x505   :  { %v2255_v10 = vpop.permute.xlu1 %2254 }
 0x506   :  { %2446 = vrot.lane.b32.xlu1 %v7482_v39, %s6444_s21 }
 0x508   :  { %2456 = vrot.lane.b32.xlu0 %v7487_v45, %s6415_s0 }
 0x50a   :  { %2458 = vrot.lane.b32.xlu1 %v7482_v39, %s6415_s0 }
 0x50c   :  { %2601 = vrot.lane.b32.xlu0 %v7487_v45, %s6445_s15 }
 0x50e   :  { %2603 = vrot.lane.b32.xlu1 %v7482_v39, %s6445_s15 }
 0x5b3   :  { %v1999_v33 = vpop.f32.mrb[20].mxu1 }
 0x5b4   :  { %v2000_v51 = vadd.f32 %v1999_v33, %v1946_v21  ;;  %v2001_v52 = vpop.f32.mrb[21].mxu1  ;;  %v2257_v21 = vpop.permute.xlu1 %2256 }
 0x5b5   :  { %v2002_v19 = vpop.f32.mrb[22].mxu1 }
 0x5b6   :  { %v2003_v7 = vadd.f32 %v2002_v19, %v1951_v24  ;;  %v2004_v61 = vpop.f32.mrb[23].mxu1  ;;  %v2006_v6 = vmax.f32 %v2000_v51, 0.0  ;;  %v2190_v24 = vpop.permute.xlu0 %2189 }
 0x5b8   :  { %v2007_v63 = vmax.f32 %v2003_v7, 0.0 }
 0x5ba   :  { %v2024_v8 = vpack.c.bf16 %v2007_v63, %v2006_v6 }
 0x5bc   :  { %5992 = vmatmul.mubr.bf16.vlgmr.msra.gmra.mrb[24].mxu0 %v2024_v8  ;;  %6012 = vmatmul.mubr.bf16.vlgmr.msra.gmra.mrb[24].mxu1 %v2024_v8 }
 0x5bd   :  { %6016 = vmatpush3.bf16.msra.mxu0 %v2182_v48  ;;  %6036 = vmatpush3.bf16.msra.mxu1 %v2249_v44  ;;  %v2259_v44 = vpop.permute.xlu1 %2258  ;;  %v2192_v48 = vpop.permute.xlu0 %2191 }
 0x5be   :  { %6017 = vmatprep.subr.bf16.mxu0 %v9434_v37  ;;  %6037 = vmatprep.subr.bf16.mxu1 %v9434_v37 }
 0x5bf   :  { %6031 = vmatprep.mubr.msk.bf16.mxu0 %vm6432_vm10, %v9434_v37  ;;  %6051 = vmatprep.mubr.msk.bf16.mxu1 %vm6432_vm10, %v9434_v37 }
 0x5c1   :  { %6018 = vmatpush3.bf16.msra.mxu0 %v2184_v54  ;;  %6038 = vmatpush3.bf16.msra.mxu1 %v2251_v49  ;;  %v2261_v49 = vpop.permute.xlu1 %2260  ;;  %v2194_v54 = vpop.permute.xlu0 %2193 }
 0x5c2   :  { %6019 = vmatprep.subr.bf16.mxu0 %v9434_v37  ;;  %6039 = vmatprep.subr.bf16.mxu1 %v9434_v37 }
 0x5c5   :  { %6020 = vmatpush3.bf16.msra.mxu0 %v2186_v25  ;;  %6040 = vmatpush3.bf16.msra.mxu1 %v2253_v26  ;;  %v2196_v33 = vpop.permute.xlu0 %2195 }
 0x5c6   :  { %6021 = vmatprep.subr.bf16.mxu0 %v9434_v37  ;;  %6041 = vmatprep.subr.bf16.mxu1 %v9434_v37 }
 0x5c9   :  { %6022 = vmatpush3.bf16.msra.mxu0 %v2188_v4  ;;  %6042 = vmatpush3.bf16.msra.mxu1 %v2255_v10  ;;  %v2263_v4 = vpop.permute.xlu1 %2262 }
 0x5ca   :  { %6023 = vmatprep.subr.bf16.mxu0 %v9434_v37  ;;  %6043 = vmatprep.subr.bf16.mxu1 %v9434_v37 }
 0x5cd   :  { %6024 = vmatpush3.bf16.msra.mxu0 %v2190_v24  ;;  %6044 = vmatpush3.bf16.msra.mxu1 %v2257_v21 }
 0x5ce   :  { %6025 = vmatprep.subr.bf16.mxu0 %v9434_v37  ;;  %6045 = vmatprep.subr.bf16.mxu1 %v9434_v37 }
 0x5d1   :  { %6026 = vmatpush3.bf16.msra.mxu0 %v2192_v48  ;;  %6046 = vmatpush3.bf16.msra.mxu1 %v2259_v44 }
 0x5d2   :  { %6027 = vmatprep.subr.bf16.mxu0 %v9434_v37  ;;  %6047 = vmatprep.subr.bf16.mxu1 %v9434_v37 }
 0x5d5   :  { %6028 = vmatpush3.bf16.msra.mxu0 %v2194_v54  ;;  %6048 = vmatpush3.bf16.msra.mxu1 %v2261_v49 }
 0x5d6   :  { %6029 = vmatprep.subr.bf16.mxu0 %v9434_v37  ;;  %6049 = vmatprep.subr.bf16.mxu1 %v9434_v37 }
 0x5d9   :  { %6030 = vmatpush3.bf16.msra.mxu0 %v2196_v33  ;;  %6050 = vmatpush3.bf16.msra.mxu1 %v2263_v4 }
 0x5da   :  { %6055 = vmatprep.subr.bf16.mxu1 %v9434_v37 }
 0x5dc   :  { %6032 = vmatmul.mubr.bf16.vlgmr.msra.gmra.mrb[28].mxu0 %v2024_v8  ;;  %6052 = vmatmul.mubr.bf16.vlgmr.msra.gmra.mrb[28].mxu1 %v2024_v8 }
 0x5dd   :  { %6059 = vmatprep.mubr.msk.bf16.mxu1 %vm6432_vm10, %v9434_v37 }
 0x68f   :  { %v2107_v51 = vpop.f32.mrb[24].mxu0  ;;  %v2172_v52 = vpop.f32.mrb[24].mxu1 }
 0x690   :  { %v2179_v19 = vmax.f32 %v2107_v51, %v2172_v52  ;;  %v5993_v7 = vpop.f32.mrb[25].mxu0  ;;  %v6013_v61 = vpop.f32.mrb[25].mxu1 }
 0x691   :  { %v2110_v6 = vpop.f32.mrb[26].mxu0  ;;  %v2175_v63 = vpop.f32.mrb[26].mxu1 }
 0x692   :  { %v2180_v26 = vmax.f32 %v2110_v6, %v2175_v63  ;;  %v5994_v25 = vpop.f32.mrb[27].mxu0  ;;  %v6014_v8 = vpop.f32.mrb[27].mxu1 }
 0x693   :  { %v6329_v25 = vld [vmem:[%s9423_s5 + $0x564] ss:$16 sps:$4 sm:$0xff]  }
 0x694   :  { %2703 = vmatprep.mubr.bf16.mxu0 %v6329_v25 }
 0x6af   :  { %v2239_v10 = vpop.f32.mrb[28].mxu0  ;;  %v2306_v21 = vpop.f32.mrb[28].mxu1 }
 0x6b0   :  { %v2246_v24 = vmax.f32 %v2179_v19, %v2239_v10  ;;  %v6033_v44 = vpop.f32.mrb[29].mxu0  ;;  %v6053_v48 = vpop.f32.mrb[29].mxu1 }
 0x6b1   :  { %v2242_v49 = vpop.f32.mrb[30].mxu0  ;;  %v2309_v54 = vpop.f32.mrb[30].mxu1  ;;  %v2640_v48 = vld [vmem:[%s9424_s6 + $0x120] sm:$0xff] }
 0x6b2   :  { %v2313_v4 = vmax.f32 %v2246_v24, %v2306_v21  ;;  %v2247_v33 = vmax.f32 %v2180_v26, %v2242_v49  ;;  %v6034_v37 = vpop.f32.mrb[31].mxu0  ;;  %v6054_v3 = vpop.f32.mrb[31].mxu1  ;;  %v2641_v49 = vld [vmem:[%s9424_s6 + $0x140] sm:$0xff] }
 0x6b3   :  { %v7584_v3 = vpop.permute.xlu0 %2327  ;;  %v7587_v37 = vpop.permute.xlu1 %2329 }
 0x6b4   :  { %v2314_v1 = vmax.f32 %v2247_v33, %v2309_v54  ;;  %2323 = vrot.lane.b32.xlu0 %v2313_v4, %s6433_s26 }
 0x6b6   :  { %2325 = vrot.lane.b32.xlu1 %v2314_v1, %s6433_s26  ;;  %v2478_v51 = vpack.c.bf16 %v2314_v1, %v2313_v4 }
 0x6b7   :  { %v2340_v52 = vpop.permute.xlu0 %2339  ;;  %v2342_v19 = vpop.permute.xlu1 %2341 }
 0x6b8   :  { %2335 = vrot.lane.b32.xlu0 %v2313_v4, %s6434_s27  ;;  %5941 = vmatprep.subr.bf16.mxu0 %v2478_v51  ;;  %v2351_v42 = vsel %vm2347_vm11, %v7587_v37, %v2342_v19  ;;  %v2350_v41 = vsel %vm2347_vm11, %v7584_v3, %v2340_v52  ;;  %v7710_v52 = vrot.slane %v7674_v5, %v6596_v11 }
 0x6b9   :  { %v2359_v17 = vmul.f32 %v7679_v31, %v2351_v42 }
 0x6ba   :  { %2337 = vrot.lane.b32.xlu1 %v2314_v1, %s6434_s27 }
 0x6bb   :  { %v7594_v7 = vpop.permute.xlu0 %2484  ;;  %v7597_v61 = vpop.permute.xlu1 %2486 }
 0x6bc   :  { %2480 = vrot.lane.b32.xlu0 %v2313_v4, %s6417_s12 }
 0x6be   :  { %2482 = vrot.lane.b32.xlu1 %v2314_v1, %s6417_s12 }
 0x6bf   :  { %v7601_v6 = vpop.permute.xlu0 %2496  ;;  %v7604_v63 = vpop.permute.xlu1 %2498 }
 0x6c0   :  { %2492 = vrot.lane.b32.xlu0 %v2313_v4, %s6435_s2 }
 0x6c2   :  { %2494 = vrot.lane.b32.xlu1 %v2314_v1, %s6435_s2 }
 0x6c3   :  { %v7608_v26 = vpop.permute.xlu0 %2366  ;;  %v7614_v8 = vpop.permute.xlu1 %2368 }
 0x6c4   :  { %2362 = vrot.lane.b32.xlu0 %v2313_v4, %s6436_s30 }
 0x6c6   :  { %2364 = vrot.lane.b32.xlu1 %v2314_v1, %s6436_s30 }
 0x6c7   :  { %v7618_v10 = vpop.permute.xlu0 %2378  ;;  %v7621_v21 = vpop.permute.xlu1 %2380 }
 0x6c8   :  { %2374 = vrot.lane.b32.xlu0 %v2313_v4, %s6437_s8 }
 0x6ca   :  { %2376 = vrot.lane.b32.xlu1 %v2314_v1, %s6437_s8 }
 0x6cb   :  { %v7625_v24 = vpop.permute.xlu0 %2523  ;;  %v7629_v44 = vpop.permute.xlu1 %2525 }
 0x6cc   :  { %2519 = vrot.lane.b32.xlu0 %v2313_v4, %s6438_s9 }
 0x6ce   :  { %2521 = vrot.lane.b32.xlu1 %v2314_v1, %s6438_s9 }
 0x6cf   :  { %v7641_v54 = vpop.permute.xlu1 %2537 }
 0x6d0   :  { %2531 = vrot.lane.b32.xlu0 %v2313_v4, %s6439_s18 }
 0x6d2   :  { %2533 = vrot.lane.b32.xlu1 %v2314_v1, %s6439_s18 }
 0x6d3   :  { %v7645_v33 = vpop.permute.xlu1 %2407 }
 0x6d4   :  { %2401 = vrot.lane.b32.xlu0 %v2313_v4, %s6440_s16 }
 0x6d6   :  { %2403 = vrot.lane.b32.xlu1 %v2314_v1, %s6440_s16 }
 0x6d7   :  { %v7649_v25 = vpop.permute.xlu1 %2419 }
 0x6d8   :  { %2413 = vrot.lane.b32.xlu0 %v2313_v4, %s6441_s17 }
 0x6da   :  { %2415 = vrot.lane.b32.xlu1 %v2314_v1, %s6441_s17 }
 0x6db   :  { %v7653_v14 = vpop.permute.xlu1 %2564 }
 0x6dc   :  { %2558 = vrot.lane.b32.xlu0 %v2313_v4, %s6442_s19 }
 0x6de   :  { %2560 = vrot.lane.b32.xlu1 %v2314_v1, %s6442_s19 }
 0x6e0   :  { %2570 = vrot.lane.b32.xlu0 %v2313_v4, %s6443_s20 }
 0x6e2   :  { %2572 = vrot.lane.b32.xlu1 %v2314_v1, %s6443_s20 }
 0x6e4   :  { %2440 = vrot.lane.b32.xlu0 %v2313_v4, %s6444_s21 }
 0x6e6   :  { %2442 = vrot.lane.b32.xlu1 %v2314_v1, %s6444_s21 }
 0x6e8   :  { %2452 = vrot.lane.b32.xlu0 %v2313_v4, %s6415_s0 }
 0x6ea   :  { %2454 = vrot.lane.b32.xlu1 %v2314_v1, %s6415_s0 }
 0x6ec   :  { %2597 = vrot.lane.b32.xlu0 %v2313_v4, %s6445_s15 }
 0x6ee   :  { %2599 = vrot.lane.b32.xlu1 %v2314_v1, %s6445_s15 }
 0x6f0   :  { %2609 = vrot.lane.b32.xlu0 %v2313_v4, %s6446_s11 }
 0x6f2   :  { %2611 = vrot.lane.b32.xlu1 %v2314_v1, %s6446_s11  ;;  %v7639_v1 = vpop.permute.xlu0 %2535 }
 0x6f4   :  { %2613 = vrot.lane.b32.xlu0 %v7487_v45, %s6446_s11 }
 0x6f6   :  { %2615 = vrot.lane.b32.xlu1 %v7482_v39, %s6446_s11  ;;  %v7643_v4 = vpop.permute.xlu0 %2405 }
 0x6f8   :  { %2644 = vperm.xlu0 %6119, %v2640_v48   ;;  %v7657_v48 = vpop.permute.xlu1 %2576 }
 0x6fa   :  { %2649 = vperm.xlu1 %6120, %v2641_v49   ;;  %v7647_v51 = vpop.permute.xlu0 %2417 }
 0x6fc   :  { %v7661_v49 = vpop.permute.xlu1 %2446 }
 0x6fe   :  { %v7651_v0 = vpop.permute.xlu0 %2562 }
 0x700   :  { %v7665_v50 = vpop.permute.xlu1 %2458 }
 0x702   :  { %v7655_v2 = vpop.permute.xlu0 %2574 }
 0x704   :  { %v7669_v30 = vpop.permute.xlu1 %2603 }
 0x706   :  { %v7659_v58 = vpop.permute.xlu0 %2444 }
 0x70a   :  { %v7663_v60 = vpop.permute.xlu0 %2456 }
 0x70e   :  { %v7667_v62 = vpop.permute.xlu0 %2601 }
 0x726   :  { %v2324_v29 = vpop.permute.xlu0 %2323 }
 0x728   :  { %v2326_v57 = vpop.permute.xlu1 %2325 }
 0x72a   :  { %v2336_v20 = vpop.permute.xlu0 %2335 }
 0x72b   :  { %v2348_v22 = vsel %vm2347_vm11, %v2324_v29, %v2336_v20  ;;  %v2479_v20 = vpack.c.bf16 %v7482_v39, %v7487_v45  ;;  %v2358_v29 = vmul.f32 %v7679_v31, %v2350_v41 }
 0x72c   :  { %v2338_v12 = vpop.permute.xlu1 %2337  ;;  %v2356_v23 = vmul.f32 %v7679_v31, %v2348_v22  ;;  %v7695_v22 = vrot.slane %v7674_v5, %v6706_v43 }
 0x72d   :  { %v2349_v40 = vsel %vm2347_vm11, %v2326_v57, %v2338_v12  ;;  %v2361_v12 = vpack.c.bf16 %v2359_v17, %v2358_v29 }
 0x72e   :  { %v2357_v16 = vmul.f32 %v7679_v31, %v2349_v40  ;;  %v2481_v28 = vpop.permute.xlu0 %2480 }
 0x730   :  { %v2360_v15 = vpack.c.bf16 %v2357_v16, %v2356_v23  ;;  %v2483_v18 = vpop.permute.xlu1 %2482 }
 0x732   :  { %v2493_v37 = vpop.permute.xlu0 %2492  ;;  %5942 = vmatpush3.bf16.msra.mxu0 %v2360_v15  ;;  %v2508_v15 = vsel %vm2504_vm12, %v7597_v61, %v7604_v63  ;;  %v2390_v61 = vsel %vm2386_vm13, %v7614_v8, %v7621_v21 }
 0x733   :  { %v2505_v3 = vsel %vm2504_vm12, %v2481_v28, %v2493_v37  ;;  %5943 = vmatprep.subr.bf16.mxu0 %v2479_v20  ;;  %v2507_v28 = vsel %vm2504_vm12, %v7594_v7, %v7601_v6  ;;  %v2516_v45 = vmul.f32 %v7695_v22, %v2508_v15  ;;  %v2389_v7 = vsel %vm2386_vm13, %v7608_v26, %v7618_v10 }
 0x734   :  { %v2495_v40 = vpop.permute.xlu1 %2494  ;;  %v2513_v42 = vmul.f32 %v7695_v22, %v2505_v3  ;;  %v2515_v20 = vmul.f32 %v7695_v22, %v2507_v28  ;;  %v2398_v11 = vmul.f32 %v7710_v52, %v2390_v61  ;;  %v2397_v37 = vmul.f32 %v7710_v52, %v2389_v7 }
 0x735   :  { %v2506_v57 = vsel %vm2504_vm12, %v2483_v18, %v2495_v40  ;;  %v7727_v10 = vrot.slane %v7674_v5, %v6771_v27  ;;  %v2547_v28 = vsel %vm2543_vm14, %v7629_v44, %v7641_v54  ;;  %v2546_v27 = vsel %vm2543_vm14, %v7625_v24, %v7639_v1 }
 0x736   :  { %v2514_v41 = vmul.f32 %v7695_v22, %v2506_v57  ;;  %v2363_v16 = vpop.permute.xlu0 %2362  ;;  %5944 = vmatpush3.bf16.msra.mxu0 %v2361_v12  ;;  %v2518_v40 = vpack.c.bf16 %v2516_v45, %v2515_v20  ;;  %v2400_v26 = vpack.c.bf16 %v2398_v11, %v2397_v37  ;;  %v2429_v44 = vsel %vm2425_vm15, %v7645_v33, %v7649_v25 }
 0x737   :  { %v2555_v45 = vmul.f32 %v7727_v10, %v2547_v28  ;;  %v2554_v61 = vmul.f32 %v7727_v10, %v2546_v27  ;;  %v2428_v24 = vsel %vm2425_vm15, %v7643_v4, %v7647_v51  ;;  %v7759_v51 = vrot.slane %v7674_v5, %v6744_v53 }
 0x738   :  { %v2365_v23 = vpop.permute.xlu1 %2364  ;;  %v2517_v39 = vpack.c.bf16 %v2514_v41, %v2513_v42  ;;  %v2585_v53 = vsel %vm2582_vm8, %v7651_v0, %v7655_v2  ;;  %v2466_v0 = vsel %vm178_vm3, %v7659_v58, %v7663_v60  ;;  %v7791_v58 = vld [vmem:[%s9424_s6 + $0x180] ss:$0 sm:$0xff] }
 0x739   :  { %v2557_v11 = vpack.c.bf16 %v2555_v45, %v2554_v61 }
 0x73a   :  { %v2375_v43 = vpop.permute.xlu0 %2374  ;;  %5945 = vmatprep.subr.bf16.mxu0 %v2517_v39 }
 0x73b   :  { %v2387_v18 = vsel %vm2386_vm13, %v2363_v16, %v2375_v43 }
 0x73c   :  { %v2377_v19 = vpop.permute.xlu1 %2376  ;;  %v2395_v63 = vmul.f32 %v7710_v52, %v2387_v18 }
 0x73d   :  { %v2388_v6 = vsel %vm2386_vm13, %v2365_v23, %v2377_v19  ;;  %v7742_v19 = vrot.slane %v7674_v5, %v6670_v13 }
 0x73e   :  { %v2396_v17 = vmul.f32 %v7710_v52, %v2388_v6  ;;  %v2520_v29 = vpop.permute.xlu0 %2519 }
 0x73f   :  { %v2437_v13 = vmul.f32 %v7742_v19, %v2429_v44  ;;  %v6327_v44 = vld [vmem:[%s9423_s5 + $0x560] ss:$16 sps:$4 sm:$0xff]  }
 0x740   :  { %v2399_v3 = vpack.c.bf16 %v2396_v17, %v2395_v63  ;;  %v2522_v12 = vpop.permute.xlu1 %2521  ;;  %v2436_v63 = vmul.f32 %v7742_v19, %v2428_v24 }
 0x742   :  { %v2532_v8 = vpop.permute.xlu0 %2531  ;;  %5946 = vmatpush3.bf16.msra.mxu0 %v2399_v3  ;;  %v2439_v4 = vpack.c.bf16 %v2437_v13, %v2436_v63 }
 0x743   :  { %v2544_v21 = vsel %vm2543_vm14, %v2520_v29, %v2532_v8  ;;  %5947 = vmatprep.subr.bf16.mxu0 %v2518_v40 }
 0x744   :  { %v2534_v57 = vpop.permute.xlu1 %2533  ;;  %v2552_v41 = vmul.f32 %v7727_v10, %v2544_v21 }
 0x745   :  { %v2545_v42 = vsel %vm2543_vm14, %v2522_v12, %v2534_v57  ;;  %v2586_v57 = vsel %vm2582_vm8, %v7653_v14, %v7657_v48  ;;  %v2467_v14 = vsel %vm178_vm3, %v7661_v49, %v7665_v50 }
 0x746   :  { %v2553_v16 = vmul.f32 %v7727_v10, %v2545_v42  ;;  %v2402_v23 = vpop.permute.xlu0 %2401  ;;  %5948 = vmatpush3.bf16.msra.mxu0 %v2400_v26 }
 0x748   :  { %v2404_v39 = vpop.permute.xlu1 %2403  ;;  %v2556_v15 = vpack.c.bf16 %v2553_v16, %v2552_v41  ;;  %v2594_v16 = vmul.f32 %v7759_v51, %v2586_v57 }
 0x74a   :  { %v2414_v43 = vpop.permute.xlu0 %2413  ;;  %5949 = vmatprep.subr.bf16.mxu0 %v2556_v15  ;;  %v2593_v15 = vmul.f32 %v7759_v51, %v2585_v53 }
 0x74b   :  { %v2426_v18 = vsel %vm2425_vm15, %v2402_v23, %v2414_v43  ;;  %v7774_v23 = vrot.slane %v7674_v5, %v6655_v59 }
 0x74c   :  { %v2416_v20 = vpop.permute.xlu1 %2415  ;;  %v2434_v54 = vmul.f32 %v7742_v19, %v2426_v18  ;;  %v2596_v45 = vpack.c.bf16 %v2594_v16, %v2593_v15 }
 0x74d   :  { %v2427_v1 = vsel %vm2425_vm15, %v2404_v39, %v2416_v20  ;;  %v2475_v59 = vmul.f32 %v7774_v23, %v2467_v14  ;;  %v2474_v5 = vmul.f32 %v7774_v23, %v2466_v0 }
 0x74e   :  { %v2435_v7 = vmul.f32 %v7742_v19, %v2427_v1  ;;  %v2559_v6 = vpop.permute.xlu0 %2558 }
 0x74f   :  { %v2477_v49 = vpack.c.bf16 %v2475_v59, %v2474_v5 }
 0x750   :  { %v2438_v17 = vpack.c.bf16 %v2435_v7, %v2434_v54  ;;  %v2561_v29 = vpop.permute.xlu1 %2560 }
 0x752   :  { %v2571_v33 = vpop.permute.xlu0 %2570  ;;  %5950 = vmatpush3.bf16.msra.mxu0 %v2438_v17 }
 0x753   :  { %v2583_v25 = vsel %vm2582_vm8, %v2559_v6, %v2571_v33  ;;  %5951 = vmatprep.subr.bf16.mxu0 %v2557_v11  ;;  %v9554_v6 = vmov 0.0  }
 0x754   :  { %v2573_v37 = vpop.permute.xlu1 %2572  ;;  %v2591_v12 = vmul.f32 %v7759_v51, %v2583_v25  ;;  %v9555_v25 = vmov 0  }
 0x755   :  { %v2584_v3 = vsel %vm2582_vm8, %v2561_v29, %v2573_v37 }
 0x756   :  { %v2592_v40 = vmul.f32 %v7759_v51, %v2584_v3  ;;  %v2441_v8 = vpop.permute.xlu0 %2440  ;;  %5952 = vmatpush3.bf16.msra.mxu0 %v2439_v4 }
 0x758   :  { %v2443_v21 = vpop.permute.xlu1 %2442  ;;  %v2595_v26 = vpack.c.bf16 %v2592_v40, %v2591_v12 }
 0x75a   :  { %v2453_v42 = vpop.permute.xlu0 %2452  ;;  %5953 = vmatprep.subr.bf16.mxu0 %v2595_v26 }
 0x75b   :  { %v2464_v41 = vsel %vm178_vm3, %v2441_v8, %v2453_v42 }
 0x75c   :  { %v2455_v39 = vpop.permute.xlu1 %2454  ;;  %v2472_v48 = vmul.f32 %v7774_v23, %v2464_v41 }
 0x75d   :  { %v2465_v2 = vsel %vm178_vm3, %v2443_v21, %v2455_v39 }
 0x75e   :  { %v2473_v28 = vmul.f32 %v7774_v23, %v2465_v2  ;;  %v2598_v27 = vpop.permute.xlu0 %2597 }
 0x760   :  { %v2476_v43 = vpack.c.bf16 %v2473_v28, %v2472_v48  ;;  %v2600_v18 = vpop.permute.xlu1 %2599  ;;  %v6331_v48 = vld [vmem:[%s9423_s5 + $0x584] ss:$16 sps:$4 sm:$0xff]  }
 0x761   :  { %v2896_v28 = vld [vmem:[%s9424_s6 + $0x1a0] sm:$0xff] }
 0x762   :  { %v2610_v50 = vpop.permute.xlu0 %2609  ;;  %5954 = vmatpush3.bf16.msra.mxu0 %v2476_v43 }
 0x763   :  { %v2622_v60 = vsel %vm2621_vm6, %v2598_v27, %v2610_v50  ;;  %5955 = vmatprep.subr.bf16.mxu0 %v2596_v45  ;;  %v2897_v27 = vld [vmem:[%s9424_s6 + $0x1c0] sm:$0xff] }
 0x764   :  { %v2612_v20 = vpop.permute.xlu1 %2611  ;;  %v2630_v24 = vmul.f32 %v7791_v58, %v2622_v60 }
 0x765   :  { %v2623_v61 = vsel %vm2621_vm6, %v2600_v18, %v2612_v20 }
 0x766   :  { %v2631_v1 = vmul.f32 %v7791_v58, %v2623_v61  ;;  %v2614_v54 = vpop.permute.xlu0 %2613  ;;  %5956 = vmatpush3.bf16.msra.mxu0 %v2477_v49 }
 0x767   :  { %v2624_v7 = vsel %vm2621_vm6, %v7667_v62, %v2614_v54  ;;  %6063 = vmatprep.subr.bf16.mxu0 %v9554_v6  ;;  %v6330_v62 = vld [vmem:[%s9423_s5 + $0x568] ss:$16 sps:$4 sm:$0xff]  }
 0x768   :  { %v2634_v13 = vpack.c.bf16 %v2631_v1, %v2630_v24  ;;  %v2616_v63 = vpop.permute.xlu1 %2615  ;;  %v2632_v29 = vmul.f32 %v7791_v58, %v2624_v7 }
 0x769   :  { %v2625_v17 = vsel %vm2621_vm6, %v7669_v30, %v2616_v63  ;;  %2704 = vmatmul.mubr.bf16.vlgmr.msra.gmra.mrb[32].mxu0 %v6327_v44 }
 0x76a   :  { %v2633_v11 = vmul.f32 %v7791_v58, %v2625_v17  ;;  %6056 = vmatpush3.bf16.msra.mxu1 %v2634_v13  ;;  %6067 = vmatprep.mubr.msk.bf16.mxu0 %vm6432_vm10, %v9554_v6 }
 0x76b   :  { %6057 = vmatprep.subr.bf16.mxu1 %v9554_v6 }
 0x76c   :  { %v2635_v33 = vpack.c.bf16 %v2633_v11, %v2632_v29 }
 0x76e   :  { %6058 = vmatpush3.bf16.msra.mxu1 %v2635_v33 }
 0x76f   :  { %2920 = vmatprep.subr.bf16.mxu1 %v9555_v25 }
 0x771   :  { %6060 = vmatmul.mubr.msk.bf16.vlgmr.msra.gmra.mrb[32].mxu1 %vm2667_vm7, %v6330_v62 }
 0x772   :  { %5665 = vmatprep.mubr.msk.bf16.mxu1 %vm94_vm0, %v6331_v48 }
 0x777   :  { %v2645_v8 = vpop.permute.xlu0 %2644 }
 0x779   :  { %v2650_v26 = vpop.permute.xlu1 %2649 }
 0x83c   :  { %v5957_v30 = vpop.f32.mrb[32].mxu0 }
 0x83d   :  { %v5958_v4 = vpop.f32.mrb[33].mxu0 }
 0x83e   :  { %v5959_v37 = vadd.f32 %v5958_v4, %v5957_v30  ;;  %v5960_v3 = vpop.f32.mrb[34].mxu0 }
 0x83f   :  { %v5961_v12 = vpop.f32.mrb[35].mxu0 }
 0x840   :  { %v5962_v40 = vadd.f32 %v5961_v12, %v5960_v3  ;;  %v2706_v21 = vadd.f32 %v5959_v37, %v2645_v8 }
 0x842   :  { %v2709_v41 = vadd.f32 %v5962_v40, %v2650_v26 }
 0x844   :  { %v2746_v57 = vpop.f32.mrb[32].mxu1 }
 0x845   :  { %v2747_v53 = vadd.f32 %v2746_v57, %v2706_v21  ;;  %v6061_v42 = vpop.f32.mrb[33].mxu1 }
 0x846   :  { %v2749_v16 = vpop.f32.mrb[34].mxu1 }
 0x847   :  { %v7815_v39 = vmax.f32 %v2747_v53, 0.0  ;;  %v2750_v15 = vadd.f32 %v2749_v16, %v2709_v41  ;;  %v6062_v14 = vpop.f32.mrb[35].mxu1 }
 0x849   :  { %v7817_v0 = vmax.f32 %v2750_v15, 0.0  ;;  %2757 = vrot.lane.b32.xlu0 %v7815_v39, %s6433_s26 }
 0x84b   :  { %2759 = vrot.lane.b32.xlu1 %v7817_v0, %s6433_s26  ;;  %v2825_v2 = vpack.c.bf16 %v7817_v0, %v7815_v39 }
 0x84d   :  { %2763 = vrot.lane.b32.xlu0 %v7815_v39, %s6434_s27 }
 0x84f   :  { %2765 = vrot.lane.b32.xlu1 %v7817_v0, %s6434_s27  ;;  %s9560_s27 = smov 15  }
 0x851   :  { %2774 = vrot.lane.b32.xlu0 %v7815_v39, %s6436_s30 }
 0x853   :  { %2776 = vrot.lane.b32.xlu1 %v7817_v0, %s6436_s30 }
 0x855   :  { %2780 = vrot.lane.b32.xlu0 %v7815_v39, %s6437_s8 }
 0x857   :  { %2782 = vrot.lane.b32.xlu1 %v7817_v0, %s6437_s8 }
 0x859   :  { %2791 = vrot.lane.b32.xlu0 %v7815_v39, %s6440_s16 }
 0x85b   :  { %2793 = vrot.lane.b32.xlu1 %v7817_v0, %s6440_s16 }
 0x85d   :  { %2797 = vrot.lane.b32.xlu0 %v7815_v39, %s6441_s17 }
 0x85f   :  { %2799 = vrot.lane.b32.xlu1 %v7817_v0, %s6441_s17 }
 0x861   :  { %2808 = vrot.lane.b32.xlu0 %v7815_v39, %s6444_s21 }
 0x863   :  { %2810 = vrot.lane.b32.xlu1 %v7817_v0, %s6444_s21 }
 0x865   :  { %2814 = vrot.lane.b32.xlu0 %v7815_v39, %s6415_s0 }
 0x867   :  { %2816 = vrot.lane.b32.xlu1 %v7817_v0, %s6415_s0 }
 0x869   :  { %2826 = vrot.lane.b32.xlu0 %v7815_v39, %s6417_s12 }
 0x86b   :  { %2828 = vrot.lane.b32.xlu1 %v7817_v0, %s6417_s12 }
 0x86d   :  { %2832 = vrot.lane.b32.xlu0 %v7815_v39, %s6435_s2 }
 0x86f   :  { %2834 = vrot.lane.b32.xlu1 %v7817_v0, %s6435_s2  ;;  %s9562_s2 = smov 112  }
 0x871   :  { %2843 = vrot.lane.b32.xlu0 %v7815_v39, %s6438_s9 }
 0x873   :  { %2845 = vrot.lane.b32.xlu1 %v7817_v0, %s6438_s9 }
 0x875   :  { %2849 = vrot.lane.b32.xlu0 %v7815_v39, %s6439_s18 }
 0x877   :  { %2851 = vrot.lane.b32.xlu1 %v7817_v0, %s6439_s18 }
 0x879   :  { %2860 = vrot.lane.b32.xlu0 %v7815_v39, %s6442_s19 }
 0x87b   :  { %2862 = vrot.lane.b32.xlu1 %v7817_v0, %s6442_s19 }
 0x87d   :  { %2866 = vrot.lane.b32.xlu0 %v7815_v39, %s6443_s20 }
 0x87f   :  { %2868 = vrot.lane.b32.xlu1 %v7817_v0, %s6443_s20 }
 0x881   :  { %2877 = vrot.lane.b32.xlu0 %v7815_v39, %s6445_s15 }
 0x883   :  { %2879 = vrot.lane.b32.xlu1 %v7817_v0, %s6445_s15 }
 0x885   :  { %2883 = vrot.lane.b32.xlu0 %v7815_v39, %s6446_s11 }
 0x887   :  { %2885 = vrot.lane.b32.xlu1 %v7817_v0, %s6446_s11 }
 0x889   :  { %2900 = vperm.xlu0 %6119, %v2896_v28  }
 0x88b   :  { %2905 = vperm.xlu1 %6120, %v2897_v27  }
 0x8bb   :  { %v2758_v59 = vpop.permute.xlu0 %2757 }
 0x8bd   :  { %v2760_v5 = vpop.permute.xlu1 %2759 }
 0x8bf   :  { %v2764_v43 = vpop.permute.xlu0 %2763 }
 0x8c0   :  { %v2769_v18 = vsel %vm2347_vm11, %v2758_v59, %v2764_v43 }
 0x8c1   :  { %v2766_v45 = vpop.permute.xlu1 %2765  ;;  %v2771_v60 = vmul.f32 %v2769_v18, %v7679_v31 }
 0x8c2   :  { %v2770_v50 = vsel %vm2347_vm11, %v2760_v5, %v2766_v45 }
 0x8c3   :  { %v2772_v49 = vmul.f32 %v2770_v50, %v7679_v31  ;;  %v2775_v20 = vpop.permute.xlu0 %2774 }
 0x8c5   :  { %v2773_v61 = vpack.c.bf16 %v2772_v49, %v2771_v60  ;;  %v2777_v44 = vpop.permute.xlu1 %2776 }
 0x8c7   :  { %2921 = vmatpush1.bf16.msra.mxu1 %v2773_v61  ;;  %v2781_v24 = vpop.permute.xlu0 %2780 }
 0x8c8   :  { %v2786_v1 = vsel %vm2386_vm13, %v2775_v20, %v2781_v24  ;;  %2922 = vmatprep.subr.bf16.mxu1 %v9555_v25 }
 0x8c9   :  { %v2783_v54 = vpop.permute.xlu1 %2782  ;;  %v2788_v13 = vmul.f32 %v2786_v1, %v7710_v52 }
 0x8ca   :  { %v2787_v7 = vsel %vm2386_vm13, %v2777_v44, %v2783_v54  ;;  %vm9600_vm13 = vcmask 916480  }
 0x8cb   :  { %v2789_v63 = vmul.f32 %v2787_v7, %v7710_v52  ;;  %v2792_v17 = vpop.permute.xlu0 %2791 }
 0x8cd   :  { %v2790_v29 = vpack.c.bf16 %v2789_v63, %v2788_v13  ;;  %v2794_v11 = vpop.permute.xlu1 %2793 }
 0x8cf   :  { %2923 = vmatpush1.bf16.msra.mxu1 %v2790_v29  ;;  %v2798_v31 = vpop.permute.xlu0 %2797 }
 0x8d0   :  { %v2803_v33 = vsel %vm2425_vm15, %v2792_v17, %v2798_v31  ;;  %2924 = vmatprep.subr.bf16.mxu1 %v9555_v25 }
 0x8d1   :  { %v2800_v62 = vpop.permute.xlu1 %2799  ;;  %v2805_v4 = vmul.f32 %v2803_v33, %v7742_v19 }
 0x8d2   :  { %v2804_v30 = vsel %vm2425_vm15, %v2794_v11, %v2800_v62  ;;  %v6334_v62 = vld [vmem:[%s9423_s5 + $0x5a0] ss:$16 sps:$4 sm:$0xff]  }
 0x8d3   :  { %v2806_v37 = vmul.f32 %v2804_v30, %v7742_v19  ;;  %v2809_v3 = vpop.permute.xlu0 %2808  ;;  %6064 = vmatpush3.bf16.msra.mxu0 %v6334_v62 }
 0x8d4   :  { %6065 = vmatprep.subr.bf16.mxu0 %v9554_v6 }
 0x8d5   :  { %v2807_v12 = vpack.c.bf16 %v2806_v37, %v2805_v4  ;;  %v2811_v40 = vpop.permute.xlu1 %2810 }
 0x8d7   :  { %2925 = vmatpush1.bf16.msra.mxu1 %v2807_v12  ;;  %v2815_v52 = vpop.permute.xlu0 %2814 }
 0x8d8   :  { %v2820_v8 = vsel %vm178_vm3, %v2809_v3, %v2815_v52  ;;  %2926 = vmatprep.subr.bf16.mxu1 %v9555_v25 }
 0x8d9   :  { %v2817_v21 = vpop.permute.xlu1 %2816  ;;  %v2822_v57 = vmul.f32 %v2820_v8, %v7774_v23 }
 0x8da   :  { %v2821_v26 = vsel %vm178_vm3, %v2811_v40, %v2817_v21 }
 0x8db   :  { %v2823_v53 = vmul.f32 %v2821_v26, %v7774_v23  ;;  %v2827_v42 = vpop.permute.xlu0 %2826 }
 0x8dd   :  { %v2824_v41 = vpack.c.bf16 %v2823_v53, %v2822_v57  ;;  %v2829_v16 = vpop.permute.xlu1 %2828 }
 0x8df   :  { %2927 = vmatpush1.bf16.msra.mxu1 %v2824_v41  ;;  %v2833_v19 = vpop.permute.xlu0 %2832 }
 0x8e0   :  { %v2838_v15 = vsel %vm2504_vm12, %v2827_v42, %v2833_v19  ;;  %2928 = vmatprep.subr.bf16.mxu1 %v9555_v25 }
 0x8e1   :  { %v2835_v14 = vpop.permute.xlu1 %2834  ;;  %v2840_v28 = vmul.f32 %v2838_v15, %v7695_v22  ;;  %v7968_v15 = vld [vmem:[%s9427_s3] sm:$0xff] }
 0x8e2   :  { %v2839_v48 = vsel %vm2504_vm12, %v2829_v16, %v2835_v14  ;;  %v3184_v14 = vld [vmem:[%s9424_s6 + $0x1e0] sm:$0xff] }
 0x8e3   :  { %v2841_v27 = vmul.f32 %v2839_v48, %v7695_v22  ;;  %v2844_v59 = vpop.permute.xlu0 %2843  ;;  %2929 = vmatpush1.bf16.msra.mxu1 %v2825_v2  ;;  %v8018_v48 = vld [vmem:[%s9423_s5 + $0x5e0] sm:$0xff] }
 0x8e4   :  { %2930 = vmatprep.subr.bf16.mxu1 %v9555_v25 }
 0x8e5   :  { %v2842_v23 = vpack.c.bf16 %v2841_v27, %v2840_v28  ;;  %v2846_v5 = vpop.permute.xlu1 %2845  ;;  %v5670_v28 = vcombine.high %v8018_v48, %v8018_v48 }
 0x8e7   :  { %v2850_v43 = vpop.permute.xlu0 %2849  ;;  %2931 = vmatpush1.bf16.msra.mxu1 %v2842_v23 }
 0x8e8   :  { %v2855_v18 = vsel %vm2543_vm14, %v2844_v59, %v2850_v43  ;;  %2932 = vmatprep.subr.bf16.mxu1 %v9555_v25 }
 0x8e9   :  { %v2852_v45 = vpop.permute.xlu1 %2851  ;;  %v2857_v22 = vmul.f32 %v2855_v18, %v7727_v10 }
 0x8ea   :  { %v2856_v50 = vsel %vm2543_vm14, %v2846_v5, %v2852_v45 }
 0x8eb   :  { %v2858_v60 = vmul.f32 %v2856_v50, %v7727_v10  ;;  %v2861_v49 = vpop.permute.xlu0 %2860 }
 0x8ed   :  { %v2859_v39 = vpack.c.bf16 %v2858_v60, %v2857_v22  ;;  %v2863_v0 = vpop.permute.xlu1 %2862 }
 0x8ef   :  { %v2867_v2 = vpop.permute.xlu0 %2866  ;;  %2933 = vmatpush1.bf16.msra.mxu1 %v2859_v39 }
 0x8f0   :  { %v2872_v20 = vsel %vm2582_vm8, %v2861_v49, %v2867_v2  ;;  %2934 = vmatprep.subr.bf16.mxu1 %v9555_v25 }
 0x8f1   :  { %v2869_v61 = vpop.permute.xlu1 %2868  ;;  %v2874_v24 = vmul.f32 %v2872_v20, %v7759_v51 }
 0x8f2   :  { %v2873_v44 = vsel %vm2582_vm8, %v2863_v0, %v2869_v61 }
 0x8f3   :  { %v2875_v1 = vmul.f32 %v2873_v44, %v7759_v51  ;;  %v2878_v54 = vpop.permute.xlu0 %2877  ;;  %v6333_v51 = vld [vmem:[%s9423_s5 + $0x580] ss:$16 sps:$4 sm:$0xff]  }
 0x8f5   :  { %v2876_v7 = vpack.c.bf16 %v2875_v1, %v2874_v24  ;;  %v2880_v13 = vpop.permute.xlu1 %2879 }
 0x8f7   :  { %v2884_v10 = vpop.permute.xlu0 %2883  ;;  %2935 = vmatpush1.bf16.msra.mxu1 %v2876_v7 }
 0x8f8   :  { %v2889_v63 = vsel %vm2621_vm6, %v2878_v54, %v2884_v10  ;;  %2936 = vmatprep.subr.bf16.mxu1 %v9555_v25 }
 0x8f9   :  { %v2886_v17 = vpop.permute.xlu1 %2885  ;;  %v2891_v11 = vmul.f32 %v7791_v58, %v2889_v63 }
 0x8fa   :  { %v2890_v29 = vsel %vm2621_vm6, %v2880_v13, %v2886_v17  ;;  %vm3196_vm6 = vcmask 719872  }
 0x8fb   :  { %v2892_v31 = vmul.f32 %v7791_v58, %v2890_v29  ;;  %v6335_v58 = vld [vmem:[%s9423_s5 + $0x5c0] ss:$16 sps:$4 sm:$0xff]  }
 0x8fc   :  { %6066 = vmatpush3.bf16.msra.mxu0 %v6335_v58 }
 0x8fd   :  { %v2893_v33 = vpack.c.bf16 %v2892_v31, %v2891_v11  ;;  %3203 = vmatprep.subr.bf16.mxu0 %v9555_v25 }
 0x8ff   :  { %2937 = vmatpush1.bf16.msra.mxu1 %v2893_v33 }
 0x900   :  { %6071 = vmatprep.subr.bf16.mxu1 %v9554_v6 }
 0x902   :  { %2953 = vmatmul.mubr.bf16.vlgmr.msra.gmra.mrb[36].mxu1 %v6333_v51 }
 0x903   :  { %6081 = vmatprep.mubr.msk.bf16.mxu1 %vm6432_vm10, %v9554_v6 }
 0x908   :  { %v2901_v30 = vpop.permute.xlu0 %2900 }
 0x90a   :  { %v2906_v12 = vpop.permute.xlu1 %2905 }
 0x9d5   :  { %v2954_v4 = vpop.f32.mrb[36].mxu1 }
 0x9d6   :  { %v2955_v37 = vadd.f32 %v2954_v4, %v2901_v30  ;;  %v2956_v3 = vpop.f32.mrb[37].mxu1 }
 0x9d7   :  { %v2957_v40 = vpop.f32.mrb[38].mxu1 }
 0x9d8   :  { %v2958_v52 = vadd.f32 %v2957_v40, %v2906_v12  ;;  %v2959_v8 = vpop.f32.mrb[39].mxu1  ;;  %v2961_v21 = vmax.f32 %v2955_v37, 0.0 }
 0x9da   :  { %v2962_v26 = vmax.f32 %v2958_v52, 0.0 }
 0x9dc   :  { %v2967_v57 = vpack.c.bf16 %v2962_v26, %v2961_v21 }
 0x9de   :  { %6068 = vmatmul.mubr.msk.bf16.vlgmr.msra.gmra.mrb[36].mxu0 %vm2667_vm7, %v2967_v57  ;;  %vm9588_vm7 = vcmask 924672  }
 0x9df   :  { %5671 = vmatprep.mubr.msk.bf16.mxu0 %vm3196_vm6, %v5670_v28  ;;  %vm9589_vm8 = vmmov %vm9588_vm7 }
 0x9e0   :  { %vm9596_vm10 = vmmov %vm9588_vm7 }
 0x9e1   :  { %vm9597_vm11 = vmmov %vm9588_vm7 }
 0x9e2   :  { %vm9599_vm12 = vmmov %vm9588_vm7 }
 0x9e3   :  { %vm9603_vm14 = vmmov %vm9588_vm7 }
 0x9e4   :  { %vm9605_vm15 = vmmov %vm9588_vm7 }
 0x9e5   :  { %vm9608_vm6 = vmmov %vm9588_vm7 }
 0xab1   :  { %v7953_v53 = vpop.f32.mrb[36].mxu0 }
 0xab2   :  { %3028 = vrot.lane.b32.xlu0 %v7953_v53, %s6422_s22  ;;  %v6069_v42 = vpop.f32.mrb[37].mxu0 }
 0xab3   :  { %v7957_v41 = vpop.f32.mrb[38].mxu0 }
 0xab4   :  { %3030 = vrot.lane.b32.xlu1 %v7957_v41, %s6422_s22  ;;  %v6070_v16 = vpop.f32.mrb[39].mxu0  ;;  %v3084_v19 = vpack.c.bf16 %v7957_v41, %v7953_v53 }
 0xab6   :  { %3042 = vrot.lane.b32.xlu0 %v7953_v53, %s6423_s1 }
 0xab8   :  { %3044 = vrot.lane.b32.xlu1 %v7957_v41, %s6423_s1 }
 0xaba   :  { %3032 = vrot.lane.b32.xlu0 %v7968_v15, %s6422_s22 }
 0xabc   :  { %3046 = vrot.lane.b32.xlu1 %v7968_v15, %s6423_s1 }
 0xabe   :  { %3056 = vrot.lane.b32.xlu0 %v7953_v53, %s6424_s23 }
 0xac0   :  { %3058 = vrot.lane.b32.xlu1 %v7957_v41, %s6424_s23 }
 0xac2   :  { %3070 = vrot.lane.b32.xlu0 %v7953_v53, %s6415_s0 }
 0xac4   :  { %3072 = vrot.lane.b32.xlu1 %v7957_v41, %s6415_s0 }
 0xac6   :  { %3060 = vrot.lane.b32.xlu0 %v7968_v15, %s6424_s23 }
 0xac8   :  { %3074 = vrot.lane.b32.xlu1 %v7968_v15, %s6415_s0 }
 0xaca   :  { %3086 = vrot.lane.b32.xlu0 %v7953_v53, %s6417_s12 }
 0xacc   :  { %3088 = vrot.lane.b32.xlu1 %v7957_v41, %s6417_s12 }
 0xace   :  { %3090 = vrot.lane.b32.xlu0 %v7968_v15, %s6417_s12 }
 0xad0   :  { %3100 = vrot.lane.b32.xlu1 %v7953_v53, %s6425_s24 }
 0xad2   :  { %3102 = vrot.lane.b32.xlu0 %v7957_v41, %s6425_s24 }
 0xad4   :  { %3114 = vrot.lane.b32.xlu1 %v7953_v53, %s6426_s25 }
 0xad6   :  { %3116 = vrot.lane.b32.xlu0 %v7957_v41, %s6426_s25 }
 0xad8   :  { %3104 = vrot.lane.b32.xlu1 %v7968_v15, %s6425_s24 }
 0xada   :  { %3118 = vrot.lane.b32.xlu0 %v7968_v15, %s6426_s25 }
 0xadc   :  { %3128 = vrot.lane.b32.xlu1 %v7953_v53, %s6427_s29 }
 0xade   :  { %3130 = vrot.lane.b32.xlu0 %v7957_v41, %s6427_s29 }
 0xae0   :  { %3132 = vrot.lane.b32.xlu1 %v7968_v15, %s6427_s29 }
 0xae2   :  { %3187 = vperm.xlu0 %6119, %v3184_v14  }
 0xb24   :  { %v3029_v27 = vpop.permute.xlu0 %3028 }
 0xb25   :  { %v3037_v23 = vmul.f32 %v3029_v27, %v7301_v32 }
 0xb26   :  { %v3031_v59 = vpop.permute.xlu1 %3030 }
 0xb27   :  { %v3038_v5 = vmul.f32 %v3031_v59, %v7301_v32 }
 0xb28   :  { %v3043_v43 = vpop.permute.xlu0 %3042 }
 0xb29   :  { %v3040_v18 = vpack.c.bf16 %v3038_v5, %v3037_v23  ;;  %v3051_v50 = vmul.f32 %v3043_v43, %v7305_v38  ;;  %v3085_v43 = vpack.c.bf16 %v7968_v15, %v7968_v15 }
 0xb2a   :  { %v3045_v45 = vpop.permute.xlu1 %3044 }
 0xb2b   :  { %v3052_v22 = vmul.f32 %v3045_v45, %v7305_v38  ;;  %3204 = vmatpush1.bf16.msra.mxu0 %v3040_v18 }
 0xb2c   :  { %v3033_v60 = vpop.permute.xlu0 %3032  ;;  %3205 = vmatprep.subr.bf16.mxu0 %v9555_v25 }
 0xb2d   :  { %v3054_v49 = vpack.c.bf16 %v3052_v22, %v3051_v50  ;;  %v3039_v39 = vmul.f32 %v3033_v60, %v7301_v32 }
 0xb2e   :  { %v3047_v0 = vpop.permute.xlu1 %3046 }
 0xb2f   :  { %v3145_v2 = vrot.slane %v3054_v49, 4  ;;  %v3041_v20 = vpack.c.bf16 %v3039_v39, %v3039_v39  ;;  %v3053_v61 = vmul.f32 %v3047_v0, %v7305_v38 }
 0xb30   :  { %v3057_v44 = vpop.permute.xlu0 %3056 }
 0xb31   :  { %v3055_v24 = vpack.c.bf16 %v3053_v61, %v3053_v61  ;;  %v3169_v1 = vsel %vm415_vm2, %v3041_v20, %v3145_v2  ;;  %v3065_v17 = vmul.f32 %v3057_v44, %v7310_v47 }
 0xb32   :  { %3206 = vmatpush1.bf16.msra.mxu0 %v3169_v1  ;;  %v3059_v54 = vpop.permute.xlu1 %3058 }
 0xb33   :  { %v3146_v7 = vrot.slane %v3055_v24, 4  ;;  %3207 = vmatprep.subr.bf16.mxu0 %v9555_v25  ;;  %v3066_v13 = vmul.f32 %v3059_v54, %v7310_v47 }
 0xb34   :  { %v3071_v10 = vpop.permute.xlu0 %3070 }
 0xb35   :  { %v3147_v63 = vsel %vm415_vm2, %v3145_v2, %v3146_v7  ;;  %v3079_v11 = vmul.f32 %v3071_v10, %v7316_v56  ;;  %v3068_v33 = vpack.c.bf16 %v3066_v13, %v3065_v17  ;;  %v8069_v17 = vld [vmem:[%s9424_s6 + $0xc0] ss:$0 sm:$0xff] }
 0xb36   :  { %3208 = vmatpush1.bf16.msra.mxu0 %v3147_v63  ;;  %v3073_v29 = vpop.permute.xlu1 %3072 }
 0xb37   :  { %v3080_v31 = vmul.f32 %v3073_v29, %v7316_v56  ;;  %3209 = vmatprep.subr.bf16.mxu0 %v9555_v25 }
 0xb38   :  { %v3061_v51 = vpop.permute.xlu0 %3060 }
 0xb39   :  { %v3082_v62 = vpack.c.bf16 %v3080_v31, %v3079_v11  ;;  %v3067_v58 = vmul.f32 %v3061_v51, %v7310_v47 }
 0xb3a   :  { %3210 = vmatpush1.bf16.msra.mxu0 %v3068_v33  ;;  %v3075_v30 = vpop.permute.xlu1 %3074 }
 0xb3b   :  { %v3151_v4 = vrot.slane %v3082_v62, 4  ;;  %v3069_v37 = vpack.c.bf16 %v3067_v58, %v3067_v58  ;;  %v3081_v3 = vmul.f32 %v3075_v30, %v7316_v56  ;;  %3211 = vmatprep.subr.bf16.mxu0 %v9555_v25  ;;  %v5669_v30 = vcombine.low %v8018_v48, %v8018_v48  ;;  %v3311_v48 = vld [vmem:[%s9424_s6 + $0x200] sm:$0xff] }
 0xb3c   :  { %v3087_v12 = vpop.permute.xlu0 %3086 }
 0xb3d   :  { %v3083_v40 = vpack.c.bf16 %v3081_v3, %v3081_v3  ;;  %v3173_v52 = vsel %vm415_vm2, %v3069_v37, %v3151_v4  ;;  %v3095_v26 = vmul.f32 %v3087_v12, %v7324_v9 }
 0xb3e   :  { %3212 = vmatpush1.bf16.msra.mxu0 %v3173_v52  ;;  %v3089_v8 = vpop.permute.xlu1 %3088 }
 0xb3f   :  { %v3152_v21 = vrot.slane %v3083_v40, 4  ;;  %v3096_v57 = vmul.f32 %v3089_v8, %v7324_v9  ;;  %3213 = vmatprep.subr.bf16.mxu0 %v9555_v25 }
 0xb40   :  { %v3091_v42 = vpop.permute.xlu0 %3090 }
 0xb41   :  { %v3098_v16 = vpack.c.bf16 %v3096_v57, %v3095_v26  ;;  %v3097_v14 = vmul.f32 %v3091_v42, %v7324_v9  ;;  %v3153_v28 = vsel %vm415_vm2, %v3151_v4, %v3152_v21  ;;  %v6341_v21 = vld [vmem:[%s9423_s5 + $0x628] ss:$16 sps:$4 sm:$0xff]   ;;  %v6343_v26 = vld [vmem:[%s9423_s5 + $0x62c] ss:$16 sps:$4 sm:$0xff]  }
 0xb42   :  { %3214 = vmatpush1.bf16.msra.mxu0 %v3153_v28  ;;  %v3101_v27 = vpop.permute.xlu1 %3100  ;;  %v6349_v57 = vld [vmem:[%s9423_s5 + $0x64c] ss:$16 sps:$4 sm:$0xff]   ;;  %v6347_v42 = vld [vmem:[%s9423_s5 + $0x648] ss:$16 sps:$4 sm:$0xff]  }
 0xb43   :  { %3215 = vmatprep.subr.bf16.mxu0 %v9555_v25  ;;  %v3157_v23 = vrot.slane %v3098_v16, 4  ;;  %v3099_v5 = vpack.c.bf16 %v3097_v14, %v3097_v14  ;;  %v3109_v20 = vmul.f32 %v3101_v27, %v7332_v46  ;;  %v6355_v16 = vld [vmem:[%s9423_s5 + $0x66c] ss:$16 sps:$4 sm:$0xff]   ;;  %v6353_v14 = vld [vmem:[%s9423_s5 + $0x668] ss:$16 sps:$4 sm:$0xff]  }
 0xb44   :  { %v3103_v59 = vpop.permute.xlu0 %3102  ;;  %v6361_v28 = vld [vmem:[%s9423_s5 + $0x68c] ss:$16 sps:$4 sm:$0xff]   ;;  %v6359_v27 = vld [vmem:[%s9423_s5 + $0x688] ss:$16 sps:$4 sm:$0xff]  }
 0xb45   :  { %v3158_v50 = vrot.slane %v3099_v5, 4  ;;  %v3177_v60 = vsel %vm415_vm2, %v3085_v43, %v3157_v23  ;;  %v3110_v15 = vmul.f32 %v3103_v59, %v7332_v46  ;;  %v6367_v59 = vld [vmem:[%s9423_s5 + $0x6ac] ss:$16 sps:$4 sm:$0xff]   ;;  %v6371_v43 = vld [vmem:[%s9423_s5 + $0x6c8] ss:$16 sps:$4 sm:$0xff]  }
 0xb46   :  { %v3115_v18 = vpop.permute.xlu1 %3114  ;;  %3216 = vmatpush1.bf16.msra.mxu0 %v3084_v19  ;;  %v6373_v5 = vld [vmem:[%s9423_s5 + $0x6cc] ss:$16 sps:$4 sm:$0xff]  }
 0xb47   :  { %3217 = vmatprep.subr.bf16.mxu0 %v9555_v25  ;;  %v3123_v39 = vmul.f32 %v3115_v18, %v7338_v55  ;;  %v3159_v19 = vsel %vm415_vm2, %v3157_v23, %v3158_v50  ;;  %v3112_v61 = vpack.c.bf16 %v3110_v15, %v3109_v20  ;;  %v6365_v23 = vld [vmem:[%s9423_s5 + $0x6a8] ss:$16 sps:$4 sm:$0xff]   ;;  %v6379_v18 = vld [vmem:[%s9423_s5 + $0x6ec] ss:$16 sps:$4 sm:$0xff]  }
 0xb48   :  { %v3117_v45 = vpop.permute.xlu0 %3116 }
 0xb49   :  { %v3124_v22 = vmul.f32 %v3117_v45, %v7338_v55  ;;  %v6377_v45 = vld [vmem:[%s9423_s5 + $0x6e8] ss:$16 sps:$4 sm:$0xff]  }
 0xb4a   :  { %v3105_v49 = vpop.permute.xlu1 %3104  ;;  %3218 = vmatpush1.bf16.msra.mxu0 %v3177_v60 }
 0xb4b   :  { %3219 = vmatprep.subr.bf16.mxu0 %v9555_v25  ;;  %v3126_v2 = vpack.c.bf16 %v3124_v22, %v3123_v39  ;;  %v3111_v53 = vmul.f32 %v3105_v49, %v7332_v46 }
 0xb4c   :  { %v3119_v0 = vpop.permute.xlu0 %3118 }
 0xb4d   :  { %v3125_v41 = vmul.f32 %v3119_v0, %v7338_v55  ;;  %v3163_v24 = vrot.slane %v3126_v2, 4  ;;  %v3113_v1 = vpack.c.bf16 %v3111_v53, %v3111_v53 }
 0xb4e   :  { %3220 = vmatpush1.bf16.msra.mxu0 %v3159_v19  ;;  %v3129_v44 = vpop.permute.xlu1 %3128 }
 0xb4f   :  { %3221 = vmatprep.subr.bf16.mxu0 %v9555_v25  ;;  %v3127_v54 = vpack.c.bf16 %v3125_v41, %v3125_v41  ;;  %v3181_v63 = vsel %vm415_vm2, %v3113_v1, %v3163_v24  ;;  %v3137_v33 = vmul.f32 %v8069_v17, %v3129_v44 }
 0xb50   :  { %v3131_v10 = vpop.permute.xlu0 %3130 }
 0xb51   :  { %v3164_v13 = vrot.slane %v3127_v54, 4  ;;  %v3138_v11 = vmul.f32 %v8069_v17, %v3131_v10 }
 0xb52   :  { %3222 = vmatpush1.bf16.msra.mxu0 %v3112_v61  ;;  %v3133_v7 = vpop.permute.xlu1 %3132 }
 0xb53   :  { %3223 = vmatprep.subr.bf16.mxu0 %v9555_v25  ;;  %v3139_v29 = vmul.f32 %v8069_v17, %v3133_v7  ;;  %v3165_v31 = vsel %vm415_vm2, %v3163_v24, %v3164_v13  ;;  %v3140_v62 = vpack.c.bf16 %v3138_v11, %v3137_v33 }
 0xb55   :  { %v3141_v51 = vpack.c.bf16 %v3139_v29, %v3139_v29 }
 0xb56   :  { %3224 = vmatpush1.bf16.msra.mxu0 %v3181_v63 }
 0xb57   :  { %3225 = vmatprep.subr.bf16.mxu0 %v9555_v25  ;;  %v3201_v58 = vsel %vm415_vm2, %v3141_v51, 0 }
 0xb5a   :  { %3226 = vmatpush1.bf16.msra.mxu0 %v3165_v31 }
 0xb5b   :  { %3227 = vmatprep.subr.bf16.mxu0 %v9555_v25 }
 0xb5e   :  { %3228 = vmatpush1.bf16.msra.mxu0 %v3140_v62 }
 0xb5f   :  { %3229 = vmatprep.subr.bf16.mxu0 %v9555_v25 }
 0xb61   :  { %v3188_v4 = vpop.permute.xlu0 %3187 }
 0xb62   :  { %3230 = vmatpush1.bf16.msra.mxu0 %v3201_v58 }
 0xb63   :  { %3598 = vmatprep.subr.bf16.mxu0 %v6343_v26  ;;  %v6376_v26 = vld [vmem:[%s9423_s5 + $0x6e4] ss:$16 sps:$4 sm:$0xff]  }
 0xb65   :  { %3236 = vmatmul.mubr.bf16.vlgmr.msra.gmra.mrb[40].mxu0 %v5669_v30  ;;  %v6338_v30 = vld [vmem:[%s9423_s5 + $0x620] ss:$16 sps:$4 sm:$0xff]  }
 0xb66   :  { %3630 = vmatprep.mubr.bf16.mxu0 %v9555_v25  ;;  %3599 = vmatpush1.bf16.msra.mxu0 %v6341_v21  ;;  %v6368_v21 = vld [vmem:[%s9423_s5 + $0x6c0] ss:$16 sps:$4 sm:$0xff]  }
 0xb67   :  { %3600 = vmatprep.subr.bf16.mxu0 %v6349_v57  ;;  %v6374_v57 = vld [vmem:[%s9423_s5 + $0x6e0] ss:$16 sps:$4 sm:$0xff]  }
 0xb6a   :  { %3601 = vmatpush1.bf16.msra.mxu0 %v6347_v42  ;;  %v6382_v42 = vld [vmem:[%s9423_s5 + $0x704] ss:$16 sps:$4 sm:$0xff]  }
 0xb6b   :  { %3602 = vmatprep.subr.bf16.mxu0 %v6355_v16  ;;  %v6385_v16 = vld [vmem:[%s9423_s5 + $0x70c] ss:$16 sps:$4 sm:$0xff]  }
 0xb6e   :  { %3603 = vmatpush1.bf16.msra.mxu0 %v6353_v14  ;;  %v6380_v14 = vld [vmem:[%s9423_s5 + $0x700] ss:$16 sps:$4 sm:$0xff]  }
 0xb6f   :  { %3604 = vmatprep.subr.bf16.mxu0 %v6361_v28  ;;  %v6383_v28 = vld [vmem:[%s9423_s5 + $0x708] ss:$16 sps:$4 sm:$0xff]  }
 0xb72   :  { %3605 = vmatpush1.bf16.msra.mxu0 %v6359_v27  ;;  %v8225_v27 = vld [vmem:[%s9428_s4 + $0x8] sm:$0xff] }
 0xb73   :  { %3606 = vmatprep.subr.bf16.mxu0 %v6367_v59  ;;  %v8232_v59 = vld [vmem:[%s9428_s4] sm:$0xff] }
 0xb74   :  { %9557 = vst [vmem:[#allocation29_spill] sm:$0xff] %v8232_v59 }
 0xb76   :  { %3607 = vmatpush1.bf16.msra.mxu0 %v6365_v23  ;;  %v8237_v23 = vld [vmem:[%s9428_s4 + $0x18] sm:$0xff] }
 0xb77   :  { %3608 = vmatprep.subr.bf16.mxu0 %v6373_v5  ;;  %v8246_v5 = vld [vmem:[%s9428_s4 + $0x10] sm:$0xff]  ;;  %s9561_s4 = smov 113  }
 0xb78   :  { %9558 = vst [vmem:[#allocation30_spill] sm:$0xff] %v8246_v5 }
 0xb7a   :  { %3609 = vmatpush1.bf16.msra.mxu0 %v6371_v43 }
 0xb7b   :  { %3610 = vmatprep.subr.bf16.mxu0 %v6379_v18 }
 0xb7e   :  { %3611 = vmatpush1.bf16.msra.mxu0 %v6377_v45 }
 0xb7f   :  { %3612 = vmatprep.subr.bf16.mxu0 %v6385_v16 }
 0xb82   :  { %3613 = vmatpush1.bf16.msra.mxu0 %v6383_v28 }
 0xc38   :  { %v3237_v37 = vpop.f32.mrb[40].mxu0 }
 0xc39   :  { %v3238_v3 = vadd.f32 %v3237_v37, %v3188_v4  ;;  %v3239_v12 = vpop.f32.mrb[41].mxu0  ;;  %v6344_v4 = vld [vmem:[%s9423_s5 + $0x640] ss:$16 sps:$4 sm:$0xff]   ;;  %v6352_v37 = vld [vmem:[%s9423_s5 + $0x664] ss:$16 sps:$4 sm:$0xff]  }
 0xc3a   :  { %v3240_v40 = vpop.f32.mrb[42].mxu0  ;;  %v6358_v12 = vld [vmem:[%s9423_s5 + $0x684] ss:$16 sps:$4 sm:$0xff]  }
 0xc3b   :  { %v8081_v52 = vmax.f32 %v3238_v3, 0.0  ;;  %v3241_v8 = vpop.f32.mrb[43].mxu0  ;;  %v6350_v3 = vld [vmem:[%s9423_s5 + $0x660] ss:$16 sps:$4 sm:$0xff]  }
 0xc3c   :  { %v6356_v40 = vld [vmem:[%s9423_s5 + $0x680] ss:$16 sps:$4 sm:$0xff]  }
 0xc3d   :  { %3245 = vrot.lane.b32.xlu0 %v8081_v52, %s6422_s22  ;;  %3250 = vrot.lane.b32.xlu1 %v8081_v52, %s6423_s1  ;;  %v3265_v11 = vpack.c.bf16 %v8081_v52, %v8081_v52  ;;  %v6362_v8 = vld [vmem:[%s9423_s5 + $0x6a0] ss:$16 sps:$4 sm:$0xff]  }
 0xc41   :  { %3255 = vrot.lane.b32.xlu0 %v8081_v52, %s6424_s23  ;;  %3260 = vrot.lane.b32.xlu1 %v8081_v52, %s6415_s0  ;;  %s9559_s23 = smov 16  }
 0xc45   :  { %3276 = vrot.lane.b32.xlu0 %v8081_v52, %s6426_s25  ;;  %3266 = vrot.lane.b32.xlu1 %v8081_v52, %s6417_s12  ;;  %s9563_s25 = smov 111  }
 0xc49   :  { %3281 = vrot.lane.b32.xlu0 %v8081_v52, %s6427_s29  ;;  %3271 = vrot.lane.b32.xlu1 %v8081_v52, %s6425_s24  ;;  %v6364_v52 = vld [vmem:[%s9423_s5 + $0x6a4] ss:$16 sps:$4 sm:$0xff]  }
 0xc4d   :  { %3314 = vperm.xlu1 %6120, %v3311_v48   ;;  %v6370_v48 = vld [vmem:[%s9423_s5 + $0x6c4] ss:$16 sps:$4 sm:$0xff]   ;;  %3663 = vrot.lane.b32.xlu0 %v8232_v59, %s9556_s28 }
 0xc51   :  { %3665 = vrot.lane.b32.xlu1 %v8225_v27, %s9556_s28  ;;  %3709 = vrot.lane.b32.xlu0 %v8232_v59, %s9559_s23 }
 0xc55   :  { %3647 = vrot.lane.b32.xlu1 %v8237_v23, %s9556_s28  ;;  %3755 = vrot.lane.b32.xlu0 %v8232_v59, %s9560_s27 }
 0xc59   :  { %3667 = vrot.lane.b32.xlu1 %v8246_v5, %s9556_s28  ;;  %3801 = vrot.lane.b32.xlu0 %v8232_v59, %s6415_s0 }
 0xc5d   :  { %3711 = vrot.lane.b32.xlu1 %v8225_v27, %s9559_s23  ;;  %3849 = vrot.lane.b32.xlu0 %v8225_v27, %s6417_s12 }
 0xc61   :  { %3699 = vrot.lane.b32.xlu1 %v8237_v23, %s9559_s23  ;;  %3847 = vrot.lane.b32.xlu0 %v8232_v59, %s6417_s12 }
 0xc65   :  { %3713 = vrot.lane.b32.xlu1 %v8246_v5, %s9559_s23  ;;  %3895 = vrot.lane.b32.xlu0 %v8225_v27, %s9561_s4 }
 0xc69   :  { %3757 = vrot.lane.b32.xlu1 %v8225_v27, %s9560_s27  ;;  %3893 = vrot.lane.b32.xlu0 %v8232_v59, %s9561_s4 }
 0xc6d   :  { %3745 = vrot.lane.b32.xlu1 %v8237_v23, %s9560_s27  ;;  %3941 = vrot.lane.b32.xlu0 %v8225_v27, %s9562_s2 }
 0xc71   :  { %3759 = vrot.lane.b32.xlu1 %v8246_v5, %s9560_s27  ;;  %3939 = vrot.lane.b32.xlu0 %v8232_v59, %s9562_s2 }
 0xc75   :  { %3803 = vrot.lane.b32.xlu1 %v8225_v27, %s6415_s0  ;;  %3987 = vrot.lane.b32.xlu0 %v8225_v27, %s9563_s25 }
 0xc79   :  { %3791 = vrot.lane.b32.xlu1 %v8237_v23, %s6415_s0 }
 0xc7d   :  { %3805 = vrot.lane.b32.xlu1 %v8246_v5, %s6415_s0 }
 0xc81   :  { %3851 = vrot.lane.b32.xlu1 %v8246_v5, %s6417_s12 }
 0xc85   :  { %3853 = vrot.lane.b32.xlu1 %v8237_v23, %s6417_s12 }
 0xc89   :  { %3897 = vrot.lane.b32.xlu1 %v8246_v5, %s9561_s4 }
 0xc8d   :  { %3899 = vrot.lane.b32.xlu1 %v8237_v23, %s9561_s4 }
 0xc91   :  { %3943 = vrot.lane.b32.xlu1 %v8246_v5, %s9562_s2 }
 0xc95   :  { %3945 = vrot.lane.b32.xlu1 %v8237_v23, %s9562_s2 }
 0xcaf   :  { %v3246_v50 = vpop.permute.xlu0 %3245  ;;  %v3251_v22 = vpop.permute.xlu1 %3250 }
 0xcb0   :  { %v3248_v60 = vmul.f32 %v3246_v50, %v7301_v32  ;;  %v3253_v49 = vmul.f32 %v3251_v22, %v7305_v38 }
 0xcb2   :  { %v3254_v39 = vpack.c.bf16 %v3253_v49, %v3253_v49  ;;  %v3249_v2 = vpack.c.bf16 %v3248_v60, %v3248_v60 }
 0xcb3   :  { %v3256_v15 = vpop.permute.xlu0 %3255  ;;  %v3261_v0 = vpop.permute.xlu1 %3260 }
 0xcb4   :  { %v3287_v53 = vrot.slane %v3254_v39, 4  ;;  %v3258_v41 = vmul.f32 %v3256_v15, %v7310_v47  ;;  %v3263_v19 = vmul.f32 %v3261_v0, %v7316_v56 }
 0xcb6   :  { %v3264_v20 = vpack.c.bf16 %v3263_v19, %v3263_v19  ;;  %v3296_v61 = vsel %vm415_vm2, %v3249_v2, %v3287_v53  ;;  %v3259_v1 = vpack.c.bf16 %v3258_v41, %v3258_v41 }
 0xcb7   :  { %v3277_v44 = vpop.permute.xlu0 %3276  ;;  %6072 = vmatpush3.bf16.msra.mxu1 %v3296_v61  ;;  %v3267_v24 = vpop.permute.xlu1 %3266 }
 0xcb8   :  { %v3289_v54 = vrot.slane %v3264_v20, 4  ;;  %v3279_v32 = vmul.f32 %v3277_v44, %v7338_v55  ;;  %v3269_v38 = vmul.f32 %v3267_v24, %v7324_v9  ;;  %6073 = vmatprep.subr.bf16.mxu1 %v9554_v6 }
 0xcba   :  { %v3270_v7 = vpack.c.bf16 %v3269_v38, %v3269_v38  ;;  %v3300_v13 = vsel %vm415_vm2, %v3259_v1, %v3289_v54  ;;  %v3280_v10 = vpack.c.bf16 %v3279_v32, %v3279_v32 }
 0xcbb   :  { %v3282_v47 = vpop.permute.xlu0 %3281  ;;  %6074 = vmatpush3.bf16.msra.mxu1 %v3300_v13  ;;  %v3272_v56 = vpop.permute.xlu1 %3271 }
 0xcbc   :  { %v3291_v63 = vrot.slane %v3270_v7, 4  ;;  %v3274_v29 = vmul.f32 %v3272_v56, %v7332_v46  ;;  %6075 = vmatprep.subr.bf16.mxu1 %v9554_v6  ;;  %v3284_v55 = vmul.f32 %v8069_v17, %v3282_v47  ;;  %v3293_v33 = vrot.slane %v3280_v10, 4  ;;  %v6340_v46 = vld [vmem:[%s9423_s5 + $0x624] ss:$16 sps:$4 sm:$0xff]   ;;  %v3310_v17 = vld [vmem:[%s9423_s5 + $0x600] sm:$0xf] }
 0xcbe   :  { %v3275_v9 = vpack.c.bf16 %v3274_v29, %v3274_v29  ;;  %v3304_v31 = vsel %vm415_vm2, %v3265_v11, %v3291_v63  ;;  %v3285_v51 = vpack.c.bf16 %v3284_v55, %v3284_v55 }
 0xcbf   :  { %6076 = vmatpush3.bf16.msra.mxu1 %v3304_v31  ;;  %v8374_v13 = vpop.permute.xlu0 %3663 }
 0xcc0   :  { %6077 = vmatprep.subr.bf16.mxu1 %v9554_v6  ;;  %v3308_v62 = vsel %vm415_vm2, %v3275_v9, %v3293_v33  ;;  %v3321_v58 = vsel %vm415_vm2, %v3285_v51, 0  ;;  %v8405_v9 = vld [vmem:[%s9423_s5 + $0x720] sm:$0xff] }
 0xcc1   :  { %9566 = vst [vmem:[#allocation33_spill] sm:$0xff] %v8405_v9  ;;  %v5706_v31 = vcombine.high %v8405_v9, %v8405_v9 }
 0xcc3   :  { %6078 = vmatpush3.bf16.msra.mxu1 %v3308_v62  ;;  %v8384_v56 = vpop.permute.xlu0 %3709 }
 0xcc4   :  { %6079 = vmatprep.subr.bf16.mxu1 %v9554_v6  ;;  %v6346_v6 = vld [vmem:[%s9423_s5 + $0x644] ss:$16 sps:$4 sm:$0xff]  }
 0xcc7   :  { %6080 = vmatpush3.bf16.msra.mxu1 %v3321_v58  ;;  %v8390_v63 = vpop.permute.xlu0 %3755  ;;  %v4024_v58 = vld [vmem:[%s9424_s6 + $0x220] sm:$0xff] }
 0xcc8   :  { %3557 = vmatprep.subr.bf16.mxu1 %v6340_v46 }
 0xcca   :  { %6082 = vmatmul.mubr.msk.bf16.vlgmr.msra.gmra.mrb[40].mxu1 %vm487_vm9, %v3310_v17 }
 0xccb   :  { %3558 = vmatpush1.bf16.msra.mxu1 %v6338_v30  ;;  %3589 = vmatprep.mubr.bf16.mxu1 %v9555_v25  ;;  %v8398_v11 = vpop.permute.xlu0 %3801 }
 0xccc   :  { %3559 = vmatprep.subr.bf16.mxu1 %v6346_v6  ;;  %v3315_v43 = vpop.permute.xlu1 %3314 }
 0xccf   :  { %3560 = vmatpush1.bf16.msra.mxu1 %v6344_v4  ;;  %v8411_v33 = vpop.permute.xlu0 %3849 }
 0xcd0   :  { %3561 = vmatprep.subr.bf16.mxu1 %v6352_v37  ;;  %v8320_v44 = vpop.permute.xlu1 %3665 }
 0xcd3   :  { %3562 = vmatpush1.bf16.msra.mxu1 %v6350_v3  ;;  %v8421_v62 = vpop.permute.xlu0 %3847 }
 0xcd4   :  { %3563 = vmatprep.subr.bf16.mxu1 %v6358_v12  ;;  %v8326_v24 = vpop.permute.xlu1 %3647 }
 0xcd7   :  { %3564 = vmatpush1.bf16.msra.mxu1 %v6356_v40  ;;  %v8428_v17 = vpop.permute.xlu0 %3895 }
 0xcd8   :  { %3565 = vmatprep.subr.bf16.mxu1 %v6364_v52  ;;  %v8336_v1 = vpop.permute.xlu1 %3667 }
 0xcdb   :  { %3566 = vmatpush1.bf16.msra.mxu1 %v6362_v8  ;;  %v8432_v6 = vpop.permute.xlu0 %3893 }
 0xcdc   :  { %3567 = vmatprep.subr.bf16.mxu1 %v6370_v48  ;;  %v8342_v54 = vpop.permute.xlu1 %3711 }
 0xcdf   :  { %3568 = vmatpush1.bf16.msra.mxu1 %v6368_v21  ;;  %v8436_v37 = vpop.permute.xlu0 %3941 }
 0xce0   :  { %3569 = vmatprep.subr.bf16.mxu1 %v6376_v26  ;;  %v8352_v32 = vpop.permute.xlu1 %3699 }
 0xce3   :  { %3570 = vmatpush1.bf16.msra.mxu1 %v6374_v57  ;;  %v8440_v12 = vpop.permute.xlu0 %3939 }
 0xce4   :  { %3571 = vmatprep.subr.bf16.mxu1 %v6382_v42  ;;  %v8358_v38 = vpop.permute.xlu1 %3713  ;;  %9567 = vst [vmem:[#allocation34_spill] sm:$0xff] %v8440_v12 }
 0xce7   :  { %3572 = vmatpush1.bf16.msra.mxu1 %v6380_v14  ;;  %v8444_v52 = vpop.permute.xlu0 %3987 }
 0xce8   :  { %v8368_v7 = vpop.permute.xlu1 %3757  ;;  %9568 = vst [vmem:[#allocation35_spill] sm:$0xff] %v8444_v52  ;;  %v9574_v52 = vld [vmem:[#allocation4_spill] sm:$0xff] }
 0xcec   :  { %v8376_v47 = vpop.permute.xlu1 %3745 }
 0xcf0   :  { %v8386_v10 = vpop.permute.xlu1 %3759 }
 0xcf4   :  { %v8392_v29 = vpop.permute.xlu1 %3803 }
 0xcf8   :  { %v8400_v55 = vpop.permute.xlu1 %3791 }
 0xcfc   :  { %v8413_v51 = vpop.permute.xlu1 %3805 }
 0xd00   :  { %v8423_v46 = vpop.permute.xlu1 %3851 }
 0xd04   :  { %v8430_v30 = vpop.permute.xlu1 %3853 }
 0xd08   :  { %v8434_v4 = vpop.permute.xlu1 %3897 }
 0xd0c   :  { %v8438_v3 = vpop.permute.xlu1 %3899 }
 0xd10   :  { %v8442_v40 = vpop.permute.xlu1 %3943 }
 0xd14   :  { %v8446_v8 = vpop.permute.xlu1 %3945 }
 0xd15   :  { %9569 = vst [vmem:[#allocation36_spill] sm:$0xff] %v8446_v8  ;;  %v9575_v8 = vld [vmem:[#allocation2_spill] sm:$0xff] }
 0xd9d   :  { %v3357_v18 = vpop.f32.mrb[40].mxu1 }
 0xd9e   :  { %v3358_v45 = vadd.f32 %v3357_v18, %v3315_v43  ;;  %v6083_v50 = vpop.f32.mrb[41].mxu1  ;;  %v3672_v43 = vsel %vm52_vm1, %v8374_v13, %v8320_v44 }
 0xd9f   :  { %v3360_v22 = vpop.f32.mrb[42].mxu1 }
 0xda0   :  { %v3363_v60 = vmax.f32 %v3358_v45, 0.0  ;;  %v6084_v49 = vpop.f32.mrb[43].mxu1  ;;  %v3690_v22 = vmul.f32 %v3672_v43, %v6641_v35  ;;  %v3673_v43 = vsel %vm52_vm1, %v8320_v44, %v8336_v1  ;;  %v3684_v44 = vsel %vm52_vm1, %v8326_v24, %v8374_v13 }
 0xda1   :  { %v3691_v9 = vmul.f32 %v3673_v43, %v6645_v36  ;;  %v3766_v13 = vsel %vm136_vm4, %v8386_v10, %v8376_v47  ;;  %v9577_v43 = vld [vmem:[#allocation3_spill] sm:$0xff] }
 0xda2   :  { %v3396_v39 = vpack.c.bf16 %v3363_v60, %v3363_v60 }
 0xda4   :  { %3590 = vmatmul.mubr.bf16.vlgmr.msra.gmra.mrb[44].mxu1 %v3396_v39  ;;  %3631 = vmatmul.mubr.bf16.vlgmr.msra.gmra.mrb[44].mxu0 %v3396_v39 }
 0xda5   :  { %5707 = vmatprep.mubr.msk.bf16.mxu1 %vm94_vm0, %v5706_v31  ;;  %5708 = vmatprep.mubr.msk.bf16.mxu0 %vm94_vm0, %v5706_v31 }
 0xe77   :  { %v8300_v15 = vpop.f32.mrb[44].mxu1  ;;  %v8302_v0 = vpop.f32.mrb[44].mxu0 }
 0xe78   :  { %9564 = vst [vmem:[#allocation31_spill] sm:$0xff] %v8300_v15  ;;  %9565 = vst [vmem:[#allocation32_spill] sm:$0xff] %v8302_v0  ;;  %3843 = vrot.lane.b32.xlu1 %v8302_v0, %s6417_s12  ;;  %v8306_v2 = vpop.f32.mrb[45].mxu0  ;;  %3657 = vrot.lane.b32.xlu0 %v8300_v15, %s9556_s28  ;;  %v8310_v53 = vpop.f32.mrb[45].mxu1 }
 0xe79   :  { %v3595_v41 = vpop.f32.mrb[46].mxu1  ;;  %v3636_v19 = vpop.f32.mrb[46].mxu0 }
 0xe7a   :  { %v3596_v20 = vpop.f32.mrb[47].mxu1  ;;  %v3637_v61 = vpop.f32.mrb[47].mxu0 }
 0xe7c   :  { %3889 = vrot.lane.b32.xlu1 %v8302_v0, %s9561_s4  ;;  %3661 = vrot.lane.b32.xlu0 %v8302_v0, %s9556_s28 }
 0xe80   :  { %3935 = vrot.lane.b32.xlu1 %v8302_v0, %s9562_s2  ;;  %3703 = vrot.lane.b32.xlu0 %v8300_v15, %s9559_s23 }
 0xe84   :  { %3981 = vrot.lane.b32.xlu1 %v8302_v0, %s9563_s25  ;;  %3707 = vrot.lane.b32.xlu0 %v8302_v0, %s9559_s23 }
 0xe88   :  { %3749 = vrot.lane.b32.xlu0 %v8300_v15, %s9560_s27  ;;  %3659 = vrot.lane.b32.xlu1 %v8310_v53, %s9556_s28 }
 0xe8c   :  { %3753 = vrot.lane.b32.xlu0 %v8302_v0, %s9560_s27  ;;  %3705 = vrot.lane.b32.xlu1 %v8310_v53, %s9559_s23 }
 0xe90   :  { %3795 = vrot.lane.b32.xlu0 %v8300_v15, %s6415_s0  ;;  %3751 = vrot.lane.b32.xlu1 %v8310_v53, %s9560_s27 }
 0xe94   :  { %3799 = vrot.lane.b32.xlu0 %v8302_v0, %s6415_s0  ;;  %3797 = vrot.lane.b32.xlu1 %v8310_v53, %s6415_s0 }
 0xe98   :  { %3839 = vrot.lane.b32.xlu0 %v8300_v15, %s6417_s12  ;;  %3989 = vrot.lane.b32.xlu1 %v8246_v5, %s9563_s25 }
 0xe9c   :  { %3885 = vrot.lane.b32.xlu0 %v8300_v15, %s9561_s4  ;;  %3845 = vrot.lane.b32.xlu1 %v8306_v2, %s6417_s12 }
 0xea0   :  { %3931 = vrot.lane.b32.xlu0 %v8300_v15, %s9562_s2  ;;  %3891 = vrot.lane.b32.xlu1 %v8306_v2, %s9561_s4 }
 0xea4   :  { %3645 = vrot.lane.b32.xlu0 %v8306_v2, %s9556_s28  ;;  %3937 = vrot.lane.b32.xlu1 %v8306_v2, %s9562_s2 }
 0xea8   :  { %3697 = vrot.lane.b32.xlu0 %v8306_v2, %s9559_s23  ;;  %3983 = vrot.lane.b32.xlu1 %v8306_v2, %s9563_s25 }
 0xeac   :  { %3743 = vrot.lane.b32.xlu0 %v8306_v2, %s9560_s27  ;;  %3991 = vrot.lane.b32.xlu1 %v8237_v23, %s9563_s25 }
 0xeb0   :  { %3977 = vrot.lane.b32.xlu0 %v8300_v15, %s9563_s25 }
 0xeb4   :  { %3789 = vrot.lane.b32.xlu0 %v8306_v2, %s6415_s0 }
 0xeb8   :  { %3841 = vrot.lane.b32.xlu0 %v8310_v53, %s6417_s12 }
 0xebc   :  { %3887 = vrot.lane.b32.xlu0 %v8310_v53, %s9561_s4 }
 0xec0   :  { %3933 = vrot.lane.b32.xlu0 %v8310_v53, %s9562_s2 }
 0xec4   :  { %3979 = vrot.lane.b32.xlu0 %v8310_v53, %s9563_s25 }
 0xec8   :  { %3985 = vrot.lane.b32.xlu0 %v8232_v59, %s9563_s25 }
 0xecc   :  { %4027 = vperm.xlu0 %6119, %v4024_v58  }
 0xeea   :  { %v8448_v48 = vpop.permute.xlu1 %3843  ;;  %v3658_v21 = vpop.permute.xlu0 %3657 }
 0xeee   :  { %v8450_v26 = vpop.permute.xlu1 %3889  ;;  %v3662_v57 = vpop.permute.xlu0 %3661 }
 0xeef   :  { %9570 = vst [vmem:[#allocation37_spill] sm:$0xff] %v8450_v26  ;;  %v9579_v26 = vld [vmem:[#allocation5_spill] sm:$0xff] }
 0xef2   :  { %v8452_v42 = vpop.permute.xlu1 %3935  ;;  %v3704_v16 = vpop.permute.xlu0 %3703 }
 0xef3   :  { %9571 = vst [vmem:[#allocation38_spill] sm:$0xff] %v8452_v42 }
 0xef6   :  { %v8454_v14 = vpop.permute.xlu1 %3981  ;;  %v3708_v28 = vpop.permute.xlu0 %3707 }
 0xef7   :  { %9572 = vst [vmem:[#allocation39_spill] sm:$0xff] %v8454_v14 }
 0xefa   :  { %v8459_v18 = vpop.permute.xlu0 %3749  ;;  %v3660_v45 = vpop.permute.xlu1 %3659 }
 0xefb   :  { %v3669_v50 = vsel %vm52_vm1, %v3658_v21, %v3660_v45 }
 0xefc   :  { %v3686_v60 = vmul.f32 %v3669_v50, %v6641_v35  ;;  %v3674_v50 = vsel %vm52_vm1, %v8336_v1, %v8326_v24  ;;  %v3670_v35 = vsel %vm52_vm1, %v3660_v45, %v3662_v57  ;;  %v3730_v24 = vsel %vm94_vm0, %v8352_v32, %v8384_v56 }
 0xefd   :  { %v3692_v14 = vmul.f32 %v3674_v50, %v6637_v34  ;;  %v3687_v45 = vmul.f32 %v3670_v35, %v6645_v36  ;;  %v3735_v59 = vmul.f32 %v3730_v24, %v9579_v26 }
 0xefe   :  { %v8464_v49 = vpop.permute.xlu0 %3753  ;;  %v3694_v39 = vpack.c.bf16 %v3690_v22, %v3686_v60  ;;  %v3706_v19 = vpop.permute.xlu1 %3705  ;;  %v3719_v60 = vsel %vm94_vm0, %v8342_v54, %v8358_v38 }
 0xeff   :  { %v3715_v1 = vsel %vm94_vm0, %v3704_v16, %v3706_v19  ;;  %v3737_v42 = vmul.f32 %v3719_v60, %v9574_v52 }
 0xf00   :  { %4039 = vmatprep.subr.bf16.mxu1 %v3694_v39  ;;  %v3720_v39 = vsel %vm94_vm0, %v8358_v38, %v8352_v32  ;;  %v3718_v38 = vsel %vm94_vm0, %v8384_v56, %v8342_v54  ;;  %v3732_v50 = vmul.f32 %v3715_v1, %v9577_v43  ;;  %v3716_v54 = vsel %vm94_vm0, %v3706_v19, %v3708_v28 }
 0xf01   :  { %v3738_v12 = vmul.f32 %v3720_v39, %v9575_v8  ;;  %v3765_v39 = vsel %vm136_vm4, %v8368_v7, %v8386_v10  ;;  %v3736_v32 = vmul.f32 %v3718_v38, %v9577_v43  ;;  %v9580_v10 = vld [vmem:[#allocation14_spill] sm:$0xff]  ;;  %v3764_v19 = vsel %vm136_vm4, %v8390_v63, %v8368_v7 }
 0xf02   :  { %v8466_v41 = vpop.permute.xlu0 %3795  ;;  %v3752_v31 = vpop.permute.xlu1 %3751  ;;  %v3784_v15 = vmul.f32 %v3766_v13, %v9580_v10 }
 0xf03   :  { %v3761_v56 = vsel %vm136_vm4, %v8459_v18, %v3752_v31 }
 0xf06   :  { %v8468_v20 = vpop.permute.xlu0 %3799  ;;  %v8480_v22 = vpop.permute.xlu1 %3797 }
 0xf07   :  { %v3807_v7 = vsel %vm178_vm3, %v8466_v41, %v8480_v22 }
 0xf0a   :  { %v8470_v61 = vpop.permute.xlu0 %3839  ;;  %v8515_v35 = vpop.permute.xlu1 %3989 }
 0xf0b   :  { %9578 = vst [vmem:[#allocation41_spill] sm:$0xff] %v8515_v35  ;;  %v3740_v35 = vpack.c.bf16 %v3736_v32, %v3732_v50 }
 0xf0e   :  { %v8472_v58 = vpop.permute.xlu0 %3885 }
 0xf12   :  { %v8489_v25 = vpop.permute.xlu0 %3931 }
 0xf13   :  { %9573 = vst [vmem:[#allocation40_spill] sm:$0xff] %v8489_v25  ;;  %v9576_v25 = vld [vmem:[#allocation6_spill] sm:$0xff] }
 0xf14   :  { %v3689_v5 = vmul.f32 %v3684_v44, %v9576_v25 }
 0xf16   :  { %v3646_v60 = vpop.permute.xlu0 %3645 }
 0xf17   :  { %v3671_v44 = vsel %vm52_vm1, %v3662_v57, %v3646_v60  ;;  %v3683_v36 = vsel %vm52_vm1, %v3646_v60, %v3658_v21  ;;  %v3695_v57 = vpack.c.bf16 %v3691_v9, %v3687_v45  ;;  %v3733_v21 = vmul.f32 %v3716_v54, %v9574_v52  ;;  %v9582_v45 = vld [vmem:[#allocation16_spill] sm:$0xff] }
 0xf18   :  { %v3685_v1 = vmul.f32 %v3683_v36, %v9576_v25  ;;  %v3688_v0 = vmul.f32 %v3671_v44, %v6637_v34  ;;  %v3762_v36 = vsel %vm136_vm4, %v3752_v31, %v8464_v49  ;;  %v9581_v25 = vld [vmem:[#allocation15_spill] sm:$0xff] }
 0xf19   :  { %v3778_v44 = vmul.f32 %v3761_v56, %v9581_v25  ;;  %v3741_v31 = vpack.c.bf16 %v3737_v42, %v3733_v21  ;;  %v3779_v50 = vmul.f32 %v3762_v36, %v9582_v45  ;;  %v9583_v56 = vld [vmem:[#allocation10_spill] sm:$0xff] }
 0xf1a   :  { %v3693_v60 = vpack.c.bf16 %v3689_v5, %v3685_v1  ;;  %v3698_v38 = vpop.permute.xlu0 %3697  ;;  %v3696_v43 = vpack.c.bf16 %v3692_v14, %v3688_v0  ;;  %v3776_v0 = vsel %vm136_vm4, %v8376_v47, %v8390_v63  ;;  %v3782_v14 = vmul.f32 %v3764_v19, %v9581_v25 }
 0xf1b   :  { %v3717_v24 = vsel %vm94_vm0, %v3708_v28, %v3698_v38  ;;  %v3729_v13 = vsel %vm94_vm0, %v3698_v38, %v3704_v16  ;;  %v3810_v16 = vsel %vm178_vm3, %v8398_v11, %v8392_v29  ;;  %v8547_v28 = vpop.permute.xlu1 %3845  ;;  %v3824_v1 = vmul.f32 %v3807_v7, %v9583_v56  ;;  %v9585_v7 = vld [vmem:[#allocation12_spill] sm:$0xff] }
 0xf1c   :  { %v3731_v9 = vmul.f32 %v3729_v13, %v9579_v26  ;;  %v3734_v5 = vmul.f32 %v3717_v24, %v9575_v8  ;;  %4040 = vmatpush1.bf16.msra.mxu1 %v3693_v60  ;;  %4080 = vmatprep.subr.bf16.mxu0 %v3696_v43  ;;  %v3786_v19 = vpack.c.bf16 %v3782_v14, %v3778_v44  ;;  %v9584_v60 = vld [vmem:[#allocation13_spill] sm:$0xff] }
 0xf1d   :  { %4041 = vmatprep.subr.bf16.mxu1 %v3740_v35  ;;  %4081 = vmatpush1.bf16.msra.mxu0 %v3695_v57  ;;  %v3781_v38 = vmul.f32 %v3776_v0, %v9584_v60  ;;  %v9587_v0 = vld [vmem:[#allocation9_spill] sm:$0xff] }
 0xf1e   :  { %v3739_v54 = vpack.c.bf16 %v3735_v59, %v3731_v9  ;;  %v3744_v32 = vpop.permute.xlu0 %3743  ;;  %v3742_v43 = vpack.c.bf16 %v3738_v12, %v3734_v5  ;;  %v3783_v59 = vmul.f32 %v3765_v39, %v9582_v45  ;;  %v3828_v12 = vmul.f32 %v3810_v16, %v9583_v56 }
 0xf1f   :  { %v3763_v47 = vsel %vm136_vm4, %v8464_v49, %v3744_v32  ;;  %v3775_v63 = vsel %vm136_vm4, %v3744_v32, %v8459_v18  ;;  %v3822_v49 = vsel %vm178_vm3, %v8400_v55, %v8398_v11  ;;  %v3811_v18 = vsel %vm178_vm3, %v8392_v29, %v8413_v51  ;;  %v3892_v24 = vpop.permute.xlu1 %3891 }
 0xf20   :  { %v3777_v35 = vmul.f32 %v3775_v63, %v9584_v60  ;;  %v3780_v42 = vmul.f32 %v3763_v47, %v9580_v10  ;;  %4042 = vmatpush1.bf16.msra.mxu1 %v3739_v54  ;;  %4082 = vmatprep.subr.bf16.mxu0 %v3742_v43  ;;  %v3812_v39 = vsel %vm178_vm3, %v8413_v51, %v8400_v55 }
 0xf21   :  { %4043 = vmatprep.subr.bf16.mxu1 %v3786_v19  ;;  %4083 = vmatpush1.bf16.msra.mxu0 %v3741_v31  ;;  %v3787_v44 = vpack.c.bf16 %v3783_v59, %v3779_v50  ;;  %v3832_v13 = vpack.c.bf16 %v3828_v12, %v3824_v1  ;;  %v3827_v9 = vmul.f32 %v3822_v49, %v9585_v7  ;;  %v9590_v50 = vld [vmem:[#allocation17_spill] sm:$0xff]  ;;  %v9592_v1 = vld [vmem:[#allocation20_spill] sm:$0xff]  ;;  %v9593_v19 = vld [vmem:[#allocation18_spill] sm:$0xff] }
 0xf22   :  { %v3785_v57 = vpack.c.bf16 %v3781_v38, %v3777_v35  ;;  %v8566_v21 = vpop.permute.xlu0 %3977  ;;  %v3788_v36 = vpack.c.bf16 %v3784_v15, %v3780_v42  ;;  %v3858_v11 = vsel %vm223_vm5, %v8421_v62, %v8411_v33  ;;  %v3808_v29 = vsel %vm178_vm3, %v8480_v22, %v8468_v20  ;;  %v9586_v15 = vld [vmem:[#allocation11_spill] sm:$0xff]  ;;  %v9594_v35 = vld [vmem:[#allocation25_spill] sm:$0xff] }
 0xf23   :  { %v3829_v5 = vmul.f32 %v3811_v18, %v9586_v15  ;;  %v3859_v55 = vsel %vm223_vm5, %v8411_v33, %v8423_v46  ;;  %v3860_v51 = vsel %vm223_vm5, %v8423_v46, %v8430_v30  ;;  %v3830_v14 = vmul.f32 %v3812_v39, %v9587_v0  ;;  %v9595_v59 = vld [vmem:[#allocation27_spill] sm:$0xff] }
 0xf24   :  { %4044 = vmatpush1.bf16.msra.mxu1 %v3785_v57  ;;  %4084 = vmatprep.subr.bf16.mxu0 %v3788_v36  ;;  %v3872_v22 = vsel %vm223_vm5, %v8430_v30, %v8421_v62  ;;  %v3904_v16 = vsel %vm9588_vm7, %v8432_v6, %v8428_v17  ;;  %v3905_v33 = vsel %vm9589_vm8, %v8428_v17, %v8434_v4  ;;  %v9591_v30 = vld [vmem:[#allocation19_spill] sm:$0xff]  ;;  %vm9610_vm7 = vmmov %vm9600_vm13 }
 0xf25   :  { %4045 = vmatprep.subr.bf16.mxu1 %v3832_v13  ;;  %4085 = vmatpush1.bf16.msra.mxu0 %v3787_v44  ;;  %v8596_v54 = vmul.f32 %v3858_v11, %v9590_v50  ;;  %v3825_v46 = vmul.f32 %v3808_v29, %v9586_v15  ;;  %v3878_v43 = vmul.f32 %v3859_v55, %v9591_v30  ;;  %vm9613_vm8 = vmmov %vm9610_vm7 }
 0xf26   :  { %v3790_v31 = vpop.permute.xlu0 %3789  ;;  %v8605_v47 = vmul.f32 %v3860_v51, %v9592_v1  ;;  %v3880_v38 = vmul.f32 %v3872_v22, %v9593_v19  ;;  %v8611_v42 = vmul.f32 %v3904_v16, %v9594_v35  ;;  %v3924_v12 = vmul.f32 %v3905_v33, %v9595_v59  ;;  %v9602_v51 = vld [vmem:[#allocation29_spill] sm:$0xff] }
 0xf27   :  { %v3809_v32 = vsel %vm178_vm3, %v8468_v20, %v3790_v31  ;;  %v3821_v62 = vsel %vm178_vm3, %v3790_v31, %v8466_v41  ;;  %v3871_v41 = vsel %vm223_vm5, %v8547_v28, %v8470_v61  ;;  %v3938_v20 = vpop.permute.xlu1 %3937  ;;  %v3918_v49 = vsel %vm9596_vm10, %v8438_v3, %v8432_v6  ;;  %v9604_v33 = vld [vmem:[#allocation37_spill] sm:$0xff]  ;;  %vm9615_vm10 = vmmov %vm9610_vm7 }
 0xf28   :  { %v3823_v63 = vmul.f32 %v3821_v62, %v9585_v7  ;;  %v3826_v17 = vmul.f32 %v3809_v32, %v9587_v0  ;;  %v3836_v39 = vpack.c.bf16 %v8225_v27, %v8310_v53  ;;  %v3833_v44 = vpack.c.bf16 %v3829_v5, %v3825_v46  ;;  %v9598_v53 = vld [vmem:[#allocation26_spill] sm:$0xff]  ;;  %v9606_v46 = vld [vmem:[#allocation32_spill] sm:$0xff] }
 0xf29   :  { %v3838_v29 = vpack.c.bf16 %v8237_v23, %v8306_v2  ;;  %v3857_v6 = vsel %vm223_vm5, %v8448_v48, %v8547_v28  ;;  %v3906_v27 = vsel %vm9597_vm11, %v8434_v4, %v8438_v3  ;;  %v3917_v5 = vsel %vm9599_vm12, %v3892_v24, %v8472_v58  ;;  %v9601_v28 = vld [vmem:[#allocation31_spill] sm:$0xff]  ;;  %v9607_v32 = vld [vmem:[#allocation30_spill] sm:$0xff]  ;;  %vm9617_vm11 = vmmov %vm9610_vm7 }
 0xf2a   :  { %v3831_v18 = vpack.c.bf16 %v3827_v9, %v3823_v63  ;;  %v3842_v57 = vpop.permute.xlu0 %3841  ;;  %v3834_v36 = vpack.c.bf16 %v3830_v14, %v3826_v17  ;;  %v3876_v9 = vmul.f32 %v3871_v41, %v9593_v19  ;;  %v3951_v23 = vsel %vm9600_vm13, %v8436_v37, %v8442_v40  ;;  %vm9619_vm12 = vmmov %vm9610_vm7 }
 0xf2b   :  { %v3855_v13 = vsel %vm223_vm5, %v8470_v61, %v3842_v57  ;;  %v3856_v11 = vsel %vm223_vm5, %v3842_v57, %v8448_v48  ;;  %v3926_v61 = vmul.f32 %v3918_v49, %v9598_v53  ;;  %v3835_v14 = vpack.c.bf16 %v9602_v51, %v9601_v28  ;;  %v3984_v3 = vpop.permute.xlu1 %3983  ;;  %v9609_v49 = vld [vmem:[#allocation34_spill] sm:$0xff]  ;;  %vm9620_vm13 = vmmov %vm9610_vm7 }
 0xf2c   :  { %v3874_v55 = vmul.f32 %v3856_v11, %v9591_v30  ;;  %4046 = vmatpush1.bf16.msra.mxu1 %v3831_v18  ;;  %4086 = vmatprep.subr.bf16.mxu0 %v3834_v36  ;;  %v3873_v2 = vmul.f32 %v3855_v13, %v9590_v50  ;;  %v3875_v4 = vmul.f32 %v3857_v6, %v9592_v1  ;;  %v9612_v36 = vld [vmem:[#allocation40_spill] sm:$0xff]  ;;  %v9621_v28 = vld [vmem:[#allocation22_spill] sm:$0xff] }
 0xf2d   :  { %4047 = vmatprep.subr.bf16.mxu1 %v3836_v39  ;;  %4087 = vmatpush1.bf16.msra.mxu0 %v3833_v44  ;;  %v3837_v62 = vpack.c.bf16 %v9607_v32, %v9606_v46  ;;  %v3903_v63 = vsel %vm9608_vm6, %v9604_v33, %v3892_v24  ;;  %v3922_v17 = vmul.f32 %v3917_v5, %v9598_v53  ;;  %v9614_v44 = vld [vmem:[#allocation36_spill] sm:$0xff]  ;;  %v9618_v5 = vld [vmem:[#allocation38_spill] sm:$0xff] }
 0xf2e   :  { %v3888_v48 = vpop.permute.xlu0 %3887  ;;  %4088 = vmatprep.subr.bf16.mxu0 %v3838_v29  ;;  %v3882_v22 = vpack.c.bf16 %v3878_v43, %v3874_v55  ;;  %v3884_v43 = vpack.c.bf16 %v3880_v38, %v3876_v9  ;;  %v3950_v18 = vsel %vm9610_vm7, %v9609_v49, %v8436_v37  ;;  %v3963_v39 = vsel %vm9613_vm8, %v3938_v20, %v9612_v36  ;;  %v9616_v6 = vld [vmem:[#allocation28_spill] sm:$0xff] }
 0xf2f   :  { %v3901_v16 = vsel %vm9603_vm14, %v8472_v58, %v3888_v48  ;;  %v3902_v31 = vsel %vm9605_vm15, %v3888_v48, %v9604_v33  ;;  %v9611_v58 = vld [vmem:[#allocation23_spill] sm:$0xff]  ;;  %v3964_v24 = vsel %vm9615_vm10, %v9614_v44, %v9609_v49  ;;  %v3881_v13 = vpack.c.bf16 %v8596_v54, %v3873_v2  ;;  %vm9622_vm14 = vmmov %vm9610_vm7 }
 0xf30   :  { %v3920_v41 = vmul.f32 %v3902_v31, %v9595_v59  ;;  %4048 = vmatpush1.bf16.msra.mxu1 %v3835_v14  ;;  %v3970_v57 = vmul.f32 %v3951_v23, %v9611_v58  ;;  %v3919_v11 = vmul.f32 %v3901_v16, %v9594_v35  ;;  %v3883_v37 = vpack.c.bf16 %v8605_v47, %v3875_v4  ;;  %v9623_v14 = vld [vmem:[#allocation41_spill] sm:$0xff]  ;;  %v3992_v16 = vpop.permute.xlu1 %3991 }
 0xf31   :  { %4049 = vmatprep.subr.bf16.mxu1 %v3882_v22  ;;  %4089 = vmatpush1.bf16.msra.mxu0 %v3837_v62  ;;  %v3921_v9 = vmul.f32 %v3903_v63, %v9616_v6  ;;  %v3949_v48 = vsel %vm9620_vm13, %v9618_v5, %v3938_v20  ;;  %v3968_v54 = vmul.f32 %v3963_v39, %v9621_v28  ;;  %v9624_v22 = vld [vmem:[#allocation35_spill] sm:$0xff]  ;;  %vm9625_vm15 = vcmask 908288   ;;  %v9626_v31 = vld [vmem:[#allocation21_spill] sm:$0xff] }
 0xf32   :  { %v3934_v38 = vpop.permute.xlu0 %3933  ;;  %4090 = vmatprep.subr.bf16.mxu0 %v3884_v43  ;;  %v3928_v29 = vpack.c.bf16 %v3924_v12, %v3920_v41  ;;  %v3930_v51 = vpack.c.bf16 %v3926_v61, %v3922_v17  ;;  %v3925_v12 = vmul.f32 %v3906_v27, %v9616_v6  ;;  %v3952_v47 = vsel %vm9622_vm14, %v8442_v40, %v9614_v44  ;;  %v9627_v40 = vld [vmem:[#allocation24_spill] sm:$0xff]  ;;  %v9628_v17 = vld [vmem:[#allocation39_spill] sm:$0xff]  ;;  %vm9629_vm6 = vmmov %vm9625_vm15 }
 0xf33   :  { %v3947_v55 = vsel %vm9617_vm11, %v9612_v36, %v3934_v38  ;;  %v3948_v23 = vsel %vm9619_vm12, %v3934_v38, %v9618_v5  ;;  %v3997_v4 = vsel %vm9625_vm15, %v9624_v22, %v9623_v14  ;;  %v3972_v20 = vmul.f32 %v3964_v24, %v9621_v28  ;;  %v8694_v43 = vld [vmem:[%s9424_s6 + $0x48] ss:$0 sm:$0xff]  ;;  %vm9630_vm7 = vmmov %vm9629_vm6 }
 0xf34   :  { %v3966_v2 = vmul.f32 %v3948_v23, %v9611_v58  ;;  %4050 = vmatpush1.bf16.msra.mxu1 %v3881_v13  ;;  %v3927_v33 = vpack.c.bf16 %v8611_v42, %v3919_v11  ;;  %v3965_v46 = vmul.f32 %v3947_v55, %v9626_v31  ;;  %v3969_v32 = vmul.f32 %v3950_v18, %v9626_v31  ;;  %vm9631_vm8 = vmmov %vm9629_vm6  ;;  %v8725_v23 = vld [vmem:[%s9424_s6 + $0x40] ss:$0 sm:$0xff] }
 0xf35   :  { %4051 = vmatprep.subr.bf16.mxu1 %v3928_v29  ;;  %4091 = vmatpush1.bf16.msra.mxu0 %v3883_v37  ;;  %v3929_v62 = vpack.c.bf16 %v3925_v12, %v3921_v9  ;;  %v3967_v63 = vmul.f32 %v3949_v48, %v9627_v40  ;;  %v4016_v42 = vmul.f32 %v8694_v43, %v3997_v4  ;;  %vm9632_vm10 = vmmov %vm9629_vm6  ;;  %v8710_v37 = vld [vmem:[%s9424_s6 + $0x50] ss:$0 sm:$0xff] }
 0xf36   :  { %v3980_v61 = vpop.permute.xlu0 %3979  ;;  %4092 = vmatprep.subr.bf16.mxu0 %v3930_v51  ;;  %v3974_v27 = vpack.c.bf16 %v3970_v57, %v3966_v2  ;;  %v3998_v49 = vsel %vm9630_vm7, %v9623_v14, %v3992_v16  ;;  %v3976_v18 = vpack.c.bf16 %v3972_v20, %v3968_v54  ;;  %v3971_v36 = vmul.f32 %v3952_v47, %v9627_v40  ;;  %vm9633_vm11 = vmmov %vm9629_vm6 }
 0xf37   :  { %v3994_v41 = vsel %vm9629_vm6, %v3980_v61, %v9628_v17  ;;  %v4009_v39 = vsel %vm9631_vm8, %v3984_v3, %v8566_v21  ;;  %v3993_v44 = vsel %vm9632_vm10, %v8566_v21, %v3980_v61  ;;  %v3995_v24 = vsel %vm9633_vm11, %v9628_v17, %v3984_v3  ;;  %vm9634_vm12 = vmmov %vm9629_vm6  ;;  %v8719_v3 = vld [vmem:[%s9424_s6 + $0x58] ss:$0 sm:$0xff] }
 0xf38   :  { %v4012_v57 = vmul.f32 %v8694_v43, %v3994_v41  ;;  %4052 = vmatpush1.bf16.msra.mxu1 %v3927_v33  ;;  %v3973_v13 = vpack.c.bf16 %v3969_v32, %v3965_v46  ;;  %v3975_v29 = vpack.c.bf16 %v3971_v36, %v3967_v63  ;;  %v4017_v9 = vmul.f32 %v8710_v37, %v3998_v49  ;;  %vm9635_vm13 = vmmov %vm9629_vm6 }
 0xf39   :  { %4053 = vmatprep.subr.bf16.mxu1 %v3974_v27  ;;  %4093 = vmatpush1.bf16.msra.mxu0 %v3929_v62  ;;  %v4014_v5 = vmul.f32 %v8719_v3, %v4009_v39  ;;  %v4011_v48 = vmul.f32 %v8725_v23, %v3993_v44  ;;  %v4013_v51 = vmul.f32 %v8710_v37, %v3995_v24  ;;  %v4430_v24 = vld [vmem:[%s9424_s6 + $0x240] sm:$0xff]  ;;  %vm9641_vm15 = vmmov %vm9622_vm14  ;;  %vm9642_vm6 = vcmask 924672  }
 0xf3a   :  { %v3986_v11 = vpop.permute.xlu0 %3985  ;;  %4094 = vmatprep.subr.bf16.mxu0 %v3976_v18  ;;  %v4020_v38 = vpack.c.bf16 %v4016_v42, %v4012_v57  ;;  %vm9643_vm7 = vmmov %vm9642_vm6 }
 0xf3b   :  { %v3996_v21 = vsel %vm9634_vm12, %v3986_v11, %v9624_v22  ;;  %v4010_v55 = vsel %vm9635_vm13, %v3992_v16, %v3986_v11  ;;  %v4021_v14 = vpack.c.bf16 %v4017_v9, %v4013_v51  ;;  %v9636_v22 = vld [vmem:[#allocation33_spill] sm:$0xff]  ;;  %v9637_v16 = vmov 0   ;;  %vm9644_vm10 = vmmov %vm9631_vm8 }
 0xf3c   :  { %v4015_v54 = vmul.f32 %v8725_v23, %v3996_v21  ;;  %v4018_v2 = vmul.f32 %v8719_v3, %v4010_v55  ;;  %4054 = vmatpush1.bf16.msra.mxu1 %v3973_v13  ;;  %v5705_v4 = vcombine.low %v9636_v22, %v9636_v22  ;;  %vm9646_vm11 = vmmov %vm9622_vm14 }
 0xf3d   :  { %4055 = vmatprep.subr.bf16.mxu1 %v4020_v38  ;;  %4095 = vmatpush1.bf16.msra.mxu0 %v3975_v29  ;;  %vm9647_vm12 = vmmov %vm9646_vm11 }
 0xf3e   :  { %v4019_v12 = vpack.c.bf16 %v4015_v54, %v4011_v48  ;;  %v4022_v47 = vpack.c.bf16 %v4018_v2, %v4014_v5  ;;  %vm9648_vm13 = vmmov %vm9642_vm6 }
 0xf40   :  { %4056 = vmatpush1.bf16.msra.mxu1 %v4019_v12  ;;  %4096 = vmatprep.subr.bf16.mxu0 %v4022_v47 }
 0xf41   :  { %4097 = vmatpush1.bf16.msra.mxu0 %v4021_v14  ;;  %v9638_v14 = vld [vmem:[#allocation3_spill] sm:$0xff] }
 0xf43   :  { %4072 = vmatmul.mubr.bf16.vlgmr.msra.gmra.mrb[48].mxu1 %v5705_v4 }
 0xf44   :  { %4113 = vmatmul.mubr.bf16.vlgmr.msra.gmra.mrb[48].mxu0 %v5705_v4  ;;  %4483 = vmatprep.mubr.bf16.mxu1 %v9637_v16 }
 0xf45   :  { %4895 = vmatprep.mubr.bf16.mxu0 %v9637_v16 }
 0xf4b   :  { %v4028_v20 = vpop.permute.xlu0 %4027 }
0x1016   :  { %v4073_v33 = vpop.f32.mrb[48].mxu1 }
0x1017   :  { %v4074_v46 = vadd.f32 %v4073_v33, %v4028_v20  ;;  %v4075_v61 = vpop.f32.mrb[49].mxu1  ;;  %v4114_v27 = vpop.f32.mrb[48].mxu0 }
0x1018   :  { %v4077_v32 = vpop.f32.mrb[50].mxu1  ;;  %v4116_v62 = vpop.f32.mrb[49].mxu0  ;;  %v4115_v49 = vadd.f32 %v4114_v27, %v4028_v20  ;;  %v4076_v18 = vadd.f32 %v4075_v61, %v4028_v20 }
0x1019   :  { %v8735_v63 = vmax.f32 %v4074_v46, 0.0  ;;  %v4078_v17 = vpop.f32.mrb[51].mxu1  ;;  %v4118_v41 = vpop.f32.mrb[50].mxu0  ;;  %v4117_v36 = vadd.f32 %v4116_v62, %v4028_v20  ;;  %v9639_v62 = vld [vmem:[#allocation6_spill] sm:$0xff] }
0x101a   :  { %v4119_v42 = vpop.f32.mrb[51].mxu0  ;;  %v8745_v57 = vmax.f32 %v4115_v49, 0.0  ;;  %v8759_v39 = vmax.f32 %v4076_v18, 0.0  ;;  %v9640_v41 = vld [vmem:[#allocation7_spill] sm:$0xff] }
0x101b   :  { %4132 = vrot.lane.b32.xlu0 %v8735_v63, %s9556_s28  ;;  %4157 = vrot.lane.b32.xlu1 %v8735_v63, %s9559_s23  ;;  %v8761_v44 = vmax.f32 %v4117_v36, 0.0 }
0x101f   :  { %4182 = vrot.lane.b32.xlu0 %v8735_v63, %s9560_s27  ;;  %4207 = vrot.lane.b32.xlu1 %v8735_v63, %s6415_s0 }
0x1023   :  { %4237 = vrot.lane.b32.xlu0 %v8745_v57, %s6417_s12  ;;  %4233 = vrot.lane.b32.xlu1 %v8735_v63, %s6417_s12 }
0x1027   :  { %4283 = vrot.lane.b32.xlu0 %v8735_v63, %s9562_s2  ;;  %4287 = vrot.lane.b32.xlu1 %v8745_v57, %s9562_s2 }
0x102b   :  { %4262 = vrot.lane.b32.xlu0 %v8745_v57, %s9561_s4  ;;  %4258 = vrot.lane.b32.xlu1 %v8735_v63, %s9561_s4 }
0x102f   :  { %4159 = vrot.lane.b32.xlu0 %v8759_v39, %s9559_s23  ;;  %4154 = vrot.lane.b32.xlu1 %v8761_v44, %s9559_s23 }
0x1033   :  { %4126 = vrot.lane.b32.xlu0 %v8761_v44, %s9556_s28  ;;  %4134 = vrot.lane.b32.xlu1 %v8759_v39, %s9556_s28 }
0x1037   :  { %4209 = vrot.lane.b32.xlu0 %v8759_v39, %s6415_s0  ;;  %4204 = vrot.lane.b32.xlu1 %v8761_v44, %s6415_s0 }
0x103b   :  { %4179 = vrot.lane.b32.xlu0 %v8761_v44, %s9560_s27  ;;  %4184 = vrot.lane.b32.xlu1 %v8759_v39, %s9560_s27 }
0x103f   :  { %4285 = vrot.lane.b32.xlu0 %v8759_v39, %s9562_s2  ;;  %4235 = vrot.lane.b32.xlu1 %v8759_v39, %s6417_s12 }
0x1043   :  { %4308 = vrot.lane.b32.xlu0 %v8735_v63, %s9563_s25  ;;  %4260 = vrot.lane.b32.xlu1 %v8759_v39, %s9561_s4 }
0x1047   :  { %4312 = vrot.lane.b32.xlu0 %v8745_v57, %s9563_s25  ;;  %4310 = vrot.lane.b32.xlu1 %v8759_v39, %s9563_s25 }
0x104b   :  { %4136 = vrot.lane.b32.xlu0 %v8745_v57, %s9556_s28  ;;  %4161 = vrot.lane.b32.xlu1 %v8745_v57, %s9559_s23 }
0x104f   :  { %4186 = vrot.lane.b32.xlu0 %v8745_v57, %s9560_s27  ;;  %4211 = vrot.lane.b32.xlu1 %v8745_v57, %s6415_s0 }
0x1053   :  { %4289 = vrot.lane.b32.xlu0 %v8761_v44, %s9562_s2  ;;  %4239 = vrot.lane.b32.xlu1 %v8761_v44, %s6417_s12 }
0x1057   :  { %4314 = vrot.lane.b32.xlu0 %v8761_v44, %s9563_s25  ;;  %4264 = vrot.lane.b32.xlu1 %v8761_v44, %s9561_s4 }
0x105b   :  { %4433 = vperm.xlu1 %6120, %v4430_v24  }
0x108d   :  { %v4133_v13 = vpop.permute.xlu0 %4132  ;;  %v4158_v11 = vpop.permute.xlu1 %4157 }
0x1091   :  { %v4183_v38 = vpop.permute.xlu0 %4182  ;;  %v4208_v29 = vpop.permute.xlu1 %4207 }
0x1095   :  { %v8810_v9 = vpop.permute.xlu0 %4237  ;;  %v8812_v21 = vpop.permute.xlu1 %4233 }
0x1099   :  { %v8814_v55 = vpop.permute.xlu0 %4283  ;;  %v8816_v5 = vpop.permute.xlu1 %4287 }
0x109d   :  { %v8818_v48 = vpop.permute.xlu0 %4262  ;;  %v8820_v54 = vpop.permute.xlu1 %4258 }
0x10a1   :  { %v8822_v2 = vpop.permute.xlu0 %4159  ;;  %v8824_v51 = vpop.permute.xlu1 %4154 }
0x10a2   :  { %v4163_v12 = vsel %vm94_vm0, %v4158_v11, %v8822_v2  ;;  %v4170_v47 = vsel %vm94_vm0, %v8824_v51, %v4158_v11 }
0x10a3   :  { %v4172_v22 = vmul.f32 %v4163_v12, %v9638_v14  ;;  %v4171_v4 = vmul.f32 %v4170_v47, %v9579_v26 }
0x10a5   :  { %v4176_v20 = vpack.c.bf16 %v4172_v22, %v4172_v22  ;;  %v4175_v33 = vpack.c.bf16 %v4171_v4, %v4171_v4  ;;  %v8832_v46 = vpop.permute.xlu0 %4126  ;;  %v8834_v61 = vpop.permute.xlu1 %4134 }
0x10a6   :  { %v4145_v27 = vsel %vm52_vm1, %v8832_v46, %v4133_v13  ;;  %v4138_v32 = vsel %vm52_vm1, %v4133_v13, %v8834_v61 }
0x10a7   :  { %v4146_v17 = vmul.f32 %v4145_v27, %v9639_v62  ;;  %v4147_v42 = vmul.f32 %v4138_v32, %v9640_v41  ;;  %v4338_v49 = vrot.slane %v4176_v20, 4  ;;  %v4337_v18 = vrot.slane %v4175_v33, 4 }
0x10a9   :  { %v4150_v36 = vpack.c.bf16 %v4146_v17, %v4146_v17  ;;  %v4151_v24 = vpack.c.bf16 %v4147_v42, %v4147_v42  ;;  %v8842_v11 = vpop.permute.xlu0 %4209  ;;  %v8844_v12 = vpop.permute.xlu1 %4204 }
0x10aa   :  { %v4213_v47 = vsel %vm178_vm3, %v4208_v29, %v8842_v11  ;;  %v4220_v22 = vsel %vm178_vm3, %v8844_v12, %v4208_v29 }
0x10ab   :  { %v4222_v13 = vmul.f32 %v4213_v47, %v9583_v56  ;;  %v4221_v4 = vmul.f32 %v4220_v22, %v9585_v7  ;;  %v4371_v27 = vsel %vm415_vm2, %v4151_v24, %v4338_v49  ;;  %v4367_v20 = vsel %vm415_vm2, %v4150_v36, %v4337_v18 }
0x10ac   :  { %4451 = vmatprep.subr.bf16.mxu1 %v4371_v27 }
0x10ad   :  { %v4226_v33 = vpack.c.bf16 %v4222_v13, %v4222_v13  ;;  %v4225_v32 = vpack.c.bf16 %v4221_v4, %v4221_v4  ;;  %v8854_v17 = vpop.permute.xlu0 %4179  ;;  %4452 = vmatpush1.bf16.msra.mxu1 %v4367_v20  ;;  %v8856_v42 = vpop.permute.xlu1 %4184 }
0x10ae   :  { %v4195_v62 = vsel %vm136_vm4, %v8854_v17, %v4183_v38  ;;  %v4188_v29 = vsel %vm136_vm4, %v4183_v38, %v8856_v42 }
0x10af   :  { %v4196_v47 = vmul.f32 %v4195_v62, %v9584_v60  ;;  %v4197_v49 = vmul.f32 %v4188_v29, %v9581_v25  ;;  %v4346_v24 = vrot.slane %v4226_v33, 4  ;;  %v4345_v18 = vrot.slane %v4225_v32, 4 }
0x10b1   :  { %v4200_v36 = vpack.c.bf16 %v4196_v47, %v4196_v47  ;;  %v4201_v22 = vpack.c.bf16 %v4197_v49, %v4197_v49  ;;  %v4286_v13 = vpop.permute.xlu0 %4285  ;;  %v4236_v4 = vpop.permute.xlu1 %4235 }
0x10b2   :  { %v4291_v27 = vsel %vm9622_vm14, %v8814_v55, %v4286_v13  ;;  %v4292_v20 = vsel %vm9641_vm15, %v4286_v13, %v8816_v5  ;;  %v4241_v7 = vsel %vm223_vm5, %v8812_v21, %v4236_v4  ;;  %v4242_v38 = vsel %vm223_vm5, %v4236_v4, %v8810_v9  ;;  %vm9649_vm14 = vmmov %vm9642_vm6 }
0x10b3   :  { %v4300_v62 = vmul.f32 %v4291_v27, %v9626_v31  ;;  %v4301_v33 = vmul.f32 %v4292_v20, %v9611_v58  ;;  %v4250_v32 = vmul.f32 %v4241_v7, %v9590_v50  ;;  %v4251_v29 = vmul.f32 %v4242_v38, %v9591_v30  ;;  %vm9650_vm15 = vmmov %vm9631_vm8 }
0x10b4   :  { %v4387_v47 = vsel %vm415_vm2, %v4201_v22, %v4346_v24  ;;  %v4383_v49 = vsel %vm415_vm2, %v4200_v36, %v4345_v18  ;;  %v4229_v27 = vpack.c.bf16 %v8735_v63, %v8735_v63  ;;  %v4230_v36 = vpack.c.bf16 %v8759_v39, %v8759_v39 }
0x10b5   :  { %v4305_v60 = vpack.c.bf16 %v4301_v33, %v4301_v33  ;;  %v4254_v13 = vpack.c.bf16 %v4250_v32, %v4250_v32  ;;  %v4255_v26 = vpack.c.bf16 %v4251_v29, %v4251_v29  ;;  %4453 = vmatprep.subr.bf16.mxu1 %v4387_v47  ;;  %v8878_v25 = vpop.permute.xlu0 %4308  ;;  %v4261_v56 = vpop.permute.xlu1 %4260  ;;  %v4304_v24 = vpack.c.bf16 %v4300_v62, %v4300_v62 }
0x10b6   :  { %4454 = vmatpush1.bf16.msra.mxu1 %v4383_v49  ;;  %v4266_v4 = vsel %vm9642_vm6, %v8820_v54, %v4261_v56  ;;  %v4267_v7 = vsel %vm9643_vm7, %v4261_v56, %v8818_v48  ;;  %vm9651_vm6 = vmmov %vm9631_vm8 }
0x10b7   :  { %v4353_v22 = vrot.slane %v4254_v13, 4  ;;  %v4354_v18 = vrot.slane %v4255_v26, 4  ;;  %v4275_v20 = vmul.f32 %v4266_v4, %v9594_v35  ;;  %v4276_v38 = vmul.f32 %v4267_v7, %v9595_v59  ;;  %vm9655_vm7 = vmmov %vm9646_vm11 }
0x10b8   :  { %v4362_v33 = vrot.slane %v4305_v60, 4  ;;  %v4361_v62 = vrot.slane %v4304_v24, 4 }
0x10b9   :  { %v8890_v32 = vpop.permute.xlu0 %4312  ;;  %v4311_v29 = vpop.permute.xlu1 %4310  ;;  %v4403_v47 = vsel %vm415_vm2, %v4230_v36, %v4354_v18  ;;  %v4399_v56 = vsel %vm415_vm2, %v4229_v27, %v4353_v22  ;;  %v4279_v49 = vpack.c.bf16 %v4275_v20, %v4275_v20  ;;  %v4280_v63 = vpack.c.bf16 %v4276_v38, %v4276_v38 }
0x10ba   :  { %v4316_v26 = vsel %vm9631_vm8, %v8878_v25, %v4311_v29  ;;  %v4317_v39 = vsel %vm9644_vm10, %v4311_v29, %v8890_v32  ;;  %4455 = vmatprep.subr.bf16.mxu1 %v4403_v47  ;;  %vm9657_vm8 = vmmov %vm9655_vm7 }
0x10bb   :  { %v4325_v13 = vmul.f32 %v8725_v23, %v4316_v26  ;;  %v4326_v60 = vmul.f32 %v8694_v43, %v4317_v39  ;;  %4456 = vmatpush1.bf16.msra.mxu1 %v4399_v56  ;;  %v4419_v4 = vsel %vm415_vm2, %v4280_v63, %v4362_v33  ;;  %v4415_v36 = vsel %vm415_vm2, %v4279_v49, %v4361_v62  ;;  %v9645_v33 = vld [vmem:[#allocation8_spill] sm:$0xff]  ;;  %vm9659_vm10 = vmmov %vm9648_vm13 }
0x10bc   :  { %4457 = vmatprep.subr.bf16.mxu1 %v4419_v4 }
0x10bd   :  { %v4329_v7 = vpack.c.bf16 %v4325_v13, %v4325_v13  ;;  %v4330_v18 = vpack.c.bf16 %v4326_v60, %v4326_v60  ;;  %v4137_v27 = vpop.permute.xlu0 %4136  ;;  %v4162_v22 = vpop.permute.xlu1 %4161 }
0x10be   :  { %v4139_v20 = vsel %vm52_vm1, %v8834_v61, %v4137_v27  ;;  %v4140_v24 = vsel %vm52_vm1, %v4137_v27, %v8832_v46  ;;  %v4164_v38 = vsel %vm94_vm0, %v8822_v2, %v4162_v22  ;;  %v4165_v29 = vsel %vm94_vm0, %v4162_v22, %v8824_v51 }
0x10bf   :  { %v4148_v47 = vmul.f32 %v4139_v20, %v9645_v33  ;;  %v4149_v56 = vmul.f32 %v4140_v24, %v6637_v34  ;;  %v4173_v63 = vmul.f32 %v4164_v38, %v9574_v52  ;;  %v4174_v49 = vmul.f32 %v4165_v29, %v9575_v8  ;;  %4458 = vmatpush1.bf16.msra.mxu1 %v4415_v36 }
0x10c0   :  { %5709 = vmatprep.subr.msk.bf16.mxu1 %vm415_vm2, %v4330_v18  ;;  %v4440_v62 = vsel %vm415_vm2, %v4329_v7, 0  ;;  %v8923_v18 = vld [vmem:[%s9423_s5 + $0x740] sm:$0xf] }
0x10c1   :  { %v4177_v61 = vpack.c.bf16 %v4173_v63, %v4173_v63  ;;  %v4178_v26 = vpack.c.bf16 %v4174_v49, %v4174_v49  ;;  %v4187_v46 = vpop.permute.xlu0 %4186  ;;  %v4212_v39 = vpop.permute.xlu1 %4211  ;;  %v4152_v13 = vpack.c.bf16 %v4148_v47, %v4148_v47  ;;  %v4153_v60 = vpack.c.bf16 %v4149_v56, %v4149_v56 }
0x10c2   :  { %v4214_v2 = vsel %vm178_vm3, %v8842_v11, %v4212_v39  ;;  %v4215_v51 = vsel %vm178_vm3, %v4212_v39, %v8844_v12  ;;  %v4189_v22 = vsel %vm136_vm4, %v8856_v42, %v4187_v46  ;;  %v4190_v11 = vsel %vm136_vm4, %v4187_v46, %v8854_v17 }
0x10c3   :  { %v4339_v4 = vrot.slane %v4177_v61, 4  ;;  %v4340_v27 = vrot.slane %v4178_v26, 4  ;;  %4460 = vmatpush1.bf16.msra.mxu1 %v4440_v62  ;;  %v4223_v12 = vmul.f32 %v4214_v2, %v9586_v15  ;;  %v4224_v7 = vmul.f32 %v4215_v51, %v9587_v0 }
0x10c4   :  { %v4198_v17 = vmul.f32 %v4189_v22, %v9582_v45  ;;  %v4199_v42 = vmul.f32 %v4190_v11, %v9580_v10 }
0x10c5   :  { %v4290_v36 = vpop.permute.xlu0 %4289  ;;  %v4240_v20 = vpop.permute.xlu1 %4239  ;;  %v4379_v24 = vsel %vm415_vm2, %v4153_v60, %v4340_v27  ;;  %v4375_v38 = vsel %vm415_vm2, %v4152_v13, %v4339_v4  ;;  %v4227_v29 = vpack.c.bf16 %v4223_v12, %v4223_v12  ;;  %v4228_v47 = vpack.c.bf16 %v4224_v7, %v4224_v7 }
0x10c6   :  { %v4299_v56 = vsel %vm9646_vm11, %v4290_v36, %v8814_v55  ;;  %5710 = vmatmul.mubr.msk.bf16.vlgmr.msra.gmra.mrb[52].mxu1 %vm487_vm9, %v8923_v18  ;;  %v4243_v63 = vsel %vm223_vm5, %v8810_v9, %v4240_v20  ;;  %v4249_v49 = vsel %vm223_vm5, %v4240_v20, %v8812_v21  ;;  %4492 = vmatprep.subr.bf16.mxu1 %v4379_v24  ;;  %vm9661_vm11 = vmmov %vm9659_vm10 }
0x10c7   :  { %v4303_v61 = vmul.f32 %v4299_v56, %v9621_v28  ;;  %v4252_v26 = vmul.f32 %v4243_v63, %v9592_v1  ;;  %v4253_v55 = vmul.f32 %v4249_v49, %v9593_v19  ;;  %4493 = vmatpush1.bf16.msra.mxu1 %v4375_v38  ;;  %4524 = vmatprep.mubr.bf16.mxu1 %v9637_v16  ;;  %v4347_v2 = vrot.slane %v4227_v29, 4 }
0x10c8   :  { %v4293_v46 = vsel %vm9647_vm12, %v8816_v5, %v4290_v36  ;;  %v4348_v51 = vrot.slane %v4228_v47, 4  ;;  %v4202_v13 = vpack.c.bf16 %v4198_v17, %v4198_v17  ;;  %v4203_v21 = vpack.c.bf16 %v4199_v42, %v4199_v42  ;;  %vm9663_vm12 = vmmov %vm9655_vm7 }
0x10c9   :  { %v4265_v39 = vpop.permute.xlu1 %4264  ;;  %v4256_v9 = vpack.c.bf16 %v4252_v26, %v4252_v26  ;;  %v4257_v62 = vpack.c.bf16 %v4253_v55, %v4253_v55  ;;  %v4232_v60 = vpack.c.bf16 %v8761_v44, %v8761_v44  ;;  %v4307_v4 = vpack.c.bf16 %v4303_v61, %v4303_v61  ;;  %v4315_v7 = vpop.permute.xlu0 %4314 }
0x10ca   :  { %v4268_v22 = vsel %vm9648_vm13, %v8818_v48, %v4265_v39  ;;  %v4274_v11 = vsel %vm9649_vm14, %v4265_v39, %v8820_v54  ;;  %v4302_v5 = vmul.f32 %v4293_v46, %v9627_v40  ;;  %v4395_v20 = vsel %vm415_vm2, %v4203_v21, %v4348_v51  ;;  %vm9664_vm13 = vmmov %vm9655_vm7 }
0x10cb   :  { %v4356_v27 = vrot.slane %v4257_v62, 4  ;;  %v4355_v12 = vrot.slane %v4256_v9, 4  ;;  %v4278_v36 = vmul.f32 %v4274_v11, %v9598_v53  ;;  %v4391_v24 = vsel %vm415_vm2, %v4202_v13, %v4347_v2  ;;  %4494 = vmatprep.subr.bf16.mxu1 %v4395_v20  ;;  %v4842_v20 = vld [vmem:[%s9424_s6 + $0x260] sm:$0xff]  ;;  %vm9665_vm14 = vmmov %vm9659_vm10 }
0x10cc   :  { %v4277_v38 = vmul.f32 %v4268_v22, %v9616_v6  ;;  %v4231_v48 = vpack.c.bf16 %v8745_v57, %v8745_v57  ;;  %v4364_v54 = vrot.slane %v4307_v4, 4  ;;  %v4318_v47 = vsel %vm9650_vm15, %v8890_v32, %v4315_v7  ;;  %4495 = vmatpush1.bf16.msra.mxu1 %v4391_v24  ;;  %vm9666_vm15 = vmmov %vm9659_vm10 }
0x10cd   :  { %v4411_v44 = vsel %vm415_vm2, %v4232_v60, %v4356_v27  ;;  %v4282_v29 = vpack.c.bf16 %v4278_v36, %v4278_v36  ;;  %v4324_v56 = vsel %vm9651_vm6, %v4315_v7, %v8878_v25  ;;  %v4306_v17 = vpack.c.bf16 %v4302_v5, %v4302_v5 }
0x10ce   :  { %4496 = vmatprep.subr.bf16.mxu1 %v4411_v44  ;;  %v4407_v42 = vsel %vm415_vm2, %v4231_v48, %v4355_v12  ;;  %v4327_v49 = vmul.f32 %v8710_v37, %v4318_v47  ;;  %v4328_v61 = vmul.f32 %v8719_v3, %v4324_v56  ;;  %v4281_v26 = vpack.c.bf16 %v4277_v38, %v4277_v38 }
0x10cf   :  { %v4427_v63 = vsel %vm415_vm2, %v4282_v29, %v4364_v54  ;;  %v4363_v57 = vrot.slane %v4306_v17, 4 }
0x10d0   :  { %4497 = vmatpush1.bf16.msra.mxu1 %v4407_v42  ;;  %v4331_v55 = vpack.c.bf16 %v4327_v49, %v4327_v49  ;;  %v4332_v32 = vpack.c.bf16 %v4328_v61, %v4328_v61 }
0x10d1   :  { %4498 = vmatprep.subr.bf16.mxu1 %v4427_v63  ;;  %v4423_v46 = vsel %vm415_vm2, %v4281_v26, %v4363_v57 }
0x10d2   :  { %v4446_v25 = vsel %vm415_vm2, %v4331_v55, 0 }
0x10d4   :  { %4499 = vmatpush1.bf16.msra.mxu1 %v4423_v46 }
0x10d5   :  { %5711 = vmatprep.subr.msk.bf16.mxu1 %vm415_vm2, %v4332_v32 }
0x10d8   :  { %4501 = vmatpush1.bf16.msra.mxu1 %v4446_v25 }
0x10da   :  { %v4434_v39 = vpop.permute.xlu1 %4433 }
0x10db   :  { %5712 = vmatmul.mubr.msk.bf16.vlgmr.msra.gmra.mrb[56].mxu1 %vm487_vm9, %v8923_v18 }
0x10dc   :  { %4936 = vmatprep.mubr.bf16.mxu1 %v9637_v16 }
0x1199   :  { %v4485_v2 = vpop.f32.mrb[52].mxu1 }
0x119a   :  { %v4486_v51 = vadd.f32 %v4485_v2, %v4434_v39  ;;  %v4487_v9 = vpop.f32.mrb[53].mxu1 }
0x119b   :  { %v4488_v62 = vadd.f32 %v4487_v9, %v4434_v39  ;;  %v4489_v13 = vpop.f32.mrb[54].mxu1 }
0x119c   :  { %v8977_v21 = vmax.f32 %v4486_v51, 0.0  ;;  %v4490_v60 = vpop.f32.mrb[55].mxu1  ;;  %v9652_v13 = vld [vmem:[#allocation10_spill] sm:$0xff] }
0x119d   :  { %v8979_v4 = vmax.f32 %v4488_v62, 0.0 }
0x119e   :  { %4569 = vrot.lane.b32.xlu0 %v8977_v21, %s9559_s23 }
0x119f   :  { %4571 = vrot.lane.b32.xlu1 %v8979_v4, %s9559_s23 }
0x11a2   :  { %4544 = vrot.lane.b32.xlu0 %v8977_v21, %s9556_s28 }
0x11a3   :  { %4546 = vrot.lane.b32.xlu1 %v8979_v4, %s9556_s28 }
0x11a6   :  { %4619 = vrot.lane.b32.xlu0 %v8977_v21, %s6415_s0 }
0x11a7   :  { %4621 = vrot.lane.b32.xlu1 %v8979_v4, %s6415_s0 }
0x11aa   :  { %4594 = vrot.lane.b32.xlu0 %v8977_v21, %s9560_s27 }
0x11ab   :  { %4596 = vrot.lane.b32.xlu1 %v8979_v4, %s9560_s27 }
0x11ae   :  { %4645 = vrot.lane.b32.xlu0 %v8977_v21, %s6417_s12  ;;  %v4526_v18 = vpop.f32.mrb[56].mxu1 }
0x11af   :  { %v4527_v27 = vadd.f32 %v4526_v18, %v4434_v39  ;;  %v4528_v22 = vpop.f32.mrb[57].mxu1 }
0x11b0   :  { %v4530_v11 = vpop.f32.mrb[58].mxu1  ;;  %v4529_v7 = vadd.f32 %v4528_v22, %v4434_v39 }
0x11b1   :  { %v9001_v5 = vmax.f32 %v4527_v27, 0.0  ;;  %v4531_v12 = vpop.f32.mrb[59].mxu1  ;;  %v9653_v27 = vld [vmem:[#allocation15_spill] sm:$0xff] }
0x11b2   :  { %4695 = vrot.lane.b32.xlu0 %v8977_v21, %s9562_s2  ;;  %v9015_v36 = vmax.f32 %v4529_v7, 0.0 }
0x11b3   :  { %4573 = vrot.lane.b32.xlu1 %v9001_v5, %s9559_s23 }
0x11b6   :  { %4647 = vrot.lane.b32.xlu0 %v8979_v4, %s6417_s12 }
0x11b7   :  { %4548 = vrot.lane.b32.xlu1 %v9001_v5, %s9556_s28 }
0x11ba   :  { %4697 = vrot.lane.b32.xlu0 %v8979_v4, %s9562_s2 }
0x11bb   :  { %4623 = vrot.lane.b32.xlu1 %v9001_v5, %s6415_s0 }
0x11be   :  { %4672 = vrot.lane.b32.xlu0 %v8979_v4, %s9561_s4 }
0x11bf   :  { %4598 = vrot.lane.b32.xlu1 %v9001_v5, %s9560_s27 }
0x11c2   :  { %4566 = vrot.lane.b32.xlu0 %v9015_v36, %s9559_s23 }
0x11c3   :  { %4649 = vrot.lane.b32.xlu1 %v9001_v5, %s6417_s12 }
0x11c6   :  { %4538 = vrot.lane.b32.xlu0 %v9015_v36, %s9556_s28 }
0x11c7   :  { %4699 = vrot.lane.b32.xlu1 %v9001_v5, %s9562_s2 }
0x11ca   :  { %4616 = vrot.lane.b32.xlu0 %v9015_v36, %s6415_s0 }
0x11cb   :  { %4674 = vrot.lane.b32.xlu1 %v9001_v5, %s9561_s4 }
0x11ce   :  { %4591 = vrot.lane.b32.xlu0 %v9015_v36, %s9560_s27 }
0x11cf   :  { %4651 = vrot.lane.b32.xlu1 %v9015_v36, %s6417_s12 }
0x11d2   :  { %4670 = vrot.lane.b32.xlu0 %v8977_v21, %s9561_s4 }
0x11d3   :  { %4701 = vrot.lane.b32.xlu1 %v9015_v36, %s9562_s2 }
0x11d6   :  { %4720 = vrot.lane.b32.xlu0 %v8977_v21, %s9563_s25 }
0x11d7   :  { %4676 = vrot.lane.b32.xlu1 %v9015_v36, %s9561_s4 }
0x11da   :  { %4724 = vrot.lane.b32.xlu0 %v9001_v5, %s9563_s25 }
0x11db   :  { %4722 = vrot.lane.b32.xlu1 %v8979_v4, %s9563_s25 }
0x11de   :  { %4845 = vperm.xlu0 %6119, %v4842_v20  }
0x11df   :  { %4726 = vrot.lane.b32.xlu1 %v9015_v36, %s9563_s25 }
0x1210   :  { %v4570_v24 = vpop.permute.xlu0 %4569 }
0x1211   :  { %v4572_v44 = vpop.permute.xlu1 %4571 }
0x1212   :  { %v4575_v38 = vsel %vm94_vm0, %v4570_v24, %v4572_v44 }
0x1213   :  { %v4584_v29 = vmul.f32 %v4575_v38, %v9638_v14 }
0x1214   :  { %v4545_v48 = vpop.permute.xlu0 %4544 }
0x1215   :  { %v4588_v54 = vpack.c.bf16 %v4584_v29, %v4584_v29  ;;  %v4547_v47 = vpop.permute.xlu1 %4546 }
0x1216   :  { %v4550_v56 = vsel %vm52_vm1, %v4545_v48, %v4547_v47 }
0x1217   :  { %v4559_v17 = vmul.f32 %v4550_v56, %v9640_v41  ;;  %v4750_v63 = vrot.slane %v4588_v54, 4 }
0x1218   :  { %v9056_v42 = vpop.permute.xlu0 %4619 }
0x1219   :  { %v4563_v49 = vpack.c.bf16 %v4559_v17, %v4559_v17  ;;  %v4622_v57 = vpop.permute.xlu1 %4621 }
0x121a   :  { %v4625_v2 = vsel %vm178_vm3, %v9056_v42, %v4622_v57 }
0x121b   :  { %v4783_v61 = vsel %vm415_vm2, %v4563_v49, %v4750_v63  ;;  %v4634_v60 = vmul.f32 %v4625_v2, %v9652_v13  ;;  %v9654_v2 = vld [vmem:[#allocation5_spill] sm:$0xff] }
0x121c   :  { %4863 = vmatprep.subr.bf16.mxu0 %v4783_v61  ;;  %v9059_v26 = vpop.permute.xlu0 %4594 }
0x121d   :  { %v4597_v46 = vpop.permute.xlu1 %4596  ;;  %v4638_v7 = vpack.c.bf16 %v4634_v60, %v4634_v60 }
0x121e   :  { %v4600_v62 = vsel %vm136_vm4, %v9059_v26, %v4597_v46 }
0x121f   :  { %v4609_v22 = vmul.f32 %v4600_v62, %v9653_v27  ;;  %v4758_v60 = vrot.slane %v4638_v7, 4 }
0x1220   :  { %v9061_v55 = vpop.permute.xlu0 %4645 }
0x1221   :  { %v4613_v56 = vpack.c.bf16 %v4609_v22, %v4609_v22 }
0x1224   :  { %v9063_v32 = vpop.permute.xlu0 %4695 }
0x1225   :  { %v4574_v39 = vpop.permute.xlu1 %4573 }
0x1226   :  { %v4576_v11 = vsel %vm94_vm0, %v4572_v44, %v4574_v39 }
0x1227   :  { %v4585_v38 = vmul.f32 %v4576_v11, %v9574_v52 }
0x1228   :  { %v4648_v25 = vpop.permute.xlu0 %4647 }
0x1229   :  { %v4549_v9 = vpop.permute.xlu1 %4548  ;;  %v4653_v20 = vsel %vm223_vm5, %v9061_v55, %v4648_v25  ;;  %v4589_v13 = vpack.c.bf16 %v4585_v38, %v4585_v38 }
0x122a   :  { %v4551_v29 = vsel %vm52_vm1, %v4547_v47, %v4549_v9  ;;  %v4662_v61 = vmul.f32 %v4653_v20, %v9590_v50 }
0x122b   :  { %v4560_v27 = vmul.f32 %v4551_v29, %v9645_v33  ;;  %v9656_v29 = vld [vmem:[#allocation6_spill] sm:$0xff] }
0x122c   :  { %v4698_v51 = vpop.permute.xlu0 %4697  ;;  %v4666_v7 = vpack.c.bf16 %v4662_v61, %v4662_v61 }
0x122d   :  { %v4624_v12 = vpop.permute.xlu1 %4623  ;;  %v4703_v38 = vsel %vm9655_vm7, %v9063_v32, %v4698_v51  ;;  %vm9667_vm7 = vmmov %vm9651_vm6 }
0x122e   :  { %v4626_v11 = vsel %vm178_vm3, %v4622_v57, %v4624_v12 }
0x122f   :  { %v4635_v22 = vmul.f32 %v4626_v11, %v9586_v15 }
0x1230   :  { %v9070_v18 = vpop.permute.xlu0 %4672 }
0x1231   :  { %v4599_v17 = vpop.permute.xlu1 %4598 }
0x1234   :  { %v4567_v54 = vpop.permute.xlu0 %4566 }
0x1235   :  { %v4577_v63 = vsel %vm94_vm0, %v4574_v39, %v4567_v54  ;;  %v4582_v49 = vsel %vm94_vm0, %v4567_v54, %v4570_v24  ;;  %v9087_v39 = vpop.permute.xlu1 %4649 }
0x1236   :  { %v4583_v44 = vmul.f32 %v4582_v49, %v9654_v2  ;;  %v4586_v62 = vmul.f32 %v4577_v63, %v9575_v8  ;;  %v4799_v63 = vsel %vm415_vm2, %v4613_v56, %v4758_v60  ;;  %v4654_v57 = vsel %vm223_vm5, %v4648_v25, %v9087_v39 }
0x1237   :  { %v4751_v8 = vrot.slane %v4589_v13, 4 }
0x1238   :  { %v4587_v47 = vpack.c.bf16 %v4583_v44, %v4583_v44  ;;  %v4539_v52 = vpop.permute.xlu0 %4538  ;;  %v4590_v24 = vpack.c.bf16 %v4586_v62, %v4586_v62  ;;  %v4564_v44 = vpack.c.bf16 %v4560_v27, %v4560_v27  ;;  %v4663_v62 = vmul.f32 %v4654_v57, %v9591_v30 }
0x1239   :  { %v4552_v20 = vsel %vm52_vm1, %v4549_v9, %v4539_v52  ;;  %v4557_v54 = vsel %vm52_vm1, %v4539_v52, %v4545_v48  ;;  %v4601_v52 = vsel %vm136_vm4, %v4597_v46, %v4599_v17  ;;  %v9101_v2 = vpop.permute.xlu1 %4699 }
0x123a   :  { %v4558_v49 = vmul.f32 %v4557_v54, %v9656_v29  ;;  %v4561_v9 = vmul.f32 %v4552_v20, %v6637_v34  ;;  %v4749_v48 = vrot.slane %v4587_v47, 4  ;;  %v4752_v60 = vrot.slane %v4590_v24, 4  ;;  %v9658_v54 = vld [vmem:[#allocation12_spill] sm:$0xff] }
0x123b   :  { %v4704_v11 = vsel %vm9657_vm8, %v4698_v51, %v9101_v2  ;;  %v4639_v47 = vpack.c.bf16 %v4635_v22, %v4635_v22  ;;  %v4667_v57 = vpack.c.bf16 %v4663_v62, %v4663_v62  ;;  %vm9668_vm8 = vmmov %vm9651_vm6 }
0x123c   :  { %v4562_v56 = vpack.c.bf16 %v4558_v49, %v4558_v49  ;;  %v4617_v61 = vpop.permute.xlu0 %4616  ;;  %v4565_v33 = vpack.c.bf16 %v4561_v9, %v4561_v9  ;;  %v4787_v49 = vsel %vm415_vm2, %v4564_v44, %v4751_v8  ;;  %v4765_v8 = vrot.slane %v4666_v7, 4 }
0x123d   :  { %v4627_v25 = vsel %vm178_vm3, %v4624_v12, %v4617_v61  ;;  %v4632_v27 = vsel %vm178_vm3, %v4617_v61, %v9056_v42  ;;  %v4610_v12 = vmul.f32 %v4601_v52, %v9582_v45  ;;  %v4713_v42 = vmul.f32 %v4704_v11, %v9611_v58  ;;  %v4675_v61 = vpop.permute.xlu1 %4674  ;;  %v9660_v52 = vld [vmem:[#allocation13_spill] sm:$0xff] }
0x123e   :  { %v4633_v20 = vmul.f32 %v4632_v27, %v9658_v54  ;;  %v4636_v13 = vmul.f32 %v4627_v25, %v9587_v0  ;;  %v4779_v46 = vsel %vm415_vm2, %v4562_v56, %v4749_v48  ;;  %v4791_v24 = vsel %vm415_vm2, %v4565_v33, %v4752_v60 }
0x123f   :  { %4864 = vmatpush1.bf16.msra.mxu0 %v4779_v46  ;;  %4904 = vmatprep.subr.bf16.mxu1 %v4791_v24  ;;  %v4642_v33 = vpack.c.bf16 %v8979_v4, %v8979_v4  ;;  %v4712_v44 = vmul.f32 %v4703_v38, %v9626_v31  ;;  %v4679_v62 = vsel %vm9659_vm10, %v9070_v18, %v4675_v61  ;;  %v4759_v56 = vrot.slane %v4639_v47, 4  ;;  %vm9669_vm10 = vmmov %vm9651_vm6 }
0x1240   :  { %v4637_v9 = vpack.c.bf16 %v4633_v20, %v4633_v20  ;;  %4865 = vmatprep.subr.bf16.mxu0 %v4799_v63  ;;  %v4592_v51 = vpop.permute.xlu0 %4591  ;;  %v4640_v27 = vpack.c.bf16 %v4636_v13, %v4636_v13  ;;  %4905 = vmatpush1.bf16.msra.mxu1 %v4787_v49  ;;  %v4766_v60 = vrot.slane %v4667_v57, 4  ;;  %v4688_v25 = vmul.f32 %v4679_v62, %v9595_v59 }
0x1241   :  { %v4602_v48 = vsel %vm136_vm4, %v4599_v17, %v4592_v51  ;;  %v4607_v22 = vsel %vm136_vm4, %v4592_v51, %v9059_v26  ;;  %v4614_v11 = vpack.c.bf16 %v4610_v12, %v4610_v12  ;;  %v4717_v20 = vpack.c.bf16 %v4713_v42, %v4713_v42  ;;  %v4652_v24 = vpop.permute.xlu1 %4651 }
0x1242   :  { %v4608_v63 = vmul.f32 %v4607_v22, %v9660_v52  ;;  %v4611_v17 = vmul.f32 %v4602_v48, %v9580_v10  ;;  %v4757_v26 = vrot.slane %v4637_v9, 4  ;;  %v4692_v4 = vpack.c.bf16 %v4688_v25, %v4688_v25 }
0x1243   :  { %v4760_v7 = vrot.slane %v4640_v27, 4  ;;  %v4655_v47 = vsel %vm223_vm5, %v9087_v39, %v4652_v24  ;;  %v4661_v57 = vsel %vm223_vm5, %v4652_v24, %v9061_v55  ;;  %v4815_v48 = vsel %vm415_vm2, %v4642_v33, %v4766_v60 }
0x1244   :  { %v4612_v13 = vpack.c.bf16 %v4608_v63, %v4608_v63  ;;  %v4671_v46 = vpop.permute.xlu0 %4670  ;;  %v4615_v38 = vpack.c.bf16 %v4611_v17, %v4611_v17  ;;  %v4664_v42 = vmul.f32 %v4655_v47, %v9592_v1  ;;  %v4665_v9 = vmul.f32 %v4661_v57, %v9593_v19 }
0x1245   :  { %v4678_v49 = vsel %vm9661_vm11, %v4671_v46, %v9070_v18  ;;  %v4716_v18 = vpack.c.bf16 %v4712_v44, %v4712_v44  ;;  %v4774_v22 = vrot.slane %v4717_v20, 4  ;;  %v4803_v39 = vsel %vm415_vm2, %v4614_v11, %v4759_v56  ;;  %v4702_v63 = vpop.permute.xlu1 %4701  ;;  %vm9674_vm11 = vmmov %vm9663_vm12 }
0x1246   :  { %v4687_v51 = vmul.f32 %v4678_v49, %v9594_v35  ;;  %v4795_v12 = vsel %vm415_vm2, %v4612_v13, %v4757_v26  ;;  %v4807_v27 = vsel %vm415_vm2, %v4615_v38, %v4760_v7  ;;  %v4668_v55 = vpack.c.bf16 %v4664_v42, %v4664_v42 }
0x1247   :  { %4866 = vmatpush1.bf16.msra.mxu0 %v4795_v12  ;;  %4906 = vmatprep.subr.bf16.mxu1 %v4807_v27  ;;  %v4669_v62 = vpack.c.bf16 %v4665_v9, %v4665_v9  ;;  %v4644_v17 = vpack.c.bf16 %v9015_v36, %v9015_v36  ;;  %v9662_v26 = vpack.c.bf16 %v8977_v21, %v8977_v21  ;;  %v4773_v24 = vrot.slane %v4716_v18, 4 }
0x1248   :  { %4867 = vmatprep.subr.bf16.mxu0 %v4815_v48  ;;  %4907 = vmatpush1.bf16.msra.mxu1 %v4803_v39  ;;  %v4721_v25 = vpop.permute.xlu0 %4720  ;;  %v4705_v33 = vsel %vm9663_vm12, %v9101_v2, %v4702_v63  ;;  %v4711_v44 = vsel %vm9664_vm13, %v4702_v63, %v9063_v32  ;;  %v4691_v56 = vpack.c.bf16 %v4687_v51, %v4687_v51  ;;  %v4767_v11 = vrot.slane %v4668_v55, 4 }
0x1249   :  { %v4811_v13 = vsel %vm415_vm2, %v9662_v26, %v4765_v8  ;;  %v4831_v60 = vsel %vm415_vm2, %v4692_v4, %v4774_v22  ;;  %v4768_v20 = vrot.slane %v4669_v62, 4  ;;  %v4714_v7 = vmul.f32 %v4705_v33, %v9627_v40  ;;  %v4677_v38 = vpop.permute.xlu1 %4676 }
0x124a   :  { %v4715_v36 = vmul.f32 %v4711_v44, %v9621_v28  ;;  %v4643_v21 = vpack.c.bf16 %v9001_v5, %v9001_v5  ;;  %v4680_v49 = vsel %vm9665_vm14, %v4675_v61, %v4677_v38  ;;  %v4686_v4 = vsel %vm9666_vm15, %v4677_v38, %v4671_v46 }
0x124b   :  { %4868 = vmatpush1.bf16.msra.mxu0 %v4811_v13  ;;  %v4718_v8 = vpack.c.bf16 %v4714_v7, %v4714_v7  ;;  %v4823_v32 = vsel %vm415_vm2, %v4644_v17, %v4768_v20  ;;  %v4827_v57 = vsel %vm415_vm2, %v4691_v56, %v4773_v24  ;;  %v4689_v51 = vmul.f32 %v4680_v49, %v9616_v6 }
0x124c   :  { %4869 = vmatprep.subr.bf16.mxu0 %v4831_v60  ;;  %v4719_v2 = vpack.c.bf16 %v4715_v36, %v4715_v36  ;;  %4908 = vmatprep.subr.bf16.mxu1 %v4823_v32  ;;  %v4819_v47 = vsel %vm415_vm2, %v4643_v21, %v4767_v11  ;;  %v4690_v12 = vmul.f32 %v4686_v4, %v9598_v53  ;;  %v4725_v5 = vpop.permute.xlu0 %4724 }
0x124d   :  { %4909 = vmatpush1.bf16.msra.mxu1 %v4819_v47  ;;  %v4775_v42 = vrot.slane %v4718_v8, 4  ;;  %v4693_v27 = vpack.c.bf16 %v4689_v51, %v4689_v51  ;;  %v4723_v18 = vpop.permute.xlu1 %4722 }
0x124e   :  { %v4776_v9 = vrot.slane %v4719_v2, 4  ;;  %v4694_v48 = vpack.c.bf16 %v4690_v12, %v4690_v12  ;;  %v4728_v61 = vsel %vm9651_vm6, %v4721_v25, %v4723_v18  ;;  %v4729_v46 = vsel %vm9667_vm7, %v4723_v18, %v4725_v5 }
0x124f   :  { %4870 = vmatpush1.bf16.msra.mxu0 %v4827_v57  ;;  %v4737_v22 = vmul.f32 %v8725_v23, %v4728_v61  ;;  %v4738_v39 = vmul.f32 %v8694_v43, %v4729_v46  ;;  %v4835_v62 = vsel %vm415_vm2, %v4693_v27, %v4775_v42  ;;  %v4841_v23 = vld [vmem:[%s9423_s5 + $0x760] sm:$0xf] }
0x1250   :  { %v4839_v55 = vsel %vm415_vm2, %v4694_v48, %v4776_v9  ;;  %v5254_v42 = vld [vmem:[%s9424_s6 + $0x280] sm:$0xff] }
0x1251   :  { %4910 = vmatprep.subr.bf16.mxu1 %v4839_v55  ;;  %v4741_v63 = vpack.c.bf16 %v4737_v22, %v4737_v22  ;;  %v4742_v17 = vpack.c.bf16 %v4738_v39, %v4738_v39  ;;  %v4727_v26 = vpop.permute.xlu1 %4726 }
0x1252   :  { %4911 = vmatpush1.bf16.msra.mxu1 %v4835_v62  ;;  %v4730_v13 = vsel %vm9668_vm8, %v4725_v5, %v4727_v26  ;;  %v4736_v33 = vsel %vm9669_vm10, %v4727_v26, %v4721_v25  ;;  %v5362_v5 = vld [vmem:[%s9424_s6 + $0x2a0] sm:$0x7]  ;;  %vm1708_vm8 = vcmask 64512  }
0x1253   :  { %v4739_v44 = vmul.f32 %v8710_v37, %v4730_v13  ;;  %v4740_v56 = vmul.f32 %v8719_v3, %v4736_v33  ;;  %5713 = vmatprep.subr.msk.bf16.mxu0 %vm415_vm2, %v4742_v17  ;;  %v4852_v43 = vsel %vm415_vm2, %v4741_v63, 0 }
0x1254   :  { %4872 = vmatpush1.bf16.msra.mxu0 %v4852_v43 }
0x1255   :  { %v4743_v60 = vpack.c.bf16 %v4739_v44, %v4739_v44  ;;  %v4744_v11 = vpack.c.bf16 %v4740_v56, %v4740_v56 }
0x1257   :  { %5714 = vmatmul.mubr.msk.bf16.vlgmr.msra.gmra.mrb[52].mxu0 %vm487_vm9, %v4841_v23  ;;  %5715 = vmatprep.subr.msk.bf16.mxu1 %vm415_vm2, %v4744_v11  ;;  %v4858_v25 = vsel %vm415_vm2, %v4743_v60, 0 }
0x1258   :  { %4913 = vmatpush1.bf16.msra.mxu1 %v4858_v25  ;;  %5307 = vmatprep.mubr.bf16.mxu0 %v9637_v16  ;;  %v9670_v25 = vld [vmem:[#allocation10_spill] sm:$0xff] }
0x125b   :  { %5716 = vmatmul.mubr.msk.bf16.vlgmr.msra.gmra.mrb[60].mxu1 %vm487_vm9, %v4841_v23 }
0x125c   :  { %5348 = vmatprep.mubr.bf16.mxu1 %v9637_v16 }
0x125d   :  { %v4846_v37 = vpop.permute.xlu0 %4845 }
0x132a   :  { %v4897_v3 = vpop.f32.mrb[52].mxu0 }
0x132b   :  { %v4898_v20 = vadd.f32 %v4897_v3, %v4846_v37  ;;  %v4899_v7 = vpop.f32.mrb[53].mxu0 }
0x132c   :  { %v4901_v36 = vpop.f32.mrb[54].mxu0  ;;  %v4900_v49 = vadd.f32 %v4899_v7, %v4846_v37 }
0x132d   :  { %v9182_v24 = vmax.f32 %v4898_v20, 0.0  ;;  %v4902_v21 = vpop.f32.mrb[55].mxu0 }
0x132e   :  { %v4938_v8 = vpop.f32.mrb[60].mxu1  ;;  %v9196_v4 = vmax.f32 %v4900_v49, 0.0 }
0x132f   :  { %v4940_v2 = vpop.f32.mrb[61].mxu1  ;;  %4956 = vrot.lane.b32.xlu0 %v9182_v24, %s9556_s28  ;;  %4981 = vrot.lane.b32.xlu1 %v9182_v24, %s9559_s23  ;;  %v4939_v47 = vadd.f32 %v4938_v8, %v4846_v37 }
0x1330   :  { %v4942_v38 = vpop.f32.mrb[62].mxu1  ;;  %v4941_v51 = vadd.f32 %v4940_v2, %v4846_v37  ;;  %v9671_v2 = vld [vmem:[#allocation15_spill] sm:$0xff] }
0x1331   :  { %v4943_v32 = vpop.f32.mrb[63].mxu1  ;;  %v9206_v57 = vmax.f32 %v4939_v47, 0.0 }
0x1332   :  { %v9224_v12 = vmax.f32 %v4941_v51, 0.0  ;;  %v9672_v32 = vld [vmem:[#allocation4_spill] sm:$0xff] }
0x1333   :  { %5006 = vrot.lane.b32.xlu0 %v9182_v24, %s9560_s27  ;;  %5031 = vrot.lane.b32.xlu1 %v9182_v24, %s6415_s0 }
0x1337   :  { %5057 = vrot.lane.b32.xlu0 %v9182_v24, %s6417_s12  ;;  %5107 = vrot.lane.b32.xlu1 %v9182_v24, %s9562_s2 }
0x133b   :  { %4983 = vrot.lane.b32.xlu0 %v9196_v4, %s9559_s23  ;;  %4958 = vrot.lane.b32.xlu1 %v9196_v4, %s9556_s28 }
0x133f   :  { %5033 = vrot.lane.b32.xlu0 %v9196_v4, %s6415_s0  ;;  %5008 = vrot.lane.b32.xlu1 %v9196_v4, %s9560_s27 }
0x1343   :  { %5059 = vrot.lane.b32.xlu0 %v9196_v4, %s6417_s12  ;;  %4985 = vrot.lane.b32.xlu1 %v9206_v57, %s9559_s23 }
0x1347   :  { %5035 = vrot.lane.b32.xlu0 %v9206_v57, %s6415_s0  ;;  %5061 = vrot.lane.b32.xlu1 %v9206_v57, %s6417_s12 }
0x134b   :  { %5111 = vrot.lane.b32.xlu0 %v9206_v57, %s9562_s2  ;;  %4960 = vrot.lane.b32.xlu1 %v9206_v57, %s9556_s28 }
0x134f   :  { %5010 = vrot.lane.b32.xlu0 %v9206_v57, %s9560_s27  ;;  %5109 = vrot.lane.b32.xlu1 %v9196_v4, %s9562_s2 }
0x1353   :  { %4950 = vrot.lane.b32.xlu0 %v9224_v12, %s9556_s28  ;;  %4978 = vrot.lane.b32.xlu1 %v9224_v12, %s9559_s23 }
0x1357   :  { %5003 = vrot.lane.b32.xlu0 %v9224_v12, %s9560_s27  ;;  %5028 = vrot.lane.b32.xlu1 %v9224_v12, %s6415_s0 }
0x135b   :  { %5086 = vrot.lane.b32.xlu0 %v9206_v57, %s9561_s4  ;;  %5084 = vrot.lane.b32.xlu1 %v9196_v4, %s9561_s4 }
0x135f   :  { %5134 = vrot.lane.b32.xlu0 %v9196_v4, %s9563_s25  ;;  %5082 = vrot.lane.b32.xlu1 %v9182_v24, %s9561_s4 }
0x1363   :  { %5063 = vrot.lane.b32.xlu0 %v9224_v12, %s6417_s12  ;;  %5132 = vrot.lane.b32.xlu1 %v9182_v24, %s9563_s25 }
0x1367   :  { %5113 = vrot.lane.b32.xlu0 %v9224_v12, %s9562_s2  ;;  %5136 = vrot.lane.b32.xlu1 %v9206_v57, %s9563_s25 }
0x136b   :  { %5138 = vrot.lane.b32.xlu0 %v9224_v12, %s9563_s25  ;;  %5088 = vrot.lane.b32.xlu1 %v9224_v12, %s9561_s4 }
0x136f   :  { %5369 = vperm.xlu0 %6119, %v5362_v5   ;;  %5257 = vperm.xlu1 %6120, %v5254_v42  }
0x13a1   :  { %v4957_v9 = vpop.permute.xlu0 %4956  ;;  %v4982_v27 = vpop.permute.xlu1 %4981 }
0x13a5   :  { %v9260_v48 = vpop.permute.xlu0 %5006  ;;  %v9262_v18 = vpop.permute.xlu1 %5031 }
0x13a9   :  { %v9264_v61 = vpop.permute.xlu0 %5057  ;;  %v9266_v46 = vpop.permute.xlu1 %5107 }
0x13ad   :  { %v4984_v22 = vpop.permute.xlu0 %4983  ;;  %v4959_v39 = vpop.permute.xlu1 %4958 }
0x13ae   :  { %v4987_v55 = vsel %vm94_vm0, %v4982_v27, %v4984_v22  ;;  %v4962_v62 = vsel %vm52_vm1, %v4957_v9, %v4959_v39 }
0x13af   :  { %v4996_v63 = vmul.f32 %v4987_v55, %v9638_v14  ;;  %v4971_v17 = vmul.f32 %v4962_v62, %v9640_v41 }
0x13b1   :  { %v5000_v26 = vpack.c.bf16 %v4996_v63, %v4996_v63  ;;  %v5034_v13 = vpop.permute.xlu0 %5033  ;;  %v5009_v33 = vpop.permute.xlu1 %5008  ;;  %v4975_v56 = vpack.c.bf16 %v4971_v17, %v4971_v17 }
0x13b2   :  { %v5037_v11 = vsel %vm178_vm3, %v9262_v18, %v5034_v13  ;;  %v5012_v14 = vsel %vm136_vm4, %v9260_v48, %v5009_v33 }
0x13b3   :  { %v5162_v44 = vrot.slane %v5000_v26, 4  ;;  %v5046_v37 = vmul.f32 %v5037_v11, %v9670_v25  ;;  %v5021_v38 = vmul.f32 %v5012_v14, %v9671_v2 }
0x13b5   :  { %v5060_v43 = vpop.permute.xlu0 %5059  ;;  %v4986_v23 = vpop.permute.xlu1 %4985  ;;  %v5195_v60 = vsel %vm415_vm2, %v4975_v56, %v5162_v44  ;;  %v5050_v7 = vpack.c.bf16 %v5046_v37, %v5046_v37  ;;  %v5025_v63 = vpack.c.bf16 %v5021_v38, %v5021_v38  ;;  %v9673_v56 = vld [vmem:[#allocation8_spill] sm:$0xff]  ;;  %v9675_v38 = vld [vmem:[#allocation5_spill] sm:$0xff] }
0x13b6   :  { %5275 = vmatprep.subr.bf16.mxu0 %v5195_v60  ;;  %v4988_v41 = vsel %vm94_vm0, %v4984_v22, %v4986_v23  ;;  %v5065_v8 = vsel %vm223_vm5, %v9264_v61, %v5060_v43 }
0x13b7   :  { %v4997_v49 = vmul.f32 %v4988_v41, %v9672_v32  ;;  %v5170_v5 = vrot.slane %v5050_v7, 4  ;;  %v9291_v42 = vmul.f32 %v5065_v8, %v9590_v50 }
0x13b9   :  { %v5036_v3 = vpop.permute.xlu0 %5035  ;;  %v9276_v20 = vpop.permute.xlu1 %5061  ;;  %v5001_v17 = vpack.c.bf16 %v4997_v49, %v4997_v49 }
0x13ba   :  { %v5038_v47 = vsel %vm178_vm3, %v5034_v13, %v5036_v3  ;;  %v5066_v51 = vsel %vm223_vm5, %v5060_v43, %v9276_v20  ;;  %v5078_v43 = vpack.c.bf16 %v9291_v42, %v9291_v42 }
0x13bb   :  { %v9295_v26 = vmul.f32 %v5038_v47, %v9586_v15  ;;  %v5075_v44 = vmul.f32 %v5066_v51, %v9591_v30  ;;  %v5163_v30 = vrot.slane %v5001_v17, 4 }
0x13bd   :  { %v9281_v36 = vpop.permute.xlu0 %5111  ;;  %v4961_v21 = vpop.permute.xlu1 %4960  ;;  %v5051_v41 = vpack.c.bf16 %v9295_v26, %v9295_v26  ;;  %v5079_v7 = vpack.c.bf16 %v5075_v44, %v5075_v44 }
0x13be   :  { %v4963_v22 = vsel %vm52_vm1, %v4959_v39, %v4961_v21  ;;  %v5211_v39 = vsel %vm415_vm2, %v5025_v63, %v5170_v5 }
0x13bf   :  { %v4972_v13 = vmul.f32 %v4963_v22, %v9673_v56 }
0x13c1   :  { %v5011_v55 = vpop.permute.xlu0 %5010  ;;  %v5110_v62 = vpop.permute.xlu1 %5109 }
0x13c2   :  { %v5013_v60 = vsel %vm136_vm4, %v5009_v33, %v5011_v55  ;;  %v4976_v33 = vpack.c.bf16 %v4972_v13, %v4972_v13  ;;  %v5115_v2 = vsel %vm9674_vm11, %v9266_v46, %v5110_v62 }
0x13c5   :  { %v4951_v50 = vpop.permute.xlu0 %4950  ;;  %v4979_v11 = vpop.permute.xlu1 %4978 }
0x13c6   :  { %v4964_v25 = vsel %vm52_vm1, %v4961_v21, %v4951_v50  ;;  %v4969_v37 = vsel %vm52_vm1, %v4951_v50, %v4957_v9  ;;  %v4989_v15 = vsel %vm94_vm0, %v4986_v23, %v4979_v11  ;;  %v4994_v14 = vsel %vm94_vm0, %v4979_v11, %v4982_v27  ;;  %v9676_v21 = vld [vmem:[#allocation2_spill] sm:$0xff]  ;;  %vm9677_vm1 = vmmov %vm9674_vm11 }
0x13c7   :  { %v4970_v8 = vmul.f32 %v4969_v37, %v9656_v29  ;;  %v4995_v32 = vmul.f32 %v4994_v14, %v9675_v38  ;;  %v4998_v49 = vmul.f32 %v4989_v15, %v9676_v21  ;;  %v5022_v9 = vmul.f32 %v5013_v60, %v9582_v45  ;;  %vm9678_vm0 = vmmov %vm9665_vm14 }
0x13c8   :  { %v5116_v27 = vsel %vm9677_vm1, %v5110_v62, %v9281_v36  ;;  %v4973_v23 = vmul.f32 %v4964_v25, %v6637_v34  ;;  %v5178_v60 = vrot.slane %v5079_v7, 4  ;;  %v5053_v21 = vpack.c.bf16 %v9182_v24, %v9182_v24  ;;  %vm9682_vm12 = vmmov %vm9677_vm1 }
0x13c9   :  { %v4974_v47 = vpack.c.bf16 %v4970_v8, %v4970_v8  ;;  %v5004_v51 = vpop.permute.xlu0 %5003  ;;  %v5029_v5 = vpop.permute.xlu1 %5028  ;;  %v4999_v42 = vpack.c.bf16 %v4995_v32, %v4995_v32  ;;  %v5002_v29 = vpack.c.bf16 %v4998_v49, %v4998_v49  ;;  %v5026_v37 = vpack.c.bf16 %v5022_v9, %v5022_v9  ;;  %vm9684_vm14 = vmmov %vm9678_vm0 }
0x13ca   :  { %v5014_v22 = vsel %vm136_vm4, %v5011_v55, %v5004_v51  ;;  %v5019_v63 = vsel %vm136_vm4, %v5004_v51, %v9260_v48  ;;  %v5039_v45 = vsel %vm178_vm3, %v5036_v3, %v5029_v5  ;;  %v5044_v62 = vsel %vm178_vm3, %v5029_v5, %v9262_v18  ;;  %vm9679_vm3 = vmmov %vm9678_vm0 }
0x13cb   :  { %v5020_v17 = vmul.f32 %v5019_v63, %v9660_v52  ;;  %v5023_v26 = vmul.f32 %v5014_v22, %v9580_v10  ;;  %v5161_v34 = vrot.slane %v4999_v42, 4  ;;  %v5164_v44 = vrot.slane %v5002_v29, 4  ;;  %vm9680_vm4 = vmmov %vm9651_vm6 }
0x13cc   :  { %v5045_v56 = vmul.f32 %v5044_v62, %v9658_v54  ;;  %v5048_v13 = vmul.f32 %v5039_v45, %v9587_v0  ;;  %v5124_v55 = vmul.f32 %v5115_v2, %v9626_v31  ;;  %v5125_v48 = vmul.f32 %v5116_v27, %v9611_v58  ;;  %v6409_v45 = vld [vmem:[%s9424_s6 + $0x40] ss:$0 sm:$0xff]  ;;  %vm9683_vm13 = vmmov %vm9680_vm4 }
0x13cd   :  { %v4977_v50 = vpack.c.bf16 %v4973_v23, %v4973_v23  ;;  %v9330_v52 = vpop.permute.xlu0 %5086  ;;  %v5085_v10 = vpop.permute.xlu1 %5084  ;;  %v5191_v25 = vsel %vm415_vm2, %v4974_v47, %v5161_v34  ;;  %v5199_v31 = vsel %vm415_vm2, %v4976_v33, %v5163_v30  ;;  %v5024_v58 = vpack.c.bf16 %v5020_v17, %v5020_v17  ;;  %vm9685_vm15 = vmmov %vm9680_vm4 }
0x13ce   :  { %v5049_v11 = vpack.c.bf16 %v5045_v56, %v5045_v56  ;;  %v5052_v3 = vpack.c.bf16 %v5048_v13, %v5048_v13  ;;  %v5091_v18 = vsel %vm9678_vm0, %v5085_v10, %v9330_v52  ;;  %5276 = vmatpush1.bf16.msra.mxu0 %v5191_v25  ;;  %v5027_v15 = vpack.c.bf16 %v5023_v26, %v5023_v26  ;;  %vm9686_vm6 = vmmov %vm9680_vm4 }
0x13cf   :  { %v5100_v54 = vmul.f32 %v5091_v18, %v9595_v59  ;;  %v5203_v0 = vsel %vm415_vm2, %v4977_v50, %v5164_v44  ;;  %5277 = vmatprep.subr.bf16.mxu0 %v5211_v39  ;;  %v5177_v8 = vrot.slane %v5078_v43, 4  ;;  %v5129_v2 = vpack.c.bf16 %v5125_v48, %v5125_v48  ;;  %vm9687_vm7 = vmmov %vm9678_vm0 }
0x13d0   :  { %v5169_v14 = vrot.slane %v5049_v11, 4  ;;  %v5172_v7 = vrot.slane %v5052_v3, 4  ;;  %5316 = vmatprep.subr.bf16.mxu1 %v5203_v0  ;;  %v5054_v59 = vpack.c.bf16 %v9196_v4, %v9196_v4  ;;  %v5171_v49 = vrot.slane %v5051_v41, 4 }
0x13d1   :  { %5317 = vmatpush1.bf16.msra.mxu1 %v5199_v31  ;;  %v5135_v38 = vpop.permute.xlu0 %5134  ;;  %v9338_v32 = vpop.permute.xlu1 %5082  ;;  %v5104_v43 = vpack.c.bf16 %v5100_v54, %v5100_v54  ;;  %v5128_v23 = vpack.c.bf16 %v5124_v55, %v5124_v55  ;;  %v5186_v24 = vrot.slane %v5129_v2, 4  ;;  %v5223_v51 = vsel %vm415_vm2, %v5053_v21, %v5177_v8  ;;  %v6411_v2 = vld [vmem:[%s9424_s6 + $0x50] ss:$0 sm:$0xff] }
0x13d2   :  { %v5090_v30 = vsel %vm9679_vm3, %v9338_v32, %v5085_v10  ;;  %v5207_v33 = vsel %vm415_vm2, %v5024_v58, %v5169_v14  ;;  %v5219_v39 = vsel %vm415_vm2, %v5027_v15, %v5172_v7  ;;  %v5227_v27 = vsel %vm415_vm2, %v5054_v59, %v5178_v60 }
0x13d3   :  { %v5099_v9 = vmul.f32 %v5090_v30, %v9594_v35  ;;  %5278 = vmatpush1.bf16.msra.mxu0 %v5207_v33  ;;  %5318 = vmatprep.subr.bf16.mxu1 %v5219_v39  ;;  %v5215_v4 = vsel %vm415_vm2, %v5026_v37, %v5171_v49  ;;  %v5243_v17 = vsel %vm415_vm2, %v5104_v43, %v5186_v24  ;;  %v5185_v26 = vrot.slane %v5128_v23, 4 }
0x13d4   :  { %5279 = vmatprep.subr.bf16.mxu0 %v5227_v27  ;;  %v5056_v56 = vpack.c.bf16 %v9224_v12, %v9224_v12 }
0x13d5   :  { %5319 = vmatpush1.bf16.msra.mxu1 %v5215_v4  ;;  %v5064_v41 = vpop.permute.xlu0 %5063  ;;  %v5133_v47 = vpop.permute.xlu1 %5132  ;;  %v5103_v5 = vpack.c.bf16 %v5099_v9, %v5099_v9 }
0x13d6   :  { %v5067_v42 = vsel %vm223_vm5, %v9276_v20, %v5064_v41  ;;  %v5073_v35 = vsel %vm223_vm5, %v5064_v41, %v9264_v61  ;;  %v5140_v29 = vsel %vm9680_vm4, %v5133_v47, %v5135_v38  ;;  %vm9681_vm5 = vmmov %vm9677_vm1 }
0x13d7   :  { %v5076_v22 = vmul.f32 %v5067_v42, %v9592_v1  ;;  %v5077_v63 = vmul.f32 %v5073_v35, %v9593_v19  ;;  %5280 = vmatpush1.bf16.msra.mxu0 %v5223_v51  ;;  %v5149_v62 = vmul.f32 %v6409_v45, %v5140_v29  ;;  %v5055_v1 = vpack.c.bf16 %v9206_v57, %v9206_v57  ;;  %v6410_v57 = vld [vmem:[%s9424_s6 + $0x48] ss:$0 sm:$0xff] }
0x13d8   :  { %5281 = vmatprep.subr.bf16.mxu0 %v5243_v17  ;;  %v5239_v55 = vsel %vm415_vm2, %v5103_v5, %v5185_v26 }
0x13d9   :  { %v5080_v20 = vpack.c.bf16 %v5076_v22, %v5076_v22  ;;  %v5081_v34 = vpack.c.bf16 %v5077_v63, %v5077_v63  ;;  %v5114_v44 = vpop.permute.xlu0 %5113  ;;  %v5137_v61 = vpop.permute.xlu1 %5136  ;;  %v5153_v12 = vpack.c.bf16 %v5149_v62, %v5149_v62  ;;  %v5361_v22 = vld [vmem:[%s9423_s5 + $0x7a0] sm:$0x3] }
0x13da   :  { %v5117_v19 = vsel %vm9681_vm5, %v9281_v36, %v5114_v44  ;;  %v5123_v13 = vsel %vm9682_vm12, %v5114_v44, %v9266_v46  ;;  %v5141_v60 = vsel %vm9683_vm13, %v5135_v38, %v5137_v61 }
0x13db   :  { %v5179_v48 = vrot.slane %v5080_v20, 4  ;;  %v5180_v50 = vrot.slane %v5081_v34, 4  ;;  %v5126_v10 = vmul.f32 %v5117_v19, %v9627_v40  ;;  %v5127_v11 = vmul.f32 %v5123_v13, %v9621_v28  ;;  %5282 = vmatpush1.bf16.msra.mxu0 %v5239_v55 }
0x13dc   :  { %v5150_v36 = vmul.f32 %v6410_v57, %v5141_v60  ;;  %v5264_v14 = vsel %vm415_vm2, %v5153_v12, 0 }
0x13dd   :  { %v5139_v3 = vpop.permute.xlu0 %5138  ;;  %v5089_v18 = vpop.permute.xlu1 %5088  ;;  %v5235_v46 = vsel %vm415_vm2, %v5056_v56, %v5180_v50  ;;  %v5231_v25 = vsel %vm415_vm2, %v5055_v1, %v5179_v48  ;;  %v5130_v37 = vpack.c.bf16 %v5126_v10, %v5126_v10  ;;  %v5131_v28 = vpack.c.bf16 %v5127_v11, %v5127_v11 }
0x13de   :  { %v5154_v54 = vpack.c.bf16 %v5150_v36, %v5150_v36  ;;  %v5092_v40 = vsel %vm9684_vm14, %v9330_v52, %v5089_v18  ;;  %5320 = vmatprep.subr.bf16.mxu1 %v5235_v46  ;;  %v5142_v0 = vsel %vm9685_vm15, %v5137_v61, %v5139_v3  ;;  %v5148_v31 = vsel %vm9686_vm6, %v5139_v3, %v5133_v47  ;;  %v5253_v52 = vld [vmem:[%s9423_s5 + $0x780] sm:$0xf] }
0x13df   :  { %5321 = vmatpush1.bf16.msra.mxu1 %v5231_v25  ;;  %v5098_v58 = vsel %vm9687_vm7, %v5089_v18, %v9338_v32  ;;  %v5101_v15 = vmul.f32 %v5092_v40, %v9616_v6  ;;  %v5187_v8 = vrot.slane %v5130_v37, 4  ;;  %v5151_v38 = vmul.f32 %v6411_v2, %v5142_v0  ;;  %v6412_v6 = vld [vmem:[%s9424_s6 + $0x58] ss:$0 sm:$0xff] }
0x13e0   :  { %5717 = vmatprep.subr.msk.bf16.mxu0 %vm415_vm2, %v5154_v54  ;;  %v5102_v7 = vmul.f32 %v5098_v58, %v9598_v53  ;;  %v5152_v32 = vmul.f32 %v6412_v6, %v5148_v31  ;;  %v5188_v21 = vrot.slane %v5131_v28, 4 }
0x13e1   :  { %5284 = vmatpush1.bf16.msra.mxu0 %v5264_v14  ;;  %v5105_v59 = vpack.c.bf16 %v5101_v15, %v5101_v15  ;;  %v5155_v33 = vpack.c.bf16 %v5151_v38, %v5151_v38 }
0x13e2   :  { %v5106_v49 = vpack.c.bf16 %v5102_v7, %v5102_v7  ;;  %v5156_v39 = vpack.c.bf16 %v5152_v32, %v5152_v32 }
0x13e3   :  { %v5247_v53 = vsel %vm415_vm2, %v5105_v59, %v5187_v8  ;;  %v5270_v43 = vsel %vm415_vm2, %v5155_v33, 0 }
0x13e4   :  { %5718 = vmatmul.mubr.msk.bf16.vlgmr.msra.gmra.mrb[56].mxu0 %vm487_vm9, %v5253_v52  ;;  %v5251_v30 = vsel %vm415_vm2, %v5106_v49, %v5188_v21 }
0x13e5   :  { %5419 = vmatprep.mubr.bf16.mxu0 %v9637_v16  ;;  %5322 = vmatprep.subr.bf16.mxu1 %v5251_v30 }
0x13e6   :  { %5323 = vmatpush1.bf16.msra.mxu1 %v5247_v53 }
0x13e7   :  { %5719 = vmatprep.subr.msk.bf16.mxu1 %vm415_vm2, %v5156_v39 }
0x13ea   :  { %5325 = vmatpush1.bf16.msra.mxu1 %v5270_v43 }
0x13ed   :  { %5720 = vmatmul.mubr.msk.bf16.vlgmr.msra.gmra.mrb[64].mxu1 %vm487_vm9, %v5253_v52 }
0x13ee   :  { %v5258_v9 = vpop.permute.xlu1 %5257  ;;  %v5370_v19 = vpop.permute.xlu0 %5369 }
0x14b7   :  { %v5309_v27 = vpop.f32.mrb[56].mxu0 }
0x14b8   :  { %v5310_v23 = vadd.f32 %v5309_v27, %v5258_v9  ;;  %v5311_v4 = vpop.f32.mrb[57].mxu0 }
0x14b9   :  { %v5312_v24 = vadd.f32 %v5311_v4, %v5258_v9  ;;  %v5313_v41 = vpop.f32.mrb[58].mxu0 }
0x14ba   :  { %v5357_v47 = vmax.f32 %v5310_v23, 0.0  ;;  %v5314_v51 = vpop.f32.mrb[59].mxu0 }
0x14bb   :  { %v5358_v5 = vmax.f32 %v5312_v24, 0.0 }
0x14bc   :  { %v5363_v42 = vpack.c.bf16 %v5357_v47, %v5357_v47 }
0x14bd   :  { %v5364_v35 = vpack.c.bf16 %v5358_v5, %v5358_v5 }
0x14be   :  { %v5376_v29 = vsel %vm415_vm2, %v5363_v42, 0 }
0x14bf   :  { %5721 = vmatprep.subr.msk.bf16.mxu0 %vm415_vm2, %v5364_v35 }
0x14c0   :  { %5388 = vmatpush1.bf16.msra.mxu0 %v5376_v29  ;;  %v5350_v63 = vpop.f32.mrb[64].mxu1 }
0x14c1   :  { %v5351_v17 = vadd.f32 %v5350_v63, %v5258_v9  ;;  %v5352_v26 = vpop.f32.mrb[65].mxu1 }
0x14c2   :  { %v5353_v45 = vadd.f32 %v5352_v26, %v5258_v9  ;;  %v5354_v62 = vpop.f32.mrb[66].mxu1 }
0x14c3   :  { %5722 = vmatmul.mubr.msk.bf16.vlgmr.msra.gmra.mrb[60].mxu0 %vm1708_vm8, %v5361_v22  ;;  %v5359_v20 = vmax.f32 %v5351_v17, 0.0  ;;  %v5355_v34 = vpop.f32.mrb[67].mxu1 }
0x14c4   :  { %5460 = vmatprep.mubr.bf16.mxu0 %v9637_v16  ;;  %v5360_v44 = vmax.f32 %v5353_v45, 0.0 }
0x14c5   :  { %v5365_v61 = vpack.c.bf16 %v5359_v20, %v5359_v20 }
0x14c6   :  { %v5366_v56 = vpack.c.bf16 %v5360_v44, %v5360_v44 }
0x14c7   :  { %v5382_v1 = vsel %vm415_vm2, %v5365_v61, 0 }
0x14c8   :  { %5723 = vmatprep.subr.msk.bf16.mxu0 %vm415_vm2, %v5366_v56 }
0x14c9   :  { %5429 = vmatpush1.bf16.msra.mxu0 %v5382_v1 }
0x14cc   :  { %5724 = vmatmul.mubr.msk.bf16.vlgmr.msra.gmra.mrb[64].mxu0 %vm1708_vm8, %v5361_v22 }
0x1596   :  { %v5421_v13 = vpop.f32.mrb[60].mxu0 }
0x1597   :  { %v5422_v60 = vadd.f32 %v5421_v13, %v5370_v19  ;;  %v5423_v55 = vpop.f32.mrb[61].mxu0 }
0x1598   :  { %v5424_v48 = vadd.f32 %v5423_v55, %v5370_v19  ;;  %v5425_v50 = vpop.f32.mrb[62].mxu0 }
0x1599   :  { %v5725_v10 = vmul.f32 -1.442695, %v5422_v60  ;;  %v5426_v11 = vpop.f32.mrb[63].mxu0 }
0x159a   :  { %v5726_v12 = vmul.f32 -1.442695, %v5424_v48 }
0x159b   :  { %6388 = vpow2.f32 %v5725_v10 }
0x159c   :  { %6390 = vpow2.f32 %v5726_v12 }
0x159f   :  { %v5462_v16 = vpop.f32.mrb[64].mxu0 }
0x15a0   :  { %v5463_v57 = vadd.f32 %v5462_v16, %v5370_v19  ;;  %v5464_v36 = vpop.f32.mrb[65].mxu0 }
0x15a1   :  { %v5465_v3 = vadd.f32 %v5464_v36, %v5370_v19  ;;  %v5466_v18 = vpop.f32.mrb[66].mxu0 }
0x15a2   :  { %v5727_v46 = vmul.f32 -1.442695, %v5463_v57  ;;  %v5467_v25 = vpop.f32.mrb[67].mxu0 }
0x15a3   :  { %v5728_v37 = vmul.f32 -1.442695, %v5465_v3 }
0x15a4   :  { %6392 = vpow2.f32 %v5727_v46 }
0x15a5   :  { %v6389_v54 = vpop.eup %6388  ;;  %6394 = vpow2.f32 %v5728_v37 }
0x15a6   :  { %v6391_v40 = vpop.eup %6390  ;;  %v5481_v28 = vadd.f32 1.0, %v6389_v54 }
0x15a7   :  { %v5482_v0 = vadd.f32 1.0, %v6391_v40 }
0x15a8   :  { %6396 = vrcp.f32 %v5481_v28 }
0x15a9   :  { %6398 = vrcp.f32 %v5482_v0 }
0x15ae   :  { %v6393_v31 = vpop.eup %6392 }
0x15af   :  { %v6395_v58 = vpop.eup %6394  ;;  %v5483_v15 = vadd.f32 1.0, %v6393_v31 }
0x15b0   :  { %v5484_v14 = vadd.f32 1.0, %v6395_v58 }
0x15b1   :  { %6400 = vrcp.f32 %v5483_v15 }
0x15b2   :  { %v6397_v7 = vpop.eup %6396  ;;  %6402 = vrcp.f32 %v5484_v14 }
0x15b3   :  { %v6399_v52 = vpop.eup %6398 }
0x15b4   :  { %v5497_v8 = vcombine.low %v6397_v7, %v6399_v52 }
0x15b6   :  { %5501 = vst [vmem:[%s9429_s7] sm:$0x77] %v5497_v8 }
0x15bb   :  { %v6401_v2 = vpop.eup %6400 }
0x15bc   :  { %v6403_v38 = vpop.eup %6402 }
0x15bd   :  { %v5498_v6 = vcombine.low %v6401_v2, %v6403_v38 }
0x15bf   :  { %5502 = vst [vmem:[%s9429_s7 + $0x8] sm:$0x77] %v5498_v6 }

</bundles_post_ra>
